<compile_context>
chip_gen: v6e
topology: v6e:2x2x1
jax: 0.10.0
libtpu: 0.0.40
codegen_flags: <defaults>
</compile_context>

<pallas_src>
import math
import functools
import numpy as np
import jax
import jax.numpy as jnp
from jax.experimental import pallas as pl
from jax.experimental.pallas import tpu as pltpu


# ----------------------------------------------------------------------------
# Filter construction (mirrors Resampler.__init__, numpy, deterministic)
# ----------------------------------------------------------------------------
def _hann_window(a):
    return np.heaviside(1.0 - np.abs(a), 0.0) * (0.5 + 0.5 * np.cos(a * np.pi))


def _kaiser_window(a, beta):
    w = np.i0(beta * np.sqrt(np.clip(1.0 - a ** 2, 0.0, 1.0))) / np.i0(beta)
    return np.heaviside(1.0 - np.abs(a), 0.0) * w


def make_resampler_params(input_sr, output_sr, num_zeros=64, cutoff_ratio=0.95,
                          filter='kaiser', beta=14.0, np_dtype=np.float32):
    assert isinstance(input_sr, int) and isinstance(output_sr, int)
    d = math.gcd(input_sr, output_sr)
    input_sr, output_sr = input_sr // d, output_sr // d
    assert filter in ['hann', 'kaiser', 'kaiser_best', 'kaiser_fast']
    if filter == 'kaiser_best':
        num_zeros, beta, cutoff_ratio, filter = 64, 14.769656459379492, 0.9475937167399596, 'kaiser'
    elif filter == 'kaiser_fast':
        num_zeros, beta, cutoff_ratio, filter = 16, 8.555504641634386, 0.85, 'kaiser'

    zeros_per_block = min(input_sr, output_sr) * cutoff_ratio
    blocks_per_side = int(np.ceil(num_zeros / zeros_per_block))
    kernel_width = 2 * blocks_per_side + 1
    window_radius_in_blocks = blocks_per_side

    times = (np.arange(output_sr, dtype=np_dtype).reshape((output_sr, 1, 1)) / output_sr
             - np.arange(input_sr, dtype=np_dtype).reshape((1, input_sr, 1)) / input_sr
             - (np.arange(kernel_width, dtype=np_dtype).reshape((1, 1, kernel_width)) - blocks_per_side))

    if filter == 'hann':
        win = _hann_window(times / window_radius_in_blocks)
    else:
        win = _kaiser_window(times / window_radius_in_blocks, beta)
    weights = (np.sinc(times * zeros_per_block) * win * zeros_per_block / input_sr).astype(np_dtype)
    assert weights.shape == (output_sr, input_sr, kernel_width)
    return weights, input_sr, output_sr, blocks_per_side, kernel_width


def _round_up(x, m):
    return (x + m - 1) // m * m


# ----------------------------------------------------------------------------
# Pallas kernel: chunked VPU scalar-FMA convolution over one (8 rows, tile_n) tile
# ----------------------------------------------------------------------------
def _resample_kernel(xc_ref, xh_ref, o_ref, xw_ref, *,
                     weights, isr, osr, kw, tile_n, chunk):
    # xc_ref: VMEM (isr, 8, tile_n)       -- current lane-aligned time tile
    # xh_ref: VMEM (isr, 8, halo)         -- right halo (start of next tile / overlap)
    # o_ref : VMEM (osr, 8, tile_n)       -- lane-dense output tile
    # xw_ref: VMEM scratch (isr, 8, tile_n + halo)
    # weights: numpy (osr, isr, kw) -- compile-time constants (no SMEM traffic).

    # Assemble tile + halo once; every tap is then a static slice of this buffer.
    xw_ref[:, :, :tile_n] = xc_ref[...]
    xw_ref[:, :, tile_n:] = xh_ref[...]

    rows = xw_ref.shape[1]  # 8

    # Inner chunk loop: keeps the live accumulator set at ~(osr * chunk/128) vregs
    # even when tile_n is large (big DMA tile, small compute granularity).
    for c0 in range(0, tile_n, chunk):
        cw = min(chunk, tile_n - c0)
        accs = [jnp.zeros((rows, cw), jnp.float32) for _ in range(osr)]
        for i in range(isr):
            for k in range(kw):
                xs = xw_ref[i, :, c0 + k:c0 + k + cw]      # (8, cw), static offsets
                for o in range(osr):
                    accs[o] = accs[o] + float(weights[o, i, k]) * xs
        for o in range(osr):
            o_ref[o, :, c0:c0 + cw] = accs[o].astype(o_ref.dtype)


def _resample_general(data, *, weights_np, isr, osr, pad, kw,
                      max_tile=2048, chunk=512, mb_tile=8):
    mb, seq_len = data.shape
    num_blocks = seq_len // isr
    out_dtype = data.dtype

    # -------------------- static tiling parameters --------------------
    halo = _round_up(max(kw - 1, 1), 128)

    # Small-batch sublane packing: fold `fold` time segments onto the sublane axis
    # so (nearly) all 8 sublanes carry real data even for mono/stereo clips.
    fold = max(1, mb_tile // mb) if mb < mb_tile else 1
    seg_nb = -(-num_blocks // fold)                 # output blocks per folded segment
    rows = mb * fold
    mb_pad = _round_up(rows, mb_tile)

    tile_n = min(max_tile, _round_up(seg_nb, 128))
    tile_n = _round_up(max(tile_n, halo), halo)     # halo must divide tile_n
    # v7x: if there is only one row tile, make sure the time grid has >= 2 steps
    # so both TensorCores get work through the "parallel" grid axes.
    if mb_pad // mb_tile == 1 and seg_nb > halo:
        half = _round_up(max(_round_up(-(-seg_nb // 2), 128), halo), halo)
        tile_n = min(tile_n, half)
    n_tiles = -(-seg_nb // tile_n)
    out_w = n_tiles * tile_n
    in_w = out_w + halo
    hbpt = tile_n // halo                            # halo-blocks per time tile

    # -------------------- glue: layout the input --------------------
    # De-interleave blocks, go channel-major (isr, mb, blocks), left-pad `pad`
    # filter blocks, right-pad so every folded segment slice is in range.
    total_len = (fold - 1) * seg_nb + in_w
    x = data[:, :num_blocks * isr].reshape(mb, num_blocks, isr)
    x = jnp.transpose(x, (2, 0, 1)).astype(jnp.float32)          # (isr, mb, num_blocks)
    x = jnp.pad(x, ((0, 0), (0, 0), (pad, total_len - pad - num_blocks)))
    if fold > 1:
        # Overlap-save fold: segment s gets padded-input columns
        # [s*seg_nb, s*seg_nb + in_w); its trailing `halo` columns are the overlap.
        segs = [x[:, :, s * seg_nb:s * seg_nb + in_w] for s in range(fold)]
        x = jnp.stack(segs, axis=2).reshape(isr, rows, in_w)
    x = jnp.pad(x, ((0, 0), (0, mb_pad - rows), (0, 0)))          # (isr, mb_pad, in_w)

    # -------------------- kernel call --------------------
    kernel = functools.partial(_resample_kernel, weights=weights_np,
                               isr=isr, osr=osr, kw=kw, tile_n=tile_n, chunk=chunk)

    out = pl.pallas_call(
        kernel,
        out_shape=jax.ShapeDtypeStruct((osr, mb_pad, out_w), out_dtype),
        grid=(mb_pad // mb_tile, n_tiles),
        in_specs=[
            pl.BlockSpec((isr, mb_tile, tile_n), lambda r, j: (0, r, j)),       # tile
            pl.BlockSpec((isr, mb_tile, halo),
                         lambda r, j: (0, r, (j + 1) * hbpt)),                  # halo
        ],
        out_specs=pl.BlockSpec((osr, mb_tile, tile_n), lambda r, j: (0, r, j)),
        scratch_shapes=[pltpu.VMEM((isr, mb_tile, tile_n + halo), jnp.float32)],
        compiler_params=pltpu.CompilerParams(
            dimension_semantics=("parallel", "parallel"),
            vmem_limit_bytes=32 * 1024 * 1024),
    )(x, x)

    # -------------------- glue: unfold + interleave output channels --------------------
    out = out[:, :rows, :seg_nb]                                   # (osr, mb*fold, seg_nb)
    out = out.reshape(osr, mb, fold, seg_nb)
    out = jnp.transpose(out, (1, 2, 3, 0)).reshape(mb, fold * seg_nb, osr)
    out = out[:, :num_blocks, :].reshape(mb, num_blocks * osr)
    return out


class ResamplerPallas:
    """JAX/Pallas port of the PyTorch Resampler forward pass ('general' path)."""

    def __init__(self, input_sr, output_sr, dtype=jnp.float32, num_zeros=64,
                 cutoff_ratio=0.95, filter='kaiser', beta=14.0):
        if input_sr == output_sr:
            self.resample_type = 'trivial'
            return
        weights, isr, osr, pad, kw = make_resampler_params(
            input_sr, output_sr, num_zeros, cutoff_ratio, filter, beta,
            np_dtype=np.float32)
        self.input_sr, self.output_sr = isr, osr
        self.padding, self.kernel_width = pad, kw
        self.dtype = dtype
        self.weights = weights                                      # numpy (osr, isr, kw)
        if osr == 1 or isr == 1:
            # TODO(synk): integer_downsample / integer_upsample strided-conv paths not ported.
            self.resample_type = 'integer'
        else:
            self.resample_type = 'general'
            self._fn = jax.jit(functools.partial(
                _resample_general, weights_np=weights,
                isr=isr, osr=osr, pad=pad, kw=kw))

    def __call__(self, data):
        if self.resample_type == 'trivial':
            return data
        if self.resample_type != 'general':
            raise NotImplementedError("only 'general' and 'trivial' paths are implemented")
        mb, seq_len = data.shape
        if seq_len // self.input_sr == 0:
            raise RuntimeError('Signal is too short to resample')
        return self._fn(data.astype(self.dtype))


# ----------------------------------------------------------------------------
# Pure numpy reference (exactly the torch 'general' branch semantics)
# ----------------------------------------------------------------------------
def resample_reference(data_np, weights, isr, osr, pad, kw):
    mb, seq_len = data_np.shape
    num_blocks = seq_len // isr
    x = data_np[:, :num_blocks * isr].reshape(mb, num_blocks, isr).transpose(0, 2, 1)
    x_pad = np.pad(x, ((0, 0), (0, 0), (pad, pad)))
    out = np.zeros((mb, osr, num_blocks), dtype=np.float32)
    for k in range(kw):
        out += np.einsum('oi,bit->bot', weights[:, :, k], x_pad[:, :, k:k + num_blocks])
    return out.transpose(0, 2, 1).reshape(mb, num_blocks * osr)


if __name__ == "__main__":
    # 16 kHz -> 24 kHz  ==>  after gcd: input_sr=2, output_sr=3 (the 'general' path)
    resampler = ResamplerPallas(16000, 24000, dtype=jnp.float32)
    W, ISR, OSR = resampler.weights, resampler.input_sr, resampler.output_sr
    PAD, KW = resampler.padding, resampler.kernel_width

    # Test 1: tiny stereo clip -> exercises fold=4 sublane packing, single tile.
    mb, seq_len = 2, 64
    data = jax.random.normal(jax.random.PRNGKey(0), (mb, seq_len), dtype=jnp.float32)
    out = jax.block_until_ready(resampler(data))
    assert out.shape == (mb, (seq_len // ISR) * OSR), out.shape
    ref = resample_reference(np.asarray(data), W, ISR, OSR, PAD, KW)
    np.testing.assert_allclose(np.asarray(out), ref, rtol=1e-4, atol=1e-4)

    # Test 2: 9 rows, odd length -> multiple row tiles, chunked tap loop, no fold,
    # seq_len not divisible by input_sr (trailing sample dropped).
    mb2, seq_len2 = 9, 1401
    data2 = jax.random.normal(jax.random.PRNGKey(1), (mb2, seq_len2), dtype=jnp.float32)
    out2 = jax.block_until_ready(resampler(data2))
    assert out2.shape == (mb2, (seq_len2 // ISR) * OSR), out2.shape
    ref2 = resample_reference(np.asarray(data2), W, ISR, OSR, PAD, KW)
    np.testing.assert_allclose(np.asarray(out2), ref2, rtol=1e-4, atol=1e-4)

    # Test 3: mono clip -> fold=8 sublane packing, multiple time tiles, segment halos.
    mb3, seq_len3 = 1, 3000
    data3 = jax.random.normal(jax.random.PRNGKey(2), (mb3, seq_len3), dtype=jnp.float32)
    out3 = jax.block_until_ready(resampler(data3))
    assert out3.shape == (mb3, (seq_len3 // ISR) * OSR), out3.shape
    ref3 = resample_reference(np.asarray(data3), W, ISR, OSR, PAD, KW)
    np.testing.assert_allclose(np.asarray(out3), ref3, rtol=1e-4, atol=1e-4)

    print("KERNEL_OK")
</pallas_src>

<mosaic_0001>
module attributes {stable_mosaic.version = 11 : i64} {
  func.func @_resample_kernel(%arg0: i32, %arg1: i32, %arg2: memref<2x8x128xf32, #tpu.memory_space<vmem>>, %arg3: memref<2x8x128xf32, #tpu.memory_space<vmem>>, %arg4: memref<3x8x128xf32, #tpu.memory_space<vmem>>, %arg5: memref<2x8x256xf32, #tpu.memory_space<vmem>>) attributes {dimension_semantics = [#tpu.dimension_semantics<parallel>, #tpu.dimension_semantics<parallel>], iteration_bounds = array<i64: 1, 1>, scalar_prefetch = 0 : i64, scratch_operands = 1 : i64, tpu.core_type = #tpu.core_type<tc>, window_params = [{transform_indices = @transform_0, window_bounds = array<i64: 2, 8, 128>}, {transform_indices = @transform_1, window_bounds = array<i64: 2, 8, 128>}, {transform_indices = @transform_2, window_bounds = array<i64: 3, 8, 128>}]} {
    %c0 = arith.constant 0 : index
    %c0_0 = arith.constant 0 : index
    %c0_1 = arith.constant 0 : index
    %0 = vector.load %arg2[%c0, %c0_0, %c0_1] : memref<2x8x128xf32, #tpu.memory_space<vmem>>, vector<2x8x128xf32>
    %c0_2 = arith.constant 0 : index
    %c0_3 = arith.constant 0 : index
    %c0_4 = arith.constant 0 : index
    %1 = vector.load %arg5[%c0_2, %c0_3, %c0_4] : memref<2x8x256xf32, #tpu.memory_space<vmem>>, vector<2x8x128xf32>
    tpu.vector_store %arg5[%c0_2, %c0_3, %c0_4], %0 {strides = array<i32>} : memref<2x8x256xf32, #tpu.memory_space<vmem>>, vector<2x8x128xf32>,
    %c0_5 = arith.constant 0 : index
    %c0_6 = arith.constant 0 : index
    %c0_7 = arith.constant 0 : index
    %2 = vector.load %arg3[%c0_5, %c0_6, %c0_7] : memref<2x8x128xf32, #tpu.memory_space<vmem>>, vector<2x8x128xf32>
    %c0_8 = arith.constant 0 : index
    %c0_9 = arith.constant 0 : index
    %c128 = arith.constant 128 : index
    %3 = vector.load %arg5[%c0_8, %c0_9, %c128] : memref<2x8x256xf32, #tpu.memory_space<vmem>>, vector<2x8x128xf32>
    tpu.vector_store %arg5[%c0_8, %c0_9, %c128], %2 {strides = array<i32>} : memref<2x8x256xf32, #tpu.memory_space<vmem>>, vector<2x8x128xf32>,
    %cst = arith.constant 0.000000e+00 : f32
    %4 = vector.broadcast %cst : f32 to vector<8x128xf32>
    %cst_10 = arith.constant 0.000000e+00 : f32
    %5 = vector.broadcast %cst_10 : f32 to vector<8x128xf32>
    %cst_11 = arith.constant 0.000000e+00 : f32
    %6 = vector.broadcast %cst_11 : f32 to vector<8x128xf32>
    %c0_12 = arith.constant 0 : index
    %c0_13 = arith.constant 0 : index
    %c0_14 = arith.constant 0 : index
    %7 = vector.load %arg5[%c0_12, %c0_13, %c0_14] : memref<2x8x256xf32, #tpu.memory_space<vmem>>, vector<1x8x128xf32>
    %8 = vector.shape_cast %7 : vector<1x8x128xf32> to vector<8x128xf32>
    %cst_15 = arith.constant 0.000000e+00 : f32
    %9 = vector.broadcast %cst_15 : f32 to vector<8x128xf32>
    %10 = arith.mulf %9, %8 : vector<8x128xf32>
    %11 = arith.addf %4, %10 : vector<8x128xf32>
    %cst_16 = arith.constant -0.000000e+00 : f32
    %12 = vector.broadcast %cst_16 : f32 to vector<8x128xf32>
    %13 = arith.mulf %12, %8 : vector<8x128xf32>
    %14 = arith.addf %5, %13 : vector<8x128xf32>
    %cst_17 = arith.constant -0.000000e+00 : f32
    %15 = vector.broadcast %cst_17 : f32 to vector<8x128xf32>
    %16 = arith.mulf %15, %8 : vector<8x128xf32>
    %17 = arith.addf %6, %16 : vector<8x128xf32>
    %c0_18 = arith.constant 0 : index
    %c0_19 = arith.constant 0 : index
    %c1 = arith.constant 1 : index
    %18 = vector.load %arg5[%c0_18, %c0_19, %c1] : memref<2x8x256xf32, #tpu.memory_space<vmem>>, vector<1x8x128xf32>
    %19 = vector.shape_cast %18 : vector<1x8x128xf32> to vector<8x128xf32>
    %cst_20 = arith.constant 1.99564326E-7 : f32
    %20 = vector.broadcast %cst_20 : f32 to vector<8x128xf32>
    %21 = arith.mulf %20, %19 : vector<8x128xf32>
    %22 = arith.addf %11, %21 : vector<8x128xf32>
    %cst_21 = arith.constant -1.28560501E-7 : f32
    %23 = vector.broadcast %cst_21 : f32 to vector<8x128xf32>
    %24 = arith.mulf %23, %19 : vector<8x128xf32>
    %25 = arith.addf %14, %24 : vector<8x128xf32>
    %cst_22 = arith.constant -8.43928127E-9 : f32
    %26 = vector.broadcast %cst_22 : f32 to vector<8x128xf32>
    %27 = arith.mulf %26, %19 : vector<8x128xf32>
    %28 = arith.addf %17, %27 : vector<8x128xf32>
    %c0_23 = arith.constant 0 : index
    %c0_24 = arith.constant 0 : index
    %c2 = arith.constant 2 : index
    %29 = vector.load %arg5[%c0_23, %c0_24, %c2] : memref<2x8x256xf32, #tpu.memory_space<vmem>>, vector<1x8x128xf32>
    %30 = vector.shape_cast %29 : vector<1x8x128xf32> to vector<8x128xf32>
    %cst_25 = arith.constant 4.842120e-07 : f32
    %31 = vector.broadcast %cst_25 : f32 to vector<8x128xf32>
    %32 = arith.mulf %31, %30 : vector<8x128xf32>
    %33 = arith.addf %22, %32 : vector<8x128xf32>
    %cst_26 = arith.constant -5.59963325E-7 : f32
    %34 = vector.broadcast %cst_26 : f32 to vector<8x128xf32>
    %35 = arith.mulf %34, %30 : vector<8x128xf32>
    %36 = arith.addf %25, %35 : vector<8x128xf32>
    %cst_27 = arith.constant 7.99310768E-8 : f32
    %37 = vector.broadcast %cst_27 : f32 to vector<8x128xf32>
    %38 = arith.mulf %37, %30 : vector<8x128xf32>
    %39 = arith.addf %28, %38 : vector<8x128xf32>
    %c0_28 = arith.constant 0 : index
    %c0_29 = arith.constant 0 : index
    %c3 = arith.constant 3 : index
    %40 = vector.load %arg5[%c0_28, %c0_29, %c3] : memref<2x8x256xf32, #tpu.memory_space<vmem>>, vector<1x8x128xf32>
    %41 = vector.shape_cast %40 : vector<1x8x128xf32> to vector<8x128xf32>
    %cst_30 = arith.constant 6.56423197E-7 : f32
    %42 = vector.broadcast %cst_30 : f32 to vector<8x128xf32>
    %43 = arith.mulf %42, %41 : vector<8x128xf32>
    %44 = arith.addf %33, %43 : vector<8x128xf32>
    %cst_31 = arith.constant -1.57150066E-6 : f32
    %45 = vector.broadcast %cst_31 : f32 to vector<8x128xf32>
    %46 = arith.mulf %45, %41 : vector<8x128xf32>
    %47 = arith.addf %36, %46 : vector<8x128xf32>
    %cst_32 = arith.constant 5.76834623E-7 : f32
    %48 = vector.broadcast %cst_32 : f32 to vector<8x128xf32>
    %49 = arith.mulf %48, %41 : vector<8x128xf32>
    %50 = arith.addf %39, %49 : vector<8x128xf32>
    %c0_33 = arith.constant 0 : index
    %c0_34 = arith.constant 0 : index
    %c4 = arith.constant 4 : index
    %51 = vector.load %arg5[%c0_33, %c0_34, %c4] : memref<2x8x256xf32, #tpu.memory_space<vmem>>, vector<1x8x128xf32>
    %52 = vector.shape_cast %51 : vector<1x8x128xf32> to vector<8x128xf32>
    %cst_35 = arith.constant -2.01684017E-11 : f32
    %53 = vector.broadcast %cst_35 : f32 to vector<8x128xf32>
    %54 = arith.mulf %53, %52 : vector<8x128xf32>
    %55 = arith.addf %44, %54 : vector<8x128xf32>
    %cst_36 = arith.constant -3.34970241E-6 : f32
    %56 = vector.broadcast %cst_36 : f32 to vector<8x128xf32>
    %57 = arith.mulf %56, %52 : vector<8x128xf32>
    %58 = arith.addf %47, %57 : vector<8x128xf32>
    %cst_37 = arith.constant 2.08853385E-6 : f32
    %59 = vector.broadcast %cst_37 : f32 to vector<8x128xf32>
    %60 = arith.mulf %59, %52 : vector<8x128xf32>
    %61 = arith.addf %50, %60 : vector<8x128xf32>
    %c0_38 = arith.constant 0 : index
    %c0_39 = arith.constant 0 : index
    %c5 = arith.constant 5 : index
    %62 = vector.load %arg5[%c0_38, %c0_39, %c5] : memref<2x8x256xf32, #tpu.memory_space<vmem>>, vector<1x8x128xf32>
    %63 = vector.shape_cast %62 : vector<1x8x128xf32> to vector<8x128xf32>
    %cst_40 = arith.constant -2.9398318E-6 : f32
    %64 = vector.broadcast %cst_40 : f32 to vector<8x128xf32>
    %65 = arith.mulf %64, %63 : vector<8x128xf32>
    %66 = arith.addf %55, %65 : vector<8x128xf32>
    %cst_41 = arith.constant -5.65100299E-6 : f32
    %67 = vector.broadcast %cst_41 : f32 to vector<8x128xf32>
    %68 = arith.mulf %67, %63 : vector<8x128xf32>
    %69 = arith.addf %58, %68 : vector<8x128xf32>
    %cst_42 = arith.constant 5.50331924E-6 : f32
    %70 = vector.broadcast %cst_42 : f32 to vector<8x128xf32>
    %71 = arith.mulf %70, %63 : vector<8x128xf32>
    %72 = arith.addf %61, %71 : vector<8x128xf32>
    %c0_43 = arith.constant 0 : index
    %c0_44 = arith.constant 0 : index
    %c6 = arith.constant 6 : index
    %73 = vector.load %arg5[%c0_43, %c0_44, %c6] : memref<2x8x256xf32, #tpu.memory_space<vmem>>, vector<1x8x128xf32>
    %74 = vector.shape_cast %73 : vector<1x8x128xf32> to vector<8x128xf32>
    %cst_45 = arith.constant -1.04536775E-5 : f32
    %75 = vector.broadcast %cst_45 : f32 to vector<8x128xf32>
    %76 = arith.mulf %75, %74 : vector<8x128xf32>
    %77 = arith.addf %66, %76 : vector<8x128xf32>
    %cst_46 = arith.constant -7.26991038E-6 : f32
    %78 = vector.broadcast %cst_46 : f32 to vector<8x128xf32>
    %79 = arith.mulf %78, %74 : vector<8x128xf32>
    %80 = arith.addf %69, %79 : vector<8x128xf32>
    %cst_47 = arith.constant 1.17404925E-5 : f32
    %81 = vector.broadcast %cst_47 : f32 to vector<8x128xf32>
    %82 = arith.mulf %81, %74 : vector<8x128xf32>
    %83 = arith.addf %72, %82 : vector<8x128xf32>
    %c0_48 = arith.constant 0 : index
    %c0_49 = arith.constant 0 : index
    %c7 = arith.constant 7 : index
    %84 = vector.load %arg5[%c0_48, %c0_49, %c7] : memref<2x8x256xf32, #tpu.memory_space<vmem>>, vector<1x8x128xf32>
    %85 = vector.shape_cast %84 : vector<1x8x128xf32> to vector<8x128xf32>
    %cst_50 = arith.constant -2.53799917E-5 : f32
    %86 = vector.broadcast %cst_50 : f32 to vector<8x128xf32>
    %87 = arith.mulf %86, %85 : vector<8x128xf32>
    %88 = arith.addf %77, %87 : vector<8x128xf32>
    %cst_51 = arith.constant -5.42906673E-6 : f32
    %89 = vector.broadcast %cst_51 : f32 to vector<8x128xf32>
    %90 = arith.mulf %89, %85 : vector<8x128xf32>
    %91 = arith.addf %80, %90 : vector<8x128xf32>
    %cst_52 = arith.constant 2.11422721E-5 : f32
    %92 = vector.broadcast %cst_52 : f32 to vector<8x128xf32>
    %93 = arith.mulf %92, %85 : vector<8x128xf32>
    %94 = arith.addf %83, %93 : vector<8x128xf32>
    %c0_53 = arith.constant 0 : index
    %c0_54 = arith.constant 0 : index
    %c8 = arith.constant 8 : index
    %95 = vector.load %arg5[%c0_53, %c0_54, %c8] : memref<2x8x256xf32, #tpu.memory_space<vmem>>, vector<1x8x128xf32>
    %96 = vector.shape_cast %95 : vector<1x8x128xf32> to vector<8x128xf32>
    %cst_55 = arith.constant -5.01921459E-5 : f32
    %97 = vector.broadcast %cst_55 : f32 to vector<8x128xf32>
    %98 = arith.mulf %97, %96 : vector<8x128xf32>
    %99 = arith.addf %88, %98 : vector<8x128xf32>
    %cst_56 = arith.constant 4.66063102E-6 : f32
    %100 = vector.broadcast %cst_56 : f32 to vector<8x128xf32>
    %101 = arith.mulf %100, %96 : vector<8x128xf32>
    %102 = arith.addf %91, %101 : vector<8x128xf32>
    %cst_57 = arith.constant 3.24686698E-5 : f32
    %103 = vector.broadcast %cst_57 : f32 to vector<8x128xf32>
    %104 = arith.mulf %103, %96 : vector<8x128xf32>
    %105 = arith.addf %94, %104 : vector<8x128xf32>
    %c0_58 = arith.constant 0 : index
    %c0_59 = arith.constant 0 : index
    %c9 = arith.constant 9 : index
    %106 = vector.load %arg5[%c0_58, %c0_59, %c9] : memref<2x8x256xf32, #tpu.memory_space<vmem>>, vector<1x8x128xf32>
    %107 = vector.shape_cast %106 : vector<1x8x128xf32> to vector<8x128xf32>
    %cst_60 = arith.constant -8.53199671E-5 : f32
    %108 = vector.broadcast %cst_60 : f32 to vector<8x128xf32>
    %109 = arith.mulf %108, %107 : vector<8x128xf32>
    %110 = arith.addf %99, %109 : vector<8x128xf32>
    %cst_61 = arith.constant 2.96881572E-5 : f32
    %111 = vector.broadcast %cst_61 : f32 to vector<8x128xf32>
    %112 = arith.mulf %111, %107 : vector<8x128xf32>
    %113 = arith.addf %102, %112 : vector<8x128xf32>
    %cst_62 = arith.constant 4.16164912E-5 : f32
    %114 = vector.broadcast %cst_62 : f32 to vector<8x128xf32>
    %115 = arith.mulf %114, %107 : vector<8x128xf32>
    %116 = arith.addf %105, %115 : vector<8x128xf32>
    %c0_63 = arith.constant 0 : index
    %c0_64 = arith.constant 0 : index
    %c10 = arith.constant 10 : index
    %117 = vector.load %arg5[%c0_63, %c0_64, %c10] : memref<2x8x256xf32, #tpu.memory_space<vmem>>, vector<1x8x128xf32>
    %118 = vector.shape_cast %117 : vector<1x8x128xf32> to vector<8x128xf32>
    %cst_65 = arith.constant -1.26782834E-4 : f32
    %119 = vector.broadcast %cst_65 : f32 to vector<8x128xf32>
    %120 = arith.mulf %119, %118 : vector<8x128xf32>
    %121 = arith.addf %110, %120 : vector<8x128xf32>
    %cst_66 = arith.constant 7.71411505E-5 : f32
    %122 = vector.broadcast %cst_66 : f32 to vector<8x128xf32>
    %123 = arith.mulf %122, %118 : vector<8x128xf32>
    %124 = arith.addf %113, %123 : vector<8x128xf32>
    %cst_67 = arith.constant 4.04116545E-5 : f32
    %125 = vector.broadcast %cst_67 : f32 to vector<8x128xf32>
    %126 = arith.mulf %125, %118 : vector<8x128xf32>
    %127 = arith.addf %116, %126 : vector<8x128xf32>
    %c0_68 = arith.constant 0 : index
    %c0_69 = arith.constant 0 : index
    %c11 = arith.constant 11 : index
    %128 = vector.load %arg5[%c0_68, %c0_69, %c11] : memref<2x8x256xf32, #tpu.memory_space<vmem>>, vector<1x8x128xf32>
    %129 = vector.shape_cast %128 : vector<1x8x128xf32> to vector<8x128xf32>
    %cst_70 = arith.constant -1.63568358E-4 : f32
    %130 = vector.broadcast %cst_70 : f32 to vector<8x128xf32>
    %131 = arith.mulf %130, %129 : vector<8x128xf32>
    %132 = arith.addf %121, %131 : vector<8x128xf32>
    %cst_71 = arith.constant 1.5286688E-4 : f32
    %133 = vector.broadcast %cst_71 : f32 to vector<8x128xf32>
    %134 = arith.mulf %133, %129 : vector<8x128xf32>
    %135 = arith.addf %124, %134 : vector<8x128xf32>
    %cst_72 = arith.constant 1.60616146E-5 : f32
    %136 = vector.broadcast %cst_72 : f32 to vector<8x128xf32>
    %137 = arith.mulf %136, %129 : vector<8x128xf32>
    %138 = arith.addf %127, %137 : vector<8x128xf32>
    %c0_73 = arith.constant 0 : index
    %c0_74 = arith.constant 0 : index
    %c12 = arith.constant 12 : index
    %139 = vector.load %arg5[%c0_73, %c0_74, %c12] : memref<2x8x256xf32, #tpu.memory_space<vmem>>, vector<1x8x128xf32>
    %140 = vector.shape_cast %139 : vector<1x8x128xf32> to vector<8x128xf32>
    %cst_75 = arith.constant -1.75567271E-4 : f32
    %141 = vector.broadcast %cst_75 : f32 to vector<8x128xf32>
    %142 = arith.mulf %141, %140 : vector<8x128xf32>
    %143 = arith.addf %132, %142 : vector<8x128xf32>
    %cst_76 = arith.constant 2.57229985E-4 : f32
    %144 = vector.broadcast %cst_76 : f32 to vector<8x128xf32>
    %145 = arith.mulf %144, %140 : vector<8x128xf32>
    %146 = arith.addf %135, %145 : vector<8x128xf32>
    %cst_77 = arith.constant -4.80092531E-5 : f32
    %147 = vector.broadcast %cst_77 : f32 to vector<8x128xf32>
    %148 = arith.mulf %147, %140 : vector<8x128xf32>
    %149 = arith.addf %138, %148 : vector<8x128xf32>
    %c0_78 = arith.constant 0 : index
    %c0_79 = arith.constant 0 : index
    %c13 = arith.constant 13 : index
    %150 = vector.load %arg5[%c0_78, %c0_79, %c13] : memref<2x8x256xf32, #tpu.memory_space<vmem>>, vector<1x8x128xf32>
    %151 = vector.shape_cast %150 : vector<1x8x128xf32> to vector<8x128xf32>
    %cst_80 = arith.constant -1.33207534E-4 : f32
    %152 = vector.broadcast %cst_80 : f32 to vector<8x128xf32>
    %153 = arith.mulf %152, %151 : vector<8x128xf32>
    %154 = arith.addf %143, %153 : vector<8x128xf32>
    %cst_81 = arith.constant 3.80286336E-4 : f32
    %155 = vector.broadcast %cst_81 : f32 to vector<8x128xf32>
    %156 = arith.mulf %155, %151 : vector<8x128xf32>
    %157 = arith.addf %146, %156 : vector<8x128xf32>
    %cst_82 = arith.constant -1.69187144E-4 : f32
    %158 = vector.broadcast %cst_82 : f32 to vector<8x128xf32>
    %159 = arith.mulf %158, %151 : vector<8x128xf32>
    %160 = arith.addf %149, %159 : vector<8x128xf32>
    %c0_83 = arith.constant 0 : index
    %c0_84 = arith.constant 0 : index
    %c14 = arith.constant 14 : index
    %161 = vector.load %arg5[%c0_83, %c0_84, %c14] : memref<2x8x256xf32, #tpu.memory_space<vmem>>, vector<1x8x128xf32>
    %162 = vector.shape_cast %161 : vector<1x8x128xf32> to vector<8x128xf32>
    %cst_85 = arith.constant 1.73311943E-9 : f32
    %163 = vector.broadcast %cst_85 : f32 to vector<8x128xf32>
    %164 = arith.mulf %163, %162 : vector<8x128xf32>
    %165 = arith.addf %154, %164 : vector<8x128xf32>
    %cst_86 = arith.constant 4.96981374E-4 : f32
    %166 = vector.broadcast %cst_86 : f32 to vector<8x128xf32>
    %167 = arith.mulf %166, %162 : vector<8x128xf32>
    %168 = arith.addf %157, %167 : vector<8x128xf32>
    %cst_87 = arith.constant -3.60278733E-4 : f32
    %169 = vector.broadcast %cst_87 : f32 to vector<8x128xf32>
    %170 = arith.mulf %169, %162 : vector<8x128xf32>
    %171 = arith.addf %160, %170 : vector<8x128xf32>
    %c0_88 = arith.constant 0 : index
    %c0_89 = arith.constant 0 : index
    %c15 = arith.constant 15 : index
    %172 = vector.load %arg5[%c0_88, %c0_89, %c15] : memref<2x8x256xf32, #tpu.memory_space<vmem>>, vector<1x8x128xf32>
    %173 = vector.shape_cast %172 : vector<1x8x128xf32> to vector<8x128xf32>
    %cst_90 = arith.constant 2.60978093E-4 : f32
    %174 = vector.broadcast %cst_90 : f32 to vector<8x128xf32>
    %175 = arith.mulf %174, %173 : vector<8x128xf32>
    %176 = arith.addf %165, %175 : vector<8x128xf32>
    %cst_91 = arith.constant 5.639760e-04 : f32
    %177 = vector.broadcast %cst_91 : f32 to vector<8x128xf32>
    %178 = arith.mulf %177, %173 : vector<8x128xf32>
    %179 = arith.addf %168, %178 : vector<8x128xf32>
    %cst_92 = arith.constant -6.217630e-04 : f32
    %180 = vector.broadcast %cst_92 : f32 to vector<8x128xf32>
    %181 = arith.mulf %180, %173 : vector<8x128xf32>
    %182 = arith.addf %171, %181 : vector<8x128xf32>
    %c0_93 = arith.constant 0 : index
    %c0_94 = arith.constant 0 : index
    %c16 = arith.constant 16 : index
    %183 = vector.load %arg5[%c0_93, %c0_94, %c16] : memref<2x8x256xf32, #tpu.memory_space<vmem>>, vector<1x8x128xf32>
    %184 = vector.shape_cast %183 : vector<1x8x128xf32> to vector<8x128xf32>
    %cst_95 = arith.constant 6.76509633E-4 : f32
    %185 = vector.broadcast %cst_95 : f32 to vector<8x128xf32>
    %186 = arith.mulf %185, %184 : vector<8x128xf32>
    %187 = arith.addf %176, %186 : vector<8x128xf32>
    %cst_96 = arith.constant 5.19991096E-4 : f32
    %188 = vector.broadcast %cst_96 : f32 to vector<8x128xf32>
    %189 = arith.mulf %188, %184 : vector<8x128xf32>
    %190 = arith.addf %179, %189 : vector<8x128xf32>
    %cst_97 = arith.constant -9.329230e-04 : f32
    %191 = vector.broadcast %cst_97 : f32 to vector<8x128xf32>
    %192 = arith.mulf %191, %184 : vector<8x128xf32>
    %193 = arith.addf %182, %192 : vector<8x128xf32>
    %c0_98 = arith.constant 0 : index
    %c0_99 = arith.constant 0 : index
    %c17 = arith.constant 17 : index
    %194 = vector.load %arg5[%c0_98, %c0_99, %c17] : memref<2x8x256xf32, #tpu.memory_space<vmem>>, vector<1x8x128xf32>
    %195 = vector.shape_cast %194 : vector<1x8x128xf32> to vector<8x128xf32>
    %cst_100 = arith.constant 0.00124920544 : f32
    %196 = vector.broadcast %cst_100 : f32 to vector<8x128xf32>
    %197 = arith.mulf %196, %195 : vector<8x128xf32>
    %198 = arith.addf %187, %197 : vector<8x128xf32>
    %cst_101 = arith.constant 2.91548495E-4 : f32
    %199 = vector.broadcast %cst_101 : f32 to vector<8x128xf32>
    %200 = arith.mulf %199, %195 : vector<8x128xf32>
    %201 = arith.addf %190, %200 : vector<8x128xf32>
    %cst_102 = arith.constant -0.00124371483 : f32
    %202 = vector.broadcast %cst_102 : f32 to vector<8x128xf32>
    %203 = arith.mulf %202, %195 : vector<8x128xf32>
    %204 = arith.addf %193, %203 : vector<8x128xf32>
    %c0_103 = arith.constant 0 : index
    %c0_104 = arith.constant 0 : index
    %c18 = arith.constant 18 : index
    %205 = vector.load %arg5[%c0_103, %c0_104, %c18] : memref<2x8x256xf32, #tpu.memory_space<vmem>>, vector<1x8x128xf32>
    %206 = vector.shape_cast %205 : vector<1x8x128xf32> to vector<8x128xf32>
    %cst_105 = arith.constant 0.00194240164 : f32
    %207 = vector.broadcast %cst_105 : f32 to vector<8x128xf32>
    %208 = arith.mulf %207, %206 : vector<8x128xf32>
    %209 = arith.addf %198, %208 : vector<8x128xf32>
    %cst_106 = arith.constant -1.94792854E-4 : f32
    %210 = vector.broadcast %cst_106 : f32 to vector<8x128xf32>
    %211 = arith.mulf %210, %206 : vector<8x128xf32>
    %212 = arith.addf %201, %211 : vector<8x128xf32>
    %cst_107 = arith.constant -0.00147010642 : f32
    %213 = vector.broadcast %cst_107 : f32 to vector<8x128xf32>
    %214 = arith.mulf %213, %206 : vector<8x128xf32>
    %215 = arith.addf %204, %214 : vector<8x128xf32>
    %c0_108 = arith.constant 0 : index
    %c0_109 = arith.constant 0 : index
    %c19 = arith.constant 19 : index
    %216 = vector.load %arg5[%c0_108, %c0_109, %c19] : memref<2x8x256xf32, #tpu.memory_space<vmem>>, vector<1x8x128xf32>
    %217 = vector.shape_cast %216 : vector<1x8x128xf32> to vector<8x128xf32>
    %cst_110 = arith.constant 0.00266695325 : f32
    %218 = vector.broadcast %cst_110 : f32 to vector<8x128xf32>
    %219 = arith.mulf %218, %217 : vector<8x128xf32>
    %220 = arith.addf %209, %219 : vector<8x128xf32>
    %cst_111 = arith.constant -9.93775902E-4 : f32
    %221 = vector.broadcast %cst_111 : f32 to vector<8x128xf32>
    %222 = arith.mulf %221, %217 : vector<8x128xf32>
    %223 = arith.addf %212, %222 : vector<8x128xf32>
    %cst_112 = arith.constant -0.00149576028 : f32
    %224 = vector.broadcast %cst_112 : f32 to vector<8x128xf32>
    %225 = arith.mulf %224, %217 : vector<8x128xf32>
    %226 = arith.addf %215, %225 : vector<8x128xf32>
    %c0_113 = arith.constant 0 : index
    %c0_114 = arith.constant 0 : index
    %c20 = arith.constant 20 : index
    %227 = vector.load %arg5[%c0_113, %c0_114, %c20] : memref<2x8x256xf32, #tpu.memory_space<vmem>>, vector<1x8x128xf32>
    %228 = vector.shape_cast %227 : vector<1x8x128xf32> to vector<8x128xf32>
    %cst_115 = arith.constant 0.00327425497 : f32
    %229 = vector.broadcast %cst_115 : f32 to vector<8x128xf32>
    %230 = arith.mulf %229, %228 : vector<8x128xf32>
    %231 = arith.addf %220, %230 : vector<8x128xf32>
    %cst_116 = arith.constant -0.00211822498 : f32
    %232 = vector.broadcast %cst_116 : f32 to vector<8x128xf32>
    %233 = arith.mulf %232, %228 : vector<8x128xf32>
    %234 = arith.addf %223, %233 : vector<8x128xf32>
    %cst_117 = arith.constant -0.00118254707 : f32
    %235 = vector.broadcast %cst_117 : f32 to vector<8x128xf32>
    %236 = arith.mulf %235, %228 : vector<8x128xf32>
    %237 = arith.addf %226, %236 : vector<8x128xf32>
    %c0_118 = arith.constant 0 : index
    %c0_119 = arith.constant 0 : index
    %c21 = arith.constant 21 : index
    %238 = vector.load %arg5[%c0_118, %c0_119, %c21] : memref<2x8x256xf32, #tpu.memory_space<vmem>>, vector<1x8x128xf32>
    %239 = vector.shape_cast %238 : vector<1x8x128xf32> to vector<8x128xf32>
    %cst_120 = arith.constant 0.00355919101 : f32
    %240 = vector.broadcast %cst_120 : f32 to vector<8x128xf32>
    %241 = arith.mulf %240, %239 : vector<8x128xf32>
    %242 = arith.addf %231, %241 : vector<8x128xf32>
    %cst_121 = arith.constant -0.00351463398 : f32
    %243 = vector.broadcast %cst_121 : f32 to vector<8x128xf32>
    %244 = arith.mulf %243, %239 : vector<8x128xf32>
    %245 = arith.addf %234, %244 : vector<8x128xf32>
    %cst_122 = arith.constant -3.90922447E-4 : f32
    %246 = vector.broadcast %cst_122 : f32 to vector<8x128xf32>
    %247 = arith.mulf %246, %239 : vector<8x128xf32>
    %248 = arith.addf %237, %247 : vector<8x128xf32>
    %c0_123 = arith.constant 0 : index
    %c0_124 = arith.constant 0 : index
    %c22 = arith.constant 22 : index
    %249 = vector.load %arg5[%c0_123, %c0_124, %c22] : memref<2x8x256xf32, #tpu.memory_space<vmem>>, vector<1x8x128xf32>
    %250 = vector.shape_cast %249 : vector<1x8x128xf32> to vector<8x128xf32>
    %cst_125 = arith.constant 0.00327573391 : f32
    %251 = vector.broadcast %cst_125 : f32 to vector<8x128xf32>
    %252 = arith.mulf %251, %250 : vector<8x128xf32>
    %253 = arith.addf %242, %252 : vector<8x128xf32>
    %cst_126 = arith.constant -0.00504245935 : f32
    %254 = vector.broadcast %cst_126 : f32 to vector<8x128xf32>
    %255 = arith.mulf %254, %250 : vector<8x128xf32>
    %256 = arith.addf %245, %255 : vector<8x128xf32>
    %cst_127 = arith.constant 9.9060242E-4 : f32
    %257 = vector.broadcast %cst_127 : f32 to vector<8x128xf32>
    %258 = arith.mulf %257, %250 : vector<8x128xf32>
    %259 = arith.addf %248, %258 : vector<8x128xf32>
    %c0_128 = arith.constant 0 : index
    %c0_129 = arith.constant 0 : index
    %c23 = arith.constant 23 : index
    %260 = vector.load %arg5[%c0_128, %c0_129, %c23] : memref<2x8x256xf32, #tpu.memory_space<vmem>>, vector<1x8x128xf32>
    %261 = vector.shape_cast %260 : vector<1x8x128xf32> to vector<8x128xf32>
    %cst_130 = arith.constant 0.00216597086 : f32
    %262 = vector.broadcast %cst_130 : f32 to vector<8x128xf32>
    %263 = arith.mulf %262, %261 : vector<8x128xf32>
    %264 = arith.addf %253, %263 : vector<8x128xf32>
    %cst_131 = arith.constant -0.00646236772 : f32
    %265 = vector.broadcast %cst_131 : f32 to vector<8x128xf32>
    %266 = arith.mulf %265, %261 : vector<8x128xf32>
    %267 = arith.addf %256, %266 : vector<8x128xf32>
    %cst_132 = arith.constant 0.00300999917 : f32
    %268 = vector.broadcast %cst_132 : f32 to vector<8x128xf32>
    %269 = arith.mulf %268, %261 : vector<8x128xf32>
    %270 = arith.addf %259, %269 : vector<8x128xf32>
    %c0_133 = arith.constant 0 : index
    %c0_134 = arith.constant 0 : index
    %c24 = arith.constant 24 : index
    %271 = vector.load %arg5[%c0_133, %c0_134, %c24] : memref<2x8x256xf32, #tpu.memory_space<vmem>>, vector<1x8x128xf32>
    %272 = vector.shape_cast %271 : vector<1x8x128xf32> to vector<8x128xf32>
    %cst_135 = arith.constant -1.2473742E-8 : f32
    %273 = vector.broadcast %cst_135 : f32 to vector<8x128xf32>
    %274 = arith.mulf %273, %272 : vector<8x128xf32>
    %275 = arith.addf %264, %274 : vector<8x128xf32>
    %cst_136 = arith.constant -0.00743761146 : f32
    %276 = vector.broadcast %cst_136 : f32 to vector<8x128xf32>
    %277 = arith.mulf %276, %272 : vector<8x128xf32>
    %278 = arith.addf %267, %277 : vector<8x128xf32>
    %cst_137 = arith.constant 0.0056153317 : f32
    %279 = vector.broadcast %cst_137 : f32 to vector<8x128xf32>
    %280 = arith.mulf %279, %272 : vector<8x128xf32>
    %281 = arith.addf %270, %280 : vector<8x128xf32>
    %c0_138 = arith.constant 0 : index
    %c0_139 = arith.constant 0 : index
    %c25 = arith.constant 25 : index
    %282 = vector.load %arg5[%c0_138, %c0_139, %c25] : memref<2x8x256xf32, #tpu.memory_space<vmem>>, vector<1x8x128xf32>
    %283 = vector.shape_cast %282 : vector<1x8x128xf32> to vector<8x128xf32>
    %cst_140 = arith.constant -0.00337849534 : f32
    %284 = vector.broadcast %cst_140 : f32 to vector<8x128xf32>
    %285 = arith.mulf %284, %283 : vector<8x128xf32>
    %286 = arith.addf %275, %285 : vector<8x128xf32>
    %cst_141 = arith.constant -0.00755022187 : f32
    %287 = vector.broadcast %cst_141 : f32 to vector<8x128xf32>
    %288 = arith.mulf %287, %283 : vector<8x128xf32>
    %289 = arith.addf %278, %288 : vector<8x128xf32>
    %cst_142 = arith.constant 0.00862358324 : f32
    %290 = vector.broadcast %cst_142 : f32 to vector<8x128xf32>
    %291 = arith.mulf %290, %283 : vector<8x128xf32>
    %292 = arith.addf %281, %291 : vector<8x128xf32>
    %c0_143 = arith.constant 0 : index
    %c0_144 = arith.constant 0 : index
    %c26 = arith.constant 26 : index
    %293 = vector.load %arg5[%c0_143, %c0_144, %c26] : memref<2x8x256xf32, #tpu.memory_space<vmem>>, vector<1x8x128xf32>
    %294 = vector.shape_cast %293 : vector<1x8x128xf32> to vector<8x128xf32>
    %cst_145 = arith.constant -0.00800847634 : f32
    %295 = vector.broadcast %cst_145 : f32 to vector<8x128xf32>
    %296 = arith.mulf %295, %294 : vector<8x128xf32>
    %297 = arith.addf %286, %296 : vector<8x128xf32>
    %cst_146 = arith.constant -0.0063296142 : f32
    %298 = vector.broadcast %cst_146 : f32 to vector<8x128xf32>
    %299 = arith.mulf %298, %294 : vector<8x128xf32>
    %300 = arith.addf %289, %299 : vector<8x128xf32>
    %cst_147 = arith.constant 0.0116997026 : f32
    %301 = vector.broadcast %cst_147 : f32 to vector<8x128xf32>
    %302 = arith.mulf %301, %294 : vector<8x128xf32>
    %303 = arith.addf %292, %302 : vector<8x128xf32>
    %c0_148 = arith.constant 0 : index
    %c0_149 = arith.constant 0 : index
    %c27 = arith.constant 27 : index
    %304 = vector.load %arg5[%c0_148, %c0_149, %c27] : memref<2x8x256xf32, #tpu.memory_space<vmem>>, vector<1x8x128xf32>
    %305 = vector.shape_cast %304 : vector<1x8x128xf32> to vector<8x128xf32>
    %cst_150 = arith.constant -0.0137790395 : f32
    %306 = vector.broadcast %cst_150 : f32 to vector<8x128xf32>
    %307 = arith.mulf %306, %305 : vector<8x128xf32>
    %308 = arith.addf %297, %307 : vector<8x128xf32>
    %cst_151 = arith.constant -0.00328519568 : f32
    %309 = vector.broadcast %cst_151 : f32 to vector<8x128xf32>
    %310 = arith.mulf %309, %305 : vector<8x128xf32>
    %311 = arith.addf %300, %310 : vector<8x128xf32>
    %cst_152 = arith.constant 0.0143483989 : f32
    %312 = vector.broadcast %cst_152 : f32 to vector<8x128xf32>
    %313 = arith.mulf %312, %305 : vector<8x128xf32>
    %314 = arith.addf %303, %313 : vector<8x128xf32>
    %c0_153 = arith.constant 0 : index
    %c0_154 = arith.constant 0 : index
    %c28 = arith.constant 28 : index
    %315 = vector.load %arg5[%c0_153, %c0_154, %c28] : memref<2x8x256xf32, #tpu.memory_space<vmem>>, vector<1x8x128xf32>
    %316 = vector.shape_cast %315 : vector<1x8x128xf32> to vector<8x128xf32>
    %cst_155 = arith.constant -0.020415267 : f32
    %317 = vector.broadcast %cst_155 : f32 to vector<8x128xf32>
    %318 = arith.mulf %317, %316 : vector<8x128xf32>
    %319 = arith.addf %308, %318 : vector<8x128xf32>
    %cst_156 = arith.constant 0.00207453757 : f32
    %320 = vector.broadcast %cst_156 : f32 to vector<8x128xf32>
    %321 = arith.mulf %320, %316 : vector<8x128xf32>
    %322 = arith.addf %311, %321 : vector<8x128xf32>
    %cst_157 = arith.constant 0.0159131382 : f32
    %323 = vector.broadcast %cst_157 : f32 to vector<8x128xf32>
    %324 = arith.mulf %323, %316 : vector<8x128xf32>
    %325 = arith.addf %314, %324 : vector<8x128xf32>
    %c0_158 = arith.constant 0 : index
    %c0_159 = arith.constant 0 : index
    %c29 = arith.constant 29 : index
    %326 = vector.load %arg5[%c0_158, %c0_159, %c29] : memref<2x8x256xf32, #tpu.memory_space<vmem>>, vector<1x8x128xf32>
    %327 = vector.shape_cast %326 : vector<1x8x128xf32> to vector<8x128xf32>
    %cst_160 = arith.constant -0.0274894182 : f32
    %328 = vector.broadcast %cst_160 : f32 to vector<8x128xf32>
    %329 = arith.mulf %328, %327 : vector<8x128xf32>
    %330 = arith.addf %319, %329 : vector<8x128xf32>
    %cst_161 = arith.constant 0.0102712587 : f32
    %331 = vector.broadcast %cst_161 : f32 to vector<8x128xf32>
    %332 = arith.mulf %331, %327 : vector<8x128xf32>
    %333 = arith.addf %322, %332 : vector<8x128xf32>
    %cst_162 = arith.constant 0.0155625213 : f32
    %334 = vector.broadcast %cst_162 : f32 to vector<8x128xf32>
    %335 = arith.mulf %334, %327 : vector<8x128xf32>
    %336 = arith.addf %325, %335 : vector<8x128xf32>
    %c0_163 = arith.constant 0 : index
    %c0_164 = arith.constant 0 : index
    %c30 = arith.constant 30 : index
    %337 = vector.load %arg5[%c0_163, %c0_164, %c30] : memref<2x8x256xf32, #tpu.memory_space<vmem>>, vector<1x8x128xf32>
    %338 = vector.shape_cast %337 : vector<1x8x128xf32> to vector<8x128xf32>
    %cst_165 = arith.constant -0.0344576314 : f32
    %339 = vector.broadcast %cst_165 : f32 to vector<8x128xf32>
    %340 = arith.mulf %339, %338 : vector<8x128xf32>
    %341 = arith.addf %330, %340 : vector<8x128xf32>
    %cst_166 = arith.constant 0.0220159963 : f32
    %342 = vector.broadcast %cst_166 : f32 to vector<8x128xf32>
    %343 = arith.mulf %342, %338 : vector<8x128xf32>
    %344 = arith.addf %333, %343 : vector<8x128xf32>
    %cst_167 = arith.constant 0.0122092646 : f32
    %345 = vector.broadcast %cst_167 : f32 to vector<8x128xf32>
    %346 = arith.mulf %345, %338 : vector<8x128xf32>
    %347 = arith.addf %336, %346 : vector<8x128xf32>
    %c0_168 = arith.constant 0 : index
    %c0_169 = arith.constant 0 : index
    %c31 = arith.constant 31 : index
    %348 = vector.load %arg5[%c0_168, %c0_169, %c31] : memref<2x8x256xf32, #tpu.memory_space<vmem>>, vector<1x8x128xf32>
    %349 = vector.shape_cast %348 : vector<1x8x128xf32> to vector<8x128xf32>
    %cst_170 = arith.constant -0.0407199487 : f32
    %350 = vector.broadcast %cst_170 : f32 to vector<8x128xf32>
    %351 = arith.mulf %350, %349 : vector<8x128xf32>
    %352 = arith.addf %341, %351 : vector<8x128xf32>
    %cst_171 = arith.constant 0.0387480929 : f32
    %353 = vector.broadcast %cst_171 : f32 to vector<8x128xf32>
    %354 = arith.mulf %353, %349 : vector<8x128xf32>
    %355 = arith.addf %344, %354 : vector<8x128xf32>
    %cst_172 = arith.constant 0.00419390155 : f32
    %356 = vector.broadcast %cst_172 : f32 to vector<8x128xf32>
    %357 = arith.mulf %356, %349 : vector<8x128xf32>
    %358 = arith.addf %347, %357 : vector<8x128xf32>
    %c0_173 = arith.constant 0 : index
    %c0_174 = arith.constant 0 : index
    %c32 = arith.constant 32 : index
    %359 = vector.load %arg5[%c0_173, %c0_174, %c32] : memref<2x8x256xf32, #tpu.memory_space<vmem>>, vector<1x8x128xf32>
    %360 = vector.shape_cast %359 : vector<1x8x128xf32> to vector<8x128xf32>
    %cst_175 = arith.constant -0.0456945077 : f32
    %361 = vector.broadcast %cst_175 : f32 to vector<8x128xf32>
    %362 = arith.mulf %361, %360 : vector<8x128xf32>
    %363 = arith.addf %352, %362 : vector<8x128xf32>
    %cst_176 = arith.constant 0.0646301433 : f32
    %364 = vector.broadcast %cst_176 : f32 to vector<8x128xf32>
    %365 = arith.mulf %364, %360 : vector<8x128xf32>
    %366 = arith.addf %355, %365 : vector<8x128xf32>
    %cst_177 = arith.constant -0.0119037619 : f32
    %367 = vector.broadcast %cst_177 : f32 to vector<8x128xf32>
    %368 = arith.mulf %367, %360 : vector<8x128xf32>
    %369 = arith.addf %358, %368 : vector<8x128xf32>
    %c0_178 = arith.constant 0 : index
    %c0_179 = arith.constant 0 : index
    %c33 = arith.constant 33 : index
    %370 = vector.load %arg5[%c0_178, %c0_179, %c33] : memref<2x8x256xf32, #tpu.memory_space<vmem>>, vector<1x8x128xf32>
    %371 = vector.shape_cast %370 : vector<1x8x128xf32> to vector<8x128xf32>
    %cst_180 = arith.constant -0.0488953702 : f32
    %372 = vector.broadcast %cst_180 : f32 to vector<8x128xf32>
    %373 = arith.mulf %372, %371 : vector<8x128xf32>
    %374 = arith.addf %363, %373 : vector<8x128xf32>
    %cst_181 = arith.constant 0.117486827 : f32
    %375 = vector.broadcast %cst_181 : f32 to vector<8x128xf32>
    %376 = arith.mulf %375, %371 : vector<8x128xf32>
    %377 = arith.addf %366, %376 : vector<8x128xf32>
    %cst_182 = arith.constant -0.0469784662 : f32
    %378 = vector.broadcast %cst_182 : f32 to vector<8x128xf32>
    %379 = arith.mulf %378, %371 : vector<8x128xf32>
    %380 = arith.addf %369, %379 : vector<8x128xf32>
    %c0_183 = arith.constant 0 : index
    %c0_184 = arith.constant 0 : index
    %c34 = arith.constant 34 : index
    %381 = vector.load %arg5[%c0_183, %c0_184, %c34] : memref<2x8x256xf32, #tpu.memory_space<vmem>>, vector<1x8x128xf32>
    %382 = vector.shape_cast %381 : vector<1x8x128xf32> to vector<8x128xf32>
    %cst_185 = arith.constant 0.950000047 : f32
    %383 = vector.broadcast %cst_185 : f32 to vector<8x128xf32>
    %384 = arith.mulf %383, %382 : vector<8x128xf32>
    %385 = arith.addf %374, %384 : vector<8x128xf32>
    %cst_186 = arith.constant 0.435902923 : f32
    %386 = vector.broadcast %cst_186 : f32 to vector<8x128xf32>
    %387 = arith.mulf %386, %382 : vector<8x128xf32>
    %388 = arith.addf %377, %387 : vector<8x128xf32>
    %cst_187 = arith.constant -0.176953286 : f32
    %389 = vector.broadcast %cst_187 : f32 to vector<8x128xf32>
    %390 = arith.mulf %389, %382 : vector<8x128xf32>
    %391 = arith.addf %380, %390 : vector<8x128xf32>
    %c0_188 = arith.constant 0 : index
    %c0_189 = arith.constant 0 : index
    %c35 = arith.constant 35 : index
    %392 = vector.load %arg5[%c0_188, %c0_189, %c35] : memref<2x8x256xf32, #tpu.memory_space<vmem>>, vector<1x8x128xf32>
    %393 = vector.shape_cast %392 : vector<1x8x128xf32> to vector<8x128xf32>
    %cst_190 = arith.constant -0.0488953702 : f32
    %394 = vector.broadcast %cst_190 : f32 to vector<8x128xf32>
    %395 = arith.mulf %394, %393 : vector<8x128xf32>
    %396 = arith.addf %385, %395 : vector<8x128xf32>
    %cst_191 = arith.constant -0.176953226 : f32
    %397 = vector.broadcast %cst_191 : f32 to vector<8x128xf32>
    %398 = arith.mulf %397, %393 : vector<8x128xf32>
    %399 = arith.addf %388, %398 : vector<8x128xf32>
    %cst_192 = arith.constant 0.435903043 : f32
    %400 = vector.broadcast %cst_192 : f32 to vector<8x128xf32>
    %401 = arith.mulf %400, %393 : vector<8x128xf32>
    %402 = arith.addf %391, %401 : vector<8x128xf32>
    %c0_193 = arith.constant 0 : index
    %c0_194 = arith.constant 0 : index
    %c36 = arith.constant 36 : index
    %403 = vector.load %arg5[%c0_193, %c0_194, %c36] : memref<2x8x256xf32, #tpu.memory_space<vmem>>, vector<1x8x128xf32>
    %404 = vector.shape_cast %403 : vector<1x8x128xf32> to vector<8x128xf32>
    %cst_195 = arith.constant -0.0456945077 : f32
    %405 = vector.broadcast %cst_195 : f32 to vector<8x128xf32>
    %406 = arith.mulf %405, %404 : vector<8x128xf32>
    %407 = arith.addf %396, %406 : vector<8x128xf32>
    %cst_196 = arith.constant -0.0469783954 : f32
    %408 = vector.broadcast %cst_196 : f32 to vector<8x128xf32>
    %409 = arith.mulf %408, %404 : vector<8x128xf32>
    %410 = arith.addf %399, %409 : vector<8x128xf32>
    %cst_197 = arith.constant 0.117486849 : f32
    %411 = vector.broadcast %cst_197 : f32 to vector<8x128xf32>
    %412 = arith.mulf %411, %404 : vector<8x128xf32>
    %413 = arith.addf %402, %412 : vector<8x128xf32>
    %c0_198 = arith.constant 0 : index
    %c0_199 = arith.constant 0 : index
    %c37 = arith.constant 37 : index
    %414 = vector.load %arg5[%c0_198, %c0_199, %c37] : memref<2x8x256xf32, #tpu.memory_space<vmem>>, vector<1x8x128xf32>
    %415 = vector.shape_cast %414 : vector<1x8x128xf32> to vector<8x128xf32>
    %cst_200 = arith.constant -0.0407199487 : f32
    %416 = vector.broadcast %cst_200 : f32 to vector<8x128xf32>
    %417 = arith.mulf %416, %415 : vector<8x128xf32>
    %418 = arith.addf %407, %417 : vector<8x128xf32>
    %cst_201 = arith.constant -0.0119037619 : f32
    %419 = vector.broadcast %cst_201 : f32 to vector<8x128xf32>
    %420 = arith.mulf %419, %415 : vector<8x128xf32>
    %421 = arith.addf %410, %420 : vector<8x128xf32>
    %cst_202 = arith.constant 0.0646301433 : f32
    %422 = vector.broadcast %cst_202 : f32 to vector<8x128xf32>
    %423 = arith.mulf %422, %415 : vector<8x128xf32>
    %424 = arith.addf %413, %423 : vector<8x128xf32>
    %c0_203 = arith.constant 0 : index
    %c0_204 = arith.constant 0 : index
    %c38 = arith.constant 38 : index
    %425 = vector.load %arg5[%c0_203, %c0_204, %c38] : memref<2x8x256xf32, #tpu.memory_space<vmem>>, vector<1x8x128xf32>
    %426 = vector.shape_cast %425 : vector<1x8x128xf32> to vector<8x128xf32>
    %cst_205 = arith.constant -0.0344576314 : f32
    %427 = vector.broadcast %cst_205 : f32 to vector<8x128xf32>
    %428 = arith.mulf %427, %426 : vector<8x128xf32>
    %429 = arith.addf %418, %428 : vector<8x128xf32>
    %cst_206 = arith.constant 0.00419390155 : f32
    %430 = vector.broadcast %cst_206 : f32 to vector<8x128xf32>
    %431 = arith.mulf %430, %426 : vector<8x128xf32>
    %432 = arith.addf %421, %431 : vector<8x128xf32>
    %cst_207 = arith.constant 0.0387480929 : f32
    %433 = vector.broadcast %cst_207 : f32 to vector<8x128xf32>
    %434 = arith.mulf %433, %426 : vector<8x128xf32>
    %435 = arith.addf %424, %434 : vector<8x128xf32>
    %c0_208 = arith.constant 0 : index
    %c0_209 = arith.constant 0 : index
    %c39 = arith.constant 39 : index
    %436 = vector.load %arg5[%c0_208, %c0_209, %c39] : memref<2x8x256xf32, #tpu.memory_space<vmem>>, vector<1x8x128xf32>
    %437 = vector.shape_cast %436 : vector<1x8x128xf32> to vector<8x128xf32>
    %cst_210 = arith.constant -0.0274894182 : f32
    %438 = vector.broadcast %cst_210 : f32 to vector<8x128xf32>
    %439 = arith.mulf %438, %437 : vector<8x128xf32>
    %440 = arith.addf %429, %439 : vector<8x128xf32>
    %cst_211 = arith.constant 0.0122092646 : f32
    %441 = vector.broadcast %cst_211 : f32 to vector<8x128xf32>
    %442 = arith.mulf %441, %437 : vector<8x128xf32>
    %443 = arith.addf %432, %442 : vector<8x128xf32>
    %cst_212 = arith.constant 0.0220159963 : f32
    %444 = vector.broadcast %cst_212 : f32 to vector<8x128xf32>
    %445 = arith.mulf %444, %437 : vector<8x128xf32>
    %446 = arith.addf %435, %445 : vector<8x128xf32>
    %c0_213 = arith.constant 0 : index
    %c0_214 = arith.constant 0 : index
    %c40 = arith.constant 40 : index
    %447 = vector.load %arg5[%c0_213, %c0_214, %c40] : memref<2x8x256xf32, #tpu.memory_space<vmem>>, vector<1x8x128xf32>
    %448 = vector.shape_cast %447 : vector<1x8x128xf32> to vector<8x128xf32>
    %cst_215 = arith.constant -0.020415267 : f32
    %449 = vector.broadcast %cst_215 : f32 to vector<8x128xf32>
    %450 = arith.mulf %449, %448 : vector<8x128xf32>
    %451 = arith.addf %440, %450 : vector<8x128xf32>
    %cst_216 = arith.constant 0.0155625213 : f32
    %452 = vector.broadcast %cst_216 : f32 to vector<8x128xf32>
    %453 = arith.mulf %452, %448 : vector<8x128xf32>
    %454 = arith.addf %443, %453 : vector<8x128xf32>
    %cst_217 = arith.constant 0.0102712587 : f32
    %455 = vector.broadcast %cst_217 : f32 to vector<8x128xf32>
    %456 = arith.mulf %455, %448 : vector<8x128xf32>
    %457 = arith.addf %446, %456 : vector<8x128xf32>
    %c0_218 = arith.constant 0 : index
    %c0_219 = arith.constant 0 : index
    %c41 = arith.constant 41 : index
    %458 = vector.load %arg5[%c0_218, %c0_219, %c41] : memref<2x8x256xf32, #tpu.memory_space<vmem>>, vector<1x8x128xf32>
    %459 = vector.shape_cast %458 : vector<1x8x128xf32> to vector<8x128xf32>
    %cst_220 = arith.constant -0.0137790395 : f32
    %460 = vector.broadcast %cst_220 : f32 to vector<8x128xf32>
    %461 = arith.mulf %460, %459 : vector<8x128xf32>
    %462 = arith.addf %451, %461 : vector<8x128xf32>
    %cst_221 = arith.constant 0.0159131382 : f32
    %463 = vector.broadcast %cst_221 : f32 to vector<8x128xf32>
    %464 = arith.mulf %463, %459 : vector<8x128xf32>
    %465 = arith.addf %454, %464 : vector<8x128xf32>
    %cst_222 = arith.constant 0.00207453757 : f32
    %466 = vector.broadcast %cst_222 : f32 to vector<8x128xf32>
    %467 = arith.mulf %466, %459 : vector<8x128xf32>
    %468 = arith.addf %457, %467 : vector<8x128xf32>
    %c0_223 = arith.constant 0 : index
    %c0_224 = arith.constant 0 : index
    %c42 = arith.constant 42 : index
    %469 = vector.load %arg5[%c0_223, %c0_224, %c42] : memref<2x8x256xf32, #tpu.memory_space<vmem>>, vector<1x8x128xf32>
    %470 = vector.shape_cast %469 : vector<1x8x128xf32> to vector<8x128xf32>
    %cst_225 = arith.constant -0.00800847634 : f32
    %471 = vector.broadcast %cst_225 : f32 to vector<8x128xf32>
    %472 = arith.mulf %471, %470 : vector<8x128xf32>
    %473 = arith.addf %462, %472 : vector<8x128xf32>
    %cst_226 = arith.constant 0.0143483989 : f32
    %474 = vector.broadcast %cst_226 : f32 to vector<8x128xf32>
    %475 = arith.mulf %474, %470 : vector<8x128xf32>
    %476 = arith.addf %465, %475 : vector<8x128xf32>
    %cst_227 = arith.constant -0.00328519568 : f32
    %477 = vector.broadcast %cst_227 : f32 to vector<8x128xf32>
    %478 = arith.mulf %477, %470 : vector<8x128xf32>
    %479 = arith.addf %468, %478 : vector<8x128xf32>
    %c0_228 = arith.constant 0 : index
    %c0_229 = arith.constant 0 : index
    %c43 = arith.constant 43 : index
    %480 = vector.load %arg5[%c0_228, %c0_229, %c43] : memref<2x8x256xf32, #tpu.memory_space<vmem>>, vector<1x8x128xf32>
    %481 = vector.shape_cast %480 : vector<1x8x128xf32> to vector<8x128xf32>
    %cst_230 = arith.constant -0.00337849534 : f32
    %482 = vector.broadcast %cst_230 : f32 to vector<8x128xf32>
    %483 = arith.mulf %482, %481 : vector<8x128xf32>
    %484 = arith.addf %473, %483 : vector<8x128xf32>
    %cst_231 = arith.constant 0.0116997026 : f32
    %485 = vector.broadcast %cst_231 : f32 to vector<8x128xf32>
    %486 = arith.mulf %485, %481 : vector<8x128xf32>
    %487 = arith.addf %476, %486 : vector<8x128xf32>
    %cst_232 = arith.constant -0.0063296142 : f32
    %488 = vector.broadcast %cst_232 : f32 to vector<8x128xf32>
    %489 = arith.mulf %488, %481 : vector<8x128xf32>
    %490 = arith.addf %479, %489 : vector<8x128xf32>
    %c0_233 = arith.constant 0 : index
    %c0_234 = arith.constant 0 : index
    %c44 = arith.constant 44 : index
    %491 = vector.load %arg5[%c0_233, %c0_234, %c44] : memref<2x8x256xf32, #tpu.memory_space<vmem>>, vector<1x8x128xf32>
    %492 = vector.shape_cast %491 : vector<1x8x128xf32> to vector<8x128xf32>
    %cst_235 = arith.constant -1.2473742E-8 : f32
    %493 = vector.broadcast %cst_235 : f32 to vector<8x128xf32>
    %494 = arith.mulf %493, %492 : vector<8x128xf32>
    %495 = arith.addf %484, %494 : vector<8x128xf32>
    %cst_236 = arith.constant 0.00862358324 : f32
    %496 = vector.broadcast %cst_236 : f32 to vector<8x128xf32>
    %497 = arith.mulf %496, %492 : vector<8x128xf32>
    %498 = arith.addf %487, %497 : vector<8x128xf32>
    %cst_237 = arith.constant -0.00755022187 : f32
    %499 = vector.broadcast %cst_237 : f32 to vector<8x128xf32>
    %500 = arith.mulf %499, %492 : vector<8x128xf32>
    %501 = arith.addf %490, %500 : vector<8x128xf32>
    %c0_238 = arith.constant 0 : index
    %c0_239 = arith.constant 0 : index
    %c45 = arith.constant 45 : index
    %502 = vector.load %arg5[%c0_238, %c0_239, %c45] : memref<2x8x256xf32, #tpu.memory_space<vmem>>, vector<1x8x128xf32>
    %503 = vector.shape_cast %502 : vector<1x8x128xf32> to vector<8x128xf32>
    %cst_240 = arith.constant 0.00216597086 : f32
    %504 = vector.broadcast %cst_240 : f32 to vector<8x128xf32>
    %505 = arith.mulf %504, %503 : vector<8x128xf32>
    %506 = arith.addf %495, %505 : vector<8x128xf32>
    %cst_241 = arith.constant 0.0056153317 : f32
    %507 = vector.broadcast %cst_241 : f32 to vector<8x128xf32>
    %508 = arith.mulf %507, %503 : vector<8x128xf32>
    %509 = arith.addf %498, %508 : vector<8x128xf32>
    %cst_242 = arith.constant -0.00743761146 : f32
    %510 = vector.broadcast %cst_242 : f32 to vector<8x128xf32>
    %511 = arith.mulf %510, %503 : vector<8x128xf32>
    %512 = arith.addf %501, %511 : vector<8x128xf32>
    %c0_243 = arith.constant 0 : index
    %c0_244 = arith.constant 0 : index
    %c46 = arith.constant 46 : index
    %513 = vector.load %arg5[%c0_243, %c0_244, %c46] : memref<2x8x256xf32, #tpu.memory_space<vmem>>, vector<1x8x128xf32>
    %514 = vector.shape_cast %513 : vector<1x8x128xf32> to vector<8x128xf32>
    %cst_245 = arith.constant 0.00327573391 : f32
    %515 = vector.broadcast %cst_245 : f32 to vector<8x128xf32>
    %516 = arith.mulf %515, %514 : vector<8x128xf32>
    %517 = arith.addf %506, %516 : vector<8x128xf32>
    %cst_246 = arith.constant 0.00300999917 : f32
    %518 = vector.broadcast %cst_246 : f32 to vector<8x128xf32>
    %519 = arith.mulf %518, %514 : vector<8x128xf32>
    %520 = arith.addf %509, %519 : vector<8x128xf32>
    %cst_247 = arith.constant -0.00646236772 : f32
    %521 = vector.broadcast %cst_247 : f32 to vector<8x128xf32>
    %522 = arith.mulf %521, %514 : vector<8x128xf32>
    %523 = arith.addf %512, %522 : vector<8x128xf32>
    %c0_248 = arith.constant 0 : index
    %c0_249 = arith.constant 0 : index
    %c47 = arith.constant 47 : index
    %524 = vector.load %arg5[%c0_248, %c0_249, %c47] : memref<2x8x256xf32, #tpu.memory_space<vmem>>, vector<1x8x128xf32>
    %525 = vector.shape_cast %524 : vector<1x8x128xf32> to vector<8x128xf32>
    %cst_250 = arith.constant 0.00355919101 : f32
    %526 = vector.broadcast %cst_250 : f32 to vector<8x128xf32>
    %527 = arith.mulf %526, %525 : vector<8x128xf32>
    %528 = arith.addf %517, %527 : vector<8x128xf32>
    %cst_251 = arith.constant 9.9060242E-4 : f32
    %529 = vector.broadcast %cst_251 : f32 to vector<8x128xf32>
    %530 = arith.mulf %529, %525 : vector<8x128xf32>
    %531 = arith.addf %520, %530 : vector<8x128xf32>
    %cst_252 = arith.constant -0.00504245935 : f32
    %532 = vector.broadcast %cst_252 : f32 to vector<8x128xf32>
    %533 = arith.mulf %532, %525 : vector<8x128xf32>
    %534 = arith.addf %523, %533 : vector<8x128xf32>
    %c0_253 = arith.constant 0 : index
    %c0_254 = arith.constant 0 : index
    %c48 = arith.constant 48 : index
    %535 = vector.load %arg5[%c0_253, %c0_254, %c48] : memref<2x8x256xf32, #tpu.memory_space<vmem>>, vector<1x8x128xf32>
    %536 = vector.shape_cast %535 : vector<1x8x128xf32> to vector<8x128xf32>
    %cst_255 = arith.constant 0.00327425497 : f32
    %537 = vector.broadcast %cst_255 : f32 to vector<8x128xf32>
    %538 = arith.mulf %537, %536 : vector<8x128xf32>
    %539 = arith.addf %528, %538 : vector<8x128xf32>
    %cst_256 = arith.constant -3.90922447E-4 : f32
    %540 = vector.broadcast %cst_256 : f32 to vector<8x128xf32>
    %541 = arith.mulf %540, %536 : vector<8x128xf32>
    %542 = arith.addf %531, %541 : vector<8x128xf32>
    %cst_257 = arith.constant -0.00351463398 : f32
    %543 = vector.broadcast %cst_257 : f32 to vector<8x128xf32>
    %544 = arith.mulf %543, %536 : vector<8x128xf32>
    %545 = arith.addf %534, %544 : vector<8x128xf32>
    %c0_258 = arith.constant 0 : index
    %c0_259 = arith.constant 0 : index
    %c49 = arith.constant 49 : index
    %546 = vector.load %arg5[%c0_258, %c0_259, %c49] : memref<2x8x256xf32, #tpu.memory_space<vmem>>, vector<1x8x128xf32>
    %547 = vector.shape_cast %546 : vector<1x8x128xf32> to vector<8x128xf32>
    %cst_260 = arith.constant 0.00266695325 : f32
    %548 = vector.broadcast %cst_260 : f32 to vector<8x128xf32>
    %549 = arith.mulf %548, %547 : vector<8x128xf32>
    %550 = arith.addf %539, %549 : vector<8x128xf32>
    %cst_261 = arith.constant -0.00118254707 : f32
    %551 = vector.broadcast %cst_261 : f32 to vector<8x128xf32>
    %552 = arith.mulf %551, %547 : vector<8x128xf32>
    %553 = arith.addf %542, %552 : vector<8x128xf32>
    %cst_262 = arith.constant -0.00211822498 : f32
    %554 = vector.broadcast %cst_262 : f32 to vector<8x128xf32>
    %555 = arith.mulf %554, %547 : vector<8x128xf32>
    %556 = arith.addf %545, %555 : vector<8x128xf32>
    %c0_263 = arith.constant 0 : index
    %c0_264 = arith.constant 0 : index
    %c50 = arith.constant 50 : index
    %557 = vector.load %arg5[%c0_263, %c0_264, %c50] : memref<2x8x256xf32, #tpu.memory_space<vmem>>, vector<1x8x128xf32>
    %558 = vector.shape_cast %557 : vector<1x8x128xf32> to vector<8x128xf32>
    %cst_265 = arith.constant 0.00194240164 : f32
    %559 = vector.broadcast %cst_265 : f32 to vector<8x128xf32>
    %560 = arith.mulf %559, %558 : vector<8x128xf32>
    %561 = arith.addf %550, %560 : vector<8x128xf32>
    %cst_266 = arith.constant -0.00149576028 : f32
    %562 = vector.broadcast %cst_266 : f32 to vector<8x128xf32>
    %563 = arith.mulf %562, %558 : vector<8x128xf32>
    %564 = arith.addf %553, %563 : vector<8x128xf32>
    %cst_267 = arith.constant -9.93775902E-4 : f32
    %565 = vector.broadcast %cst_267 : f32 to vector<8x128xf32>
    %566 = arith.mulf %565, %558 : vector<8x128xf32>
    %567 = arith.addf %556, %566 : vector<8x128xf32>
    %c0_268 = arith.constant 0 : index
    %c0_269 = arith.constant 0 : index
    %c51 = arith.constant 51 : index
    %568 = vector.load %arg5[%c0_268, %c0_269, %c51] : memref<2x8x256xf32, #tpu.memory_space<vmem>>, vector<1x8x128xf32>
    %569 = vector.shape_cast %568 : vector<1x8x128xf32> to vector<8x128xf32>
    %cst_270 = arith.constant 0.00124920544 : f32
    %570 = vector.broadcast %cst_270 : f32 to vector<8x128xf32>
    %571 = arith.mulf %570, %569 : vector<8x128xf32>
    %572 = arith.addf %561, %571 : vector<8x128xf32>
    %cst_271 = arith.constant -0.00147010642 : f32
    %573 = vector.broadcast %cst_271 : f32 to vector<8x128xf32>
    %574 = arith.mulf %573, %569 : vector<8x128xf32>
    %575 = arith.addf %564, %574 : vector<8x128xf32>
    %cst_272 = arith.constant -1.94792854E-4 : f32
    %576 = vector.broadcast %cst_272 : f32 to vector<8x128xf32>
    %577 = arith.mulf %576, %569 : vector<8x128xf32>
    %578 = arith.addf %567, %577 : vector<8x128xf32>
    %c0_273 = arith.constant 0 : index
    %c0_274 = arith.constant 0 : index
    %c52 = arith.constant 52 : index
    %579 = vector.load %arg5[%c0_273, %c0_274, %c52] : memref<2x8x256xf32, #tpu.memory_space<vmem>>, vector<1x8x128xf32>
    %580 = vector.shape_cast %579 : vector<1x8x128xf32> to vector<8x128xf32>
    %cst_275 = arith.constant 6.76509633E-4 : f32
    %581 = vector.broadcast %cst_275 : f32 to vector<8x128xf32>
    %582 = arith.mulf %581, %580 : vector<8x128xf32>
    %583 = arith.addf %572, %582 : vector<8x128xf32>
    %cst_276 = arith.constant -0.00124371483 : f32
    %584 = vector.broadcast %cst_276 : f32 to vector<8x128xf32>
    %585 = arith.mulf %584, %580 : vector<8x128xf32>
    %586 = arith.addf %575, %585 : vector<8x128xf32>
    %cst_277 = arith.constant 2.91548495E-4 : f32
    %587 = vector.broadcast %cst_277 : f32 to vector<8x128xf32>
    %588 = arith.mulf %587, %580 : vector<8x128xf32>
    %589 = arith.addf %578, %588 : vector<8x128xf32>
    %c0_278 = arith.constant 0 : index
    %c0_279 = arith.constant 0 : index
    %c53 = arith.constant 53 : index
    %590 = vector.load %arg5[%c0_278, %c0_279, %c53] : memref<2x8x256xf32, #tpu.memory_space<vmem>>, vector<1x8x128xf32>
    %591 = vector.shape_cast %590 : vector<1x8x128xf32> to vector<8x128xf32>
    %cst_280 = arith.constant 2.60978093E-4 : f32
    %592 = vector.broadcast %cst_280 : f32 to vector<8x128xf32>
    %593 = arith.mulf %592, %591 : vector<8x128xf32>
    %594 = arith.addf %583, %593 : vector<8x128xf32>
    %cst_281 = arith.constant -9.329230e-04 : f32
    %595 = vector.broadcast %cst_281 : f32 to vector<8x128xf32>
    %596 = arith.mulf %595, %591 : vector<8x128xf32>
    %597 = arith.addf %586, %596 : vector<8x128xf32>
    %cst_282 = arith.constant 5.19991096E-4 : f32
    %598 = vector.broadcast %cst_282 : f32 to vector<8x128xf32>
    %599 = arith.mulf %598, %591 : vector<8x128xf32>
    %600 = arith.addf %589, %599 : vector<8x128xf32>
    %c0_283 = arith.constant 0 : index
    %c0_284 = arith.constant 0 : index
    %c54 = arith.constant 54 : index
    %601 = vector.load %arg5[%c0_283, %c0_284, %c54] : memref<2x8x256xf32, #tpu.memory_space<vmem>>, vector<1x8x128xf32>
    %602 = vector.shape_cast %601 : vector<1x8x128xf32> to vector<8x128xf32>
    %cst_285 = arith.constant 1.73311943E-9 : f32
    %603 = vector.broadcast %cst_285 : f32 to vector<8x128xf32>
    %604 = arith.mulf %603, %602 : vector<8x128xf32>
    %605 = arith.addf %594, %604 : vector<8x128xf32>
    %cst_286 = arith.constant -6.217630e-04 : f32
    %606 = vector.broadcast %cst_286 : f32 to vector<8x128xf32>
    %607 = arith.mulf %606, %602 : vector<8x128xf32>
    %608 = arith.addf %597, %607 : vector<8x128xf32>
    %cst_287 = arith.constant 5.639760e-04 : f32
    %609 = vector.broadcast %cst_287 : f32 to vector<8x128xf32>
    %610 = arith.mulf %609, %602 : vector<8x128xf32>
    %611 = arith.addf %600, %610 : vector<8x128xf32>
    %c0_288 = arith.constant 0 : index
    %c0_289 = arith.constant 0 : index
    %c55 = arith.constant 55 : index
    %612 = vector.load %arg5[%c0_288, %c0_289, %c55] : memref<2x8x256xf32, #tpu.memory_space<vmem>>, vector<1x8x128xf32>
    %613 = vector.shape_cast %612 : vector<1x8x128xf32> to vector<8x128xf32>
    %cst_290 = arith.constant -1.33207534E-4 : f32
    %614 = vector.broadcast %cst_290 : f32 to vector<8x128xf32>
    %615 = arith.mulf %614, %613 : vector<8x128xf32>
    %616 = arith.addf %605, %615 : vector<8x128xf32>
    %cst_291 = arith.constant -3.60278733E-4 : f32
    %617 = vector.broadcast %cst_291 : f32 to vector<8x128xf32>
    %618 = arith.mulf %617, %613 : vector<8x128xf32>
    %619 = arith.addf %608, %618 : vector<8x128xf32>
    %cst_292 = arith.constant 4.96981374E-4 : f32
    %620 = vector.broadcast %cst_292 : f32 to vector<8x128xf32>
    %621 = arith.mulf %620, %613 : vector<8x128xf32>
    %622 = arith.addf %611, %621 : vector<8x128xf32>
    %c0_293 = arith.constant 0 : index
    %c0_294 = arith.constant 0 : index
    %c56 = arith.constant 56 : index
    %623 = vector.load %arg5[%c0_293, %c0_294, %c56] : memref<2x8x256xf32, #tpu.memory_space<vmem>>, vector<1x8x128xf32>
    %624 = vector.shape_cast %623 : vector<1x8x128xf32> to vector<8x128xf32>
    %cst_295 = arith.constant -1.75567271E-4 : f32
    %625 = vector.broadcast %cst_295 : f32 to vector<8x128xf32>
    %626 = arith.mulf %625, %624 : vector<8x128xf32>
    %627 = arith.addf %616, %626 : vector<8x128xf32>
    %cst_296 = arith.constant -1.69187144E-4 : f32
    %628 = vector.broadcast %cst_296 : f32 to vector<8x128xf32>
    %629 = arith.mulf %628, %624 : vector<8x128xf32>
    %630 = arith.addf %619, %629 : vector<8x128xf32>
    %cst_297 = arith.constant 3.80286336E-4 : f32
    %631 = vector.broadcast %cst_297 : f32 to vector<8x128xf32>
    %632 = arith.mulf %631, %624 : vector<8x128xf32>
    %633 = arith.addf %622, %632 : vector<8x128xf32>
    %c0_298 = arith.constant 0 : index
    %c0_299 = arith.constant 0 : index
    %c57 = arith.constant 57 : index
    %634 = vector.load %arg5[%c0_298, %c0_299, %c57] : memref<2x8x256xf32, #tpu.memory_space<vmem>>, vector<1x8x128xf32>
    %635 = vector.shape_cast %634 : vector<1x8x128xf32> to vector<8x128xf32>
    %cst_300 = arith.constant -1.63568358E-4 : f32
    %636 = vector.broadcast %cst_300 : f32 to vector<8x128xf32>
    %637 = arith.mulf %636, %635 : vector<8x128xf32>
    %638 = arith.addf %627, %637 : vector<8x128xf32>
    %cst_301 = arith.constant -4.80092531E-5 : f32
    %639 = vector.broadcast %cst_301 : f32 to vector<8x128xf32>
    %640 = arith.mulf %639, %635 : vector<8x128xf32>
    %641 = arith.addf %630, %640 : vector<8x128xf32>
    %cst_302 = arith.constant 2.57229985E-4 : f32
    %642 = vector.broadcast %cst_302 : f32 to vector<8x128xf32>
    %643 = arith.mulf %642, %635 : vector<8x128xf32>
    %644 = arith.addf %633, %643 : vector<8x128xf32>
    %c0_303 = arith.constant 0 : index
    %c0_304 = arith.constant 0 : index
    %c58 = arith.constant 58 : index
    %645 = vector.load %arg5[%c0_303, %c0_304, %c58] : memref<2x8x256xf32, #tpu.memory_space<vmem>>, vector<1x8x128xf32>
    %646 = vector.shape_cast %645 : vector<1x8x128xf32> to vector<8x128xf32>
    %cst_305 = arith.constant -1.26782834E-4 : f32
    %647 = vector.broadcast %cst_305 : f32 to vector<8x128xf32>
    %648 = arith.mulf %647, %646 : vector<8x128xf32>
    %649 = arith.addf %638, %648 : vector<8x128xf32>
    %cst_306 = arith.constant 1.60616146E-5 : f32
    %650 = vector.broadcast %cst_306 : f32 to vector<8x128xf32>
    %651 = arith.mulf %650, %646 : vector<8x128xf32>
    %652 = arith.addf %641, %651 : vector<8x128xf32>
    %cst_307 = arith.constant 1.5286688E-4 : f32
    %653 = vector.broadcast %cst_307 : f32 to vector<8x128xf32>
    %654 = arith.mulf %653, %646 : vector<8x128xf32>
    %655 = arith.addf %644, %654 : vector<8x128xf32>
    %c0_308 = arith.constant 0 : index
    %c0_309 = arith.constant 0 : index
    %c59 = arith.constant 59 : index
    %656 = vector.load %arg5[%c0_308, %c0_309, %c59] : memref<2x8x256xf32, #tpu.memory_space<vmem>>, vector<1x8x128xf32>
    %657 = vector.shape_cast %656 : vector<1x8x128xf32> to vector<8x128xf32>
    %cst_310 = arith.constant -8.53199671E-5 : f32
    %658 = vector.broadcast %cst_310 : f32 to vector<8x128xf32>
    %659 = arith.mulf %658, %657 : vector<8x128xf32>
    %660 = arith.addf %649, %659 : vector<8x128xf32>
    %cst_311 = arith.constant 4.04116545E-5 : f32
    %661 = vector.broadcast %cst_311 : f32 to vector<8x128xf32>
    %662 = arith.mulf %661, %657 : vector<8x128xf32>
    %663 = arith.addf %652, %662 : vector<8x128xf32>
    %cst_312 = arith.constant 7.71411505E-5 : f32
    %664 = vector.broadcast %cst_312 : f32 to vector<8x128xf32>
    %665 = arith.mulf %664, %657 : vector<8x128xf32>
    %666 = arith.addf %655, %665 : vector<8x128xf32>
    %c0_313 = arith.constant 0 : index
    %c0_314 = arith.constant 0 : index
    %c60 = arith.constant 60 : index
    %667 = vector.load %arg5[%c0_313, %c0_314, %c60] : memref<2x8x256xf32, #tpu.memory_space<vmem>>, vector<1x8x128xf32>
    %668 = vector.shape_cast %667 : vector<1x8x128xf32> to vector<8x128xf32>
    %cst_315 = arith.constant -5.01921459E-5 : f32
    %669 = vector.broadcast %cst_315 : f32 to vector<8x128xf32>
    %670 = arith.mulf %669, %668 : vector<8x128xf32>
    %671 = arith.addf %660, %670 : vector<8x128xf32>
    %cst_316 = arith.constant 4.16164912E-5 : f32
    %672 = vector.broadcast %cst_316 : f32 to vector<8x128xf32>
    %673 = arith.mulf %672, %668 : vector<8x128xf32>
    %674 = arith.addf %663, %673 : vector<8x128xf32>
    %cst_317 = arith.constant 2.96881572E-5 : f32
    %675 = vector.broadcast %cst_317 : f32 to vector<8x128xf32>
    %676 = arith.mulf %675, %668 : vector<8x128xf32>
    %677 = arith.addf %666, %676 : vector<8x128xf32>
    %c0_318 = arith.constant 0 : index
    %c0_319 = arith.constant 0 : index
    %c61 = arith.constant 61 : index
    %678 = vector.load %arg5[%c0_318, %c0_319, %c61] : memref<2x8x256xf32, #tpu.memory_space<vmem>>, vector<1x8x128xf32>
    %679 = vector.shape_cast %678 : vector<1x8x128xf32> to vector<8x128xf32>
    %cst_320 = arith.constant -2.53799917E-5 : f32
    %680 = vector.broadcast %cst_320 : f32 to vector<8x128xf32>
    %681 = arith.mulf %680, %679 : vector<8x128xf32>
    %682 = arith.addf %671, %681 : vector<8x128xf32>
    %cst_321 = arith.constant 3.24686698E-5 : f32
    %683 = vector.broadcast %cst_321 : f32 to vector<8x128xf32>
    %684 = arith.mulf %683, %679 : vector<8x128xf32>
    %685 = arith.addf %674, %684 : vector<8x128xf32>
    %cst_322 = arith.constant 4.66063102E-6 : f32
    %686 = vector.broadcast %cst_322 : f32 to vector<8x128xf32>
    %687 = arith.mulf %686, %679 : vector<8x128xf32>
    %688 = arith.addf %677, %687 : vector<8x128xf32>
    %c0_323 = arith.constant 0 : index
    %c0_324 = arith.constant 0 : index
    %c62 = arith.constant 62 : index
    %689 = vector.load %arg5[%c0_323, %c0_324, %c62] : memref<2x8x256xf32, #tpu.memory_space<vmem>>, vector<1x8x128xf32>
    %690 = vector.shape_cast %689 : vector<1x8x128xf32> to vector<8x128xf32>
    %cst_325 = arith.constant -1.04536775E-5 : f32
    %691 = vector.broadcast %cst_325 : f32 to vector<8x128xf32>
    %692 = arith.mulf %691, %690 : vector<8x128xf32>
    %693 = arith.addf %682, %692 : vector<8x128xf32>
    %cst_326 = arith.constant 2.11422721E-5 : f32
    %694 = vector.broadcast %cst_326 : f32 to vector<8x128xf32>
    %695 = arith.mulf %694, %690 : vector<8x128xf32>
    %696 = arith.addf %685, %695 : vector<8x128xf32>
    %cst_327 = arith.constant -5.42906673E-6 : f32
    %697 = vector.broadcast %cst_327 : f32 to vector<8x128xf32>
    %698 = arith.mulf %697, %690 : vector<8x128xf32>
    %699 = arith.addf %688, %698 : vector<8x128xf32>
    %c0_328 = arith.constant 0 : index
    %c0_329 = arith.constant 0 : index
    %c63 = arith.constant 63 : index
    %700 = vector.load %arg5[%c0_328, %c0_329, %c63] : memref<2x8x256xf32, #tpu.memory_space<vmem>>, vector<1x8x128xf32>
    %701 = vector.shape_cast %700 : vector<1x8x128xf32> to vector<8x128xf32>
    %cst_330 = arith.constant -2.9398318E-6 : f32
    %702 = vector.broadcast %cst_330 : f32 to vector<8x128xf32>
    %703 = arith.mulf %702, %701 : vector<8x128xf32>
    %704 = arith.addf %693, %703 : vector<8x128xf32>
    %cst_331 = arith.constant 1.17404925E-5 : f32
    %705 = vector.broadcast %cst_331 : f32 to vector<8x128xf32>
    %706 = arith.mulf %705, %701 : vector<8x128xf32>
    %707 = arith.addf %696, %706 : vector<8x128xf32>
    %cst_332 = arith.constant -7.26991038E-6 : f32
    %708 = vector.broadcast %cst_332 : f32 to vector<8x128xf32>
    %709 = arith.mulf %708, %701 : vector<8x128xf32>
    %710 = arith.addf %699, %709 : vector<8x128xf32>
    %c0_333 = arith.constant 0 : index
    %c0_334 = arith.constant 0 : index
    %c64 = arith.constant 64 : index
    %711 = vector.load %arg5[%c0_333, %c0_334, %c64] : memref<2x8x256xf32, #tpu.memory_space<vmem>>, vector<1x8x128xf32>
    %712 = vector.shape_cast %711 : vector<1x8x128xf32> to vector<8x128xf32>
    %cst_335 = arith.constant -2.01684017E-11 : f32
    %713 = vector.broadcast %cst_335 : f32 to vector<8x128xf32>
    %714 = arith.mulf %713, %712 : vector<8x128xf32>
    %715 = arith.addf %704, %714 : vector<8x128xf32>
    %cst_336 = arith.constant 5.50331924E-6 : f32
    %716 = vector.broadcast %cst_336 : f32 to vector<8x128xf32>
    %717 = arith.mulf %716, %712 : vector<8x128xf32>
    %718 = arith.addf %707, %717 : vector<8x128xf32>
    %cst_337 = arith.constant -5.65100299E-6 : f32
    %719 = vector.broadcast %cst_337 : f32 to vector<8x128xf32>
    %720 = arith.mulf %719, %712 : vector<8x128xf32>
    %721 = arith.addf %710, %720 : vector<8x128xf32>
    %c0_338 = arith.constant 0 : index
    %c0_339 = arith.constant 0 : index
    %c65 = arith.constant 65 : index
    %722 = vector.load %arg5[%c0_338, %c0_339, %c65] : memref<2x8x256xf32, #tpu.memory_space<vmem>>, vector<1x8x128xf32>
    %723 = vector.shape_cast %722 : vector<1x8x128xf32> to vector<8x128xf32>
    %cst_340 = arith.constant 6.56423197E-7 : f32
    %724 = vector.broadcast %cst_340 : f32 to vector<8x128xf32>
    %725 = arith.mulf %724, %723 : vector<8x128xf32>
    %726 = arith.addf %715, %725 : vector<8x128xf32>
    %cst_341 = arith.constant 2.08853385E-6 : f32
    %727 = vector.broadcast %cst_341 : f32 to vector<8x128xf32>
    %728 = arith.mulf %727, %723 : vector<8x128xf32>
    %729 = arith.addf %718, %728 : vector<8x128xf32>
    %cst_342 = arith.constant -3.34970241E-6 : f32
    %730 = vector.broadcast %cst_342 : f32 to vector<8x128xf32>
    %731 = arith.mulf %730, %723 : vector<8x128xf32>
    %732 = arith.addf %721, %731 : vector<8x128xf32>
    %c0_343 = arith.constant 0 : index
    %c0_344 = arith.constant 0 : index
    %c66 = arith.constant 66 : index
    %733 = vector.load %arg5[%c0_343, %c0_344, %c66] : memref<2x8x256xf32, #tpu.memory_space<vmem>>, vector<1x8x128xf32>
    %734 = vector.shape_cast %733 : vector<1x8x128xf32> to vector<8x128xf32>
    %cst_345 = arith.constant 4.842120e-07 : f32
    %735 = vector.broadcast %cst_345 : f32 to vector<8x128xf32>
    %736 = arith.mulf %735, %734 : vector<8x128xf32>
    %737 = arith.addf %726, %736 : vector<8x128xf32>
    %cst_346 = arith.constant 5.76834623E-7 : f32
    %738 = vector.broadcast %cst_346 : f32 to vector<8x128xf32>
    %739 = arith.mulf %738, %734 : vector<8x128xf32>
    %740 = arith.addf %729, %739 : vector<8x128xf32>
    %cst_347 = arith.constant -1.57150066E-6 : f32
    %741 = vector.broadcast %cst_347 : f32 to vector<8x128xf32>
    %742 = arith.mulf %741, %734 : vector<8x128xf32>
    %743 = arith.addf %732, %742 : vector<8x128xf32>
    %c0_348 = arith.constant 0 : index
    %c0_349 = arith.constant 0 : index
    %c67 = arith.constant 67 : index
    %744 = vector.load %arg5[%c0_348, %c0_349, %c67] : memref<2x8x256xf32, #tpu.memory_space<vmem>>, vector<1x8x128xf32>
    %745 = vector.shape_cast %744 : vector<1x8x128xf32> to vector<8x128xf32>
    %cst_350 = arith.constant 1.99564326E-7 : f32
    %746 = vector.broadcast %cst_350 : f32 to vector<8x128xf32>
    %747 = arith.mulf %746, %745 : vector<8x128xf32>
    %748 = arith.addf %737, %747 : vector<8x128xf32>
    %cst_351 = arith.constant 7.99310768E-8 : f32
    %749 = vector.broadcast %cst_351 : f32 to vector<8x128xf32>
    %750 = arith.mulf %749, %745 : vector<8x128xf32>
    %751 = arith.addf %740, %750 : vector<8x128xf32>
    %cst_352 = arith.constant -5.59963325E-7 : f32
    %752 = vector.broadcast %cst_352 : f32 to vector<8x128xf32>
    %753 = arith.mulf %752, %745 : vector<8x128xf32>
    %754 = arith.addf %743, %753 : vector<8x128xf32>
    %c0_353 = arith.constant 0 : index
    %c0_354 = arith.constant 0 : index
    %c68 = arith.constant 68 : index
    %755 = vector.load %arg5[%c0_353, %c0_354, %c68] : memref<2x8x256xf32, #tpu.memory_space<vmem>>, vector<1x8x128xf32>
    %756 = vector.shape_cast %755 : vector<1x8x128xf32> to vector<8x128xf32>
    %cst_355 = arith.constant 0.000000e+00 : f32
    %757 = vector.broadcast %cst_355 : f32 to vector<8x128xf32>
    %758 = arith.mulf %757, %756 : vector<8x128xf32>
    %759 = arith.addf %748, %758 : vector<8x128xf32>
    %cst_356 = arith.constant -8.43928127E-9 : f32
    %760 = vector.broadcast %cst_356 : f32 to vector<8x128xf32>
    %761 = arith.mulf %760, %756 : vector<8x128xf32>
    %762 = arith.addf %751, %761 : vector<8x128xf32>
    %cst_357 = arith.constant -1.28560501E-7 : f32
    %763 = vector.broadcast %cst_357 : f32 to vector<8x128xf32>
    %764 = arith.mulf %763, %756 : vector<8x128xf32>
    %765 = arith.addf %754, %764 : vector<8x128xf32>
    %c1_358 = arith.constant 1 : index
    %c0_359 = arith.constant 0 : index
    %c0_360 = arith.constant 0 : index
    %766 = vector.load %arg5[%c1_358, %c0_359, %c0_360] : memref<2x8x256xf32, #tpu.memory_space<vmem>>, vector<1x8x128xf32>
    %767 = vector.shape_cast %766 : vector<1x8x128xf32> to vector<8x128xf32>
    %cst_361 = arith.constant -9.91475986E-8 : f32
    %768 = vector.broadcast %cst_361 : f32 to vector<8x128xf32>
    %769 = arith.mulf %768, %767 : vector<8x128xf32>
    %770 = arith.addf %759, %769 : vector<8x128xf32>
    %cst_362 = arith.constant 4.34954721E-8 : f32
    %771 = vector.broadcast %cst_362 : f32 to vector<8x128xf32>
    %772 = arith.mulf %771, %767 : vector<8x128xf32>
    %773 = arith.addf %762, %772 : vector<8x128xf32>
    %cst_363 = arith.constant 0.000000e+00 : f32
    %774 = vector.broadcast %cst_363 : f32 to vector<8x128xf32>
    %775 = arith.mulf %774, %767 : vector<8x128xf32>
    %776 = arith.addf %765, %775 : vector<8x128xf32>
    %c1_364 = arith.constant 1 : index
    %c0_365 = arith.constant 0 : index
    %c1_366 = arith.constant 1 : index
    %777 = vector.load %arg5[%c1_364, %c0_365, %c1_366] : memref<2x8x256xf32, #tpu.memory_space<vmem>>, vector<1x8x128xf32>
    %778 = vector.shape_cast %777 : vector<1x8x128xf32> to vector<8x128xf32>
    %cst_367 = arith.constant -3.33325858E-7 : f32
    %779 = vector.broadcast %cst_367 : f32 to vector<8x128xf32>
    %780 = arith.mulf %779, %778 : vector<8x128xf32>
    %781 = arith.addf %770, %780 : vector<8x128xf32>
    %cst_368 = arith.constant 2.89386605E-7 : f32
    %782 = vector.broadcast %cst_368 : f32 to vector<8x128xf32>
    %783 = arith.mulf %782, %778 : vector<8x128xf32>
    %784 = arith.addf %773, %783 : vector<8x128xf32>
    %cst_369 = arith.constant -1.0113653E-8 : f32
    %785 = vector.broadcast %cst_369 : f32 to vector<8x128xf32>
    %786 = arith.mulf %785, %778 : vector<8x128xf32>
    %787 = arith.addf %776, %786 : vector<8x128xf32>
    %c1_370 = arith.constant 1 : index
    %c0_371 = arith.constant 0 : index
    %c2_372 = arith.constant 2 : index
    %788 = vector.load %arg5[%c1_370, %c0_371, %c2_372] : memref<2x8x256xf32, #tpu.memory_space<vmem>>, vector<1x8x128xf32>
    %789 = vector.shape_cast %788 : vector<1x8x128xf32> to vector<8x128xf32>
    %cst_373 = arith.constant -6.14523117E-7 : f32
    %790 = vector.broadcast %cst_373 : f32 to vector<8x128xf32>
    %791 = arith.mulf %790, %789 : vector<8x128xf32>
    %792 = arith.addf %781, %791 : vector<8x128xf32>
    %cst_374 = arith.constant 9.76518322E-7 : f32
    %793 = vector.broadcast %cst_374 : f32 to vector<8x128xf32>
    %794 = arith.mulf %793, %789 : vector<8x128xf32>
    %795 = arith.addf %784, %794 : vector<8x128xf32>
    %cst_375 = arith.constant -2.47036752E-7 : f32
    %796 = vector.broadcast %cst_375 : f32 to vector<8x128xf32>
    %797 = arith.mulf %796, %789 : vector<8x128xf32>
    %798 = arith.addf %787, %797 : vector<8x128xf32>
    %c1_376 = arith.constant 1 : index
    %c0_377 = arith.constant 0 : index
    %c3_378 = arith.constant 3 : index
    %799 = vector.load %arg5[%c1_376, %c0_377, %c3_378] : memref<2x8x256xf32, #tpu.memory_space<vmem>>, vector<1x8x128xf32>
    %800 = vector.shape_cast %799 : vector<1x8x128xf32> to vector<8x128xf32>
    %cst_379 = arith.constant -5.02981266E-7 : f32
    %801 = vector.broadcast %cst_379 : f32 to vector<8x128xf32>
    %802 = arith.mulf %801, %800 : vector<8x128xf32>
    %803 = arith.addf %792, %802 : vector<8x128xf32>
    %cst_380 = arith.constant 2.36448227E-6 : f32
    %804 = vector.broadcast %cst_380 : f32 to vector<8x128xf32>
    %805 = arith.mulf %804, %800 : vector<8x128xf32>
    %806 = arith.addf %795, %805 : vector<8x128xf32>
    %cst_381 = arith.constant -1.15545924E-6 : f32
    %807 = vector.broadcast %cst_381 : f32 to vector<8x128xf32>
    %808 = arith.mulf %807, %800 : vector<8x128xf32>
    %809 = arith.addf %798, %808 : vector<8x128xf32>
    %c1_382 = arith.constant 1 : index
    %c0_383 = arith.constant 0 : index
    %c4_384 = arith.constant 4 : index
    %810 = vector.load %arg5[%c1_382, %c0_383, %c4_384] : memref<2x8x256xf32, #tpu.memory_space<vmem>>, vector<1x8x128xf32>
    %811 = vector.shape_cast %810 : vector<1x8x128xf32> to vector<8x128xf32>
    %cst_385 = arith.constant 1.06005291E-6 : f32
    %812 = vector.broadcast %cst_385 : f32 to vector<8x128xf32>
    %813 = arith.mulf %812, %811 : vector<8x128xf32>
    %814 = arith.addf %803, %813 : vector<8x128xf32>
    %cst_386 = arith.constant 4.48051878E-6 : f32
    %815 = vector.broadcast %cst_386 : f32 to vector<8x128xf32>
    %816 = arith.mulf %815, %811 : vector<8x128xf32>
    %817 = arith.addf %806, %816 : vector<8x128xf32>
    %cst_387 = arith.constant -3.49617221E-6 : f32
    %818 = vector.broadcast %cst_387 : f32 to vector<8x128xf32>
    %819 = arith.mulf %818, %811 : vector<8x128xf32>
    %820 = arith.addf %809, %819 : vector<8x128xf32>
    %c1_388 = arith.constant 1 : index
    %c0_389 = arith.constant 0 : index
    %c5_390 = arith.constant 5 : index
    %821 = vector.load %arg5[%c1_388, %c0_389, %c5_390] : memref<2x8x256xf32, #tpu.memory_space<vmem>>, vector<1x8x128xf32>
    %822 = vector.shape_cast %821 : vector<1x8x128xf32> to vector<8x128xf32>
    %cst_391 = arith.constant 5.95312849E-6 : f32
    %823 = vector.broadcast %cst_391 : f32 to vector<8x128xf32>
    %824 = arith.mulf %823, %822 : vector<8x128xf32>
    %825 = arith.addf %814, %824 : vector<8x128xf32>
    %cst_392 = arith.constant 6.675700e-06 : f32
    %826 = vector.broadcast %cst_392 : f32 to vector<8x128xf32>
    %827 = arith.mulf %826, %822 : vector<8x128xf32>
    %828 = arith.addf %817, %827 : vector<8x128xf32>
    %cst_393 = arith.constant -8.22428137E-6 : f32
    %829 = vector.broadcast %cst_393 : f32 to vector<8x128xf32>
    %830 = arith.mulf %829, %822 : vector<8x128xf32>
    %831 = arith.addf %820, %830 : vector<8x128xf32>
    %c1_394 = arith.constant 1 : index
    %c0_395 = arith.constant 0 : index
    %c6_396 = arith.constant 6 : index
    %832 = vector.load %arg5[%c1_394, %c0_395, %c6_396] : memref<2x8x256xf32, #tpu.memory_space<vmem>>, vector<1x8x128xf32>
    %833 = vector.shape_cast %832 : vector<1x8x128xf32> to vector<8x128xf32>
    %cst_397 = arith.constant 1.68112911E-5 : f32
    %834 = vector.broadcast %cst_397 : f32 to vector<8x128xf32>
    %835 = arith.mulf %834, %833 : vector<8x128xf32>
    %836 = arith.addf %825, %835 : vector<8x128xf32>
    %cst_398 = arith.constant 7.03139267E-6 : f32
    %837 = vector.broadcast %cst_398 : f32 to vector<8x128xf32>
    %838 = arith.mulf %837, %833 : vector<8x128xf32>
    %839 = arith.addf %828, %838 : vector<8x128xf32>
    %cst_399 = arith.constant -1.60719683E-5 : f32
    %840 = vector.broadcast %cst_399 : f32 to vector<8x128xf32>
    %841 = arith.mulf %840, %833 : vector<8x128xf32>
    %842 = arith.addf %831, %841 : vector<8x128xf32>
    %c1_400 = arith.constant 1 : index
    %c0_401 = arith.constant 0 : index
    %c7_402 = arith.constant 7 : index
    %843 = vector.load %arg5[%c1_400, %c0_401, %c7_402] : memref<2x8x256xf32, #tpu.memory_space<vmem>>, vector<1x8x128xf32>
    %844 = vector.shape_cast %843 : vector<1x8x128xf32> to vector<8x128xf32>
    %cst_403 = arith.constant 3.64503976E-5 : f32
    %845 = vector.broadcast %cst_403 : f32 to vector<8x128xf32>
    %846 = arith.mulf %845, %844 : vector<8x128xf32>
    %847 = arith.addf %836, %846 : vector<8x128xf32>
    %cst_404 = arith.constant 1.79588528E-6 : f32
    %848 = vector.broadcast %cst_404 : f32 to vector<8x128xf32>
    %849 = arith.mulf %848, %844 : vector<8x128xf32>
    %850 = arith.addf %839, %849 : vector<8x128xf32>
    %cst_405 = arith.constant -2.67385149E-5 : f32
    %851 = vector.broadcast %cst_405 : f32 to vector<8x128xf32>
    %852 = arith.mulf %851, %844 : vector<8x128xf32>
    %853 = arith.addf %842, %852 : vector<8x128xf32>
    %c1_406 = arith.constant 1 : index
    %c0_407 = arith.constant 0 : index
    %c8_408 = arith.constant 8 : index
    %854 = vector.load %arg5[%c1_406, %c0_407, %c8_408] : memref<2x8x256xf32, #tpu.memory_space<vmem>>, vector<1x8x128xf32>
    %855 = vector.shape_cast %854 : vector<1x8x128xf32> to vector<8x128xf32>
    %cst_409 = arith.constant 6.65810949E-5 : f32
    %856 = vector.broadcast %cst_409 : f32 to vector<8x128xf32>
    %857 = arith.mulf %856, %855 : vector<8x128xf32>
    %858 = arith.addf %847, %857 : vector<8x128xf32>
    %cst_410 = arith.constant -1.48364279E-5 : f32
    %859 = vector.broadcast %cst_410 : f32 to vector<8x128xf32>
    %860 = arith.mulf %859, %855 : vector<8x128xf32>
    %861 = arith.addf %850, %860 : vector<8x128xf32>
    %cst_411 = arith.constant -3.77189717E-5 : f32
    %862 = vector.broadcast %cst_411 : f32 to vector<8x128xf32>
    %863 = arith.mulf %862, %855 : vector<8x128xf32>
    %864 = arith.addf %853, %863 : vector<8x128xf32>
    %c1_412 = arith.constant 1 : index
    %c0_413 = arith.constant 0 : index
    %c9_414 = arith.constant 9 : index
    %865 = vector.load %arg5[%c1_412, %c0_413, %c9_414] : memref<2x8x256xf32, #tpu.memory_space<vmem>>, vector<1x8x128xf32>
    %866 = vector.shape_cast %865 : vector<1x8x128xf32> to vector<8x128xf32>
    %cst_415 = arith.constant 1.05753636E-4 : f32
    %867 = vector.broadcast %cst_415 : f32 to vector<8x128xf32>
    %868 = arith.mulf %867, %866 : vector<8x128xf32>
    %869 = arith.addf %858, %868 : vector<8x128xf32>
    %cst_416 = arith.constant -5.01690229E-5 : f32
    %870 = vector.broadcast %cst_416 : f32 to vector<8x128xf32>
    %871 = arith.mulf %870, %866 : vector<8x128xf32>
    %872 = arith.addf %861, %871 : vector<8x128xf32>
    %cst_417 = arith.constant -4.30007858E-5 : f32
    %873 = vector.broadcast %cst_417 : f32 to vector<8x128xf32>
    %874 = arith.mulf %873, %866 : vector<8x128xf32>
    %875 = arith.addf %864, %874 : vector<8x128xf32>
    %c1_418 = arith.constant 1 : index
    %c0_419 = arith.constant 0 : index
    %c10_420 = arith.constant 10 : index
    %876 = vector.load %arg5[%c1_418, %c0_419, %c10_420] : memref<2x8x256xf32, #tpu.memory_space<vmem>>, vector<1x8x128xf32>
    %877 = vector.shape_cast %876 : vector<1x8x128xf32> to vector<8x128xf32>
    %cst_421 = arith.constant 1.46788414E-4 : f32
    %878 = vector.broadcast %cst_421 : f32 to vector<8x128xf32>
    %879 = arith.mulf %878, %877 : vector<8x128xf32>
    %880 = arith.addf %869, %879 : vector<8x128xf32>
    %cst_422 = arith.constant -1.11265123E-4 : f32
    %881 = vector.broadcast %cst_422 : f32 to vector<8x128xf32>
    %882 = arith.mulf %881, %877 : vector<8x128xf32>
    %883 = arith.addf %872, %882 : vector<8x128xf32>
    %cst_423 = arith.constant -3.20987965E-5 : f32
    %884 = vector.broadcast %cst_423 : f32 to vector<8x128xf32>
    %885 = arith.mulf %884, %877 : vector<8x128xf32>
    %886 = arith.addf %875, %885 : vector<8x128xf32>
    %c1_424 = arith.constant 1 : index
    %c0_425 = arith.constant 0 : index
    %c11_426 = arith.constant 11 : index
    %887 = vector.load %arg5[%c1_424, %c0_425, %c11_426] : memref<2x8x256xf32, #tpu.memory_space<vmem>>, vector<1x8x128xf32>
    %888 = vector.shape_cast %887 : vector<1x8x128xf32> to vector<8x128xf32>
    %cst_427 = arith.constant 1.74305722E-4 : f32
    %889 = vector.broadcast %cst_427 : f32 to vector<8x128xf32>
    %890 = arith.mulf %889, %888 : vector<8x128xf32>
    %891 = arith.addf %880, %890 : vector<8x128xf32>
    %cst_428 = arith.constant -2.017890e-04 : f32
    %892 = vector.broadcast %cst_428 : f32 to vector<8x128xf32>
    %893 = arith.mulf %892, %888 : vector<8x128xf32>
    %894 = arith.addf %883, %893 : vector<8x128xf32>
    %cst_429 = arith.constant 9.89126874E-6 : f32
    %895 = vector.broadcast %cst_429 : f32 to vector<8x128xf32>
    %896 = arith.mulf %895, %888 : vector<8x128xf32>
    %897 = arith.addf %886, %896 : vector<8x128xf32>
    %c1_430 = arith.constant 1 : index
    %c0_431 = arith.constant 0 : index
    %c12_432 = arith.constant 12 : index
    %898 = vector.load %arg5[%c1_430, %c0_431, %c12_432] : memref<2x8x256xf32, #tpu.memory_space<vmem>>, vector<1x8x128xf32>
    %899 = vector.shape_cast %898 : vector<1x8x128xf32> to vector<8x128xf32>
    %cst_433 = arith.constant 1.63354212E-4 : f32
    %900 = vector.broadcast %cst_433 : f32 to vector<8x128xf32>
    %901 = arith.mulf %900, %899 : vector<8x128xf32>
    %902 = arith.addf %891, %901 : vector<8x128xf32>
    %cst_434 = arith.constant -3.17583384E-4 : f32
    %903 = vector.broadcast %cst_434 : f32 to vector<8x128xf32>
    %904 = arith.mulf %903, %899 : vector<8x128xf32>
    %905 = arith.addf %894, %904 : vector<8x128xf32>
    %cst_435 = arith.constant 1.00472957E-4 : f32
    %906 = vector.broadcast %cst_435 : f32 to vector<8x128xf32>
    %907 = arith.mulf %906, %899 : vector<8x128xf32>
    %908 = arith.addf %897, %907 : vector<8x128xf32>
    %c1_436 = arith.constant 1 : index
    %c0_437 = arith.constant 0 : index
    %c13_438 = arith.constant 13 : index
    %909 = vector.load %arg5[%c1_436, %c0_437, %c13_438] : memref<2x8x256xf32, #tpu.memory_space<vmem>>, vector<1x8x128xf32>
    %910 = vector.shape_cast %909 : vector<1x8x128xf32> to vector<8x128xf32>
    %cst_439 = arith.constant 8.03591901E-5 : f32
    %911 = vector.broadcast %cst_439 : f32 to vector<8x128xf32>
    %912 = arith.mulf %911, %910 : vector<8x128xf32>
    %913 = arith.addf %902, %912 : vector<8x128xf32>
    %cst_440 = arith.constant -4.41691052E-4 : f32
    %914 = vector.broadcast %cst_440 : f32 to vector<8x128xf32>
    %915 = arith.mulf %914, %910 : vector<8x128xf32>
    %916 = arith.addf %905, %915 : vector<8x128xf32>
    %cst_441 = arith.constant 2.5557194E-4 : f32
    %917 = vector.broadcast %cst_441 : f32 to vector<8x128xf32>
    %918 = arith.mulf %917, %910 : vector<8x128xf32>
    %919 = arith.addf %908, %918 : vector<8x128xf32>
    %c1_442 = arith.constant 1 : index
    %c0_443 = arith.constant 0 : index
    %c14_444 = arith.constant 14 : index
    %920 = vector.load %arg5[%c1_442, %c0_443, %c14_444] : memref<2x8x256xf32, #tpu.memory_space<vmem>>, vector<1x8x128xf32>
    %921 = vector.shape_cast %920 : vector<1x8x128xf32> to vector<8x128xf32>
    %cst_445 = arith.constant -1.12458722E-4 : f32
    %922 = vector.broadcast %cst_445 : f32 to vector<8x128xf32>
    %923 = arith.mulf %922, %921 : vector<8x128xf32>
    %924 = arith.addf %913, %923 : vector<8x128xf32>
    %cst_446 = arith.constant -5.40138572E-4 : f32
    %925 = vector.broadcast %cst_446 : f32 to vector<8x128xf32>
    %926 = arith.mulf %925, %921 : vector<8x128xf32>
    %927 = arith.addf %916, %926 : vector<8x128xf32>
    %cst_447 = arith.constant 4.82913834E-4 : f32
    %928 = vector.broadcast %cst_447 : f32 to vector<8x128xf32>
    %929 = arith.mulf %928, %921 : vector<8x128xf32>
    %930 = arith.addf %919, %929 : vector<8x128xf32>
    %c1_448 = arith.constant 1 : index
    %c0_449 = arith.constant 0 : index
    %c15_450 = arith.constant 15 : index
    %931 = vector.load %arg5[%c1_448, %c0_449, %c15_450] : memref<2x8x256xf32, #tpu.memory_space<vmem>>, vector<1x8x128xf32>
    %932 = vector.shape_cast %931 : vector<1x8x128xf32> to vector<8x128xf32>
    %cst_451 = arith.constant -4.48513136E-4 : f32
    %933 = vector.broadcast %cst_451 : f32 to vector<8x128xf32>
    %934 = arith.mulf %933, %932 : vector<8x128xf32>
    %935 = arith.addf %924, %934 : vector<8x128xf32>
    %cst_452 = arith.constant -5.60277665E-4 : f32
    %936 = vector.broadcast %cst_452 : f32 to vector<8x128xf32>
    %937 = arith.mulf %936, %932 : vector<8x128xf32>
    %938 = arith.addf %927, %937 : vector<8x128xf32>
    %cst_453 = arith.constant 7.73493957E-4 : f32
    %939 = vector.broadcast %cst_453 : f32 to vector<8x128xf32>
    %940 = arith.mulf %939, %932 : vector<8x128xf32>
    %941 = arith.addf %930, %940 : vector<8x128xf32>
    %c1_454 = arith.constant 1 : index
    %c0_455 = arith.constant 0 : index
    %c16_456 = arith.constant 16 : index
    %942 = vector.load %arg5[%c1_454, %c0_455, %c16_456] : memref<2x8x256xf32, #tpu.memory_space<vmem>>, vector<1x8x128xf32>
    %943 = vector.shape_cast %942 : vector<1x8x128xf32> to vector<8x128xf32>
    %cst_457 = arith.constant -9.44412139E-4 : f32
    %944 = vector.broadcast %cst_457 : f32 to vector<8x128xf32>
    %945 = arith.mulf %944, %943 : vector<8x128xf32>
    %946 = arith.addf %935, %945 : vector<8x128xf32>
    %cst_458 = arith.constant -4.33607522E-4 : f32
    %947 = vector.broadcast %cst_458 : f32 to vector<8x128xf32>
    %948 = arith.mulf %947, %943 : vector<8x128xf32>
    %949 = arith.addf %938, %948 : vector<8x128xf32>
    %cst_459 = arith.constant 0.00109280297 : f32
    %950 = vector.broadcast %cst_459 : f32 to vector<8x128xf32>
    %951 = arith.mulf %950, %943 : vector<8x128xf32>
    %952 = arith.addf %941, %951 : vector<8x128xf32>
    %c1_460 = arith.constant 1 : index
    %c0_461 = arith.constant 0 : index
    %c17_462 = arith.constant 17 : index
    %953 = vector.load %arg5[%c1_460, %c0_461, %c17_462] : memref<2x8x256xf32, #tpu.memory_space<vmem>>, vector<1x8x128xf32>
    %954 = vector.shape_cast %953 : vector<1x8x128xf32> to vector<8x128xf32>
    %cst_463 = arith.constant -0.00158496713 : f32
    %955 = vector.broadcast %cst_463 : f32 to vector<8x128xf32>
    %956 = arith.mulf %955, %954 : vector<8x128xf32>
    %957 = arith.addf %946, %956 : vector<8x128xf32>
    %cst_464 = arith.constant -8.47448682E-5 : f32
    %958 = vector.broadcast %cst_464 : f32 to vector<8x128xf32>
    %959 = arith.mulf %958, %954 : vector<8x128xf32>
    %960 = arith.addf %949, %959 : vector<8x128xf32>
    %cst_465 = arith.constant 0.00137405121 : f32
    %961 = vector.broadcast %cst_465 : f32 to vector<8x128xf32>
    %962 = arith.mulf %961, %954 : vector<8x128xf32>
    %963 = arith.addf %952, %962 : vector<8x128xf32>
    %c1_466 = arith.constant 1 : index
    %c0_467 = arith.constant 0 : index
    %c18_468 = arith.constant 18 : index
    %964 = vector.load %arg5[%c1_466, %c0_467, %c18_468] : memref<2x8x256xf32, #tpu.memory_space<vmem>>, vector<1x8x128xf32>
    %965 = vector.shape_cast %964 : vector<1x8x128xf32> to vector<8x128xf32>
    %cst_469 = arith.constant -0.00230862945 : f32
    %966 = vector.broadcast %cst_469 : f32 to vector<8x128xf32>
    %967 = arith.mulf %966, %965 : vector<8x128xf32>
    %968 = arith.addf %957, %967 : vector<8x128xf32>
    %cst_470 = arith.constant 5.53104444E-4 : f32
    %969 = vector.broadcast %cst_470 : f32 to vector<8x128xf32>
    %970 = arith.mulf %969, %965 : vector<8x128xf32>
    %971 = arith.addf %960, %970 : vector<8x128xf32>
    %cst_471 = arith.constant 0.00151633774 : f32
    %972 = vector.broadcast %cst_471 : f32 to vector<8x128xf32>
    %973 = arith.mulf %972, %965 : vector<8x128xf32>
    %974 = arith.addf %963, %973 : vector<8x128xf32>
    %c1_472 = arith.constant 1 : index
    %c0_473 = arith.constant 0 : index
    %c19_474 = arith.constant 19 : index
    %975 = vector.load %arg5[%c1_472, %c0_473, %c19_474] : memref<2x8x256xf32, #tpu.memory_space<vmem>>, vector<1x8x128xf32>
    %976 = vector.shape_cast %975 : vector<1x8x128xf32> to vector<8x128xf32>
    %cst_475 = arith.constant -0.00299687544 : f32
    %977 = vector.broadcast %cst_475 : f32 to vector<8x128xf32>
    %978 = arith.mulf %977, %976 : vector<8x128xf32>
    %979 = arith.addf %968, %978 : vector<8x128xf32>
    %cst_476 = arith.constant 0.00151682412 : f32
    %980 = vector.broadcast %cst_476 : f32 to vector<8x128xf32>
    %981 = arith.mulf %980, %976 : vector<8x128xf32>
    %982 = arith.addf %971, %981 : vector<8x128xf32>
    %cst_477 = arith.constant 0.00139049022 : f32
    %983 = vector.broadcast %cst_477 : f32 to vector<8x128xf32>
    %984 = arith.mulf %983, %976 : vector<8x128xf32>
    %985 = arith.addf %974, %984 : vector<8x128xf32>
    %c1_478 = arith.constant 1 : index
    %c0_479 = arith.constant 0 : index
    %c20_480 = arith.constant 20 : index
    %986 = vector.load %arg5[%c1_478, %c0_479, %c20_480] : memref<2x8x256xf32, #tpu.memory_space<vmem>>, vector<1x8x128xf32>
    %987 = vector.shape_cast %986 : vector<1x8x128xf32> to vector<8x128xf32>
    %cst_481 = arith.constant -0.00347170583 : f32
    %988 = vector.broadcast %cst_481 : f32 to vector<8x128xf32>
    %989 = arith.mulf %988, %987 : vector<8x128xf32>
    %990 = arith.addf %979, %989 : vector<8x128xf32>
    %cst_482 = arith.constant 0.00278898631 : f32
    %991 = vector.broadcast %cst_482 : f32 to vector<8x128xf32>
    %992 = arith.mulf %991, %987 : vector<8x128xf32>
    %993 = arith.addf %982, %992 : vector<8x128xf32>
    %cst_483 = arith.constant 8.54558137E-4 : f32
    %994 = vector.broadcast %cst_483 : f32 to vector<8x128xf32>
    %995 = arith.mulf %994, %987 : vector<8x128xf32>
    %996 = arith.addf %985, %995 : vector<8x128xf32>
    %c1_484 = arith.constant 1 : index
    %c0_485 = arith.constant 0 : index
    %c21_486 = arith.constant 21 : index
    %997 = vector.load %arg5[%c1_484, %c0_485, %c21_486] : memref<2x8x256xf32, #tpu.memory_space<vmem>>, vector<1x8x128xf32>
    %998 = vector.shape_cast %997 : vector<1x8x128xf32> to vector<8x128xf32>
    %cst_487 = arith.constant -0.00350474752 : f32
    %999 = vector.broadcast %cst_487 : f32 to vector<8x128xf32>
    %1000 = arith.mulf %999, %998 : vector<8x128xf32>
    %1001 = arith.addf %990, %1000 : vector<8x128xf32>
    %cst_488 = arith.constant 0.00427470822 : f32
    %1002 = vector.broadcast %cst_488 : f32 to vector<8x128xf32>
    %1003 = arith.mulf %1002, %998 : vector<8x128xf32>
    %1004 = arith.addf %993, %1003 : vector<8x128xf32>
    %cst_489 = arith.constant -2.21178721E-4 : f32
    %1005 = vector.broadcast %cst_489 : f32 to vector<8x128xf32>
    %1006 = arith.mulf %1005, %998 : vector<8x128xf32>
    %1007 = arith.addf %996, %1006 : vector<8x128xf32>
    %c1_490 = arith.constant 1 : index
    %c0_491 = arith.constant 0 : index
    %c22_492 = arith.constant 22 : index
    %1008 = vector.load %arg5[%c1_490, %c0_491, %c22_492] : memref<2x8x256xf32, #tpu.memory_space<vmem>>, vector<1x8x128xf32>
    %1009 = vector.shape_cast %1008 : vector<1x8x128xf32> to vector<8x128xf32>
    %cst_493 = arith.constant -0.00283968938 : f32
    %1010 = vector.broadcast %cst_493 : f32 to vector<8x128xf32>
    %1011 = arith.mulf %1010, %1009 : vector<8x128xf32>
    %1012 = arith.addf %1001, %1011 : vector<8x128xf32>
    %cst_494 = arith.constant 0.00578478537 : f32
    %1013 = vector.broadcast %cst_494 : f32 to vector<8x128xf32>
    %1014 = arith.mulf %1013, %1009 : vector<8x128xf32>
    %1015 = arith.addf %1004, %1014 : vector<8x128xf32>
    %cst_495 = arith.constant -0.00192106306 : f32
    %1016 = vector.broadcast %cst_495 : f32 to vector<8x128xf32>
    %1017 = arith.mulf %1016, %1009 : vector<8x128xf32>
    %1018 = arith.addf %1007, %1017 : vector<8x128xf32>
    %c1_496 = arith.constant 1 : index
    %c0_497 = arith.constant 0 : index
    %c23_498 = arith.constant 23 : index
    %1019 = vector.load %arg5[%c1_496, %c0_497, %c23_498] : memref<2x8x256xf32, #tpu.memory_space<vmem>>, vector<1x8x128xf32>
    %1020 = vector.shape_cast %1019 : vector<1x8x128xf32> to vector<8x128xf32>
    %cst_499 = arith.constant -0.00122707139 : f32
    %1021 = vector.broadcast %cst_499 : f32 to vector<8x128xf32>
    %1022 = arith.mulf %1021, %1020 : vector<8x128xf32>
    %1023 = arith.addf %1012, %1022 : vector<8x128xf32>
    %cst_500 = arith.constant 0.00703009265 : f32
    %1024 = vector.broadcast %cst_500 : f32 to vector<8x128xf32>
    %1025 = arith.mulf %1024, %1020 : vector<8x128xf32>
    %1026 = arith.addf %1015, %1025 : vector<8x128xf32>
    %cst_501 = arith.constant -0.00424749404 : f32
    %1027 = vector.broadcast %cst_501 : f32 to vector<8x128xf32>
    %1028 = arith.mulf %1027, %1020 : vector<8x128xf32>
    %1029 = arith.addf %1018, %1028 : vector<8x128xf32>
    %c1_502 = arith.constant 1 : index
    %c0_503 = arith.constant 0 : index
    %c24_504 = arith.constant 24 : index
    %1030 = vector.load %arg5[%c1_502, %c0_503, %c24_504] : memref<2x8x256xf32, #tpu.memory_space<vmem>>, vector<1x8x128xf32>
    %1031 = vector.shape_cast %1030 : vector<1x8x128xf32> to vector<8x128xf32>
    %cst_505 = arith.constant 0.00153200817 : f32
    %1032 = vector.broadcast %cst_505 : f32 to vector<8x128xf32>
    %1033 = arith.mulf %1032, %1031 : vector<8x128xf32>
    %1034 = arith.addf %1023, %1033 : vector<8x128xf32>
    %cst_506 = arith.constant 0.0076303035 : f32
    %1035 = vector.broadcast %cst_506 : f32 to vector<8x128xf32>
    %1036 = arith.mulf %1035, %1031 : vector<8x128xf32>
    %1037 = arith.addf %1026, %1036 : vector<8x128xf32>
    %cst_507 = arith.constant -0.00708632963 : f32
    %1038 = vector.broadcast %cst_507 : f32 to vector<8x128xf32>
    %1039 = arith.mulf %1038, %1031 : vector<8x128xf32>
    %1040 = arith.addf %1029, %1039 : vector<8x128xf32>
    %c1_508 = arith.constant 1 : index
    %c0_509 = arith.constant 0 : index
    %c25_510 = arith.constant 25 : index
    %1041 = vector.load %arg5[%c1_508, %c0_509, %c25_510] : memref<2x8x256xf32, #tpu.memory_space<vmem>>, vector<1x8x128xf32>
    %1042 = vector.shape_cast %1041 : vector<1x8x128xf32> to vector<8x128xf32>
    %cst_511 = arith.constant 0.0055401735 : f32
    %1043 = vector.broadcast %cst_511 : f32 to vector<8x128xf32>
    %1044 = arith.mulf %1043, %1042 : vector<8x128xf32>
    %1045 = arith.addf %1034, %1044 : vector<8x128xf32>
    %cst_512 = arith.constant 0.00713707274 : f32
    %1046 = vector.broadcast %cst_512 : f32 to vector<8x128xf32>
    %1047 = arith.mulf %1046, %1042 : vector<8x128xf32>
    %1048 = arith.addf %1037, %1047 : vector<8x128xf32>
    %cst_513 = arith.constant -0.0101803346 : f32
    %1049 = vector.broadcast %cst_513 : f32 to vector<8x128xf32>
    %1050 = arith.mulf %1049, %1042 : vector<8x128xf32>
    %1051 = arith.addf %1040, %1050 : vector<8x128xf32>
    %c1_514 = arith.constant 1 : index
    %c0_515 = arith.constant 0 : index
    %c26_516 = arith.constant 26 : index
    %1052 = vector.load %arg5[%c1_514, %c0_515, %c26_516] : memref<2x8x256xf32, #tpu.memory_space<vmem>>, vector<1x8x128xf32>
    %1053 = vector.shape_cast %1052 : vector<1x8x128xf32> to vector<8x128xf32>
    %cst_517 = arith.constant 0.0107645169 : f32
    %1054 = vector.broadcast %cst_517 : f32 to vector<8x128xf32>
    %1055 = arith.mulf %1054, %1053 : vector<8x128xf32>
    %1056 = arith.addf %1045, %1055 : vector<8x128xf32>
    %cst_518 = arith.constant 5.066090e-03 : f32
    %1057 = vector.broadcast %cst_518 : f32 to vector<8x128xf32>
    %1058 = arith.mulf %1057, %1053 : vector<8x128xf32>
    %1059 = arith.addf %1048, %1058 : vector<8x128xf32>
    %cst_519 = arith.constant -0.0131147113 : f32
    %1060 = vector.broadcast %cst_519 : f32 to vector<8x128xf32>
    %1061 = arith.mulf %1060, %1053 : vector<8x128xf32>
    %1062 = arith.addf %1051, %1061 : vector<8x128xf32>
    %c1_520 = arith.constant 1 : index
    %c0_521 = arith.constant 0 : index
    %c27_522 = arith.constant 27 : index
    %1063 = vector.load %arg5[%c1_520, %c0_521, %c27_522] : memref<2x8x256xf32, #tpu.memory_space<vmem>>, vector<1x8x128xf32>
    %1064 = vector.shape_cast %1063 : vector<1x8x128xf32> to vector<8x128xf32>
    %cst_523 = arith.constant 0.0170123726 : f32
    %1065 = vector.broadcast %cst_523 : f32 to vector<8x128xf32>
    %1066 = arith.mulf %1065, %1064 : vector<8x128xf32>
    %1067 = arith.addf %1056, %1066 : vector<8x128xf32>
    %cst_524 = arith.constant 9.2572585E-4 : f32
    %1068 = vector.broadcast %cst_524 : f32 to vector<8x128xf32>
    %1069 = arith.mulf %1068, %1064 : vector<8x128xf32>
    %1070 = arith.addf %1059, %1069 : vector<8x128xf32>
    %cst_525 = arith.constant -0.0153137455 : f32
    %1071 = vector.broadcast %cst_525 : f32 to vector<8x128xf32>
    %1072 = arith.mulf %1071, %1064 : vector<8x128xf32>
    %1073 = arith.addf %1062, %1072 : vector<8x128xf32>
    %c1_526 = arith.constant 1 : index
    %c0_527 = arith.constant 0 : index
    %c28_528 = arith.constant 28 : index
    %1074 = vector.load %arg5[%c1_526, %c0_527, %c28_528] : memref<2x8x256xf32, #tpu.memory_space<vmem>>, vector<1x8x128xf32>
    %1075 = vector.shape_cast %1074 : vector<1x8x128xf32> to vector<8x128xf32>
    %cst_529 = arith.constant 0.0239294712 : f32
    %1076 = vector.broadcast %cst_529 : f32 to vector<8x128xf32>
    %1077 = arith.mulf %1076, %1075 : vector<8x128xf32>
    %1078 = arith.addf %1067, %1077 : vector<8x128xf32>
    %cst_530 = arith.constant -0.00578168966 : f32
    %1079 = vector.broadcast %cst_530 : f32 to vector<8x128xf32>
    %1080 = arith.mulf %1079, %1075 : vector<8x128xf32>
    %1081 = arith.addf %1070, %1080 : vector<8x128xf32>
    %cst_531 = arith.constant -0.0160373375 : f32
    %1082 = vector.broadcast %cst_531 : f32 to vector<8x128xf32>
    %1083 = arith.mulf %1082, %1075 : vector<8x128xf32>
    %1084 = arith.addf %1073, %1083 : vector<8x128xf32>
    %c1_532 = arith.constant 1 : index
    %c0_533 = arith.constant 0 : index
    %c29_534 = arith.constant 29 : index
    %1085 = vector.load %arg5[%c1_532, %c0_533, %c29_534] : memref<2x8x256xf32, #tpu.memory_space<vmem>>, vector<1x8x128xf32>
    %1086 = vector.shape_cast %1085 : vector<1x8x128xf32> to vector<8x128xf32>
    %cst_535 = arith.constant 0.0310237482 : f32
    %1087 = vector.broadcast %cst_535 : f32 to vector<8x128xf32>
    %1088 = arith.mulf %1087, %1086 : vector<8x128xf32>
    %1089 = arith.addf %1078, %1088 : vector<8x128xf32>
    %cst_536 = arith.constant -0.015638452 : f32
    %1090 = vector.broadcast %cst_536 : f32 to vector<8x128xf32>
    %1091 = arith.mulf %1090, %1086 : vector<8x128xf32>
    %1092 = arith.addf %1081, %1091 : vector<8x128xf32>
    %cst_537 = arith.constant -0.0143447481 : f32
    %1093 = vector.broadcast %cst_537 : f32 to vector<8x128xf32>
    %1094 = arith.mulf %1093, %1086 : vector<8x128xf32>
    %1095 = arith.addf %1084, %1094 : vector<8x128xf32>
    %c1_538 = arith.constant 1 : index
    %c0_539 = arith.constant 0 : index
    %c30_540 = arith.constant 30 : index
    %1096 = vector.load %arg5[%c1_538, %c0_539, %c30_540] : memref<2x8x256xf32, #tpu.memory_space<vmem>>, vector<1x8x128xf32>
    %1097 = vector.shape_cast %1096 : vector<1x8x128xf32> to vector<8x128xf32>
    %cst_541 = arith.constant 0.0377147086 : f32
    %1098 = vector.broadcast %cst_541 : f32 to vector<8x128xf32>
    %1099 = arith.mulf %1098, %1097 : vector<8x128xf32>
    %1100 = arith.addf %1089, %1099 : vector<8x128xf32>
    %cst_542 = arith.constant -0.0296070464 : f32
    %1101 = vector.broadcast %cst_542 : f32 to vector<8x128xf32>
    %1102 = arith.mulf %1101, %1097 : vector<8x128xf32>
    %1103 = arith.addf %1092, %1102 : vector<8x128xf32>
    %cst_543 = arith.constant -0.00893046707 : f32
    %1104 = vector.broadcast %cst_543 : f32 to vector<8x128xf32>
    %1105 = arith.mulf %1104, %1097 : vector<8x128xf32>
    %1106 = arith.addf %1095, %1105 : vector<8x128xf32>
    %c1_544 = arith.constant 1 : index
    %c0_545 = arith.constant 0 : index
    %c31_546 = arith.constant 31 : index
    %1107 = vector.load %arg5[%c1_544, %c0_545, %c31_546] : memref<2x8x256xf32, #tpu.memory_space<vmem>>, vector<1x8x128xf32>
    %1108 = vector.shape_cast %1107 : vector<1x8x128xf32> to vector<8x128xf32>
    %cst_547 = arith.constant 0.043401666 : f32
    %1109 = vector.broadcast %cst_547 : f32 to vector<8x128xf32>
    %1110 = arith.mulf %1109, %1108 : vector<8x128xf32>
    %1111 = arith.addf %1100, %1110 : vector<8x128xf32>
    %cst_548 = arith.constant -0.0500376895 : f32
    %1112 = vector.broadcast %cst_548 : f32 to vector<8x128xf32>
    %1113 = arith.mulf %1112, %1108 : vector<8x128xf32>
    %1114 = arith.addf %1103, %1113 : vector<8x128xf32>
    %cst_549 = arith.constant 0.00248061516 : f32
    %1115 = vector.broadcast %cst_549 : f32 to vector<8x128xf32>
    %1116 = arith.mulf %1115, %1108 : vector<8x128xf32>
    %1117 = arith.addf %1106, %1116 : vector<8x128xf32>
    %c1_550 = arith.constant 1 : index
    %c0_551 = arith.constant 0 : index
    %c32_552 = arith.constant 32 : index
    %1118 = vector.load %arg5[%c1_550, %c0_551, %c32_552] : memref<2x8x256xf32, #tpu.memory_space<vmem>>, vector<1x8x128xf32>
    %1119 = vector.shape_cast %1118 : vector<1x8x128xf32> to vector<8x128xf32>
    %cst_553 = arith.constant 0.0475413501 : f32
    %1120 = vector.broadcast %cst_553 : f32 to vector<8x128xf32>
    %1121 = arith.mulf %1120, %1119 : vector<8x128xf32>
    %1122 = arith.addf %1111, %1121 : vector<8x128xf32>
    %cst_554 = arith.constant -0.0850079805 : f32
    %1123 = vector.broadcast %cst_554 : f32 to vector<8x128xf32>
    %1124 = arith.mulf %1123, %1119 : vector<8x128xf32>
    %1125 = arith.addf %1114, %1124 : vector<8x128xf32>
    %cst_555 = arith.constant 0.0256124213 : f32
    %1126 = vector.broadcast %cst_555 : f32 to vector<8x128xf32>
    %1127 = arith.mulf %1126, %1119 : vector<8x128xf32>
    %1128 = arith.addf %1117, %1127 : vector<8x128xf32>
    %c1_556 = arith.constant 1 : index
    %c0_557 = arith.constant 0 : index
    %c33_558 = arith.constant 33 : index
    %1129 = vector.load %arg5[%c1_556, %c0_557, %c33_558] : memref<2x8x256xf32, #tpu.memory_space<vmem>>, vector<1x8x128xf32>
    %1130 = vector.shape_cast %1129 : vector<1x8x128xf32> to vector<8x128xf32>
    %cst_559 = arith.constant 0.0497220643 : f32
    %1131 = vector.broadcast %cst_559 : f32 to vector<8x128xf32>
    %1132 = arith.mulf %1131, %1130 : vector<8x128xf32>
    %1133 = arith.addf %1122, %1132 : vector<8x128xf32>
    %cst_560 = arith.constant -0.183732107 : f32
    %1134 = vector.broadcast %cst_560 : f32 to vector<8x128xf32>
    %1135 = arith.mulf %1134, %1130 : vector<8x128xf32>
    %1136 = arith.addf %1125, %1135 : vector<8x128xf32>
    %cst_561 = arith.constant 0.0851716399 : f32
    %1137 = vector.broadcast %cst_561 : f32 to vector<8x128xf32>
    %1138 = arith.mulf %1137, %1130 : vector<8x128xf32>
    %1139 = arith.addf %1128, %1138 : vector<8x128xf32>
    %c1_562 = arith.constant 1 : index
    %c0_563 = arith.constant 0 : index
    %c34_564 = arith.constant 34 : index
    %1140 = vector.load %arg5[%c1_562, %c0_563, %c34_564] : memref<2x8x256xf32, #tpu.memory_space<vmem>>, vector<1x8x128xf32>
    %1141 = vector.shape_cast %1140 : vector<1x8x128xf32> to vector<8x128xf32>
    %cst_565 = arith.constant 0.0497220643 : f32
    %1142 = vector.broadcast %cst_565 : f32 to vector<8x128xf32>
    %1143 = arith.mulf %1142, %1141 : vector<8x128xf32>
    %1144 = arith.addf %1133, %1143 : vector<8x128xf32>
    %cst_566 = arith.constant 0.800741255 : f32
    %1145 = vector.broadcast %cst_566 : f32 to vector<8x128xf32>
    %1146 = arith.mulf %1145, %1141 : vector<8x128xf32>
    %1147 = arith.addf %1136, %1146 : vector<8x128xf32>
    %cst_567 = arith.constant 0.800741136 : f32
    %1148 = vector.broadcast %cst_567 : f32 to vector<8x128xf32>
    %1149 = arith.mulf %1148, %1141 : vector<8x128xf32>
    %1150 = arith.addf %1139, %1149 : vector<8x128xf32>
    %c1_568 = arith.constant 1 : index
    %c0_569 = arith.constant 0 : index
    %c35_570 = arith.constant 35 : index
    %1151 = vector.load %arg5[%c1_568, %c0_569, %c35_570] : memref<2x8x256xf32, #tpu.memory_space<vmem>>, vector<1x8x128xf32>
    %1152 = vector.shape_cast %1151 : vector<1x8x128xf32> to vector<8x128xf32>
    %cst_571 = arith.constant 0.0475413501 : f32
    %1153 = vector.broadcast %cst_571 : f32 to vector<8x128xf32>
    %1154 = arith.mulf %1153, %1152 : vector<8x128xf32>
    %1155 = arith.addf %1144, %1154 : vector<8x128xf32>
    %cst_572 = arith.constant 0.0851715952 : f32
    %1156 = vector.broadcast %cst_572 : f32 to vector<8x128xf32>
    %1157 = arith.mulf %1156, %1152 : vector<8x128xf32>
    %1158 = arith.addf %1147, %1157 : vector<8x128xf32>
    %cst_573 = arith.constant -0.183732152 : f32
    %1159 = vector.broadcast %cst_573 : f32 to vector<8x128xf32>
    %1160 = arith.mulf %1159, %1152 : vector<8x128xf32>
    %1161 = arith.addf %1150, %1160 : vector<8x128xf32>
    %c1_574 = arith.constant 1 : index
    %c0_575 = arith.constant 0 : index
    %c36_576 = arith.constant 36 : index
    %1162 = vector.load %arg5[%c1_574, %c0_575, %c36_576] : memref<2x8x256xf32, #tpu.memory_space<vmem>>, vector<1x8x128xf32>
    %1163 = vector.shape_cast %1162 : vector<1x8x128xf32> to vector<8x128xf32>
    %cst_577 = arith.constant 0.043401666 : f32
    %1164 = vector.broadcast %cst_577 : f32 to vector<8x128xf32>
    %1165 = arith.mulf %1164, %1163 : vector<8x128xf32>
    %1166 = arith.addf %1155, %1165 : vector<8x128xf32>
    %cst_578 = arith.constant 0.0256124213 : f32
    %1167 = vector.broadcast %cst_578 : f32 to vector<8x128xf32>
    %1168 = arith.mulf %1167, %1163 : vector<8x128xf32>
    %1169 = arith.addf %1158, %1168 : vector<8x128xf32>
    %cst_579 = arith.constant -0.0850079805 : f32
    %1170 = vector.broadcast %cst_579 : f32 to vector<8x128xf32>
    %1171 = arith.mulf %1170, %1163 : vector<8x128xf32>
    %1172 = arith.addf %1161, %1171 : vector<8x128xf32>
    %c1_580 = arith.constant 1 : index
    %c0_581 = arith.constant 0 : index
    %c37_582 = arith.constant 37 : index
    %1173 = vector.load %arg5[%c1_580, %c0_581, %c37_582] : memref<2x8x256xf32, #tpu.memory_space<vmem>>, vector<1x8x128xf32>
    %1174 = vector.shape_cast %1173 : vector<1x8x128xf32> to vector<8x128xf32>
    %cst_583 = arith.constant 0.0377147086 : f32
    %1175 = vector.broadcast %cst_583 : f32 to vector<8x128xf32>
    %1176 = arith.mulf %1175, %1174 : vector<8x128xf32>
    %1177 = arith.addf %1166, %1176 : vector<8x128xf32>
    %cst_584 = arith.constant 0.00248061516 : f32
    %1178 = vector.broadcast %cst_584 : f32 to vector<8x128xf32>
    %1179 = arith.mulf %1178, %1174 : vector<8x128xf32>
    %1180 = arith.addf %1169, %1179 : vector<8x128xf32>
    %cst_585 = arith.constant -0.0500376895 : f32
    %1181 = vector.broadcast %cst_585 : f32 to vector<8x128xf32>
    %1182 = arith.mulf %1181, %1174 : vector<8x128xf32>
    %1183 = arith.addf %1172, %1182 : vector<8x128xf32>
    %c1_586 = arith.constant 1 : index
    %c0_587 = arith.constant 0 : index
    %c38_588 = arith.constant 38 : index
    %1184 = vector.load %arg5[%c1_586, %c0_587, %c38_588] : memref<2x8x256xf32, #tpu.memory_space<vmem>>, vector<1x8x128xf32>
    %1185 = vector.shape_cast %1184 : vector<1x8x128xf32> to vector<8x128xf32>
    %cst_589 = arith.constant 0.0310237482 : f32
    %1186 = vector.broadcast %cst_589 : f32 to vector<8x128xf32>
    %1187 = arith.mulf %1186, %1185 : vector<8x128xf32>
    %1188 = arith.addf %1177, %1187 : vector<8x128xf32>
    %cst_590 = arith.constant -0.00893046707 : f32
    %1189 = vector.broadcast %cst_590 : f32 to vector<8x128xf32>
    %1190 = arith.mulf %1189, %1185 : vector<8x128xf32>
    %1191 = arith.addf %1180, %1190 : vector<8x128xf32>
    %cst_591 = arith.constant -0.0296070464 : f32
    %1192 = vector.broadcast %cst_591 : f32 to vector<8x128xf32>
    %1193 = arith.mulf %1192, %1185 : vector<8x128xf32>
    %1194 = arith.addf %1183, %1193 : vector<8x128xf32>
    %c1_592 = arith.constant 1 : index
    %c0_593 = arith.constant 0 : index
    %c39_594 = arith.constant 39 : index
    %1195 = vector.load %arg5[%c1_592, %c0_593, %c39_594] : memref<2x8x256xf32, #tpu.memory_space<vmem>>, vector<1x8x128xf32>
    %1196 = vector.shape_cast %1195 : vector<1x8x128xf32> to vector<8x128xf32>
    %cst_595 = arith.constant 0.0239294712 : f32
    %1197 = vector.broadcast %cst_595 : f32 to vector<8x128xf32>
    %1198 = arith.mulf %1197, %1196 : vector<8x128xf32>
    %1199 = arith.addf %1188, %1198 : vector<8x128xf32>
    %cst_596 = arith.constant -0.0143447481 : f32
    %1200 = vector.broadcast %cst_596 : f32 to vector<8x128xf32>
    %1201 = arith.mulf %1200, %1196 : vector<8x128xf32>
    %1202 = arith.addf %1191, %1201 : vector<8x128xf32>
    %cst_597 = arith.constant -0.015638452 : f32
    %1203 = vector.broadcast %cst_597 : f32 to vector<8x128xf32>
    %1204 = arith.mulf %1203, %1196 : vector<8x128xf32>
    %1205 = arith.addf %1194, %1204 : vector<8x128xf32>
    %c1_598 = arith.constant 1 : index
    %c0_599 = arith.constant 0 : index
    %c40_600 = arith.constant 40 : index
    %1206 = vector.load %arg5[%c1_598, %c0_599, %c40_600] : memref<2x8x256xf32, #tpu.memory_space<vmem>>, vector<1x8x128xf32>
    %1207 = vector.shape_cast %1206 : vector<1x8x128xf32> to vector<8x128xf32>
    %cst_601 = arith.constant 0.0170123726 : f32
    %1208 = vector.broadcast %cst_601 : f32 to vector<8x128xf32>
    %1209 = arith.mulf %1208, %1207 : vector<8x128xf32>
    %1210 = arith.addf %1199, %1209 : vector<8x128xf32>
    %cst_602 = arith.constant -0.0160373375 : f32
    %1211 = vector.broadcast %cst_602 : f32 to vector<8x128xf32>
    %1212 = arith.mulf %1211, %1207 : vector<8x128xf32>
    %1213 = arith.addf %1202, %1212 : vector<8x128xf32>
    %cst_603 = arith.constant -0.00578168966 : f32
    %1214 = vector.broadcast %cst_603 : f32 to vector<8x128xf32>
    %1215 = arith.mulf %1214, %1207 : vector<8x128xf32>
    %1216 = arith.addf %1205, %1215 : vector<8x128xf32>
    %c1_604 = arith.constant 1 : index
    %c0_605 = arith.constant 0 : index
    %c41_606 = arith.constant 41 : index
    %1217 = vector.load %arg5[%c1_604, %c0_605, %c41_606] : memref<2x8x256xf32, #tpu.memory_space<vmem>>, vector<1x8x128xf32>
    %1218 = vector.shape_cast %1217 : vector<1x8x128xf32> to vector<8x128xf32>
    %cst_607 = arith.constant 0.0107645169 : f32
    %1219 = vector.broadcast %cst_607 : f32 to vector<8x128xf32>
    %1220 = arith.mulf %1219, %1218 : vector<8x128xf32>
    %1221 = arith.addf %1210, %1220 : vector<8x128xf32>
    %cst_608 = arith.constant -0.0153137455 : f32
    %1222 = vector.broadcast %cst_608 : f32 to vector<8x128xf32>
    %1223 = arith.mulf %1222, %1218 : vector<8x128xf32>
    %1224 = arith.addf %1213, %1223 : vector<8x128xf32>
    %cst_609 = arith.constant 9.2572585E-4 : f32
    %1225 = vector.broadcast %cst_609 : f32 to vector<8x128xf32>
    %1226 = arith.mulf %1225, %1218 : vector<8x128xf32>
    %1227 = arith.addf %1216, %1226 : vector<8x128xf32>
    %c1_610 = arith.constant 1 : index
    %c0_611 = arith.constant 0 : index
    %c42_612 = arith.constant 42 : index
    %1228 = vector.load %arg5[%c1_610, %c0_611, %c42_612] : memref<2x8x256xf32, #tpu.memory_space<vmem>>, vector<1x8x128xf32>
    %1229 = vector.shape_cast %1228 : vector<1x8x128xf32> to vector<8x128xf32>
    %cst_613 = arith.constant 0.0055401735 : f32
    %1230 = vector.broadcast %cst_613 : f32 to vector<8x128xf32>
    %1231 = arith.mulf %1230, %1229 : vector<8x128xf32>
    %1232 = arith.addf %1221, %1231 : vector<8x128xf32>
    %cst_614 = arith.constant -0.0131147113 : f32
    %1233 = vector.broadcast %cst_614 : f32 to vector<8x128xf32>
    %1234 = arith.mulf %1233, %1229 : vector<8x128xf32>
    %1235 = arith.addf %1224, %1234 : vector<8x128xf32>
    %cst_615 = arith.constant 5.066090e-03 : f32
    %1236 = vector.broadcast %cst_615 : f32 to vector<8x128xf32>
    %1237 = arith.mulf %1236, %1229 : vector<8x128xf32>
    %1238 = arith.addf %1227, %1237 : vector<8x128xf32>
    %c1_616 = arith.constant 1 : index
    %c0_617 = arith.constant 0 : index
    %c43_618 = arith.constant 43 : index
    %1239 = vector.load %arg5[%c1_616, %c0_617, %c43_618] : memref<2x8x256xf32, #tpu.memory_space<vmem>>, vector<1x8x128xf32>
    %1240 = vector.shape_cast %1239 : vector<1x8x128xf32> to vector<8x128xf32>
    %cst_619 = arith.constant 0.00153200817 : f32
    %1241 = vector.broadcast %cst_619 : f32 to vector<8x128xf32>
    %1242 = arith.mulf %1241, %1240 : vector<8x128xf32>
    %1243 = arith.addf %1232, %1242 : vector<8x128xf32>
    %cst_620 = arith.constant -0.0101803346 : f32
    %1244 = vector.broadcast %cst_620 : f32 to vector<8x128xf32>
    %1245 = arith.mulf %1244, %1240 : vector<8x128xf32>
    %1246 = arith.addf %1235, %1245 : vector<8x128xf32>
    %cst_621 = arith.constant 0.00713707274 : f32
    %1247 = vector.broadcast %cst_621 : f32 to vector<8x128xf32>
    %1248 = arith.mulf %1247, %1240 : vector<8x128xf32>
    %1249 = arith.addf %1238, %1248 : vector<8x128xf32>
    %c1_622 = arith.constant 1 : index
    %c0_623 = arith.constant 0 : index
    %c44_624 = arith.constant 44 : index
    %1250 = vector.load %arg5[%c1_622, %c0_623, %c44_624] : memref<2x8x256xf32, #tpu.memory_space<vmem>>, vector<1x8x128xf32>
    %1251 = vector.shape_cast %1250 : vector<1x8x128xf32> to vector<8x128xf32>
    %cst_625 = arith.constant -0.00122707139 : f32
    %1252 = vector.broadcast %cst_625 : f32 to vector<8x128xf32>
    %1253 = arith.mulf %1252, %1251 : vector<8x128xf32>
    %1254 = arith.addf %1243, %1253 : vector<8x128xf32>
    %cst_626 = arith.constant -0.00708632963 : f32
    %1255 = vector.broadcast %cst_626 : f32 to vector<8x128xf32>
    %1256 = arith.mulf %1255, %1251 : vector<8x128xf32>
    %1257 = arith.addf %1246, %1256 : vector<8x128xf32>
    %cst_627 = arith.constant 0.0076303035 : f32
    %1258 = vector.broadcast %cst_627 : f32 to vector<8x128xf32>
    %1259 = arith.mulf %1258, %1251 : vector<8x128xf32>
    %1260 = arith.addf %1249, %1259 : vector<8x128xf32>
    %c1_628 = arith.constant 1 : index
    %c0_629 = arith.constant 0 : index
    %c45_630 = arith.constant 45 : index
    %1261 = vector.load %arg5[%c1_628, %c0_629, %c45_630] : memref<2x8x256xf32, #tpu.memory_space<vmem>>, vector<1x8x128xf32>
    %1262 = vector.shape_cast %1261 : vector<1x8x128xf32> to vector<8x128xf32>
    %cst_631 = arith.constant -0.00283968938 : f32
    %1263 = vector.broadcast %cst_631 : f32 to vector<8x128xf32>
    %1264 = arith.mulf %1263, %1262 : vector<8x128xf32>
    %1265 = arith.addf %1254, %1264 : vector<8x128xf32>
    %cst_632 = arith.constant -0.00424749404 : f32
    %1266 = vector.broadcast %cst_632 : f32 to vector<8x128xf32>
    %1267 = arith.mulf %1266, %1262 : vector<8x128xf32>
    %1268 = arith.addf %1257, %1267 : vector<8x128xf32>
    %cst_633 = arith.constant 0.00703009265 : f32
    %1269 = vector.broadcast %cst_633 : f32 to vector<8x128xf32>
    %1270 = arith.mulf %1269, %1262 : vector<8x128xf32>
    %1271 = arith.addf %1260, %1270 : vector<8x128xf32>
    %c1_634 = arith.constant 1 : index
    %c0_635 = arith.constant 0 : index
    %c46_636 = arith.constant 46 : index
    %1272 = vector.load %arg5[%c1_634, %c0_635, %c46_636] : memref<2x8x256xf32, #tpu.memory_space<vmem>>, vector<1x8x128xf32>
    %1273 = vector.shape_cast %1272 : vector<1x8x128xf32> to vector<8x128xf32>
    %cst_637 = arith.constant -0.00350474752 : f32
    %1274 = vector.broadcast %cst_637 : f32 to vector<8x128xf32>
    %1275 = arith.mulf %1274, %1273 : vector<8x128xf32>
    %1276 = arith.addf %1265, %1275 : vector<8x128xf32>
    %cst_638 = arith.constant -0.00192106306 : f32
    %1277 = vector.broadcast %cst_638 : f32 to vector<8x128xf32>
    %1278 = arith.mulf %1277, %1273 : vector<8x128xf32>
    %1279 = arith.addf %1268, %1278 : vector<8x128xf32>
    %cst_639 = arith.constant 0.00578478537 : f32
    %1280 = vector.broadcast %cst_639 : f32 to vector<8x128xf32>
    %1281 = arith.mulf %1280, %1273 : vector<8x128xf32>
    %1282 = arith.addf %1271, %1281 : vector<8x128xf32>
    %c1_640 = arith.constant 1 : index
    %c0_641 = arith.constant 0 : index
    %c47_642 = arith.constant 47 : index
    %1283 = vector.load %arg5[%c1_640, %c0_641, %c47_642] : memref<2x8x256xf32, #tpu.memory_space<vmem>>, vector<1x8x128xf32>
    %1284 = vector.shape_cast %1283 : vector<1x8x128xf32> to vector<8x128xf32>
    %cst_643 = arith.constant -0.00347170583 : f32
    %1285 = vector.broadcast %cst_643 : f32 to vector<8x128xf32>
    %1286 = arith.mulf %1285, %1284 : vector<8x128xf32>
    %1287 = arith.addf %1276, %1286 : vector<8x128xf32>
    %cst_644 = arith.constant -2.21178721E-4 : f32
    %1288 = vector.broadcast %cst_644 : f32 to vector<8x128xf32>
    %1289 = arith.mulf %1288, %1284 : vector<8x128xf32>
    %1290 = arith.addf %1279, %1289 : vector<8x128xf32>
    %cst_645 = arith.constant 0.00427470822 : f32
    %1291 = vector.broadcast %cst_645 : f32 to vector<8x128xf32>
    %1292 = arith.mulf %1291, %1284 : vector<8x128xf32>
    %1293 = arith.addf %1282, %1292 : vector<8x128xf32>
    %c1_646 = arith.constant 1 : index
    %c0_647 = arith.constant 0 : index
    %c48_648 = arith.constant 48 : index
    %1294 = vector.load %arg5[%c1_646, %c0_647, %c48_648] : memref<2x8x256xf32, #tpu.memory_space<vmem>>, vector<1x8x128xf32>
    %1295 = vector.shape_cast %1294 : vector<1x8x128xf32> to vector<8x128xf32>
    %cst_649 = arith.constant -0.00299687544 : f32
    %1296 = vector.broadcast %cst_649 : f32 to vector<8x128xf32>
    %1297 = arith.mulf %1296, %1295 : vector<8x128xf32>
    %1298 = arith.addf %1287, %1297 : vector<8x128xf32>
    %cst_650 = arith.constant 8.54558137E-4 : f32
    %1299 = vector.broadcast %cst_650 : f32 to vector<8x128xf32>
    %1300 = arith.mulf %1299, %1295 : vector<8x128xf32>
    %1301 = arith.addf %1290, %1300 : vector<8x128xf32>
    %cst_651 = arith.constant 0.00278898631 : f32
    %1302 = vector.broadcast %cst_651 : f32 to vector<8x128xf32>
    %1303 = arith.mulf %1302, %1295 : vector<8x128xf32>
    %1304 = arith.addf %1293, %1303 : vector<8x128xf32>
    %c1_652 = arith.constant 1 : index
    %c0_653 = arith.constant 0 : index
    %c49_654 = arith.constant 49 : index
    %1305 = vector.load %arg5[%c1_652, %c0_653, %c49_654] : memref<2x8x256xf32, #tpu.memory_space<vmem>>, vector<1x8x128xf32>
    %1306 = vector.shape_cast %1305 : vector<1x8x128xf32> to vector<8x128xf32>
    %cst_655 = arith.constant -0.00230862945 : f32
    %1307 = vector.broadcast %cst_655 : f32 to vector<8x128xf32>
    %1308 = arith.mulf %1307, %1306 : vector<8x128xf32>
    %1309 = arith.addf %1298, %1308 : vector<8x128xf32>
    %cst_656 = arith.constant 0.00139049022 : f32
    %1310 = vector.broadcast %cst_656 : f32 to vector<8x128xf32>
    %1311 = arith.mulf %1310, %1306 : vector<8x128xf32>
    %1312 = arith.addf %1301, %1311 : vector<8x128xf32>
    %cst_657 = arith.constant 0.00151682412 : f32
    %1313 = vector.broadcast %cst_657 : f32 to vector<8x128xf32>
    %1314 = arith.mulf %1313, %1306 : vector<8x128xf32>
    %1315 = arith.addf %1304, %1314 : vector<8x128xf32>
    %c1_658 = arith.constant 1 : index
    %c0_659 = arith.constant 0 : index
    %c50_660 = arith.constant 50 : index
    %1316 = vector.load %arg5[%c1_658, %c0_659, %c50_660] : memref<2x8x256xf32, #tpu.memory_space<vmem>>, vector<1x8x128xf32>
    %1317 = vector.shape_cast %1316 : vector<1x8x128xf32> to vector<8x128xf32>
    %cst_661 = arith.constant -0.00158496713 : f32
    %1318 = vector.broadcast %cst_661 : f32 to vector<8x128xf32>
    %1319 = arith.mulf %1318, %1317 : vector<8x128xf32>
    %1320 = arith.addf %1309, %1319 : vector<8x128xf32>
    %cst_662 = arith.constant 0.00151633774 : f32
    %1321 = vector.broadcast %cst_662 : f32 to vector<8x128xf32>
    %1322 = arith.mulf %1321, %1317 : vector<8x128xf32>
    %1323 = arith.addf %1312, %1322 : vector<8x128xf32>
    %cst_663 = arith.constant 5.53104444E-4 : f32
    %1324 = vector.broadcast %cst_663 : f32 to vector<8x128xf32>
    %1325 = arith.mulf %1324, %1317 : vector<8x128xf32>
    %1326 = arith.addf %1315, %1325 : vector<8x128xf32>
    %c1_664 = arith.constant 1 : index
    %c0_665 = arith.constant 0 : index
    %c51_666 = arith.constant 51 : index
    %1327 = vector.load %arg5[%c1_664, %c0_665, %c51_666] : memref<2x8x256xf32, #tpu.memory_space<vmem>>, vector<1x8x128xf32>
    %1328 = vector.shape_cast %1327 : vector<1x8x128xf32> to vector<8x128xf32>
    %cst_667 = arith.constant -9.44412139E-4 : f32
    %1329 = vector.broadcast %cst_667 : f32 to vector<8x128xf32>
    %1330 = arith.mulf %1329, %1328 : vector<8x128xf32>
    %1331 = arith.addf %1320, %1330 : vector<8x128xf32>
    %cst_668 = arith.constant 0.00137405121 : f32
    %1332 = vector.broadcast %cst_668 : f32 to vector<8x128xf32>
    %1333 = arith.mulf %1332, %1328 : vector<8x128xf32>
    %1334 = arith.addf %1323, %1333 : vector<8x128xf32>
    %cst_669 = arith.constant -8.47448682E-5 : f32
    %1335 = vector.broadcast %cst_669 : f32 to vector<8x128xf32>
    %1336 = arith.mulf %1335, %1328 : vector<8x128xf32>
    %1337 = arith.addf %1326, %1336 : vector<8x128xf32>
    %c1_670 = arith.constant 1 : index
    %c0_671 = arith.constant 0 : index
    %c52_672 = arith.constant 52 : index
    %1338 = vector.load %arg5[%c1_670, %c0_671, %c52_672] : memref<2x8x256xf32, #tpu.memory_space<vmem>>, vector<1x8x128xf32>
    %1339 = vector.shape_cast %1338 : vector<1x8x128xf32> to vector<8x128xf32>
    %cst_673 = arith.constant -4.48513136E-4 : f32
    %1340 = vector.broadcast %cst_673 : f32 to vector<8x128xf32>
    %1341 = arith.mulf %1340, %1339 : vector<8x128xf32>
    %1342 = arith.addf %1331, %1341 : vector<8x128xf32>
    %cst_674 = arith.constant 0.00109280297 : f32
    %1343 = vector.broadcast %cst_674 : f32 to vector<8x128xf32>
    %1344 = arith.mulf %1343, %1339 : vector<8x128xf32>
    %1345 = arith.addf %1334, %1344 : vector<8x128xf32>
    %cst_675 = arith.constant -4.33607522E-4 : f32
    %1346 = vector.broadcast %cst_675 : f32 to vector<8x128xf32>
    %1347 = arith.mulf %1346, %1339 : vector<8x128xf32>
    %1348 = arith.addf %1337, %1347 : vector<8x128xf32>
    %c1_676 = arith.constant 1 : index
    %c0_677 = arith.constant 0 : index
    %c53_678 = arith.constant 53 : index
    %1349 = vector.load %arg5[%c1_676, %c0_677, %c53_678] : memref<2x8x256xf32, #tpu.memory_space<vmem>>, vector<1x8x128xf32>
    %1350 = vector.shape_cast %1349 : vector<1x8x128xf32> to vector<8x128xf32>
    %cst_679 = arith.constant -1.12458722E-4 : f32
    %1351 = vector.broadcast %cst_679 : f32 to vector<8x128xf32>
    %1352 = arith.mulf %1351, %1350 : vector<8x128xf32>
    %1353 = arith.addf %1342, %1352 : vector<8x128xf32>
    %cst_680 = arith.constant 7.73493957E-4 : f32
    %1354 = vector.broadcast %cst_680 : f32 to vector<8x128xf32>
    %1355 = arith.mulf %1354, %1350 : vector<8x128xf32>
    %1356 = arith.addf %1345, %1355 : vector<8x128xf32>
    %cst_681 = arith.constant -5.60277665E-4 : f32
    %1357 = vector.broadcast %cst_681 : f32 to vector<8x128xf32>
    %1358 = arith.mulf %1357, %1350 : vector<8x128xf32>
    %1359 = arith.addf %1348, %1358 : vector<8x128xf32>
    %c1_682 = arith.constant 1 : index
    %c0_683 = arith.constant 0 : index
    %c54_684 = arith.constant 54 : index
    %1360 = vector.load %arg5[%c1_682, %c0_683, %c54_684] : memref<2x8x256xf32, #tpu.memory_space<vmem>>, vector<1x8x128xf32>
    %1361 = vector.shape_cast %1360 : vector<1x8x128xf32> to vector<8x128xf32>
    %cst_685 = arith.constant 8.03591901E-5 : f32
    %1362 = vector.broadcast %cst_685 : f32 to vector<8x128xf32>
    %1363 = arith.mulf %1362, %1361 : vector<8x128xf32>
    %1364 = arith.addf %1353, %1363 : vector<8x128xf32>
    %cst_686 = arith.constant 4.82913834E-4 : f32
    %1365 = vector.broadcast %cst_686 : f32 to vector<8x128xf32>
    %1366 = arith.mulf %1365, %1361 : vector<8x128xf32>
    %1367 = arith.addf %1356, %1366 : vector<8x128xf32>
    %cst_687 = arith.constant -5.40138572E-4 : f32
    %1368 = vector.broadcast %cst_687 : f32 to vector<8x128xf32>
    %1369 = arith.mulf %1368, %1361 : vector<8x128xf32>
    %1370 = arith.addf %1359, %1369 : vector<8x128xf32>
    %c1_688 = arith.constant 1 : index
    %c0_689 = arith.constant 0 : index
    %c55_690 = arith.constant 55 : index
    %1371 = vector.load %arg5[%c1_688, %c0_689, %c55_690] : memref<2x8x256xf32, #tpu.memory_space<vmem>>, vector<1x8x128xf32>
    %1372 = vector.shape_cast %1371 : vector<1x8x128xf32> to vector<8x128xf32>
    %cst_691 = arith.constant 1.63354212E-4 : f32
    %1373 = vector.broadcast %cst_691 : f32 to vector<8x128xf32>
    %1374 = arith.mulf %1373, %1372 : vector<8x128xf32>
    %1375 = arith.addf %1364, %1374 : vector<8x128xf32>
    %cst_692 = arith.constant 2.5557194E-4 : f32
    %1376 = vector.broadcast %cst_692 : f32 to vector<8x128xf32>
    %1377 = arith.mulf %1376, %1372 : vector<8x128xf32>
    %1378 = arith.addf %1367, %1377 : vector<8x128xf32>
    %cst_693 = arith.constant -4.41691052E-4 : f32
    %1379 = vector.broadcast %cst_693 : f32 to vector<8x128xf32>
    %1380 = arith.mulf %1379, %1372 : vector<8x128xf32>
    %1381 = arith.addf %1370, %1380 : vector<8x128xf32>
    %c1_694 = arith.constant 1 : index
    %c0_695 = arith.constant 0 : index
    %c56_696 = arith.constant 56 : index
    %1382 = vector.load %arg5[%c1_694, %c0_695, %c56_696] : memref<2x8x256xf32, #tpu.memory_space<vmem>>, vector<1x8x128xf32>
    %1383 = vector.shape_cast %1382 : vector<1x8x128xf32> to vector<8x128xf32>
    %cst_697 = arith.constant 1.74305722E-4 : f32
    %1384 = vector.broadcast %cst_697 : f32 to vector<8x128xf32>
    %1385 = arith.mulf %1384, %1383 : vector<8x128xf32>
    %1386 = arith.addf %1375, %1385 : vector<8x128xf32>
    %cst_698 = arith.constant 1.00472957E-4 : f32
    %1387 = vector.broadcast %cst_698 : f32 to vector<8x128xf32>
    %1388 = arith.mulf %1387, %1383 : vector<8x128xf32>
    %1389 = arith.addf %1378, %1388 : vector<8x128xf32>
    %cst_699 = arith.constant -3.17583384E-4 : f32
    %1390 = vector.broadcast %cst_699 : f32 to vector<8x128xf32>
    %1391 = arith.mulf %1390, %1383 : vector<8x128xf32>
    %1392 = arith.addf %1381, %1391 : vector<8x128xf32>
    %c1_700 = arith.constant 1 : index
    %c0_701 = arith.constant 0 : index
    %c57_702 = arith.constant 57 : index
    %1393 = vector.load %arg5[%c1_700, %c0_701, %c57_702] : memref<2x8x256xf32, #tpu.memory_space<vmem>>, vector<1x8x128xf32>
    %1394 = vector.shape_cast %1393 : vector<1x8x128xf32> to vector<8x128xf32>
    %cst_703 = arith.constant 1.46788414E-4 : f32
    %1395 = vector.broadcast %cst_703 : f32 to vector<8x128xf32>
    %1396 = arith.mulf %1395, %1394 : vector<8x128xf32>
    %1397 = arith.addf %1386, %1396 : vector<8x128xf32>
    %cst_704 = arith.constant 9.89126874E-6 : f32
    %1398 = vector.broadcast %cst_704 : f32 to vector<8x128xf32>
    %1399 = arith.mulf %1398, %1394 : vector<8x128xf32>
    %1400 = arith.addf %1389, %1399 : vector<8x128xf32>
    %cst_705 = arith.constant -2.017890e-04 : f32
    %1401 = vector.broadcast %cst_705 : f32 to vector<8x128xf32>
    %1402 = arith.mulf %1401, %1394 : vector<8x128xf32>
    %1403 = arith.addf %1392, %1402 : vector<8x128xf32>
    %c1_706 = arith.constant 1 : index
    %c0_707 = arith.constant 0 : index
    %c58_708 = arith.constant 58 : index
    %1404 = vector.load %arg5[%c1_706, %c0_707, %c58_708] : memref<2x8x256xf32, #tpu.memory_space<vmem>>, vector<1x8x128xf32>
    %1405 = vector.shape_cast %1404 : vector<1x8x128xf32> to vector<8x128xf32>
    %cst_709 = arith.constant 1.05753636E-4 : f32
    %1406 = vector.broadcast %cst_709 : f32 to vector<8x128xf32>
    %1407 = arith.mulf %1406, %1405 : vector<8x128xf32>
    %1408 = arith.addf %1397, %1407 : vector<8x128xf32>
    %cst_710 = arith.constant -3.20987965E-5 : f32
    %1409 = vector.broadcast %cst_710 : f32 to vector<8x128xf32>
    %1410 = arith.mulf %1409, %1405 : vector<8x128xf32>
    %1411 = arith.addf %1400, %1410 : vector<8x128xf32>
    %cst_711 = arith.constant -1.11265123E-4 : f32
    %1412 = vector.broadcast %cst_711 : f32 to vector<8x128xf32>
    %1413 = arith.mulf %1412, %1405 : vector<8x128xf32>
    %1414 = arith.addf %1403, %1413 : vector<8x128xf32>
    %c1_712 = arith.constant 1 : index
    %c0_713 = arith.constant 0 : index
    %c59_714 = arith.constant 59 : index
    %1415 = vector.load %arg5[%c1_712, %c0_713, %c59_714] : memref<2x8x256xf32, #tpu.memory_space<vmem>>, vector<1x8x128xf32>
    %1416 = vector.shape_cast %1415 : vector<1x8x128xf32> to vector<8x128xf32>
    %cst_715 = arith.constant 6.65810949E-5 : f32
    %1417 = vector.broadcast %cst_715 : f32 to vector<8x128xf32>
    %1418 = arith.mulf %1417, %1416 : vector<8x128xf32>
    %1419 = arith.addf %1408, %1418 : vector<8x128xf32>
    %cst_716 = arith.constant -4.30007858E-5 : f32
    %1420 = vector.broadcast %cst_716 : f32 to vector<8x128xf32>
    %1421 = arith.mulf %1420, %1416 : vector<8x128xf32>
    %1422 = arith.addf %1411, %1421 : vector<8x128xf32>
    %cst_717 = arith.constant -5.01690229E-5 : f32
    %1423 = vector.broadcast %cst_717 : f32 to vector<8x128xf32>
    %1424 = arith.mulf %1423, %1416 : vector<8x128xf32>
    %1425 = arith.addf %1414, %1424 : vector<8x128xf32>
    %c1_718 = arith.constant 1 : index
    %c0_719 = arith.constant 0 : index
    %c60_720 = arith.constant 60 : index
    %1426 = vector.load %arg5[%c1_718, %c0_719, %c60_720] : memref<2x8x256xf32, #tpu.memory_space<vmem>>, vector<1x8x128xf32>
    %1427 = vector.shape_cast %1426 : vector<1x8x128xf32> to vector<8x128xf32>
    %cst_721 = arith.constant 3.64503976E-5 : f32
    %1428 = vector.broadcast %cst_721 : f32 to vector<8x128xf32>
    %1429 = arith.mulf %1428, %1427 : vector<8x128xf32>
    %1430 = arith.addf %1419, %1429 : vector<8x128xf32>
    %cst_722 = arith.constant -3.77189717E-5 : f32
    %1431 = vector.broadcast %cst_722 : f32 to vector<8x128xf32>
    %1432 = arith.mulf %1431, %1427 : vector<8x128xf32>
    %1433 = arith.addf %1422, %1432 : vector<8x128xf32>
    %cst_723 = arith.constant -1.48364279E-5 : f32
    %1434 = vector.broadcast %cst_723 : f32 to vector<8x128xf32>
    %1435 = arith.mulf %1434, %1427 : vector<8x128xf32>
    %1436 = arith.addf %1425, %1435 : vector<8x128xf32>
    %c1_724 = arith.constant 1 : index
    %c0_725 = arith.constant 0 : index
    %c61_726 = arith.constant 61 : index
    %1437 = vector.load %arg5[%c1_724, %c0_725, %c61_726] : memref<2x8x256xf32, #tpu.memory_space<vmem>>, vector<1x8x128xf32>
    %1438 = vector.shape_cast %1437 : vector<1x8x128xf32> to vector<8x128xf32>
    %cst_727 = arith.constant 1.68112911E-5 : f32
    %1439 = vector.broadcast %cst_727 : f32 to vector<8x128xf32>
    %1440 = arith.mulf %1439, %1438 : vector<8x128xf32>
    %1441 = arith.addf %1430, %1440 : vector<8x128xf32>
    %cst_728 = arith.constant -2.67385149E-5 : f32
    %1442 = vector.broadcast %cst_728 : f32 to vector<8x128xf32>
    %1443 = arith.mulf %1442, %1438 : vector<8x128xf32>
    %1444 = arith.addf %1433, %1443 : vector<8x128xf32>
    %cst_729 = arith.constant 1.79588528E-6 : f32
    %1445 = vector.broadcast %cst_729 : f32 to vector<8x128xf32>
    %1446 = arith.mulf %1445, %1438 : vector<8x128xf32>
    %1447 = arith.addf %1436, %1446 : vector<8x128xf32>
    %c1_730 = arith.constant 1 : index
    %c0_731 = arith.constant 0 : index
    %c62_732 = arith.constant 62 : index
    %1448 = vector.load %arg5[%c1_730, %c0_731, %c62_732] : memref<2x8x256xf32, #tpu.memory_space<vmem>>, vector<1x8x128xf32>
    %1449 = vector.shape_cast %1448 : vector<1x8x128xf32> to vector<8x128xf32>
    %cst_733 = arith.constant 5.95312849E-6 : f32
    %1450 = vector.broadcast %cst_733 : f32 to vector<8x128xf32>
    %1451 = arith.mulf %1450, %1449 : vector<8x128xf32>
    %1452 = arith.addf %1441, %1451 : vector<8x128xf32>
    %cst_734 = arith.constant -1.60719683E-5 : f32
    %1453 = vector.broadcast %cst_734 : f32 to vector<8x128xf32>
    %1454 = arith.mulf %1453, %1449 : vector<8x128xf32>
    %1455 = arith.addf %1444, %1454 : vector<8x128xf32>
    %cst_735 = arith.constant 7.03139267E-6 : f32
    %1456 = vector.broadcast %cst_735 : f32 to vector<8x128xf32>
    %1457 = arith.mulf %1456, %1449 : vector<8x128xf32>
    %1458 = arith.addf %1447, %1457 : vector<8x128xf32>
    %c1_736 = arith.constant 1 : index
    %c0_737 = arith.constant 0 : index
    %c63_738 = arith.constant 63 : index
    %1459 = vector.load %arg5[%c1_736, %c0_737, %c63_738] : memref<2x8x256xf32, #tpu.memory_space<vmem>>, vector<1x8x128xf32>
    %1460 = vector.shape_cast %1459 : vector<1x8x128xf32> to vector<8x128xf32>
    %cst_739 = arith.constant 1.06005291E-6 : f32
    %1461 = vector.broadcast %cst_739 : f32 to vector<8x128xf32>
    %1462 = arith.mulf %1461, %1460 : vector<8x128xf32>
    %1463 = arith.addf %1452, %1462 : vector<8x128xf32>
    %cst_740 = arith.constant -8.22428137E-6 : f32
    %1464 = vector.broadcast %cst_740 : f32 to vector<8x128xf32>
    %1465 = arith.mulf %1464, %1460 : vector<8x128xf32>
    %1466 = arith.addf %1455, %1465 : vector<8x128xf32>
    %cst_741 = arith.constant 6.675700e-06 : f32
    %1467 = vector.broadcast %cst_741 : f32 to vector<8x128xf32>
    %1468 = arith.mulf %1467, %1460 : vector<8x128xf32>
    %1469 = arith.addf %1458, %1468 : vector<8x128xf32>
    %c1_742 = arith.constant 1 : index
    %c0_743 = arith.constant 0 : index
    %c64_744 = arith.constant 64 : index
    %1470 = vector.load %arg5[%c1_742, %c0_743, %c64_744] : memref<2x8x256xf32, #tpu.memory_space<vmem>>, vector<1x8x128xf32>
    %1471 = vector.shape_cast %1470 : vector<1x8x128xf32> to vector<8x128xf32>
    %cst_745 = arith.constant -5.02981266E-7 : f32
    %1472 = vector.broadcast %cst_745 : f32 to vector<8x128xf32>
    %1473 = arith.mulf %1472, %1471 : vector<8x128xf32>
    %1474 = arith.addf %1463, %1473 : vector<8x128xf32>
    %cst_746 = arith.constant -3.49617221E-6 : f32
    %1475 = vector.broadcast %cst_746 : f32 to vector<8x128xf32>
    %1476 = arith.mulf %1475, %1471 : vector<8x128xf32>
    %1477 = arith.addf %1466, %1476 : vector<8x128xf32>
    %cst_747 = arith.constant 4.48051878E-6 : f32
    %1478 = vector.broadcast %cst_747 : f32 to vector<8x128xf32>
    %1479 = arith.mulf %1478, %1471 : vector<8x128xf32>
    %1480 = arith.addf %1469, %1479 : vector<8x128xf32>
    %c1_748 = arith.constant 1 : index
    %c0_749 = arith.constant 0 : index
    %c65_750 = arith.constant 65 : index
    %1481 = vector.load %arg5[%c1_748, %c0_749, %c65_750] : memref<2x8x256xf32, #tpu.memory_space<vmem>>, vector<1x8x128xf32>
    %1482 = vector.shape_cast %1481 : vector<1x8x128xf32> to vector<8x128xf32>
    %cst_751 = arith.constant -6.14523117E-7 : f32
    %1483 = vector.broadcast %cst_751 : f32 to vector<8x128xf32>
    %1484 = arith.mulf %1483, %1482 : vector<8x128xf32>
    %1485 = arith.addf %1474, %1484 : vector<8x128xf32>
    %cst_752 = arith.constant -1.15545924E-6 : f32
    %1486 = vector.broadcast %cst_752 : f32 to vector<8x128xf32>
    %1487 = arith.mulf %1486, %1482 : vector<8x128xf32>
    %1488 = arith.addf %1477, %1487 : vector<8x128xf32>
    %cst_753 = arith.constant 2.36448227E-6 : f32
    %1489 = vector.broadcast %cst_753 : f32 to vector<8x128xf32>
    %1490 = arith.mulf %1489, %1482 : vector<8x128xf32>
    %1491 = arith.addf %1480, %1490 : vector<8x128xf32>
    %c1_754 = arith.constant 1 : index
    %c0_755 = arith.constant 0 : index
    %c66_756 = arith.constant 66 : index
    %1492 = vector.load %arg5[%c1_754, %c0_755, %c66_756] : memref<2x8x256xf32, #tpu.memory_space<vmem>>, vector<1x8x128xf32>
    %1493 = vector.shape_cast %1492 : vector<1x8x128xf32> to vector<8x128xf32>
    %cst_757 = arith.constant -3.33325858E-7 : f32
    %1494 = vector.broadcast %cst_757 : f32 to vector<8x128xf32>
    %1495 = arith.mulf %1494, %1493 : vector<8x128xf32>
    %1496 = arith.addf %1485, %1495 : vector<8x128xf32>
    %cst_758 = arith.constant -2.47036752E-7 : f32
    %1497 = vector.broadcast %cst_758 : f32 to vector<8x128xf32>
    %1498 = arith.mulf %1497, %1493 : vector<8x128xf32>
    %1499 = arith.addf %1488, %1498 : vector<8x128xf32>
    %cst_759 = arith.constant 9.76518322E-7 : f32
    %1500 = vector.broadcast %cst_759 : f32 to vector<8x128xf32>
    %1501 = arith.mulf %1500, %1493 : vector<8x128xf32>
    %1502 = arith.addf %1491, %1501 : vector<8x128xf32>
    %c1_760 = arith.constant 1 : index
    %c0_761 = arith.constant 0 : index
    %c67_762 = arith.constant 67 : index
    %1503 = vector.load %arg5[%c1_760, %c0_761, %c67_762] : memref<2x8x256xf32, #tpu.memory_space<vmem>>, vector<1x8x128xf32>
    %1504 = vector.shape_cast %1503 : vector<1x8x128xf32> to vector<8x128xf32>
    %cst_763 = arith.constant -9.91475986E-8 : f32
    %1505 = vector.broadcast %cst_763 : f32 to vector<8x128xf32>
    %1506 = arith.mulf %1505, %1504 : vector<8x128xf32>
    %1507 = arith.addf %1496, %1506 : vector<8x128xf32>
    %cst_764 = arith.constant -1.0113653E-8 : f32
    %1508 = vector.broadcast %cst_764 : f32 to vector<8x128xf32>
    %1509 = arith.mulf %1508, %1504 : vector<8x128xf32>
    %1510 = arith.addf %1499, %1509 : vector<8x128xf32>
    %cst_765 = arith.constant 2.89386605E-7 : f32
    %1511 = vector.broadcast %cst_765 : f32 to vector<8x128xf32>
    %1512 = arith.mulf %1511, %1504 : vector<8x128xf32>
    %1513 = arith.addf %1502, %1512 : vector<8x128xf32>
    %c1_766 = arith.constant 1 : index
    %c0_767 = arith.constant 0 : index
    %c68_768 = arith.constant 68 : index
    %1514 = vector.load %arg5[%c1_766, %c0_767, %c68_768] : memref<2x8x256xf32, #tpu.memory_space<vmem>>, vector<1x8x128xf32>
    %1515 = vector.shape_cast %1514 : vector<1x8x128xf32> to vector<8x128xf32>
    %cst_769 = arith.constant -0.000000e+00 : f32
    %1516 = vector.broadcast %cst_769 : f32 to vector<8x128xf32>
    %1517 = arith.mulf %1516, %1515 : vector<8x128xf32>
    %1518 = arith.addf %1507, %1517 : vector<8x128xf32>
    %cst_770 = arith.constant 0.000000e+00 : f32
    %1519 = vector.broadcast %cst_770 : f32 to vector<8x128xf32>
    %1520 = arith.mulf %1519, %1515 : vector<8x128xf32>
    %1521 = arith.addf %1510, %1520 : vector<8x128xf32>
    %cst_771 = arith.constant 4.34954721E-8 : f32
    %1522 = vector.broadcast %cst_771 : f32 to vector<8x128xf32>
    %1523 = arith.mulf %1522, %1515 : vector<8x128xf32>
    %1524 = arith.addf %1513, %1523 : vector<8x128xf32>
    %c0_772 = arith.constant 0 : index
    %c0_773 = arith.constant 0 : index
    %c0_774 = arith.constant 0 : index
    %1525 = vector.load %arg4[%c0_772, %c0_773, %c0_774] : memref<3x8x128xf32, #tpu.memory_space<vmem>>, vector<1x8x128xf32>
    %1526 = vector.shape_cast %1525 : vector<1x8x128xf32> to vector<8x128xf32>
    %1527 = vector.shape_cast %1518 : vector<8x128xf32> to vector<1x8x128xf32>
    tpu.vector_store %arg4[%c0_772, %c0_773, %c0_774], %1527 {strides = array<i32>} : memref<3x8x128xf32, #tpu.memory_space<vmem>>, vector<1x8x128xf32>,
    %c1_775 = arith.constant 1 : index
    %c0_776 = arith.constant 0 : index
    %c0_777 = arith.constant 0 : index
    %1528 = vector.load %arg4[%c1_775, %c0_776, %c0_777] : memref<3x8x128xf32, #tpu.memory_space<vmem>>, vector<1x8x128xf32>
    %1529 = vector.shape_cast %1528 : vector<1x8x128xf32> to vector<8x128xf32>
    %1530 = vector.shape_cast %1521 : vector<8x128xf32> to vector<1x8x128xf32>
    tpu.vector_store %arg4[%c1_775, %c0_776, %c0_777], %1530 {strides = array<i32>} : memref<3x8x128xf32, #tpu.memory_space<vmem>>, vector<1x8x128xf32>,
    %c2_778 = arith.constant 2 : index
    %c0_779 = arith.constant 0 : index
    %c0_780 = arith.constant 0 : index
    %1531 = vector.load %arg4[%c2_778, %c0_779, %c0_780] : memref<3x8x128xf32, #tpu.memory_space<vmem>>, vector<1x8x128xf32>
    %1532 = vector.shape_cast %1531 : vector<1x8x128xf32> to vector<8x128xf32>
    %1533 = vector.shape_cast %1524 : vector<8x128xf32> to vector<1x8x128xf32>
    tpu.vector_store %arg4[%c2_778, %c0_779, %c0_780], %1533 {strides = array<i32>} : memref<3x8x128xf32, #tpu.memory_space<vmem>>, vector<1x8x128xf32>,
    return
  }
  func.func @transform_0(%arg0: i32, %arg1: i32) -> (i32, i32, i32) {
    %c0_i32 = arith.constant 0 : i32
    %c0_i32_0 = arith.constant 0 : i32
    return %c0_i32, %arg0, %arg1 : i32, i32, i32
  }
  func.func @transform_1(%arg0: i32, %arg1: i32) -> (i32, i32, i32) {
    %c1_i32 = arith.constant 1 : i32
    %0 = arith.addi %arg1, %c1_i32 : i32
    %c1_i32_0 = arith.constant 1 : i32
    %1 = arith.muli %0, %c1_i32_0 : i32
    %c0_i32 = arith.constant 0 : i32
    %c0_i32_1 = arith.constant 0 : i32
    return %c0_i32, %arg0, %1 : i32, i32, i32
  }
  func.func @transform_2(%arg0: i32, %arg1: i32) -> (i32, i32, i32) {
    %c0_i32 = arith.constant 0 : i32
    %c0_i32_0 = arith.constant 0 : i32
    return %c0_i32, %arg0, %arg1 : i32, i32, i32
  }
}

</mosaic_0001>

<bundles_post_ra>
// kernel: _resample_general.1
= control target key start
LH: loop header
LB: loop body
LE: loop exit
PB: predicated region body
PF: predicated region fallthrough
CT: control target
= control target key end

     0   :  { %s3992_s13 = smov 127   ;;  %s3993_s14 = smov 126   ;;  %vm115_vm0 = vcmask 1039360   ;;  %vm149_vm1 = vcmask 1031168   ;;  %vm183_vm2 = vcmask 1022976   ;;  %vm217_vm3 = vcmask 1014784   ;;  %s9474_s0 = inlined_call_operand.vmem [shape: f32[2,8,256], index: 0, kind: input, shape index: {}, may-alias: {0,1}]   ;;  %s9475_s1 = inlined_call_operand.vmem [shape: f32[2,8,256], index: 1, kind: input, shape index: {}, may-alias: {0,1}]   ;;  %s9476_s2 = inlined_call_operand.vmem [shape: f32[3,8,128], index: 2, kind: output, shape index: {}]  }
   0x1   :  { %v4078_v0 = vld [vmem:[%s9474_s0] sm:$0xff]  ;;  %v4083_v1 = vld [vmem:[%s9475_s1 + $0x8] sm:$0xff]  ;;  %s3994_s15 = smov 125   ;;  %s3995_s16 = smov 124   ;;  %vm251_vm4 = vcmask 1006592   ;;  %vm285_vm5 = vcmask 998400  }
   0x2   :  { %v4086_v2 = vmul.f32 -1.285605e-07, %v4078_v0  ;;  %v4089_v3 = vmul.f32 1.9956433e-07, %v4078_v0  ;;  %v4096_v4 = vmul.f32 -1.285605e-07, %v4083_v1 }
   0x3   :  { %v4099_v5 = vmul.f32 1.9956433e-07, %v4083_v1  ;;  %v4106_v6 = vmul.f32 -8.439281e-09, %v4083_v1  ;;  %v4109_v7 = vmul.f32 -8.439281e-09, %v4078_v0 }
   0x4   :  { %9903 = vst [vmem:[#allocation5_spill] sm:$0xff] %v4086_v2  ;;  %9904 = vst [vmem:[#allocation6_spill] sm:$0xff] %v4089_v3  ;;  %123 = vrot.lane.b32.xlu1 %v4086_v2, %s3992_s13  ;;  %111 = vrot.lane.b32.xlu0 %v4089_v3, %s3992_s13  ;;  %v4116_v8 = vmul.f32 4.84212e-07, %v4083_v1  ;;  %v4119_v9 = vmul.f32 4.84212e-07, %v4078_v0 }
   0x5   :  { %9905 = vst [vmem:[#allocation7_spill] sm:$0xff] %v4096_v4  ;;  %9906 = vst [vmem:[#allocation8_spill] sm:$0xff] %v4099_v5  ;;  %v4126_v10 = vmul.f32 -5.599633e-07, %v4083_v1  ;;  %v4129_v11 = vmul.f32 -5.599633e-07, %v4078_v0 }
   0x6   :  { %9907 = vst [vmem:[#allocation9_spill] sm:$0xff] %v4106_v6  ;;  %9908 = vst [vmem:[#allocation10_spill] sm:$0xff] %v4109_v7  ;;  %v4136_v12 = vmul.f32 7.993108e-08, %v4083_v1  ;;  %v4139_v13 = vmul.f32 7.993108e-08, %v4078_v0 }
   0x7   :  { %9909 = vst [vmem:[#allocation11_spill] sm:$0xff] %v4116_v8  ;;  %9910 = vst [vmem:[#allocation12_spill] sm:$0xff] %v4119_v9  ;;  %v4146_v14 = vmul.f32 6.564232e-07, %v4083_v1  ;;  %v4149_v15 = vmul.f32 6.564232e-07, %v4078_v0 }
   0x8   :  { %125 = vrot.lane.b32.xlu1 %v4096_v4, %s3992_s13  ;;  %113 = vrot.lane.b32.xlu0 %v4099_v5, %s3992_s13  ;;  %9911 = vst [vmem:[#allocation13_spill] sm:$0xff] %v4126_v10  ;;  %9912 = vst [vmem:[#allocation14_spill] sm:$0xff] %v4129_v11  ;;  %v4156_v16 = vmul.f32 -1.5715007e-06, %v4083_v1  ;;  %v4159_v17 = vmul.f32 -1.5715007e-06, %v4078_v0 }
   0x9   :  { %9913 = vst [vmem:[#allocation15_spill] sm:$0xff] %v4136_v12  ;;  %9914 = vst [vmem:[#allocation16_spill] sm:$0xff] %v4139_v13  ;;  %v4166_v18 = vmul.f32 5.768346e-07, %v4083_v1  ;;  %v4169_v19 = vmul.f32 5.768346e-07, %v4078_v0 }
   0xa   :  { %9915 = vst [vmem:[#allocation17_spill] sm:$0xff] %v4146_v14  ;;  %9916 = vst [vmem:[#allocation18_spill] sm:$0xff] %v4149_v15  ;;  %v4176_v20 = vmul.f32 -2.0168402e-11, %v4083_v1  ;;  %v4179_v21 = vmul.f32 -2.0168402e-11, %v4078_v0 }
   0xb   :  { %9917 = vst [vmem:[#allocation19_spill] sm:$0xff] %v4156_v16  ;;  %9918 = vst [vmem:[#allocation20_spill] sm:$0xff] %v4159_v17  ;;  %v4186_v22 = vmul.f32 -3.3497024e-06, %v4083_v1  ;;  %v4189_v23 = vmul.f32 -3.3497024e-06, %v4078_v0 }
   0xc   :  { %136 = vrot.lane.b32.xlu1 %v4106_v6, %s3992_s13  ;;  %134 = vrot.lane.b32.xlu0 %v4109_v7, %s3992_s13  ;;  %9919 = vst [vmem:[#allocation21_spill] sm:$0xff] %v4166_v18  ;;  %9920 = vst [vmem:[#allocation22_spill] sm:$0xff] %v4169_v19  ;;  %v4196_v24 = vmul.f32 2.0885338e-06, %v4083_v1  ;;  %v4199_v25 = vmul.f32 2.0885338e-06, %v4078_v0 }
   0xd   :  { %9921 = vst [vmem:[#allocation23_spill] sm:$0xff] %v4176_v20  ;;  %9922 = vst [vmem:[#allocation24_spill] sm:$0xff] %v4179_v21  ;;  %v4206_v26 = vmul.f32 -2.9398318e-06, %v4083_v1  ;;  %v4209_v27 = vmul.f32 -2.9398318e-06, %v4078_v0 }
   0xe   :  { %9923 = vst [vmem:[#allocation25_spill] sm:$0xff] %v4186_v22  ;;  %9924 = vst [vmem:[#allocation26_spill] sm:$0xff] %v4189_v23  ;;  %s3996_s17 = smov 123   ;;  %v4216_v28 = vmul.f32 -5.651003e-06, %v4083_v1  ;;  %s3997_s18 = smov 122  }
   0xf   :  { %9925 = vst [vmem:[#allocation27_spill] sm:$0xff] %v4196_v24  ;;  %9926 = vst [vmem:[#allocation28_spill] sm:$0xff] %v4199_v25  ;;  %v4219_v29 = vmul.f32 -5.651003e-06, %v4078_v0  ;;  %v4226_v30 = vmul.f32 5.5033192e-06, %v4083_v1 }
  0x10   :  { %147 = vrot.lane.b32.xlu1 %v4116_v8, %s3993_s14  ;;  %145 = vrot.lane.b32.xlu0 %v4119_v9, %s3993_s14  ;;  %9927 = vst [vmem:[#allocation29_spill] sm:$0xff] %v4206_v26  ;;  %9928 = vst [vmem:[#allocation30_spill] sm:$0xff] %v4209_v27  ;;  %v4229_v31 = vmul.f32 5.5033192e-06, %v4078_v0  ;;  %v4236_v32 = vmul.f32 -1.04536775e-05, %v4083_v1 }
  0x11   :  { %9929 = vst [vmem:[#allocation31_spill] sm:$0xff] %v4216_v28  ;;  %9930 = vst [vmem:[#allocation32_spill] sm:$0xff] %v4219_v29  ;;  %v4239_v33 = vmul.f32 -1.04536775e-05, %v4078_v0  ;;  %v4246_v34 = vmul.f32 -7.2699104e-06, %v4083_v1 }
  0x12   :  { %9931 = vst [vmem:[#allocation33_spill] sm:$0xff] %v4226_v30  ;;  %9932 = vst [vmem:[#allocation34_spill] sm:$0xff] %v4229_v31  ;;  %v4249_v35 = vmul.f32 -7.2699104e-06, %v4078_v0  ;;  %v4256_v36 = vmul.f32 1.17404925e-05, %v4083_v1 }
  0x13   :  { %9933 = vst [vmem:[#allocation35_spill] sm:$0xff] %v4236_v32  ;;  %9934 = vst [vmem:[#allocation36_spill] sm:$0xff] %v4239_v33  ;;  %v4259_v37 = vmul.f32 1.17404925e-05, %v4078_v0  ;;  %v4266_v38 = vmul.f32 -2.5379992e-05, %v4083_v1 }
  0x14   :  { %159 = vrot.lane.b32.xlu1 %v4126_v10, %s3993_s14  ;;  %157 = vrot.lane.b32.xlu0 %v4129_v11, %s3993_s14  ;;  %9935 = vst [vmem:[#allocation37_spill] sm:$0xff] %v4246_v34  ;;  %9936 = vst [vmem:[#allocation38_spill] sm:$0xff] %v4249_v35  ;;  %v4269_v39 = vmul.f32 -2.5379992e-05, %v4078_v0  ;;  %s3998_s19 = smov 121   ;;  %s3999_s20 = smov 120  }
  0x15   :  { %9937 = vst [vmem:[#allocation39_spill] sm:$0xff] %v4256_v36  ;;  %9938 = vst [vmem:[#allocation40_spill] sm:$0xff] %v4259_v37  ;;  %v4276_v40 = vmul.f32 -5.4290667e-06, %v4083_v1  ;;  %v4279_v41 = vmul.f32 -5.4290667e-06, %v4078_v0 }
  0x16   :  { %9939 = vst [vmem:[#allocation41_spill] sm:$0xff] %v4266_v38  ;;  %9940 = vst [vmem:[#allocation42_spill] sm:$0xff] %v4269_v39  ;;  %v4286_v42 = vmul.f32 2.1142272e-05, %v4083_v1  ;;  %v4289_v43 = vmul.f32 2.1142272e-05, %v4078_v0 }
  0x17   :  { %9941 = vst [vmem:[#allocation43_spill] sm:$0xff] %v4276_v40  ;;  %9942 = vst [vmem:[#allocation44_spill] sm:$0xff] %v4279_v41  ;;  %v4296_v44 = vmul.f32 -5.0192146e-05, %v4083_v1  ;;  %v4299_v45 = vmul.f32 -5.0192146e-05, %v4078_v0 }
  0x18   :  { %170 = vrot.lane.b32.xlu1 %v4136_v12, %s3993_s14  ;;  %168 = vrot.lane.b32.xlu0 %v4139_v13, %s3993_s14  ;;  %9943 = vst [vmem:[#allocation45_spill] sm:$0xff] %v4286_v42  ;;  %9944 = vst [vmem:[#allocation46_spill] sm:$0xff] %v4289_v43  ;;  %v4306_v46 = vmul.f32 4.660631e-06, %v4083_v1  ;;  %v4309_v47 = vmul.f32 4.660631e-06, %v4078_v0 }
  0x19   :  { %9945 = vst [vmem:[#allocation47_spill] sm:$0xff] %v4296_v44  ;;  %9946 = vst [vmem:[#allocation48_spill] sm:$0xff] %v4299_v45  ;;  %v4316_v48 = vmul.f32 3.246867e-05, %v4083_v1  ;;  %v4319_v49 = vmul.f32 3.246867e-05, %v4078_v0 }
  0x1a   :  { %9947 = vst [vmem:[#allocation49_spill] sm:$0xff] %v4306_v46  ;;  %9948 = vst [vmem:[#allocation50_spill] sm:$0xff] %v4309_v47  ;;  %v4326_v50 = vmul.f32 -8.531997e-05, %v4083_v1  ;;  %v4329_v51 = vmul.f32 -8.531997e-05, %v4078_v0 }
  0x1b   :  { %9949 = vst [vmem:[#allocation51_spill] sm:$0xff] %v4316_v48  ;;  %9950 = vst [vmem:[#allocation52_spill] sm:$0xff] %v4319_v49  ;;  %s4000_s21 = smov 119   ;;  %v4336_v52 = vmul.f32 2.9688157e-05, %v4083_v1  ;;  %s4001_s22 = smov 118  }
  0x1c   :  { %181 = vrot.lane.b32.xlu1 %v4146_v14, %s3994_s15  ;;  %179 = vrot.lane.b32.xlu0 %v4149_v15, %s3994_s15  ;;  %9951 = vst [vmem:[#allocation53_spill] sm:$0xff] %v4326_v50  ;;  %9952 = vst [vmem:[#allocation54_spill] sm:$0xff] %v4329_v51  ;;  %v4339_v53 = vmul.f32 2.9688157e-05, %v4078_v0  ;;  %v4346_v54 = vmul.f32 4.161649e-05, %v4083_v1 }
  0x1d   :  { %9953 = vst [vmem:[#allocation55_spill] sm:$0xff] %v4336_v52  ;;  %v4349_v55 = vmul.f32 4.161649e-05, %v4078_v0  ;;  %v4356_v56 = vmul.f32 -0.00012678283, %v4083_v1  ;;  %s4002_s23 = smov 117  }
  0x1e   :  { %9954 = vst [vmem:[#allocation56_spill] sm:$0xff] %v4339_v53  ;;  %9955 = vst [vmem:[#allocation57_spill] sm:$0xff] %v4346_v54  ;;  %v4359_v57 = vmul.f32 -0.00012678283, %v4078_v0  ;;  %v4366_v58 = vmul.f32 7.714115e-05, %v4083_v1 }
  0x1f   :  { %9956 = vst [vmem:[#allocation58_spill] sm:$0xff] %v4349_v55  ;;  %9957 = vst [vmem:[#allocation59_spill] sm:$0xff] %v4356_v56  ;;  %v4369_v59 = vmul.f32 7.714115e-05, %v4078_v0  ;;  %v4376_v60 = vmul.f32 4.0411654e-05, %v4083_v1 }
  0x20   :  { %193 = vrot.lane.b32.xlu1 %v4156_v16, %s3994_s15  ;;  %191 = vrot.lane.b32.xlu0 %v4159_v17, %s3994_s15  ;;  %9958 = vst [vmem:[#allocation60_spill] sm:$0xff] %v4359_v57  ;;  %9959 = vst [vmem:[#allocation61_spill] sm:$0xff] %v4366_v58  ;;  %v4379_v61 = vmul.f32 4.0411654e-05, %v4078_v0  ;;  %v4390_v2 = vmul.f32 -0.00016356836, %v4083_v1 }
  0x21   :  { %9960 = vst [vmem:[#allocation62_spill] sm:$0xff] %v4369_v59  ;;  %9961 = vst [vmem:[#allocation63_spill] sm:$0xff] %v4376_v60  ;;  %v4393_v4 = vmul.f32 -0.00016356836, %v4078_v0  ;;  %s4003_s24 = smov 116   ;;  %s4004_s25 = smov 115  }
  0x22   :  { %9962 = vst [vmem:[#allocation64_spill] sm:$0xff] %v4379_v61  ;;  %9965 = vst [vmem:[#allocation67_spill] sm:$0xff] %v4390_v2  ;;  %s4005_s26 = smov 114   ;;  %s4006_s27 = smov 113   ;;  %vm319_vm6 = vcmask 990208   ;;  %vm353_vm7 = vcmask 982016  }
  0x23   :  { %9966 = vst [vmem:[#allocation68_spill] sm:$0xff] %v4393_v4  ;;  %s4007_s28 = smov 112   ;;  %s4008_s29 = smov 111   ;;  %vm387_vm8 = vcmask 973824   ;;  %vm421_vm9 = vcmask 965632   ;;  %vm455_vm10 = vcmask 957440  }
  0x24   :  { %204 = vrot.lane.b32.xlu1 %v4166_v18, %s3994_s15  ;;  %202 = vrot.lane.b32.xlu0 %v4169_v19, %s3994_s15  ;;  %s4009_s30 = smov 110   ;;  %s4010_s3 = smov 109   ;;  %vm9848_vm11 = vcmask 949248   ;;  %vm9849_vm12 = vcmask 941056   ;;  %vm9850_vm13 = vcmask 932864   ;;  %vm9851_vm14 = vcmask 924672  }
  0x25   :  { %s4011_s4 = smov 108   ;;  %s4012_s5 = smov 107   ;;  %vm9852_vm15 = vcmask 916480  }
  0x26   :  { %s4013_s6 = smov 106   ;;  %s9704_s7 = smov 105  }
  0x27   :  { %s9609_s8 = smov 104   ;;  %s9607_s9 = smov 103  }
  0x28   :  { %215 = vrot.lane.b32.xlu1 %v4176_v20, %s3995_s16  ;;  %213 = vrot.lane.b32.xlu0 %v4179_v21, %s3995_s16  ;;  %s9605_s10 = smov 102   ;;  %s9589_s11 = smov 101  }
  0x29   :  { %s9597_s12 = smov 100  }
  0x2c   :  { %227 = vrot.lane.b32.xlu1 %v4186_v22, %s3995_s16  ;;  %225 = vrot.lane.b32.xlu0 %v4189_v23, %s3995_s16 }
  0x30   :  { %238 = vrot.lane.b32.xlu1 %v4196_v24, %s3995_s16  ;;  %236 = vrot.lane.b32.xlu0 %v4199_v25, %s3995_s16 }
  0x34   :  { %249 = vrot.lane.b32.xlu1 %v4206_v26, %s3996_s17  ;;  %247 = vrot.lane.b32.xlu0 %v4209_v27, %s3996_s17 }
  0x38   :  { %261 = vrot.lane.b32.xlu1 %v4216_v28, %s3996_s17  ;;  %259 = vrot.lane.b32.xlu0 %v4219_v29, %s3996_s17 }
  0x3c   :  { %272 = vrot.lane.b32.xlu1 %v4226_v30, %s3996_s17  ;;  %270 = vrot.lane.b32.xlu0 %v4229_v31, %s3996_s17 }
  0x40   :  { %283 = vrot.lane.b32.xlu1 %v4236_v32, %s3997_s18  ;;  %281 = vrot.lane.b32.xlu0 %v4239_v33, %s3997_s18 }
  0x44   :  { %295 = vrot.lane.b32.xlu1 %v4246_v34, %s3997_s18  ;;  %293 = vrot.lane.b32.xlu0 %v4249_v35, %s3997_s18 }
  0x48   :  { %306 = vrot.lane.b32.xlu1 %v4256_v36, %s3997_s18  ;;  %304 = vrot.lane.b32.xlu0 %v4259_v37, %s3997_s18 }
  0x4c   :  { %317 = vrot.lane.b32.xlu1 %v4266_v38, %s3998_s19  ;;  %315 = vrot.lane.b32.xlu0 %v4269_v39, %s3998_s19 }
  0x50   :  { %329 = vrot.lane.b32.xlu1 %v4276_v40, %s3998_s19  ;;  %327 = vrot.lane.b32.xlu0 %v4279_v41, %s3998_s19 }
  0x54   :  { %340 = vrot.lane.b32.xlu1 %v4286_v42, %s3998_s19  ;;  %338 = vrot.lane.b32.xlu0 %v4289_v43, %s3998_s19 }
  0x58   :  { %351 = vrot.lane.b32.xlu1 %v4296_v44, %s3999_s20  ;;  %349 = vrot.lane.b32.xlu0 %v4299_v45, %s3999_s20 }
  0x5c   :  { %363 = vrot.lane.b32.xlu1 %v4306_v46, %s3999_s20  ;;  %361 = vrot.lane.b32.xlu0 %v4309_v47, %s3999_s20 }
  0x60   :  { %374 = vrot.lane.b32.xlu1 %v4316_v48, %s3999_s20  ;;  %372 = vrot.lane.b32.xlu0 %v4319_v49, %s3999_s20 }
  0x64   :  { %385 = vrot.lane.b32.xlu1 %v4326_v50, %s4000_s21  ;;  %383 = vrot.lane.b32.xlu0 %v4329_v51, %s4000_s21 }
  0x68   :  { %397 = vrot.lane.b32.xlu1 %v4336_v52, %s4000_s21  ;;  %395 = vrot.lane.b32.xlu0 %v4339_v53, %s4000_s21 }
  0x6c   :  { %408 = vrot.lane.b32.xlu1 %v4346_v54, %s4000_s21  ;;  %406 = vrot.lane.b32.xlu0 %v4349_v55, %s4000_s21 }
  0x70   :  { %419 = vrot.lane.b32.xlu1 %v4356_v56, %s4001_s22  ;;  %417 = vrot.lane.b32.xlu0 %v4359_v57, %s4001_s22 }
  0x74   :  { %431 = vrot.lane.b32.xlu1 %v4366_v58, %s4001_s22  ;;  %429 = vrot.lane.b32.xlu0 %v4369_v59, %s4001_s22 }
  0x76   :  { %v4381_v62 = vpop.permute.xlu1 %123  ;;  %v4383_v63 = vpop.permute.xlu0 %111 }
  0x77   :  { %9963 = vst [vmem:[#allocation65_spill] sm:$0xff] %v4381_v62  ;;  %9964 = vst [vmem:[#allocation66_spill] sm:$0xff] %v4383_v63  ;;  %v4404_v62 = vmul.f32 0.00015286688, %v4083_v1  ;;  %v4407_v63 = vmul.f32 0.00015286688, %v4078_v0 }
  0x78   :  { %442 = vrot.lane.b32.xlu1 %v4376_v60, %s4001_s22  ;;  %440 = vrot.lane.b32.xlu0 %v4379_v61, %s4001_s22 }
  0x79   :  { %9969 = vst [vmem:[#allocation71_spill] sm:$0xff] %v4404_v62  ;;  %9970 = vst [vmem:[#allocation72_spill] sm:$0xff] %v4407_v63 }
  0x7a   :  { %v4395_v7 = vpop.permute.xlu1 %125  ;;  %v4397_v6 = vpop.permute.xlu0 %113 }
  0x7b   :  { %9967 = vst [vmem:[#allocation69_spill] sm:$0xff] %v4395_v7  ;;  %9968 = vst [vmem:[#allocation70_spill] sm:$0xff] %v4397_v6  ;;  %v4418_v7 = vmul.f32 1.6061615e-05, %v4083_v1  ;;  %v4421_v6 = vmul.f32 1.6061615e-05, %v4078_v0 }
  0x7c   :  { %453 = vrot.lane.b32.xlu1 %v4390_v2, %s4002_s23  ;;  %451 = vrot.lane.b32.xlu0 %v4393_v4, %s4002_s23 }
  0x7d   :  { %9973 = vst [vmem:[#allocation75_spill] sm:$0xff] %v4418_v7  ;;  %9974 = vst [vmem:[#allocation76_spill] sm:$0xff] %v4421_v6 }
  0x7e   :  { %v4409_v11 = vpop.permute.xlu1 %136  ;;  %v4411_v10 = vpop.permute.xlu0 %134 }
  0x7f   :  { %9971 = vst [vmem:[#allocation73_spill] sm:$0xff] %v4409_v11  ;;  %9972 = vst [vmem:[#allocation74_spill] sm:$0xff] %v4411_v10  ;;  %v4432_v10 = vmul.f32 -0.00017556727, %v4083_v1  ;;  %v4435_v11 = vmul.f32 -0.00017556727, %v4078_v0 }
  0x80   :  { %465 = vrot.lane.b32.xlu1 %v4404_v62, %s4002_s23  ;;  %463 = vrot.lane.b32.xlu0 %v4407_v63, %s4002_s23 }
  0x81   :  { %9977 = vst [vmem:[#allocation79_spill] sm:$0xff] %v4432_v10  ;;  %9978 = vst [vmem:[#allocation80_spill] sm:$0xff] %v4435_v11 }
  0x82   :  { %v4423_v13 = vpop.permute.xlu1 %147  ;;  %v4425_v12 = vpop.permute.xlu0 %145 }
  0x83   :  { %9975 = vst [vmem:[#allocation77_spill] sm:$0xff] %v4423_v13  ;;  %9976 = vst [vmem:[#allocation78_spill] sm:$0xff] %v4425_v12  ;;  %v4446_v12 = vmul.f32 0.00025722999, %v4083_v1  ;;  %v4449_v13 = vmul.f32 0.00025722999, %v4078_v0 }
  0x84   :  { %476 = vrot.lane.b32.xlu1 %v4418_v7, %s4002_s23  ;;  %474 = vrot.lane.b32.xlu0 %v4421_v6, %s4002_s23 }
  0x85   :  { %9981 = vst [vmem:[#allocation83_spill] sm:$0xff] %v4446_v12  ;;  %9982 = vst [vmem:[#allocation84_spill] sm:$0xff] %v4449_v13 }
  0x86   :  { %v4437_v3 = vpop.permute.xlu1 %159  ;;  %v4439_v5 = vpop.permute.xlu0 %157 }
  0x87   :  { %9979 = vst [vmem:[#allocation81_spill] sm:$0xff] %v4437_v3  ;;  %9980 = vst [vmem:[#allocation82_spill] sm:$0xff] %v4439_v5  ;;  %v4460_v5 = vmul.f32 -4.8009253e-05, %v4083_v1  ;;  %v4463_v3 = vmul.f32 -4.8009253e-05, %v4078_v0 }
  0x88   :  { %487 = vrot.lane.b32.xlu1 %v4432_v10, %s4003_s24  ;;  %485 = vrot.lane.b32.xlu0 %v4435_v11, %s4003_s24 }
  0x89   :  { %9985 = vst [vmem:[#allocation87_spill] sm:$0xff] %v4460_v5  ;;  %9986 = vst [vmem:[#allocation88_spill] sm:$0xff] %v4463_v3 }
  0x8a   :  { %v4451_v17 = vpop.permute.xlu1 %170  ;;  %v4453_v16 = vpop.permute.xlu0 %168 }
  0x8b   :  { %9983 = vst [vmem:[#allocation85_spill] sm:$0xff] %v4451_v17  ;;  %9984 = vst [vmem:[#allocation86_spill] sm:$0xff] %v4453_v16  ;;  %v4474_v16 = vmul.f32 -0.00013320753, %v4083_v1  ;;  %v4477_v17 = vmul.f32 -0.00013320753, %v4078_v0 }
  0x8c   :  { %499 = vrot.lane.b32.xlu1 %v4446_v12, %s4003_s24  ;;  %497 = vrot.lane.b32.xlu0 %v4449_v13, %s4003_s24 }
  0x8d   :  { %9989 = vst [vmem:[#allocation91_spill] sm:$0xff] %v4474_v16  ;;  %9990 = vst [vmem:[#allocation92_spill] sm:$0xff] %v4477_v17 }
  0x8e   :  { %v4465_v19 = vpop.permute.xlu1 %181  ;;  %v4467_v18 = vpop.permute.xlu0 %179 }
  0x8f   :  { %9987 = vst [vmem:[#allocation89_spill] sm:$0xff] %v4465_v19  ;;  %9988 = vst [vmem:[#allocation90_spill] sm:$0xff] %v4467_v18  ;;  %v4488_v18 = vmul.f32 0.00038028634, %v4083_v1  ;;  %v4491_v19 = vmul.f32 0.00038028634, %v4078_v0 }
  0x90   :  { %510 = vrot.lane.b32.xlu1 %v4460_v5, %s4003_s24  ;;  %508 = vrot.lane.b32.xlu0 %v4463_v3, %s4003_s24 }
  0x91   :  { %9993 = vst [vmem:[#allocation95_spill] sm:$0xff] %v4488_v18  ;;  %9994 = vst [vmem:[#allocation96_spill] sm:$0xff] %v4491_v19 }
  0x92   :  { %v4479_v9 = vpop.permute.xlu1 %193  ;;  %v4481_v8 = vpop.permute.xlu0 %191 }
  0x93   :  { %9991 = vst [vmem:[#allocation93_spill] sm:$0xff] %v4479_v9  ;;  %9992 = vst [vmem:[#allocation94_spill] sm:$0xff] %v4481_v8  ;;  %v4502_v8 = vmul.f32 -0.00016918714, %v4083_v1  ;;  %v4505_v9 = vmul.f32 -0.00016918714, %v4078_v0 }
  0x94   :  { %521 = vrot.lane.b32.xlu1 %v4474_v16, %s4004_s25  ;;  %519 = vrot.lane.b32.xlu0 %v4477_v17, %s4004_s25 }
  0x95   :  { %9997 = vst [vmem:[#allocation99_spill] sm:$0xff] %v4502_v8  ;;  %9998 = vst [vmem:[#allocation100_spill] sm:$0xff] %v4505_v9 }
  0x96   :  { %v4493_v23 = vpop.permute.xlu1 %204  ;;  %v4495_v22 = vpop.permute.xlu0 %202 }
  0x97   :  { %9995 = vst [vmem:[#allocation97_spill] sm:$0xff] %v4493_v23  ;;  %9996 = vst [vmem:[#allocation98_spill] sm:$0xff] %v4495_v22  ;;  %v4516_v22 = vmul.f32 1.7331194e-09, %v4083_v1  ;;  %v4519_v23 = vmul.f32 1.7331194e-09, %v4078_v0 }
  0x98   :  { %533 = vrot.lane.b32.xlu1 %v4488_v18, %s4004_s25  ;;  %531 = vrot.lane.b32.xlu0 %v4491_v19, %s4004_s25 }
  0x99   :  { %10001 = vst [vmem:[#allocation103_spill] sm:$0xff] %v4516_v22  ;;  %10002 = vst [vmem:[#allocation104_spill] sm:$0xff] %v4519_v23 }
  0x9a   :  { %v4507_v25 = vpop.permute.xlu1 %215  ;;  %v4509_v24 = vpop.permute.xlu0 %213 }
  0x9b   :  { %9999 = vst [vmem:[#allocation101_spill] sm:$0xff] %v4507_v25  ;;  %10000 = vst [vmem:[#allocation102_spill] sm:$0xff] %v4509_v24  ;;  %v4530_v24 = vmul.f32 0.0004969814, %v4083_v1  ;;  %v4533_v25 = vmul.f32 0.0004969814, %v4078_v0 }
  0x9c   :  { %544 = vrot.lane.b32.xlu1 %v4502_v8, %s4004_s25  ;;  %542 = vrot.lane.b32.xlu0 %v4505_v9, %s4004_s25 }
  0x9d   :  { %10005 = vst [vmem:[#allocation107_spill] sm:$0xff] %v4530_v24  ;;  %10006 = vst [vmem:[#allocation108_spill] sm:$0xff] %v4533_v25 }
  0x9e   :  { %v4521_v15 = vpop.permute.xlu1 %227  ;;  %v4523_v14 = vpop.permute.xlu0 %225 }
  0x9f   :  { %10003 = vst [vmem:[#allocation105_spill] sm:$0xff] %v4521_v15  ;;  %10004 = vst [vmem:[#allocation106_spill] sm:$0xff] %v4523_v14  ;;  %v4544_v14 = vmul.f32 -0.00036027873, %v4083_v1  ;;  %v4547_v15 = vmul.f32 -0.00036027873, %v4078_v0 }
  0xa0   :  { %555 = vrot.lane.b32.xlu1 %v4516_v22, %s4005_s26  ;;  %553 = vrot.lane.b32.xlu0 %v4519_v23, %s4005_s26 }
  0xa1   :  { %10009 = vst [vmem:[#allocation111_spill] sm:$0xff] %v4544_v14  ;;  %10010 = vst [vmem:[#allocation112_spill] sm:$0xff] %v4547_v15 }
  0xa2   :  { %v4535_v29 = vpop.permute.xlu1 %238  ;;  %v4537_v28 = vpop.permute.xlu0 %236 }
  0xa3   :  { %10007 = vst [vmem:[#allocation109_spill] sm:$0xff] %v4535_v29  ;;  %10008 = vst [vmem:[#allocation110_spill] sm:$0xff] %v4537_v28  ;;  %v4558_v28 = vmul.f32 0.0002609781, %v4083_v1  ;;  %v4561_v29 = vmul.f32 0.0002609781, %v4078_v0 }
  0xa4   :  { %567 = vrot.lane.b32.xlu1 %v4530_v24, %s4005_s26  ;;  %565 = vrot.lane.b32.xlu0 %v4533_v25, %s4005_s26 }
  0xa5   :  { %10013 = vst [vmem:[#allocation115_spill] sm:$0xff] %v4558_v28  ;;  %10014 = vst [vmem:[#allocation116_spill] sm:$0xff] %v4561_v29 }
  0xa6   :  { %v4549_v31 = vpop.permute.xlu1 %249  ;;  %v4551_v30 = vpop.permute.xlu0 %247 }
  0xa7   :  { %10011 = vst [vmem:[#allocation113_spill] sm:$0xff] %v4549_v31  ;;  %10012 = vst [vmem:[#allocation114_spill] sm:$0xff] %v4551_v30  ;;  %v4572_v30 = vmul.f32 0.000563976, %v4083_v1  ;;  %v4575_v31 = vmul.f32 0.000563976, %v4078_v0 }
  0xa8   :  { %578 = vrot.lane.b32.xlu1 %v4544_v14, %s4005_s26  ;;  %576 = vrot.lane.b32.xlu0 %v4547_v15, %s4005_s26 }
  0xa9   :  { %10017 = vst [vmem:[#allocation119_spill] sm:$0xff] %v4572_v30  ;;  %10018 = vst [vmem:[#allocation120_spill] sm:$0xff] %v4575_v31 }
  0xaa   :  { %v4563_v21 = vpop.permute.xlu1 %261  ;;  %v4565_v20 = vpop.permute.xlu0 %259 }
  0xab   :  { %10015 = vst [vmem:[#allocation117_spill] sm:$0xff] %v4563_v21  ;;  %10016 = vst [vmem:[#allocation118_spill] sm:$0xff] %v4565_v20  ;;  %v4586_v20 = vmul.f32 -0.000621763, %v4083_v1  ;;  %v4589_v21 = vmul.f32 -0.000621763, %v4078_v0 }
  0xac   :  { %589 = vrot.lane.b32.xlu1 %v4558_v28, %s4006_s27  ;;  %587 = vrot.lane.b32.xlu0 %v4561_v29, %s4006_s27 }
  0xad   :  { %10021 = vst [vmem:[#allocation123_spill] sm:$0xff] %v4586_v20  ;;  %10022 = vst [vmem:[#allocation124_spill] sm:$0xff] %v4589_v21 }
  0xae   :  { %v4577_v35 = vpop.permute.xlu1 %272  ;;  %v4579_v34 = vpop.permute.xlu0 %270 }
  0xaf   :  { %10019 = vst [vmem:[#allocation121_spill] sm:$0xff] %v4577_v35  ;;  %10020 = vst [vmem:[#allocation122_spill] sm:$0xff] %v4579_v34  ;;  %v4600_v34 = vmul.f32 0.00067650963, %v4083_v1  ;;  %v4603_v35 = vmul.f32 0.00067650963, %v4078_v0 }
  0xb0   :  { %601 = vrot.lane.b32.xlu1 %v4572_v30, %s4006_s27  ;;  %599 = vrot.lane.b32.xlu0 %v4575_v31, %s4006_s27 }
  0xb1   :  { %10025 = vst [vmem:[#allocation127_spill] sm:$0xff] %v4600_v34  ;;  %10026 = vst [vmem:[#allocation128_spill] sm:$0xff] %v4603_v35 }
  0xb2   :  { %v4591_v37 = vpop.permute.xlu1 %283  ;;  %v4593_v36 = vpop.permute.xlu0 %281 }
  0xb3   :  { %10023 = vst [vmem:[#allocation125_spill] sm:$0xff] %v4591_v37  ;;  %10024 = vst [vmem:[#allocation126_spill] sm:$0xff] %v4593_v36  ;;  %v4614_v36 = vmul.f32 0.0005199911, %v4083_v1  ;;  %v4617_v37 = vmul.f32 0.0005199911, %v4078_v0 }
  0xb4   :  { %612 = vrot.lane.b32.xlu1 %v4586_v20, %s4006_s27  ;;  %610 = vrot.lane.b32.xlu0 %v4589_v21, %s4006_s27 }
  0xb5   :  { %10029 = vst [vmem:[#allocation131_spill] sm:$0xff] %v4614_v36  ;;  %10030 = vst [vmem:[#allocation132_spill] sm:$0xff] %v4617_v37 }
  0xb6   :  { %v4605_v27 = vpop.permute.xlu1 %295  ;;  %v4607_v26 = vpop.permute.xlu0 %293 }
  0xb7   :  { %10027 = vst [vmem:[#allocation129_spill] sm:$0xff] %v4605_v27  ;;  %10028 = vst [vmem:[#allocation130_spill] sm:$0xff] %v4607_v26  ;;  %v4628_v26 = vmul.f32 -0.000932923, %v4083_v1  ;;  %v4631_v27 = vmul.f32 -0.000932923, %v4078_v0 }
  0xb8   :  { %623 = vrot.lane.b32.xlu1 %v4600_v34, %s4007_s28  ;;  %621 = vrot.lane.b32.xlu0 %v4603_v35, %s4007_s28 }
  0xb9   :  { %10033 = vst [vmem:[#allocation135_spill] sm:$0xff] %v4628_v26  ;;  %10034 = vst [vmem:[#allocation136_spill] sm:$0xff] %v4631_v27 }
  0xba   :  { %v4619_v41 = vpop.permute.xlu1 %306  ;;  %v4621_v40 = vpop.permute.xlu0 %304 }
  0xbb   :  { %10031 = vst [vmem:[#allocation133_spill] sm:$0xff] %v4619_v41  ;;  %10032 = vst [vmem:[#allocation134_spill] sm:$0xff] %v4621_v40  ;;  %v4642_v40 = vmul.f32 0.0012492054, %v4083_v1  ;;  %v4645_v41 = vmul.f32 0.0012492054, %v4078_v0 }
  0xbc   :  { %635 = vrot.lane.b32.xlu1 %v4614_v36, %s4007_s28  ;;  %633 = vrot.lane.b32.xlu0 %v4617_v37, %s4007_s28 }
  0xbd   :  { %10037 = vst [vmem:[#allocation139_spill] sm:$0xff] %v4642_v40  ;;  %10038 = vst [vmem:[#allocation140_spill] sm:$0xff] %v4645_v41 }
  0xbe   :  { %v4633_v43 = vpop.permute.xlu1 %317  ;;  %v4635_v42 = vpop.permute.xlu0 %315 }
  0xbf   :  { %10035 = vst [vmem:[#allocation137_spill] sm:$0xff] %v4633_v43  ;;  %10036 = vst [vmem:[#allocation138_spill] sm:$0xff] %v4635_v42  ;;  %v4656_v42 = vmul.f32 0.0002915485, %v4083_v1  ;;  %v4659_v43 = vmul.f32 0.0002915485, %v4078_v0 }
  0xc0   :  { %646 = vrot.lane.b32.xlu1 %v4628_v26, %s4007_s28  ;;  %644 = vrot.lane.b32.xlu0 %v4631_v27, %s4007_s28 }
  0xc1   :  { %10041 = vst [vmem:[#allocation143_spill] sm:$0xff] %v4656_v42  ;;  %10042 = vst [vmem:[#allocation144_spill] sm:$0xff] %v4659_v43 }
  0xc2   :  { %v4647_v33 = vpop.permute.xlu1 %329  ;;  %v4649_v32 = vpop.permute.xlu0 %327 }
  0xc3   :  { %10039 = vst [vmem:[#allocation141_spill] sm:$0xff] %v4647_v33  ;;  %10040 = vst [vmem:[#allocation142_spill] sm:$0xff] %v4649_v32  ;;  %v4670_v32 = vmul.f32 -0.0012437148, %v4083_v1  ;;  %v4673_v33 = vmul.f32 -0.0012437148, %v4078_v0 }
  0xc4   :  { %657 = vrot.lane.b32.xlu1 %v4642_v40, %s4008_s29  ;;  %655 = vrot.lane.b32.xlu0 %v4645_v41, %s4008_s29 }
  0xc5   :  { %10045 = vst [vmem:[#allocation147_spill] sm:$0xff] %v4670_v32  ;;  %10046 = vst [vmem:[#allocation148_spill] sm:$0xff] %v4673_v33 }
  0xc6   :  { %v4661_v47 = vpop.permute.xlu1 %340  ;;  %v4663_v46 = vpop.permute.xlu0 %338 }
  0xc7   :  { %10043 = vst [vmem:[#allocation145_spill] sm:$0xff] %v4661_v47  ;;  %10044 = vst [vmem:[#allocation146_spill] sm:$0xff] %v4663_v46  ;;  %v4684_v46 = vmul.f32 0.0019424016, %v4083_v1  ;;  %v4687_v47 = vmul.f32 0.0019424016, %v4078_v0 }
  0xc8   :  { %669 = vrot.lane.b32.xlu1 %v4656_v42, %s4008_s29  ;;  %667 = vrot.lane.b32.xlu0 %v4659_v43, %s4008_s29 }
  0xc9   :  { %10049 = vst [vmem:[#allocation151_spill] sm:$0xff] %v4684_v46  ;;  %10050 = vst [vmem:[#allocation152_spill] sm:$0xff] %v4687_v47 }
  0xca   :  { %v4675_v49 = vpop.permute.xlu1 %351  ;;  %v4677_v48 = vpop.permute.xlu0 %349 }
  0xcb   :  { %10047 = vst [vmem:[#allocation149_spill] sm:$0xff] %v4675_v49  ;;  %10048 = vst [vmem:[#allocation150_spill] sm:$0xff] %v4677_v48  ;;  %v4698_v48 = vmul.f32 -0.00019479285, %v4083_v1  ;;  %v4701_v49 = vmul.f32 -0.00019479285, %v4078_v0 }
  0xcc   :  { %680 = vrot.lane.b32.xlu1 %v4670_v32, %s4008_s29  ;;  %678 = vrot.lane.b32.xlu0 %v4673_v33, %s4008_s29 }
  0xcd   :  { %10053 = vst [vmem:[#allocation155_spill] sm:$0xff] %v4698_v48  ;;  %10054 = vst [vmem:[#allocation156_spill] sm:$0xff] %v4701_v49 }
  0xce   :  { %v4689_v39 = vpop.permute.xlu1 %363  ;;  %v4691_v38 = vpop.permute.xlu0 %361 }
  0xcf   :  { %10051 = vst [vmem:[#allocation153_spill] sm:$0xff] %v4689_v39  ;;  %10052 = vst [vmem:[#allocation154_spill] sm:$0xff] %v4691_v38  ;;  %v4712_v38 = vmul.f32 -0.0014701064, %v4083_v1  ;;  %v4715_v39 = vmul.f32 -0.0014701064, %v4078_v0 }
  0xd0   :  { %691 = vrot.lane.b32.xlu1 %v4684_v46, %s4009_s30  ;;  %689 = vrot.lane.b32.xlu0 %v4687_v47, %s4009_s30 }
  0xd1   :  { %10057 = vst [vmem:[#allocation159_spill] sm:$0xff] %v4712_v38  ;;  %10058 = vst [vmem:[#allocation160_spill] sm:$0xff] %v4715_v39 }
  0xd2   :  { %v4703_v53 = vpop.permute.xlu1 %374  ;;  %v4705_v52 = vpop.permute.xlu0 %372 }
  0xd3   :  { %10055 = vst [vmem:[#allocation157_spill] sm:$0xff] %v4703_v53  ;;  %10056 = vst [vmem:[#allocation158_spill] sm:$0xff] %v4705_v52  ;;  %v4726_v52 = vmul.f32 0.0026669533, %v4083_v1  ;;  %v4729_v53 = vmul.f32 0.0026669533, %v4078_v0 }
  0xd4   :  { %703 = vrot.lane.b32.xlu1 %v4698_v48, %s4009_s30  ;;  %701 = vrot.lane.b32.xlu0 %v4701_v49, %s4009_s30 }
  0xd5   :  { %10061 = vst [vmem:[#allocation163_spill] sm:$0xff] %v4726_v52  ;;  %10062 = vst [vmem:[#allocation164_spill] sm:$0xff] %v4729_v53 }
  0xd6   :  { %v4717_v55 = vpop.permute.xlu1 %385  ;;  %v4719_v54 = vpop.permute.xlu0 %383 }
  0xd7   :  { %10059 = vst [vmem:[#allocation161_spill] sm:$0xff] %v4717_v55  ;;  %10060 = vst [vmem:[#allocation162_spill] sm:$0xff] %v4719_v54  ;;  %v4740_v54 = vmul.f32 -0.0009937759, %v4083_v1  ;;  %v4743_v55 = vmul.f32 -0.0009937759, %v4078_v0 }
  0xd8   :  { %714 = vrot.lane.b32.xlu1 %v4712_v38, %s4009_s30  ;;  %712 = vrot.lane.b32.xlu0 %v4715_v39, %s4009_s30 }
  0xd9   :  { %10065 = vst [vmem:[#allocation167_spill] sm:$0xff] %v4740_v54  ;;  %10066 = vst [vmem:[#allocation168_spill] sm:$0xff] %v4743_v55 }
  0xda   :  { %v4731_v45 = vpop.permute.xlu1 %397  ;;  %v4733_v44 = vpop.permute.xlu0 %395 }
  0xdb   :  { %10063 = vst [vmem:[#allocation165_spill] sm:$0xff] %v4731_v45  ;;  %10064 = vst [vmem:[#allocation166_spill] sm:$0xff] %v4733_v44  ;;  %v4754_v44 = vmul.f32 -0.0014957603, %v4083_v1  ;;  %v4757_v45 = vmul.f32 -0.0014957603, %v4078_v0 }
  0xdc   :  { %725 = vrot.lane.b32.xlu1 %v4726_v52, %s4010_s3  ;;  %723 = vrot.lane.b32.xlu0 %v4729_v53, %s4010_s3 }
  0xdd   :  { %10069 = vst [vmem:[#allocation171_spill] sm:$0xff] %v4754_v44  ;;  %10070 = vst [vmem:[#allocation172_spill] sm:$0xff] %v4757_v45 }
  0xde   :  { %v4745_v59 = vpop.permute.xlu1 %408  ;;  %v4747_v58 = vpop.permute.xlu0 %406 }
  0xdf   :  { %10067 = vst [vmem:[#allocation169_spill] sm:$0xff] %v4745_v59  ;;  %10068 = vst [vmem:[#allocation170_spill] sm:$0xff] %v4747_v58  ;;  %v4768_v58 = vmul.f32 0.003274255, %v4083_v1  ;;  %v4771_v59 = vmul.f32 0.003274255, %v4078_v0 }
  0xe0   :  { %737 = vrot.lane.b32.xlu1 %v4740_v54, %s4010_s3  ;;  %735 = vrot.lane.b32.xlu0 %v4743_v55, %s4010_s3 }
  0xe1   :  { %10073 = vst [vmem:[#allocation175_spill] sm:$0xff] %v4768_v58  ;;  %10074 = vst [vmem:[#allocation176_spill] sm:$0xff] %v4771_v59 }
  0xe2   :  { %v4759_v61 = vpop.permute.xlu1 %419  ;;  %v4761_v60 = vpop.permute.xlu0 %417 }
  0xe3   :  { %10071 = vst [vmem:[#allocation173_spill] sm:$0xff] %v4759_v61  ;;  %10072 = vst [vmem:[#allocation174_spill] sm:$0xff] %v4761_v60  ;;  %v4782_v60 = vmul.f32 -0.002118225, %v4083_v1  ;;  %v4785_v61 = vmul.f32 -0.002118225, %v4078_v0 }
  0xe4   :  { %748 = vrot.lane.b32.xlu1 %v4754_v44, %s4010_s3  ;;  %746 = vrot.lane.b32.xlu0 %v4757_v45, %s4010_s3 }
  0xe5   :  { %10077 = vst [vmem:[#allocation179_spill] sm:$0xff] %v4782_v60  ;;  %10078 = vst [vmem:[#allocation180_spill] sm:$0xff] %v4785_v61 }
  0xe6   :  { %v4773_v51 = vpop.permute.xlu1 %431  ;;  %v4775_v50 = vpop.permute.xlu0 %429 }
  0xe7   :  { %10075 = vst [vmem:[#allocation177_spill] sm:$0xff] %v4773_v51  ;;  %10076 = vst [vmem:[#allocation178_spill] sm:$0xff] %v4775_v50  ;;  %v4796_v50 = vmul.f32 -0.0011825471, %v4083_v1  ;;  %v4799_v51 = vmul.f32 -0.0011825471, %v4078_v0 }
  0xe8   :  { %759 = vrot.lane.b32.xlu1 %v4768_v58, %s4011_s4  ;;  %757 = vrot.lane.b32.xlu0 %v4771_v59, %s4011_s4 }
  0xe9   :  { %10081 = vst [vmem:[#allocation183_spill] sm:$0xff] %v4796_v50  ;;  %10082 = vst [vmem:[#allocation184_spill] sm:$0xff] %v4799_v51 }
  0xea   :  { %v4787_v63 = vpop.permute.xlu1 %442  ;;  %v4789_v62 = vpop.permute.xlu0 %440 }
  0xeb   :  { %10079 = vst [vmem:[#allocation181_spill] sm:$0xff] %v4787_v63  ;;  %10080 = vst [vmem:[#allocation182_spill] sm:$0xff] %v4789_v62  ;;  %v4810_v62 = vmul.f32 0.003559191, %v4083_v1  ;;  %v4813_v63 = vmul.f32 0.003559191, %v4078_v0 }
  0xec   :  { %771 = vrot.lane.b32.xlu1 %v4782_v60, %s4011_s4  ;;  %769 = vrot.lane.b32.xlu0 %v4785_v61, %s4011_s4 }
  0xed   :  { %10085 = vst [vmem:[#allocation187_spill] sm:$0xff] %v4810_v62  ;;  %10086 = vst [vmem:[#allocation188_spill] sm:$0xff] %v4813_v63 }
  0xee   :  { %v4801_v6 = vpop.permute.xlu1 %453  ;;  %v4803_v7 = vpop.permute.xlu0 %451 }
  0xef   :  { %10083 = vst [vmem:[#allocation185_spill] sm:$0xff] %v4801_v6  ;;  %10084 = vst [vmem:[#allocation186_spill] sm:$0xff] %v4803_v7  ;;  %v4824_v7 = vmul.f32 -0.003514634, %v4083_v1  ;;  %v4827_v6 = vmul.f32 -0.003514634, %v4078_v0 }
  0xf0   :  { %782 = vrot.lane.b32.xlu1 %v4796_v50, %s4011_s4  ;;  %780 = vrot.lane.b32.xlu0 %v4799_v51, %s4011_s4 }
  0xf1   :  { %10089 = vst [vmem:[#allocation191_spill] sm:$0xff] %v4824_v7  ;;  %10090 = vst [vmem:[#allocation192_spill] sm:$0xff] %v4827_v6 }
  0xf2   :  { %v4815_v57 = vpop.permute.xlu1 %465  ;;  %v4817_v56 = vpop.permute.xlu0 %463 }
  0xf3   :  { %10087 = vst [vmem:[#allocation189_spill] sm:$0xff] %v4815_v57  ;;  %10088 = vst [vmem:[#allocation190_spill] sm:$0xff] %v4817_v56  ;;  %v4838_v56 = vmul.f32 -0.00039092245, %v4083_v1  ;;  %v4841_v57 = vmul.f32 -0.00039092245, %v4078_v0 }
  0xf4   :  { %793 = vrot.lane.b32.xlu1 %v4810_v62, %s4012_s5  ;;  %791 = vrot.lane.b32.xlu0 %v4813_v63, %s4012_s5 }
  0xf5   :  { %10093 = vst [vmem:[#allocation195_spill] sm:$0xff] %v4838_v56  ;;  %10094 = vst [vmem:[#allocation196_spill] sm:$0xff] %v4841_v57 }
  0xf6   :  { %v4829_v13 = vpop.permute.xlu1 %476  ;;  %v4831_v12 = vpop.permute.xlu0 %474 }
  0xf7   :  { %10091 = vst [vmem:[#allocation193_spill] sm:$0xff] %v4829_v13  ;;  %10092 = vst [vmem:[#allocation194_spill] sm:$0xff] %v4831_v12  ;;  %v4852_v12 = vmul.f32 0.003275734, %v4083_v1  ;;  %v4855_v13 = vmul.f32 0.003275734, %v4078_v0 }
  0xf8   :  { %805 = vrot.lane.b32.xlu1 %v4824_v7, %s4012_s5  ;;  %803 = vrot.lane.b32.xlu0 %v4827_v6, %s4012_s5 }
  0xf9   :  { %10097 = vst [vmem:[#allocation199_spill] sm:$0xff] %v4852_v12  ;;  %10098 = vst [vmem:[#allocation200_spill] sm:$0xff] %v4855_v13 }
  0xfa   :  { %v4843_v3 = vpop.permute.xlu1 %487  ;;  %v4845_v5 = vpop.permute.xlu0 %485 }
  0xfb   :  { %10095 = vst [vmem:[#allocation197_spill] sm:$0xff] %v4843_v3  ;;  %10096 = vst [vmem:[#allocation198_spill] sm:$0xff] %v4845_v5  ;;  %v4866_v5 = vmul.f32 -0.0050424594, %v4083_v1  ;;  %v4869_v3 = vmul.f32 -0.0050424594, %v4078_v0 }
  0xfc   :  { %816 = vrot.lane.b32.xlu1 %v4838_v56, %s4012_s5  ;;  %814 = vrot.lane.b32.xlu0 %v4841_v57, %s4012_s5 }
  0xfd   :  { %10101 = vst [vmem:[#allocation203_spill] sm:$0xff] %v4866_v5  ;;  %10102 = vst [vmem:[#allocation204_spill] sm:$0xff] %v4869_v3 }
  0xfe   :  { %v4857_v4 = vpop.permute.xlu1 %499  ;;  %v4859_v2 = vpop.permute.xlu0 %497 }
  0xff   :  { %10099 = vst [vmem:[#allocation201_spill] sm:$0xff] %v4857_v4  ;;  %10100 = vst [vmem:[#allocation202_spill] sm:$0xff] %v4859_v2  ;;  %v4880_v2 = vmul.f32 0.0009906024, %v4083_v1  ;;  %v4883_v4 = vmul.f32 0.0009906024, %v4078_v0 }
 0x100   :  { %827 = vrot.lane.b32.xlu1 %v4852_v12, %s4013_s6  ;;  %825 = vrot.lane.b32.xlu0 %v4855_v13, %s4013_s6 }
 0x101   :  { %10105 = vst [vmem:[#allocation207_spill] sm:$0xff] %v4880_v2  ;;  %10106 = vst [vmem:[#allocation208_spill] sm:$0xff] %v4883_v4 }
 0x102   :  { %v4871_v19 = vpop.permute.xlu1 %510  ;;  %v4873_v18 = vpop.permute.xlu0 %508 }
 0x103   :  { %10103 = vst [vmem:[#allocation205_spill] sm:$0xff] %v4871_v19  ;;  %10104 = vst [vmem:[#allocation206_spill] sm:$0xff] %v4873_v18  ;;  %v4894_v18 = vmul.f32 0.0021659709, %v4083_v1  ;;  %v4897_v19 = vmul.f32 0.0021659709, %v4078_v0 }
 0x104   :  { %839 = vrot.lane.b32.xlu1 %v4866_v5, %s4013_s6  ;;  %837 = vrot.lane.b32.xlu0 %v4869_v3, %s4013_s6 }
 0x105   :  { %10109 = vst [vmem:[#allocation211_spill] sm:$0xff] %v4897_v19 }
 0x106   :  { %v4885_v9 = vpop.permute.xlu1 %521  ;;  %v4887_v8 = vpop.permute.xlu0 %519 }
 0x107   :  { %10107 = vst [vmem:[#allocation209_spill] sm:$0xff] %v4885_v9  ;;  %10108 = vst [vmem:[#allocation210_spill] sm:$0xff] %v4887_v8  ;;  %v4908_v8 = vmul.f32 -0.0064623677, %v4083_v1  ;;  %v4911_v9 = vmul.f32 -0.0064623677, %v4078_v0 }
 0x108   :  { %850 = vrot.lane.b32.xlu1 %v4880_v2, %s4013_s6  ;;  %848 = vrot.lane.b32.xlu0 %v4883_v4, %s4013_s6 }
 0x109   :  { %10112 = vst [vmem:[#allocation214_spill] sm:$0xff] %v4908_v8  ;;  %10113 = vst [vmem:[#allocation215_spill] sm:$0xff] %v4911_v9 }
 0x10a   :  { %v4899_v11 = vpop.permute.xlu1 %533  ;;  %v4901_v10 = vpop.permute.xlu0 %531 }
 0x10b   :  { %10110 = vst [vmem:[#allocation212_spill] sm:$0xff] %v4899_v11  ;;  %10111 = vst [vmem:[#allocation213_spill] sm:$0xff] %v4901_v10  ;;  %v4922_v10 = vmul.f32 0.0030099992, %v4083_v1  ;;  %v4925_v11 = vmul.f32 0.0030099992, %v4078_v0 }
 0x10c   :  { %861 = vrot.lane.b32.xlu1 %v4894_v18, %s9704_s7  ;;  %859 = vrot.lane.b32.xlu0 %v4897_v19, %s9704_s7 }
 0x10d   :  { %10116 = vst [vmem:[#allocation218_spill] sm:$0xff] %v4922_v10  ;;  %10117 = vst [vmem:[#allocation219_spill] sm:$0xff] %v4925_v11 }
 0x10e   :  { %v4913_v25 = vpop.permute.xlu1 %544  ;;  %v4915_v24 = vpop.permute.xlu0 %542 }
 0x10f   :  { %10114 = vst [vmem:[#allocation216_spill] sm:$0xff] %v4913_v25  ;;  %10115 = vst [vmem:[#allocation217_spill] sm:$0xff] %v4915_v24  ;;  %v4936_v24 = vmul.f32 -1.2473742e-08, %v4083_v1  ;;  %v4939_v25 = vmul.f32 -1.2473742e-08, %v4078_v0 }
 0x110   :  { %873 = vrot.lane.b32.xlu1 %v4908_v8, %s9704_s7  ;;  %871 = vrot.lane.b32.xlu0 %v4911_v9, %s9704_s7 }
 0x112   :  { %v4927_v15 = vpop.permute.xlu1 %555  ;;  %v4929_v14 = vpop.permute.xlu0 %553 }
 0x113   :  { %10118 = vst [vmem:[#allocation220_spill] sm:$0xff] %v4927_v15  ;;  %10119 = vst [vmem:[#allocation221_spill] sm:$0xff] %v4929_v14  ;;  %v4950_v14 = vmul.f32 -0.0074376115, %v4083_v1  ;;  %v4953_v15 = vmul.f32 -0.0074376115, %v4078_v0 }
 0x114   :  { %884 = vrot.lane.b32.xlu1 %v4922_v10, %s9704_s7  ;;  %882 = vrot.lane.b32.xlu0 %v4925_v11, %s9704_s7  ;;  %s4059_s7 = smov 60  }
 0x115   :  { %10122 = vst [vmem:[#allocation224_spill] sm:$0xff] %v4950_v14  ;;  %10123 = vst [vmem:[#allocation225_spill] sm:$0xff] %v4953_v15 }
 0x116   :  { %v4941_v17 = vpop.permute.xlu1 %567  ;;  %v4943_v16 = vpop.permute.xlu0 %565 }
 0x117   :  { %10120 = vst [vmem:[#allocation222_spill] sm:$0xff] %v4941_v17  ;;  %10121 = vst [vmem:[#allocation223_spill] sm:$0xff] %v4943_v16  ;;  %v4964_v16 = vmul.f32 0.0056153317, %v4083_v1  ;;  %v4967_v17 = vmul.f32 0.0056153317, %v4078_v0 }
 0x118   :  { %895 = vrot.lane.b32.xlu1 %v4936_v24, %s9609_s8  ;;  %893 = vrot.lane.b32.xlu0 %v4939_v25, %s9609_s8 }
 0x119   :  { %10126 = vst [vmem:[#allocation228_spill] sm:$0xff] %v4964_v16  ;;  %10127 = vst [vmem:[#allocation229_spill] sm:$0xff] %v4967_v17 }
 0x11a   :  { %v4955_v31 = vpop.permute.xlu1 %578  ;;  %v4957_v30 = vpop.permute.xlu0 %576 }
 0x11b   :  { %10124 = vst [vmem:[#allocation226_spill] sm:$0xff] %v4955_v31  ;;  %10125 = vst [vmem:[#allocation227_spill] sm:$0xff] %v4957_v30  ;;  %v4978_v30 = vmul.f32 -0.0033784953, %v4083_v1  ;;  %v4981_v31 = vmul.f32 -0.0033784953, %v4078_v0 }
 0x11c   :  { %907 = vrot.lane.b32.xlu1 %v4950_v14, %s9609_s8  ;;  %905 = vrot.lane.b32.xlu0 %v4953_v15, %s9609_s8 }
 0x11e   :  { %v4969_v21 = vpop.permute.xlu1 %589  ;;  %v4971_v20 = vpop.permute.xlu0 %587 }
 0x11f   :  { %10128 = vst [vmem:[#allocation230_spill] sm:$0xff] %v4969_v21  ;;  %10129 = vst [vmem:[#allocation231_spill] sm:$0xff] %v4971_v20  ;;  %v4992_v20 = vmul.f32 -0.007550222, %v4083_v1  ;;  %v4995_v21 = vmul.f32 -0.007550222, %v4078_v0 }
 0x120   :  { %918 = vrot.lane.b32.xlu1 %v4964_v16, %s9609_s8  ;;  %916 = vrot.lane.b32.xlu0 %v4967_v17, %s9609_s8  ;;  %s9700_s8 = smov 96  }
 0x122   :  { %v4983_v23 = vpop.permute.xlu1 %601  ;;  %v4985_v22 = vpop.permute.xlu0 %599 }
 0x123   :  { %10130 = vst [vmem:[#allocation232_spill] sm:$0xff] %v4983_v23  ;;  %10131 = vst [vmem:[#allocation233_spill] sm:$0xff] %v4985_v22  ;;  %v5006_v22 = vmul.f32 0.008623583, %v4083_v1  ;;  %v5009_v23 = vmul.f32 0.008623583, %v4078_v0 }
 0x124   :  { %929 = vrot.lane.b32.xlu1 %v4978_v30, %s9607_s9  ;;  %927 = vrot.lane.b32.xlu0 %v4981_v31, %s9607_s9 }
 0x126   :  { %v4997_v37 = vpop.permute.xlu1 %612  ;;  %v4999_v36 = vpop.permute.xlu0 %610 }
 0x127   :  { %10132 = vst [vmem:[#allocation234_spill] sm:$0xff] %v4997_v37  ;;  %10133 = vst [vmem:[#allocation235_spill] sm:$0xff] %v4999_v36  ;;  %v5020_v36 = vmul.f32 -0.008008476, %v4083_v1  ;;  %v5023_v37 = vmul.f32 -0.008008476, %v4078_v0 }
 0x128   :  { %941 = vrot.lane.b32.xlu1 %v4992_v20, %s9607_s9  ;;  %939 = vrot.lane.b32.xlu0 %v4995_v21, %s9607_s9 }
 0x12a   :  { %v5011_v27 = vpop.permute.xlu1 %623  ;;  %v5013_v26 = vpop.permute.xlu0 %621 }
 0x12b   :  { %10134 = vst [vmem:[#allocation236_spill] sm:$0xff] %v5011_v27  ;;  %10135 = vst [vmem:[#allocation237_spill] sm:$0xff] %v5013_v26  ;;  %v5034_v26 = vmul.f32 -0.006329614, %v4083_v1  ;;  %v5037_v27 = vmul.f32 -0.006329614, %v4078_v0 }
 0x12c   :  { %952 = vrot.lane.b32.xlu1 %v5006_v22, %s9607_s9  ;;  %950 = vrot.lane.b32.xlu0 %v5009_v23, %s9607_s9  ;;  %s9698_s9 = smov 95  }
 0x12e   :  { %v5025_v29 = vpop.permute.xlu1 %635  ;;  %v5027_v28 = vpop.permute.xlu0 %633 }
 0x12f   :  { %10136 = vst [vmem:[#allocation238_spill] sm:$0xff] %v5025_v29  ;;  %10137 = vst [vmem:[#allocation239_spill] sm:$0xff] %v5027_v28  ;;  %v5048_v28 = vmul.f32 0.011699703, %v4083_v1  ;;  %v5051_v29 = vmul.f32 0.011699703, %v4078_v0 }
 0x130   :  { %963 = vrot.lane.b32.xlu1 %v5020_v36, %s9605_s10  ;;  %961 = vrot.lane.b32.xlu0 %v5023_v37, %s9605_s10 }
 0x132   :  { %v5039_v43 = vpop.permute.xlu1 %646  ;;  %v5041_v42 = vpop.permute.xlu0 %644 }
 0x133   :  { %10138 = vst [vmem:[#allocation240_spill] sm:$0xff] %v5039_v43  ;;  %10139 = vst [vmem:[#allocation241_spill] sm:$0xff] %v5041_v42  ;;  %v5062_v42 = vmul.f32 -0.0137790395, %v4083_v1  ;;  %v5065_v43 = vmul.f32 -0.0137790395, %v4078_v0 }
 0x134   :  { %975 = vrot.lane.b32.xlu1 %v5034_v26, %s9605_s10  ;;  %973 = vrot.lane.b32.xlu0 %v5037_v27, %s9605_s10 }
 0x136   :  { %v5053_v33 = vpop.permute.xlu1 %657  ;;  %v5055_v32 = vpop.permute.xlu0 %655 }
 0x137   :  { %10140 = vst [vmem:[#allocation242_spill] sm:$0xff] %v5053_v33  ;;  %10141 = vst [vmem:[#allocation243_spill] sm:$0xff] %v5055_v32  ;;  %v5076_v32 = vmul.f32 -0.0032851957, %v4083_v1  ;;  %v5079_v33 = vmul.f32 -0.0032851957, %v4078_v0 }
 0x138   :  { %986 = vrot.lane.b32.xlu1 %v5048_v28, %s9605_s10  ;;  %984 = vrot.lane.b32.xlu0 %v5051_v29, %s9605_s10  ;;  %s9632_s10 = smov 94  }
 0x13a   :  { %v5067_v35 = vpop.permute.xlu1 %669  ;;  %v5069_v34 = vpop.permute.xlu0 %667 }
 0x13b   :  { %10142 = vst [vmem:[#allocation244_spill] sm:$0xff] %v5067_v35  ;;  %10143 = vst [vmem:[#allocation245_spill] sm:$0xff] %v5069_v34  ;;  %v5090_v34 = vmul.f32 0.014348399, %v4083_v1  ;;  %v5093_v35 = vmul.f32 0.014348399, %v4078_v0 }
 0x13c   :  { %997 = vrot.lane.b32.xlu1 %v5062_v42, %s9589_s11  ;;  %995 = vrot.lane.b32.xlu0 %v5065_v43, %s9589_s11 }
 0x13e   :  { %v5081_v49 = vpop.permute.xlu1 %680  ;;  %v5083_v48 = vpop.permute.xlu0 %678 }
 0x13f   :  { %10144 = vst [vmem:[#allocation246_spill] sm:$0xff] %v5081_v49  ;;  %10145 = vst [vmem:[#allocation247_spill] sm:$0xff] %v5083_v48  ;;  %v5104_v48 = vmul.f32 -0.020415267, %v4083_v1  ;;  %v5107_v49 = vmul.f32 -0.020415267, %v4078_v0 }
 0x140   :  { %1009 = vrot.lane.b32.xlu1 %v5076_v32, %s9589_s11  ;;  %1007 = vrot.lane.b32.xlu0 %v5079_v33, %s9589_s11 }
 0x142   :  { %v5095_v39 = vpop.permute.xlu1 %691  ;;  %v5097_v38 = vpop.permute.xlu0 %689 }
 0x143   :  { %10146 = vst [vmem:[#allocation248_spill] sm:$0xff] %v5095_v39  ;;  %10147 = vst [vmem:[#allocation249_spill] sm:$0xff] %v5097_v38  ;;  %v5118_v38 = vmul.f32 0.0020745376, %v4083_v1  ;;  %v5121_v39 = vmul.f32 0.0020745376, %v4078_v0 }
 0x144   :  { %1020 = vrot.lane.b32.xlu1 %v5090_v34, %s9589_s11  ;;  %1018 = vrot.lane.b32.xlu0 %v5093_v35, %s9589_s11  ;;  %s9603_s11 = smov 99  }
 0x146   :  { %v5109_v41 = vpop.permute.xlu1 %703  ;;  %v5111_v40 = vpop.permute.xlu0 %701 }
 0x147   :  { %10148 = vst [vmem:[#allocation250_spill] sm:$0xff] %v5109_v41  ;;  %10149 = vst [vmem:[#allocation251_spill] sm:$0xff] %v5111_v40  ;;  %v5132_v40 = vmul.f32 0.015913138, %v4083_v1  ;;  %v5135_v41 = vmul.f32 0.015913138, %v4078_v0 }
 0x148   :  { %1031 = vrot.lane.b32.xlu1 %v5104_v48, %s9597_s12  ;;  %1029 = vrot.lane.b32.xlu0 %v5107_v49, %s9597_s12 }
 0x14a   :  { %v5123_v55 = vpop.permute.xlu1 %714  ;;  %v5125_v54 = vpop.permute.xlu0 %712 }
 0x14b   :  { %10150 = vst [vmem:[#allocation252_spill] sm:$0xff] %v5123_v55  ;;  %10151 = vst [vmem:[#allocation253_spill] sm:$0xff] %v5125_v54  ;;  %v5146_v54 = vmul.f32 -0.027489418, %v4083_v1  ;;  %v5149_v55 = vmul.f32 -0.027489418, %v4078_v0 }
 0x14c   :  { %1043 = vrot.lane.b32.xlu1 %v5118_v38, %s9597_s12  ;;  %1041 = vrot.lane.b32.xlu0 %v5121_v39, %s9597_s12 }
 0x14e   :  { %v5137_v45 = vpop.permute.xlu1 %725  ;;  %v5139_v44 = vpop.permute.xlu0 %723 }
 0x14f   :  { %10152 = vst [vmem:[#allocation254_spill] sm:$0xff] %v5137_v45  ;;  %10153 = vst [vmem:[#allocation255_spill] sm:$0xff] %v5139_v44  ;;  %v5160_v44 = vmul.f32 0.010271259, %v4083_v1  ;;  %v5163_v45 = vmul.f32 0.010271259, %v4078_v0 }
 0x150   :  { %1054 = vrot.lane.b32.xlu1 %v5132_v40, %s9597_s12  ;;  %1052 = vrot.lane.b32.xlu0 %v5135_v41, %s9597_s12  ;;  %s9611_s12 = smov 98  }
 0x152   :  { %v5151_v47 = vpop.permute.xlu1 %737  ;;  %v5153_v46 = vpop.permute.xlu0 %735 }
 0x153   :  { %10154 = vst [vmem:[#allocation256_spill] sm:$0xff] %v5151_v47  ;;  %10155 = vst [vmem:[#allocation257_spill] sm:$0xff] %v5153_v46  ;;  %v5174_v46 = vmul.f32 0.015562521, %v4083_v1  ;;  %v5177_v47 = vmul.f32 0.015562521, %v4078_v0 }
 0x154   :  { %1065 = vrot.lane.b32.xlu1 %v5146_v54, %s9603_s11  ;;  %1063 = vrot.lane.b32.xlu0 %v5149_v55, %s9603_s11 }
 0x156   :  { %v5165_v61 = vpop.permute.xlu1 %748  ;;  %v5167_v60 = vpop.permute.xlu0 %746 }
 0x157   :  { %10156 = vst [vmem:[#allocation258_spill] sm:$0xff] %v5165_v61  ;;  %10157 = vst [vmem:[#allocation259_spill] sm:$0xff] %v5167_v60  ;;  %v5188_v60 = vmul.f32 -0.03445763, %v4083_v1  ;;  %v5191_v61 = vmul.f32 -0.03445763, %v4078_v0 }
 0x158   :  { %1077 = vrot.lane.b32.xlu1 %v5160_v44, %s9603_s11  ;;  %1075 = vrot.lane.b32.xlu0 %v5163_v45, %s9603_s11 }
 0x15a   :  { %v5179_v51 = vpop.permute.xlu1 %759  ;;  %v5181_v50 = vpop.permute.xlu0 %757 }
 0x15b   :  { %10158 = vst [vmem:[#allocation260_spill] sm:$0xff] %v5179_v51  ;;  %10159 = vst [vmem:[#allocation261_spill] sm:$0xff] %v5181_v50  ;;  %v5202_v50 = vmul.f32 0.022015996, %v4083_v1  ;;  %v5205_v51 = vmul.f32 0.022015996, %v4078_v0 }
 0x15c   :  { %1088 = vrot.lane.b32.xlu1 %v5174_v46, %s9603_s11  ;;  %1086 = vrot.lane.b32.xlu0 %v5177_v47, %s9603_s11  ;;  %s9634_s11 = smov 93  }
 0x15e   :  { %v5193_v53 = vpop.permute.xlu1 %771  ;;  %v5195_v52 = vpop.permute.xlu0 %769 }
 0x15f   :  { %10160 = vst [vmem:[#allocation262_spill] sm:$0xff] %v5193_v53  ;;  %10161 = vst [vmem:[#allocation263_spill] sm:$0xff] %v5195_v52  ;;  %v5216_v52 = vmul.f32 0.012209265, %v4083_v1  ;;  %v5219_v53 = vmul.f32 0.012209265, %v4078_v0 }
 0x160   :  { %1099 = vrot.lane.b32.xlu1 %v5188_v60, %s9611_s12  ;;  %1097 = vrot.lane.b32.xlu0 %v5191_v61, %s9611_s12  ;;  %v5240_v0 = vld [vmem:[%s9474_s0] sm:$0xff] }
 0x161   :  { %v5257_v58 = vmul.f32 0.038748093, %v5240_v0 }
 0x162   :  { %v5207_v6 = vpop.permute.xlu1 %782  ;;  %v5209_v7 = vpop.permute.xlu0 %780 }
 0x163   :  { %10162 = vst [vmem:[#allocation264_spill] sm:$0xff] %v5207_v6  ;;  %10163 = vst [vmem:[#allocation265_spill] sm:$0xff] %v5209_v7  ;;  %v5232_v7 = vld [vmem:[%s9475_s1 + $0x8] sm:$0xff] }
 0x164   :  { %1111 = vrot.lane.b32.xlu1 %v5202_v50, %s9611_s12  ;;  %1109 = vrot.lane.b32.xlu0 %v5205_v51, %s9611_s12  ;;  %v5235_v1 = vmul.f32 -0.04071995, %v5232_v7  ;;  %v5254_v59 = vmul.f32 0.038748093, %v5232_v7 }
 0x166   :  { %v5221_v57 = vpop.permute.xlu1 %793  ;;  %v5223_v56 = vpop.permute.xlu0 %791 }
 0x167   :  { %10164 = vst [vmem:[#allocation266_spill] sm:$0xff] %v5221_v57  ;;  %10165 = vst [vmem:[#allocation267_spill] sm:$0xff] %v5223_v56  ;;  %v5243_v56 = vmul.f32 -0.04071995, %v5240_v0 }
 0x168   :  { %1122 = vrot.lane.b32.xlu1 %v5216_v52, %s9611_s12  ;;  %1120 = vrot.lane.b32.xlu0 %v5219_v53, %s9611_s12  ;;  %s9702_s12 = smov 97  }
 0x16a   :  { %v5245_v57 = vpop.permute.xlu1 %805  ;;  %v5247_v6 = vpop.permute.xlu0 %803 }
 0x16b   :  { %10166 = vst [vmem:[#allocation268_spill] sm:$0xff] %v5245_v57  ;;  %10167 = vst [vmem:[#allocation269_spill] sm:$0xff] %v5247_v6  ;;  %v5268_v6 = vmul.f32 0.0041939016, %v5232_v7  ;;  %v5271_v57 = vmul.f32 0.0041939016, %v5240_v0 }
 0x16c   :  { %1133 = vrot.lane.b32.xlu1 %v5235_v1, %s9702_s12  ;;  %1131 = vrot.lane.b32.xlu0 %v5243_v56, %s9702_s12 }
 0x16e   :  { %v5259_v3 = vpop.permute.xlu1 %816  ;;  %v5261_v5 = vpop.permute.xlu0 %814 }
 0x16f   :  { %10168 = vst [vmem:[#allocation270_spill] sm:$0xff] %v5259_v3  ;;  %10169 = vst [vmem:[#allocation271_spill] sm:$0xff] %v5261_v5  ;;  %v5282_v5 = vmul.f32 -0.045694508, %v5232_v7  ;;  %v5285_v3 = vmul.f32 -0.045694508, %v5240_v0 }
 0x170   :  { %1145 = vrot.lane.b32.xlu1 %v5254_v59, %s9702_s12  ;;  %1143 = vrot.lane.b32.xlu0 %v5257_v58, %s9702_s12 }
 0x172   :  { %v5273_v4 = vpop.permute.xlu1 %827  ;;  %v5275_v2 = vpop.permute.xlu0 %825 }
 0x173   :  { %10170 = vst [vmem:[#allocation272_spill] sm:$0xff] %v5273_v4  ;;  %10171 = vst [vmem:[#allocation273_spill] sm:$0xff] %v5275_v2  ;;  %v5296_v2 = vmul.f32 0.06463014, %v5232_v7  ;;  %v5299_v4 = vmul.f32 0.06463014, %v5240_v0 }
 0x174   :  { %1156 = vrot.lane.b32.xlu1 %v5268_v6, %s9702_s12  ;;  %1154 = vrot.lane.b32.xlu0 %v5271_v57, %s9702_s12  ;;  %s10902_s12 = smov 87  }
 0x176   :  { %v5287_v63 = vpop.permute.xlu1 %839  ;;  %v5289_v62 = vpop.permute.xlu0 %837 }
 0x177   :  { %10172 = vst [vmem:[#allocation274_spill] sm:$0xff] %v5287_v63  ;;  %10173 = vst [vmem:[#allocation275_spill] sm:$0xff] %v5289_v62  ;;  %v5310_v62 = vmul.f32 -0.011903762, %v5232_v7  ;;  %v5313_v63 = vmul.f32 -0.011903762, %v5240_v0 }
 0x178   :  { %1167 = vrot.lane.b32.xlu1 %v5282_v5, %s9700_s8  ;;  %1165 = vrot.lane.b32.xlu0 %v5285_v3, %s9700_s8 }
 0x17a   :  { %v5301_v9 = vpop.permute.xlu1 %850  ;;  %v5303_v8 = vpop.permute.xlu0 %848 }
 0x17b   :  { %10174 = vst [vmem:[#allocation276_spill] sm:$0xff] %v5301_v9  ;;  %10175 = vst [vmem:[#allocation277_spill] sm:$0xff] %v5303_v8  ;;  %v1196_v8 = vmul.f32 -0.04889537, %v5232_v7  ;;  %v1195_v9 = vmul.f32 -0.04889537, %v5240_v0 }
 0x17c   :  { %1179 = vrot.lane.b32.xlu1 %v5296_v2, %s9700_s8  ;;  %1177 = vrot.lane.b32.xlu0 %v5299_v4, %s9700_s8 }
 0x17e   :  { %v5315_v11 = vpop.permute.xlu1 %861  ;;  %v5317_v10 = vpop.permute.xlu0 %859 }
 0x17f   :  { %10176 = vst [vmem:[#allocation278_spill] sm:$0xff] %v5315_v11  ;;  %10177 = vst [vmem:[#allocation279_spill] sm:$0xff] %v5317_v10  ;;  %v1208_v10 = vmul.f32 0.11748683, %v5232_v7  ;;  %v1207_v11 = vmul.f32 0.11748683, %v5240_v0 }
 0x180   :  { %1190 = vrot.lane.b32.xlu1 %v5310_v62, %s9700_s8  ;;  %1188 = vrot.lane.b32.xlu0 %v5313_v63, %s9700_s8  ;;  %s10907_s8 = smov 86  }
 0x182   :  { %v5325_v13 = vpop.permute.xlu1 %873  ;;  %v5327_v12 = vpop.permute.xlu0 %871 }
 0x183   :  { %10178 = vst [vmem:[#allocation280_spill] sm:$0xff] %v5325_v13  ;;  %10179 = vst [vmem:[#allocation281_spill] sm:$0xff] %v5327_v12  ;;  %v1219_v13 = vmul.f32 -0.046978466, %v5232_v7  ;;  %v1218_v12 = vmul.f32 -0.046978466, %v5240_v0 }
 0x184   :  { %1201 = vrot.lane.b32.xlu1 %v1196_v8, %s9698_s9  ;;  %1199 = vrot.lane.b32.xlu0 %v1195_v9, %s9698_s9 }
 0x186   :  { %v5333_v15 = vpop.permute.xlu1 %884  ;;  %v5335_v14 = vpop.permute.xlu0 %882 }
 0x187   :  { %10180 = vst [vmem:[#allocation282_spill] sm:$0xff] %v5333_v15  ;;  %10181 = vst [vmem:[#allocation283_spill] sm:$0xff] %v5335_v14  ;;  %v1230_v15 = vmul.f32 0.95000005, %v5232_v7  ;;  %v1229_v14 = vmul.f32 0.95000005, %v5240_v0 }
 0x188   :  { %1213 = vrot.lane.b32.xlu1 %v1208_v10, %s9698_s9  ;;  %1211 = vrot.lane.b32.xlu0 %v1207_v11, %s9698_s9  ;;  %v1242_v11 = vmul.f32 0.43590292, %v5232_v7 }
 0x18a   :  { %v5341_v17 = vpop.permute.xlu1 %895  ;;  %v5343_v16 = vpop.permute.xlu0 %893 }
 0x18b   :  { %10182 = vst [vmem:[#allocation284_spill] sm:$0xff] %v5341_v17  ;;  %10183 = vst [vmem:[#allocation285_spill] sm:$0xff] %v5343_v16  ;;  %v1241_v16 = vmul.f32 0.43590292, %v5240_v0 }
 0x18c   :  { %1224 = vrot.lane.b32.xlu1 %v1219_v13, %s9698_s9  ;;  %1222 = vrot.lane.b32.xlu0 %v1218_v12, %s9698_s9  ;;  %s11937_s9 = smov 63  }
 0x18e   :  { %v5349_v19 = vpop.permute.xlu1 %907  ;;  %v5351_v10 = vpop.permute.xlu0 %905 }
 0x18f   :  { %10184 = vst [vmem:[#allocation286_spill] sm:$0xff] %v5349_v19  ;;  %10185 = vst [vmem:[#allocation287_spill] sm:$0xff] %v5351_v10  ;;  %v1253_v19 = vmul.f32 -0.17695329, %v5232_v7  ;;  %v1252_v10 = vmul.f32 -0.17695329, %v5240_v0 }
 0x190   :  { %1235 = vrot.lane.b32.xlu1 %v1230_v15, %s9632_s10  ;;  %1233 = vrot.lane.b32.xlu0 %v1229_v14, %s9632_s10 }
 0x192   :  { %v5357_v13 = vpop.permute.xlu1 %918  ;;  %v5359_v12 = vpop.permute.xlu0 %916 }
 0x193   :  { %10186 = vst [vmem:[#allocation288_spill] sm:$0xff] %v5357_v13  ;;  %10187 = vst [vmem:[#allocation289_spill] sm:$0xff] %v5359_v12 }
 0x194   :  { %1247 = vrot.lane.b32.xlu1 %v1242_v11, %s9632_s10  ;;  %1245 = vrot.lane.b32.xlu0 %v1241_v16, %s9632_s10  ;;  %v1272_v16 = vmul.f32 -0.17695323, %v5232_v7  ;;  %v1271_v11 = vmul.f32 -0.17695323, %v5240_v0 }
 0x196   :  { %v5365_v17 = vpop.permute.xlu1 %929  ;;  %v5367_v15 = vpop.permute.xlu0 %927 }
 0x197   :  { %10188 = vst [vmem:[#allocation290_spill] sm:$0xff] %v5365_v17  ;;  %10189 = vst [vmem:[#allocation291_spill] sm:$0xff] %v5367_v15 }
 0x198   :  { %1258 = vrot.lane.b32.xlu1 %v1253_v19, %s9632_s10  ;;  %1256 = vrot.lane.b32.xlu0 %v1252_v10, %s9632_s10  ;;  %v1283_v19 = vmul.f32 0.43590304, %v5232_v7  ;;  %v1282_v10 = vmul.f32 0.43590304, %v5240_v0  ;;  %s9636_s10 = smov 92  }
 0x19a   :  { %v5371_v14 = vpop.permute.xlu1 %941  ;;  %v5373_v13 = vpop.permute.xlu0 %939 }
 0x19b   :  { %10190 = vst [vmem:[#allocation292_spill] sm:$0xff] %v5371_v14  ;;  %10191 = vst [vmem:[#allocation293_spill] sm:$0xff] %v5373_v13 }
 0x19c   :  { %1265 = vrot.lane.b32.xlu1 %v1196_v8, %s9634_s11  ;;  %1263 = vrot.lane.b32.xlu0 %v1195_v9, %s9634_s11 }
 0x19e   :  { %v5379_v17 = vpop.permute.xlu1 %952  ;;  %v5381_v15 = vpop.permute.xlu0 %950 }
 0x19f   :  { %10192 = vst [vmem:[#allocation294_spill] sm:$0xff] %v5379_v17  ;;  %10193 = vst [vmem:[#allocation295_spill] sm:$0xff] %v5381_v15 }
 0x1a0   :  { %1277 = vrot.lane.b32.xlu1 %v1272_v16, %s9634_s11  ;;  %1275 = vrot.lane.b32.xlu0 %v1271_v11, %s9634_s11  ;;  %v1302_v16 = vmul.f32 -0.046978395, %v5232_v7  ;;  %v1301_v11 = vmul.f32 -0.046978395, %v5240_v0 }
 0x1a2   :  { %v5387_v13 = vpop.permute.xlu1 %963  ;;  %v5389_v8 = vpop.permute.xlu0 %961 }
 0x1a3   :  { %10194 = vst [vmem:[#allocation296_spill] sm:$0xff] %v5387_v13  ;;  %10195 = vst [vmem:[#allocation297_spill] sm:$0xff] %v5389_v8 }
 0x1a4   :  { %1288 = vrot.lane.b32.xlu1 %v1283_v19, %s9634_s11  ;;  %1286 = vrot.lane.b32.xlu0 %v1282_v10, %s9634_s11  ;;  %v1313_v10 = vmul.f32 0.11748685, %v5232_v7  ;;  %s9638_s11 = smov 91  }
 0x1a6   :  { %v5393_v9 = vpop.permute.xlu1 %975  ;;  %v5395_v14 = vpop.permute.xlu0 %973 }
 0x1a7   :  { %10196 = vst [vmem:[#allocation298_spill] sm:$0xff] %v5393_v9  ;;  %10197 = vst [vmem:[#allocation299_spill] sm:$0xff] %v5395_v14  ;;  %v1312_v14 = vmul.f32 0.11748685, %v5240_v0 }
 0x1a8   :  { %1295 = vrot.lane.b32.xlu1 %v5282_v5, %s9636_s10  ;;  %1293 = vrot.lane.b32.xlu0 %v5285_v3, %s9636_s10 }
 0x1aa   :  { %v5403_v8 = vpop.permute.xlu1 %986  ;;  %v5405_v19 = vpop.permute.xlu0 %984 }
 0x1ab   :  { %10198 = vst [vmem:[#allocation300_spill] sm:$0xff] %v5403_v8  ;;  %10199 = vst [vmem:[#allocation301_spill] sm:$0xff] %v5405_v19 }
 0x1ac   :  { %1307 = vrot.lane.b32.xlu1 %v1302_v16, %s9636_s10  ;;  %1305 = vrot.lane.b32.xlu0 %v1301_v11, %s9636_s10 }
 0x1ae   :  { %v5411_v5 = vpop.permute.xlu1 %997  ;;  %v5413_v9 = vpop.permute.xlu0 %995 }
 0x1af   :  { %10200 = vst [vmem:[#allocation302_spill] sm:$0xff] %v5411_v5  ;;  %10201 = vst [vmem:[#allocation303_spill] sm:$0xff] %v5413_v9 }
 0x1b0   :  { %1318 = vrot.lane.b32.xlu1 %v1313_v10, %s9636_s10  ;;  %1316 = vrot.lane.b32.xlu0 %v1312_v14, %s9636_s10  ;;  %s9640_s10 = smov 90  }
 0x1b2   :  { %v5417_v3 = vpop.permute.xlu1 %1009  ;;  %v5419_v13 = vpop.permute.xlu0 %1007 }
 0x1b3   :  { %10202 = vst [vmem:[#allocation304_spill] sm:$0xff] %v5417_v3  ;;  %10203 = vst [vmem:[#allocation305_spill] sm:$0xff] %v5419_v13 }
 0x1b4   :  { %1325 = vrot.lane.b32.xlu1 %v5235_v1, %s9638_s11  ;;  %1323 = vrot.lane.b32.xlu0 %v5243_v56, %s9638_s11 }
 0x1b6   :  { %v5425_v7 = vpop.permute.xlu1 %1020  ;;  %v5427_v0 = vpop.permute.xlu0 %1018 }
 0x1b7   :  { %10204 = vst [vmem:[#allocation306_spill] sm:$0xff] %v5425_v7  ;;  %10205 = vst [vmem:[#allocation307_spill] sm:$0xff] %v5427_v0 }
 0x1b8   :  { %1333 = vrot.lane.b32.xlu1 %v5310_v62, %s9638_s11  ;;  %1331 = vrot.lane.b32.xlu0 %v5313_v63, %s9638_s11 }
 0x1ba   :  { %v5433_v14 = vpop.permute.xlu1 %1031  ;;  %v5435_v16 = vpop.permute.xlu0 %1029 }
 0x1bb   :  { %10206 = vst [vmem:[#allocation308_spill] sm:$0xff] %v5433_v14  ;;  %10207 = vst [vmem:[#allocation309_spill] sm:$0xff] %v5435_v16 }
 0x1bc   :  { %1340 = vrot.lane.b32.xlu1 %v5296_v2, %s9638_s11  ;;  %1338 = vrot.lane.b32.xlu0 %v5299_v4, %s9638_s11  ;;  %s9642_s11 = smov 89  }
 0x1be   :  { %v5441_v56 = vpop.permute.xlu1 %1043  ;;  %v5443_v1 = vpop.permute.xlu0 %1041 }
 0x1bf   :  { %10208 = vst [vmem:[#allocation310_spill] sm:$0xff] %v5441_v56  ;;  %10209 = vst [vmem:[#allocation311_spill] sm:$0xff] %v5443_v1 }
 0x1c0   :  { %1347 = vrot.lane.b32.xlu1 %v5188_v60, %s9640_s10  ;;  %1345 = vrot.lane.b32.xlu0 %v5191_v61, %s9640_s10 }
 0x1c2   :  { %v5449_v62 = vpop.permute.xlu1 %1054  ;;  %v5451_v63 = vpop.permute.xlu0 %1052 }
 0x1c3   :  { %10210 = vst [vmem:[#allocation312_spill] sm:$0xff] %v5449_v62  ;;  %10211 = vst [vmem:[#allocation313_spill] sm:$0xff] %v5451_v63 }
 0x1c4   :  { %1355 = vrot.lane.b32.xlu1 %v5268_v6, %s9640_s10  ;;  %1353 = vrot.lane.b32.xlu0 %v5271_v57, %s9640_s10 }
 0x1c6   :  { %v5457_v2 = vpop.permute.xlu1 %1065  ;;  %v5459_v4 = vpop.permute.xlu0 %1063 }
 0x1c7   :  { %10212 = vst [vmem:[#allocation314_spill] sm:$0xff] %v5457_v2  ;;  %10213 = vst [vmem:[#allocation315_spill] sm:$0xff] %v5459_v4 }
 0x1c8   :  { %1362 = vrot.lane.b32.xlu1 %v5254_v59, %s9640_s10  ;;  %1360 = vrot.lane.b32.xlu0 %v5257_v58, %s9640_s10  ;;  %s9644_s10 = smov 88  }
 0x1ca   :  { %v5465_v60 = vpop.permute.xlu1 %1077  ;;  %v5467_v61 = vpop.permute.xlu0 %1075 }
 0x1cb   :  { %10214 = vst [vmem:[#allocation316_spill] sm:$0xff] %v5465_v60  ;;  %10215 = vst [vmem:[#allocation317_spill] sm:$0xff] %v5467_v61 }
 0x1cc   :  { %1369 = vrot.lane.b32.xlu1 %v5146_v54, %s9642_s11  ;;  %1367 = vrot.lane.b32.xlu0 %v5149_v55, %s9642_s11 }
 0x1ce   :  { %v5473_v6 = vpop.permute.xlu1 %1088  ;;  %v5475_v57 = vpop.permute.xlu0 %1086 }
 0x1cf   :  { %10216 = vst [vmem:[#allocation318_spill] sm:$0xff] %v5473_v6  ;;  %10217 = vst [vmem:[#allocation319_spill] sm:$0xff] %v5475_v57 }
 0x1d0   :  { %1377 = vrot.lane.b32.xlu1 %v5216_v52, %s9642_s11  ;;  %1375 = vrot.lane.b32.xlu0 %v5219_v53, %s9642_s11 }
 0x1d2   :  { %v5481_v58 = vpop.permute.xlu1 %1099  ;;  %v5483_v59 = vpop.permute.xlu0 %1097 }
 0x1d3   :  { %10218 = vst [vmem:[#allocation320_spill] sm:$0xff] %v5481_v58  ;;  %10219 = vst [vmem:[#allocation321_spill] sm:$0xff] %v5483_v59 }
 0x1d4   :  { %1384 = vrot.lane.b32.xlu1 %v5202_v50, %s9642_s11  ;;  %1382 = vrot.lane.b32.xlu0 %v5205_v51, %s9642_s11  ;;  %s9646_s11 = smov 87  }
 0x1d6   :  { %v5489_v54 = vpop.permute.xlu1 %1111  ;;  %v5491_v55 = vpop.permute.xlu0 %1109 }
 0x1d7   :  { %10220 = vst [vmem:[#allocation322_spill] sm:$0xff] %v5489_v54  ;;  %10221 = vst [vmem:[#allocation323_spill] sm:$0xff] %v5491_v55 }
 0x1d8   :  { %1391 = vrot.lane.b32.xlu1 %v5104_v48, %s9644_s10  ;;  %1389 = vrot.lane.b32.xlu0 %v5107_v49, %s9644_s10 }
 0x1da   :  { %v5497_v52 = vpop.permute.xlu1 %1122  ;;  %v5499_v53 = vpop.permute.xlu0 %1120 }
 0x1db   :  { %10222 = vst [vmem:[#allocation324_spill] sm:$0xff] %v5497_v52  ;;  %10223 = vst [vmem:[#allocation325_spill] sm:$0xff] %v5499_v53 }
 0x1dc   :  { %1399 = vrot.lane.b32.xlu1 %v5174_v46, %s9644_s10  ;;  %1397 = vrot.lane.b32.xlu0 %v5177_v47, %s9644_s10 }
 0x1de   :  { %v5505_v50 = vpop.permute.xlu1 %1133  ;;  %v5507_v51 = vpop.permute.xlu0 %1131 }
 0x1df   :  { %10224 = vst [vmem:[#allocation326_spill] sm:$0xff] %v5505_v50  ;;  %10225 = vst [vmem:[#allocation327_spill] sm:$0xff] %v5507_v51 }
 0x1e0   :  { %1406 = vrot.lane.b32.xlu1 %v5160_v44, %s9644_s10  ;;  %1404 = vrot.lane.b32.xlu0 %v5163_v45, %s9644_s10  ;;  %s9648_s10 = smov 86  }
 0x1e2   :  { %v5513_v48 = vpop.permute.xlu1 %1145  ;;  %v5515_v49 = vpop.permute.xlu0 %1143 }
 0x1e3   :  { %10226 = vst [vmem:[#allocation328_spill] sm:$0xff] %v5513_v48  ;;  %10227 = vst [vmem:[#allocation329_spill] sm:$0xff] %v5515_v49 }
 0x1e4   :  { %1413 = vrot.lane.b32.xlu1 %v5062_v42, %s9646_s11  ;;  %1411 = vrot.lane.b32.xlu0 %v5065_v43, %s9646_s11 }
 0x1e6   :  { %v5521_v46 = vpop.permute.xlu1 %1156  ;;  %v5523_v47 = vpop.permute.xlu0 %1154 }
 0x1e7   :  { %10228 = vst [vmem:[#allocation330_spill] sm:$0xff] %v5521_v46  ;;  %10229 = vst [vmem:[#allocation331_spill] sm:$0xff] %v5523_v47 }
 0x1e8   :  { %1421 = vrot.lane.b32.xlu1 %v5132_v40, %s9646_s11  ;;  %1419 = vrot.lane.b32.xlu0 %v5135_v41, %s9646_s11 }
 0x1ea   :  { %v5529_v44 = vpop.permute.xlu1 %1167  ;;  %v5531_v45 = vpop.permute.xlu0 %1165 }
 0x1eb   :  { %10230 = vst [vmem:[#allocation332_spill] sm:$0xff] %v5529_v44  ;;  %10231 = vst [vmem:[#allocation333_spill] sm:$0xff] %v5531_v45 }
 0x1ec   :  { %1428 = vrot.lane.b32.xlu1 %v5118_v38, %s9646_s11  ;;  %1426 = vrot.lane.b32.xlu0 %v5121_v39, %s9646_s11  ;;  %s9650_s11 = smov 85  }
 0x1ee   :  { %v5537_v42 = vpop.permute.xlu1 %1179  ;;  %v5539_v43 = vpop.permute.xlu0 %1177 }
 0x1ef   :  { %10232 = vst [vmem:[#allocation334_spill] sm:$0xff] %v5537_v42  ;;  %10233 = vst [vmem:[#allocation335_spill] sm:$0xff] %v5539_v43 }
 0x1f0   :  { %1435 = vrot.lane.b32.xlu1 %v5020_v36, %s9648_s10  ;;  %1433 = vrot.lane.b32.xlu0 %v5023_v37, %s9648_s10 }
 0x1f2   :  { %v5545_v40 = vpop.permute.xlu1 %1190  ;;  %v5547_v41 = vpop.permute.xlu0 %1188 }
 0x1f3   :  { %10234 = vst [vmem:[#allocation336_spill] sm:$0xff] %v5545_v40  ;;  %10235 = vst [vmem:[#allocation337_spill] sm:$0xff] %v5547_v41 }
 0x1f4   :  { %1443 = vrot.lane.b32.xlu1 %v5090_v34, %s9648_s10  ;;  %1441 = vrot.lane.b32.xlu0 %v5093_v35, %s9648_s10 }
 0x1f6   :  { %v5553_v38 = vpop.permute.xlu1 %1201  ;;  %v5555_v39 = vpop.permute.xlu0 %1199 }
 0x1f7   :  { %10236 = vst [vmem:[#allocation338_spill] sm:$0xff] %v5553_v38  ;;  %10237 = vst [vmem:[#allocation339_spill] sm:$0xff] %v5555_v39 }
 0x1f8   :  { %1450 = vrot.lane.b32.xlu1 %v5076_v32, %s9648_s10  ;;  %1448 = vrot.lane.b32.xlu0 %v5079_v33, %s9648_s10  ;;  %s9652_s10 = smov 84  }
 0x1fa   :  { %v5561_v36 = vpop.permute.xlu1 %1213  ;;  %v5563_v37 = vpop.permute.xlu0 %1211 }
 0x1fb   :  { %10238 = vst [vmem:[#allocation340_spill] sm:$0xff] %v5561_v36  ;;  %10239 = vst [vmem:[#allocation341_spill] sm:$0xff] %v5563_v37 }
 0x1fc   :  { %1457 = vrot.lane.b32.xlu1 %v4978_v30, %s9650_s11  ;;  %1455 = vrot.lane.b32.xlu0 %v4981_v31, %s9650_s11 }
 0x1fe   :  { %v5569_v34 = vpop.permute.xlu1 %1224  ;;  %v5571_v35 = vpop.permute.xlu0 %1222 }
 0x1ff   :  { %10240 = vst [vmem:[#allocation342_spill] sm:$0xff] %v5569_v34  ;;  %10241 = vst [vmem:[#allocation343_spill] sm:$0xff] %v5571_v35 }
 0x200   :  { %1465 = vrot.lane.b32.xlu1 %v5048_v28, %s9650_s11  ;;  %1463 = vrot.lane.b32.xlu0 %v5051_v29, %s9650_s11 }
 0x202   :  { %v5577_v32 = vpop.permute.xlu1 %1235  ;;  %v5579_v33 = vpop.permute.xlu0 %1233 }
 0x203   :  { %10242 = vst [vmem:[#allocation344_spill] sm:$0xff] %v5577_v32  ;;  %10243 = vst [vmem:[#allocation345_spill] sm:$0xff] %v5579_v33 }
 0x204   :  { %1472 = vrot.lane.b32.xlu1 %v5034_v26, %s9650_s11  ;;  %1470 = vrot.lane.b32.xlu0 %v5037_v27, %s9650_s11  ;;  %s9654_s11 = smov 83  }
 0x206   :  { %v5585_v30 = vpop.permute.xlu1 %1247  ;;  %v5587_v31 = vpop.permute.xlu0 %1245 }
 0x207   :  { %10244 = vst [vmem:[#allocation346_spill] sm:$0xff] %v5585_v30  ;;  %10245 = vst [vmem:[#allocation347_spill] sm:$0xff] %v5587_v31  ;;  %v10271_v30 = vld [vmem:[#allocation214_spill] sm:$0xff] }
 0x208   :  { %1479 = vrot.lane.b32.xlu1 %v4936_v24, %s9652_s10  ;;  %1477 = vrot.lane.b32.xlu0 %v4939_v25, %s9652_s10 }
 0x20a   :  { %v5593_v28 = vpop.permute.xlu1 %1258  ;;  %v5595_v29 = vpop.permute.xlu0 %1256 }
 0x20b   :  { %10246 = vst [vmem:[#allocation348_spill] sm:$0xff] %v5593_v28  ;;  %10247 = vst [vmem:[#allocation349_spill] sm:$0xff] %v5595_v29 }
 0x20c   :  { %1487 = vrot.lane.b32.xlu1 %v5006_v22, %s9652_s10  ;;  %1485 = vrot.lane.b32.xlu0 %v5009_v23, %s9652_s10  ;;  %v10252_v22 = vld [vmem:[#allocation211_spill] sm:$0xff] }
 0x20e   :  { %v5601_v26 = vpop.permute.xlu1 %1265  ;;  %v5603_v27 = vpop.permute.xlu0 %1263 }
 0x20f   :  { %10248 = vst [vmem:[#allocation350_spill] sm:$0xff] %v5601_v26  ;;  %10249 = vst [vmem:[#allocation351_spill] sm:$0xff] %v5603_v27 }
 0x210   :  { %1494 = vrot.lane.b32.xlu1 %v4992_v20, %s9652_s10  ;;  %1492 = vrot.lane.b32.xlu0 %v4995_v21, %s9652_s10  ;;  %v10255_v20 = vld [vmem:[#allocation228_spill] sm:$0xff]  ;;  %v10256_v21 = vld [vmem:[#allocation229_spill] sm:$0xff]  ;;  %s9656_s10 = smov 82  }
 0x212   :  { %v5609_v24 = vpop.permute.xlu1 %1277  ;;  %v5611_v25 = vpop.permute.xlu0 %1275 }
 0x213   :  { %10250 = vst [vmem:[#allocation352_spill] sm:$0xff] %v5609_v24  ;;  %10251 = vst [vmem:[#allocation353_spill] sm:$0xff] %v5611_v25  ;;  %v10259_v24 = vld [vmem:[#allocation224_spill] sm:$0xff] }
 0x214   :  { %1501 = vrot.lane.b32.xlu1 %v4894_v18, %s9654_s11  ;;  %1499 = vrot.lane.b32.xlu0 %v10252_v22, %s9654_s11  ;;  %v10260_v18 = vld [vmem:[#allocation225_spill] sm:$0xff] }
 0x216   :  { %v5617_v23 = vpop.permute.xlu1 %1288  ;;  %v5619_v11 = vpop.permute.xlu0 %1286 }
 0x217   :  { %10253 = vst [vmem:[#allocation211_spill] sm:$0xff] %v5617_v23  ;;  %10254 = vst [vmem:[#allocation354_spill] sm:$0xff] %v5619_v11 }
 0x218   :  { %1509 = vrot.lane.b32.xlu1 %v10255_v20, %s9654_s11  ;;  %1507 = vrot.lane.b32.xlu0 %v10256_v21, %s9654_s11  ;;  %v10263_v20 = vld [vmem:[#allocation199_spill] sm:$0xff]  ;;  %v10264_v21 = vld [vmem:[#allocation200_spill] sm:$0xff] }
 0x21a   :  { %v5625_v10 = vpop.permute.xlu1 %1295  ;;  %v5627_v25 = vpop.permute.xlu0 %1293 }
 0x21b   :  { %10257 = vst [vmem:[#allocation228_spill] sm:$0xff] %v5625_v10  ;;  %10258 = vst [vmem:[#allocation229_spill] sm:$0xff] %v5627_v25 }
 0x21c   :  { %1516 = vrot.lane.b32.xlu1 %v10259_v24, %s9654_s11  ;;  %1514 = vrot.lane.b32.xlu0 %v10260_v18, %s9654_s11  ;;  %v10267_v24 = vld [vmem:[#allocation218_spill] sm:$0xff]  ;;  %v10268_v18 = vld [vmem:[#allocation219_spill] sm:$0xff]  ;;  %s9658_s11 = smov 81  }
 0x21e   :  { %v5633_v22 = vpop.permute.xlu1 %1307  ;;  %v5635_v31 = vpop.permute.xlu0 %1305 }
 0x21f   :  { %10261 = vst [vmem:[#allocation224_spill] sm:$0xff] %v5633_v22  ;;  %10262 = vst [vmem:[#allocation225_spill] sm:$0xff] %v5635_v31 }
 0x220   :  { %1523 = vrot.lane.b32.xlu1 %v10263_v20, %s9656_s10  ;;  %1521 = vrot.lane.b32.xlu0 %v10264_v21, %s9656_s10  ;;  %v10272_v20 = vld [vmem:[#allocation215_spill] sm:$0xff] }
 0x222   :  { %v5641_v10 = vpop.permute.xlu1 %1318  ;;  %v5643_v25 = vpop.permute.xlu0 %1316 }
 0x223   :  { %10265 = vst [vmem:[#allocation199_spill] sm:$0xff] %v5641_v10  ;;  %10266 = vst [vmem:[#allocation200_spill] sm:$0xff] %v5643_v25  ;;  %v10283_v25 = vld [vmem:[#allocation203_spill] sm:$0xff] }
 0x224   :  { %1531 = vrot.lane.b32.xlu1 %v10267_v24, %s9656_s10  ;;  %1529 = vrot.lane.b32.xlu0 %v10268_v18, %s9656_s10  ;;  %v10275_v24 = vld [vmem:[#allocation187_spill] sm:$0xff]  ;;  %v10276_v18 = vld [vmem:[#allocation188_spill] sm:$0xff] }
 0x226   :  { %v5649_v22 = vpop.permute.xlu1 %1325  ;;  %v5651_v31 = vpop.permute.xlu0 %1323 }
 0x227   :  { %10269 = vst [vmem:[#allocation218_spill] sm:$0xff] %v5649_v22  ;;  %10270 = vst [vmem:[#allocation219_spill] sm:$0xff] %v5651_v31 }
 0x228   :  { %1538 = vrot.lane.b32.xlu1 %v10271_v30, %s9656_s10  ;;  %1536 = vrot.lane.b32.xlu0 %v10272_v20, %s9656_s10  ;;  %v10279_v30 = vld [vmem:[#allocation207_spill] sm:$0xff]  ;;  %v10280_v20 = vld [vmem:[#allocation208_spill] sm:$0xff]  ;;  %s9660_s10 = smov 80  }
 0x22a   :  { %v5657_v21 = vpop.permute.xlu1 %1333  ;;  %v5659_v10 = vpop.permute.xlu0 %1331 }
 0x22b   :  { %10273 = vst [vmem:[#allocation214_spill] sm:$0xff] %v5657_v21  ;;  %10274 = vst [vmem:[#allocation215_spill] sm:$0xff] %v5659_v10 }
 0x22c   :  { %1545 = vrot.lane.b32.xlu1 %v10275_v24, %s9658_s11  ;;  %1543 = vrot.lane.b32.xlu0 %v10276_v18, %s9658_s11  ;;  %v10284_v24 = vld [vmem:[#allocation204_spill] sm:$0xff] }
 0x22e   :  { %v5665_v22 = vpop.permute.xlu1 %1340  ;;  %v5667_v31 = vpop.permute.xlu0 %1338 }
 0x22f   :  { %10277 = vst [vmem:[#allocation187_spill] sm:$0xff] %v5665_v22  ;;  %10278 = vst [vmem:[#allocation188_spill] sm:$0xff] %v5667_v31  ;;  %v10295_v31 = vld [vmem:[#allocation191_spill] sm:$0xff] }
 0x230   :  { %1553 = vrot.lane.b32.xlu1 %v10279_v30, %s9658_s11  ;;  %1551 = vrot.lane.b32.xlu0 %v10280_v20, %s9658_s11  ;;  %v10287_v30 = vld [vmem:[#allocation175_spill] sm:$0xff]  ;;  %v10288_v20 = vld [vmem:[#allocation176_spill] sm:$0xff] }
 0x232   :  { %v5673_v21 = vpop.permute.xlu1 %1347  ;;  %v5675_v10 = vpop.permute.xlu0 %1345 }
 0x233   :  { %10281 = vst [vmem:[#allocation207_spill] sm:$0xff] %v5673_v21  ;;  %10282 = vst [vmem:[#allocation208_spill] sm:$0xff] %v5675_v10 }
 0x234   :  { %1560 = vrot.lane.b32.xlu1 %v10283_v25, %s9658_s11  ;;  %1558 = vrot.lane.b32.xlu0 %v10284_v24, %s9658_s11  ;;  %v10291_v25 = vld [vmem:[#allocation195_spill] sm:$0xff]  ;;  %v10292_v24 = vld [vmem:[#allocation196_spill] sm:$0xff]  ;;  %s9662_s11 = smov 79  }
 0x236   :  { %v5681_v18 = vpop.permute.xlu1 %1355  ;;  %v5683_v22 = vpop.permute.xlu0 %1353 }
 0x237   :  { %10285 = vst [vmem:[#allocation203_spill] sm:$0xff] %v5681_v18  ;;  %10286 = vst [vmem:[#allocation204_spill] sm:$0xff] %v5683_v22 }
 0x238   :  { %1567 = vrot.lane.b32.xlu1 %v10287_v30, %s9660_s10  ;;  %1565 = vrot.lane.b32.xlu0 %v10288_v20, %s9660_s10  ;;  %v10296_v30 = vld [vmem:[#allocation192_spill] sm:$0xff] }
 0x23a   :  { %v5689_v21 = vpop.permute.xlu1 %1362  ;;  %v5691_v10 = vpop.permute.xlu0 %1360 }
 0x23b   :  { %10289 = vst [vmem:[#allocation175_spill] sm:$0xff] %v5689_v21  ;;  %10290 = vst [vmem:[#allocation176_spill] sm:$0xff] %v5691_v10  ;;  %v10307_v10 = vld [vmem:[#allocation179_spill] sm:$0xff] }
 0x23c   :  { %1575 = vrot.lane.b32.xlu1 %v10291_v25, %s9660_s10  ;;  %1573 = vrot.lane.b32.xlu0 %v10292_v24, %s9660_s10  ;;  %v10299_v25 = vld [vmem:[#allocation163_spill] sm:$0xff]  ;;  %v10300_v24 = vld [vmem:[#allocation164_spill] sm:$0xff] }
 0x23e   :  { %v5697_v18 = vpop.permute.xlu1 %1369  ;;  %v5699_v22 = vpop.permute.xlu0 %1367 }
 0x23f   :  { %10293 = vst [vmem:[#allocation195_spill] sm:$0xff] %v5697_v18  ;;  %10294 = vst [vmem:[#allocation196_spill] sm:$0xff] %v5699_v22 }
 0x240   :  { %1582 = vrot.lane.b32.xlu1 %v10295_v31, %s9660_s10  ;;  %1580 = vrot.lane.b32.xlu0 %v10296_v30, %s9660_s10  ;;  %v10303_v31 = vld [vmem:[#allocation183_spill] sm:$0xff]  ;;  %v10304_v30 = vld [vmem:[#allocation184_spill] sm:$0xff]  ;;  %s9664_s10 = smov 78  }
 0x242   :  { %v5705_v20 = vpop.permute.xlu1 %1377  ;;  %v5707_v21 = vpop.permute.xlu0 %1375 }
 0x243   :  { %10297 = vst [vmem:[#allocation191_spill] sm:$0xff] %v5705_v20  ;;  %10298 = vst [vmem:[#allocation192_spill] sm:$0xff] %v5707_v21 }
 0x244   :  { %1589 = vrot.lane.b32.xlu1 %v10299_v25, %s9662_s11  ;;  %1587 = vrot.lane.b32.xlu0 %v10300_v24, %s9662_s11  ;;  %v10308_v25 = vld [vmem:[#allocation180_spill] sm:$0xff] }
 0x246   :  { %v5713_v18 = vpop.permute.xlu1 %1384  ;;  %v5715_v22 = vpop.permute.xlu0 %1382 }
 0x247   :  { %10301 = vst [vmem:[#allocation163_spill] sm:$0xff] %v5713_v18  ;;  %10302 = vst [vmem:[#allocation164_spill] sm:$0xff] %v5715_v22  ;;  %v10319_v22 = vld [vmem:[#allocation167_spill] sm:$0xff] }
 0x248   :  { %1597 = vrot.lane.b32.xlu1 %v10303_v31, %s9662_s11  ;;  %1595 = vrot.lane.b32.xlu0 %v10304_v30, %s9662_s11  ;;  %v10311_v31 = vld [vmem:[#allocation151_spill] sm:$0xff]  ;;  %v10312_v30 = vld [vmem:[#allocation152_spill] sm:$0xff] }
 0x24a   :  { %v5721_v20 = vpop.permute.xlu1 %1391  ;;  %v5723_v21 = vpop.permute.xlu0 %1389 }
 0x24b   :  { %10305 = vst [vmem:[#allocation183_spill] sm:$0xff] %v5721_v20  ;;  %10306 = vst [vmem:[#allocation184_spill] sm:$0xff] %v5723_v21 }
 0x24c   :  { %1604 = vrot.lane.b32.xlu1 %v10307_v10, %s9662_s11  ;;  %1602 = vrot.lane.b32.xlu0 %v10308_v25, %s9662_s11  ;;  %v10315_v10 = vld [vmem:[#allocation171_spill] sm:$0xff]  ;;  %v10316_v25 = vld [vmem:[#allocation172_spill] sm:$0xff]  ;;  %s9666_s11 = smov 77  }
 0x24e   :  { %v5729_v24 = vpop.permute.xlu1 %1399  ;;  %v5731_v18 = vpop.permute.xlu0 %1397 }
 0x24f   :  { %10309 = vst [vmem:[#allocation179_spill] sm:$0xff] %v5729_v24  ;;  %10310 = vst [vmem:[#allocation180_spill] sm:$0xff] %v5731_v18 }
 0x250   :  { %1611 = vrot.lane.b32.xlu1 %v10311_v31, %s9664_s10  ;;  %1609 = vrot.lane.b32.xlu0 %v10312_v30, %s9664_s10  ;;  %v10320_v31 = vld [vmem:[#allocation168_spill] sm:$0xff] }
 0x252   :  { %v5737_v20 = vpop.permute.xlu1 %1406  ;;  %v5739_v21 = vpop.permute.xlu0 %1404 }
 0x253   :  { %10313 = vst [vmem:[#allocation151_spill] sm:$0xff] %v5737_v20  ;;  %10314 = vst [vmem:[#allocation152_spill] sm:$0xff] %v5739_v21  ;;  %v10331_v21 = vld [vmem:[#allocation155_spill] sm:$0xff] }
 0x254   :  { %1619 = vrot.lane.b32.xlu1 %v10315_v10, %s9664_s10  ;;  %1617 = vrot.lane.b32.xlu0 %v10316_v25, %s9664_s10  ;;  %v10323_v10 = vld [vmem:[#allocation139_spill] sm:$0xff]  ;;  %v10324_v25 = vld [vmem:[#allocation140_spill] sm:$0xff] }
 0x256   :  { %v5745_v24 = vpop.permute.xlu1 %1413  ;;  %v5747_v18 = vpop.permute.xlu0 %1411 }
 0x257   :  { %10317 = vst [vmem:[#allocation171_spill] sm:$0xff] %v5745_v24  ;;  %10318 = vst [vmem:[#allocation172_spill] sm:$0xff] %v5747_v18 }
 0x258   :  { %1626 = vrot.lane.b32.xlu1 %v10319_v22, %s9664_s10  ;;  %1624 = vrot.lane.b32.xlu0 %v10320_v31, %s9664_s10  ;;  %v10327_v22 = vld [vmem:[#allocation159_spill] sm:$0xff]  ;;  %v10328_v31 = vld [vmem:[#allocation160_spill] sm:$0xff]  ;;  %s9668_s10 = smov 76  }
 0x25a   :  { %v5753_v30 = vpop.permute.xlu1 %1421  ;;  %v5755_v20 = vpop.permute.xlu0 %1419 }
 0x25b   :  { %10321 = vst [vmem:[#allocation167_spill] sm:$0xff] %v5753_v30  ;;  %10322 = vst [vmem:[#allocation168_spill] sm:$0xff] %v5755_v20 }
 0x25c   :  { %1633 = vrot.lane.b32.xlu1 %v10323_v10, %s9666_s11  ;;  %1631 = vrot.lane.b32.xlu0 %v10324_v25, %s9666_s11  ;;  %v10332_v10 = vld [vmem:[#allocation156_spill] sm:$0xff] }
 0x25e   :  { %v5761_v24 = vpop.permute.xlu1 %1428  ;;  %v5763_v18 = vpop.permute.xlu0 %1426 }
 0x25f   :  { %10325 = vst [vmem:[#allocation139_spill] sm:$0xff] %v5761_v24  ;;  %10326 = vst [vmem:[#allocation140_spill] sm:$0xff] %v5763_v18  ;;  %v10343_v18 = vld [vmem:[#allocation143_spill] sm:$0xff] }
 0x260   :  { %1641 = vrot.lane.b32.xlu1 %v10327_v22, %s9666_s11  ;;  %1639 = vrot.lane.b32.xlu0 %v10328_v31, %s9666_s11  ;;  %v10335_v22 = vld [vmem:[#allocation127_spill] sm:$0xff]  ;;  %v10336_v31 = vld [vmem:[#allocation128_spill] sm:$0xff] }
 0x262   :  { %v5769_v30 = vpop.permute.xlu1 %1435  ;;  %v5771_v20 = vpop.permute.xlu0 %1433 }
 0x263   :  { %10329 = vst [vmem:[#allocation159_spill] sm:$0xff] %v5769_v30  ;;  %10330 = vst [vmem:[#allocation160_spill] sm:$0xff] %v5771_v20 }
 0x264   :  { %1648 = vrot.lane.b32.xlu1 %v10331_v21, %s9666_s11  ;;  %1646 = vrot.lane.b32.xlu0 %v10332_v10, %s9666_s11  ;;  %v10339_v21 = vld [vmem:[#allocation147_spill] sm:$0xff]  ;;  %v10340_v10 = vld [vmem:[#allocation148_spill] sm:$0xff]  ;;  %s9670_s11 = smov 75  }
 0x266   :  { %v5777_v25 = vpop.permute.xlu1 %1443  ;;  %v5779_v24 = vpop.permute.xlu0 %1441 }
 0x267   :  { %10333 = vst [vmem:[#allocation155_spill] sm:$0xff] %v5777_v25  ;;  %10334 = vst [vmem:[#allocation156_spill] sm:$0xff] %v5779_v24 }
 0x268   :  { %1655 = vrot.lane.b32.xlu1 %v10335_v22, %s9668_s10  ;;  %1653 = vrot.lane.b32.xlu0 %v10336_v31, %s9668_s10  ;;  %v10344_v22 = vld [vmem:[#allocation144_spill] sm:$0xff] }
 0x26a   :  { %v5785_v30 = vpop.permute.xlu1 %1450  ;;  %v5787_v20 = vpop.permute.xlu0 %1448 }
 0x26b   :  { %10337 = vst [vmem:[#allocation127_spill] sm:$0xff] %v5785_v30  ;;  %10338 = vst [vmem:[#allocation128_spill] sm:$0xff] %v5787_v20  ;;  %v10355_v20 = vld [vmem:[#allocation131_spill] sm:$0xff] }
 0x26c   :  { %1663 = vrot.lane.b32.xlu1 %v10339_v21, %s9668_s10  ;;  %1661 = vrot.lane.b32.xlu0 %v10340_v10, %s9668_s10  ;;  %v10347_v21 = vld [vmem:[#allocation115_spill] sm:$0xff]  ;;  %v10348_v10 = vld [vmem:[#allocation116_spill] sm:$0xff] }
 0x26e   :  { %v5793_v25 = vpop.permute.xlu1 %1457  ;;  %v5795_v24 = vpop.permute.xlu0 %1455 }
 0x26f   :  { %10341 = vst [vmem:[#allocation147_spill] sm:$0xff] %v5793_v25  ;;  %10342 = vst [vmem:[#allocation148_spill] sm:$0xff] %v5795_v24 }
 0x270   :  { %1670 = vrot.lane.b32.xlu1 %v10343_v18, %s9668_s10  ;;  %1668 = vrot.lane.b32.xlu0 %v10344_v22, %s9668_s10  ;;  %v10351_v18 = vld [vmem:[#allocation135_spill] sm:$0xff]  ;;  %v10352_v22 = vld [vmem:[#allocation136_spill] sm:$0xff]  ;;  %s9672_s10 = smov 74  }
 0x272   :  { %v5801_v31 = vpop.permute.xlu1 %1465  ;;  %v5803_v30 = vpop.permute.xlu0 %1463 }
 0x273   :  { %10345 = vst [vmem:[#allocation143_spill] sm:$0xff] %v5801_v31  ;;  %10346 = vst [vmem:[#allocation144_spill] sm:$0xff] %v5803_v30 }
 0x274   :  { %1677 = vrot.lane.b32.xlu1 %v10347_v21, %s9670_s11  ;;  %1675 = vrot.lane.b32.xlu0 %v10348_v10, %s9670_s11  ;;  %v10356_v21 = vld [vmem:[#allocation132_spill] sm:$0xff] }
 0x276   :  { %v5809_v25 = vpop.permute.xlu1 %1472  ;;  %v5811_v24 = vpop.permute.xlu0 %1470 }
 0x277   :  { %10349 = vst [vmem:[#allocation115_spill] sm:$0xff] %v5809_v25  ;;  %10350 = vst [vmem:[#allocation116_spill] sm:$0xff] %v5811_v24  ;;  %v10367_v24 = vld [vmem:[#allocation119_spill] sm:$0xff] }
 0x278   :  { %1685 = vrot.lane.b32.xlu1 %v10351_v18, %s9670_s11  ;;  %1683 = vrot.lane.b32.xlu0 %v10352_v22, %s9670_s11  ;;  %v10359_v18 = vld [vmem:[#allocation103_spill] sm:$0xff]  ;;  %v10360_v22 = vld [vmem:[#allocation104_spill] sm:$0xff] }
 0x27a   :  { %v5817_v31 = vpop.permute.xlu1 %1479  ;;  %v5819_v30 = vpop.permute.xlu0 %1477 }
 0x27b   :  { %10353 = vst [vmem:[#allocation135_spill] sm:$0xff] %v5817_v31  ;;  %10354 = vst [vmem:[#allocation136_spill] sm:$0xff] %v5819_v30 }
 0x27c   :  { %1692 = vrot.lane.b32.xlu1 %v10355_v20, %s9670_s11  ;;  %1690 = vrot.lane.b32.xlu0 %v10356_v21, %s9670_s11  ;;  %v10363_v20 = vld [vmem:[#allocation123_spill] sm:$0xff]  ;;  %v10364_v21 = vld [vmem:[#allocation124_spill] sm:$0xff]  ;;  %s9674_s11 = smov 73  }
 0x27e   :  { %v5825_v10 = vpop.permute.xlu1 %1487  ;;  %v5827_v25 = vpop.permute.xlu0 %1485 }
 0x27f   :  { %10357 = vst [vmem:[#allocation131_spill] sm:$0xff] %v5825_v10  ;;  %10358 = vst [vmem:[#allocation132_spill] sm:$0xff] %v5827_v25 }
 0x280   :  { %1699 = vrot.lane.b32.xlu1 %v10359_v18, %s9672_s10  ;;  %1697 = vrot.lane.b32.xlu0 %v10360_v22, %s9672_s10  ;;  %v10368_v18 = vld [vmem:[#allocation120_spill] sm:$0xff] }
 0x282   :  { %v5833_v31 = vpop.permute.xlu1 %1494  ;;  %v5835_v30 = vpop.permute.xlu0 %1492 }
 0x283   :  { %10361 = vst [vmem:[#allocation103_spill] sm:$0xff] %v5833_v31  ;;  %10362 = vst [vmem:[#allocation104_spill] sm:$0xff] %v5835_v30  ;;  %v10379_v30 = vld [vmem:[#allocation107_spill] sm:$0xff] }
 0x284   :  { %1707 = vrot.lane.b32.xlu1 %v10363_v20, %s9672_s10  ;;  %1705 = vrot.lane.b32.xlu0 %v10364_v21, %s9672_s10  ;;  %v10371_v20 = vld [vmem:[#allocation91_spill] sm:$0xff]  ;;  %v10372_v21 = vld [vmem:[#allocation92_spill] sm:$0xff] }
 0x286   :  { %v5841_v10 = vpop.permute.xlu1 %1501  ;;  %v5843_v25 = vpop.permute.xlu0 %1499 }
 0x287   :  { %10365 = vst [vmem:[#allocation123_spill] sm:$0xff] %v5841_v10  ;;  %10366 = vst [vmem:[#allocation124_spill] sm:$0xff] %v5843_v25 }
 0x288   :  { %1714 = vrot.lane.b32.xlu1 %v10367_v24, %s9672_s10  ;;  %1712 = vrot.lane.b32.xlu0 %v10368_v18, %s9672_s10  ;;  %v10375_v24 = vld [vmem:[#allocation111_spill] sm:$0xff]  ;;  %v10376_v18 = vld [vmem:[#allocation112_spill] sm:$0xff]  ;;  %s9676_s10 = smov 72  }
 0x28a   :  { %v5849_v22 = vpop.permute.xlu1 %1509  ;;  %v5851_v31 = vpop.permute.xlu0 %1507 }
 0x28b   :  { %10369 = vst [vmem:[#allocation119_spill] sm:$0xff] %v5849_v22  ;;  %10370 = vst [vmem:[#allocation120_spill] sm:$0xff] %v5851_v31 }
 0x28c   :  { %1721 = vrot.lane.b32.xlu1 %v10371_v20, %s9674_s11  ;;  %1719 = vrot.lane.b32.xlu0 %v10372_v21, %s9674_s11  ;;  %v10380_v20 = vld [vmem:[#allocation108_spill] sm:$0xff] }
 0x28e   :  { %v5857_v10 = vpop.permute.xlu1 %1516  ;;  %v5859_v25 = vpop.permute.xlu0 %1514 }
 0x28f   :  { %10373 = vst [vmem:[#allocation91_spill] sm:$0xff] %v5857_v10  ;;  %10374 = vst [vmem:[#allocation92_spill] sm:$0xff] %v5859_v25  ;;  %v10391_v25 = vld [vmem:[#allocation95_spill] sm:$0xff] }
 0x290   :  { %1729 = vrot.lane.b32.xlu1 %v10375_v24, %s9674_s11  ;;  %1727 = vrot.lane.b32.xlu0 %v10376_v18, %s9674_s11  ;;  %v10383_v24 = vld [vmem:[#allocation79_spill] sm:$0xff]  ;;  %v10384_v18 = vld [vmem:[#allocation80_spill] sm:$0xff] }
 0x292   :  { %v5865_v22 = vpop.permute.xlu1 %1523  ;;  %v5867_v31 = vpop.permute.xlu0 %1521 }
 0x293   :  { %10377 = vst [vmem:[#allocation111_spill] sm:$0xff] %v5865_v22  ;;  %10378 = vst [vmem:[#allocation112_spill] sm:$0xff] %v5867_v31 }
 0x294   :  { %1736 = vrot.lane.b32.xlu1 %v10379_v30, %s9674_s11  ;;  %1734 = vrot.lane.b32.xlu0 %v10380_v20, %s9674_s11  ;;  %v10387_v30 = vld [vmem:[#allocation99_spill] sm:$0xff]  ;;  %v10388_v20 = vld [vmem:[#allocation100_spill] sm:$0xff]  ;;  %s9678_s11 = smov 71  }
 0x296   :  { %v5873_v21 = vpop.permute.xlu1 %1531  ;;  %v5875_v10 = vpop.permute.xlu0 %1529 }
 0x297   :  { %10381 = vst [vmem:[#allocation107_spill] sm:$0xff] %v5873_v21  ;;  %10382 = vst [vmem:[#allocation108_spill] sm:$0xff] %v5875_v10 }
 0x298   :  { %1743 = vrot.lane.b32.xlu1 %v10383_v24, %s9676_s10  ;;  %1741 = vrot.lane.b32.xlu0 %v10384_v18, %s9676_s10  ;;  %v10392_v24 = vld [vmem:[#allocation96_spill] sm:$0xff] }
 0x29a   :  { %v5881_v22 = vpop.permute.xlu1 %1538  ;;  %v5883_v31 = vpop.permute.xlu0 %1536 }
 0x29b   :  { %10385 = vst [vmem:[#allocation79_spill] sm:$0xff] %v5881_v22  ;;  %10386 = vst [vmem:[#allocation80_spill] sm:$0xff] %v5883_v31  ;;  %v10403_v31 = vld [vmem:[#allocation83_spill] sm:$0xff] }
 0x29c   :  { %1751 = vrot.lane.b32.xlu1 %v10387_v30, %s9676_s10  ;;  %1749 = vrot.lane.b32.xlu0 %v10388_v20, %s9676_s10  ;;  %v10395_v30 = vld [vmem:[#allocation67_spill] sm:$0xff]  ;;  %v10396_v20 = vld [vmem:[#allocation68_spill] sm:$0xff] }
 0x29e   :  { %v5889_v21 = vpop.permute.xlu1 %1545  ;;  %v5891_v10 = vpop.permute.xlu0 %1543 }
 0x29f   :  { %10389 = vst [vmem:[#allocation99_spill] sm:$0xff] %v5889_v21  ;;  %10390 = vst [vmem:[#allocation100_spill] sm:$0xff] %v5891_v10 }
 0x2a0   :  { %1758 = vrot.lane.b32.xlu1 %v10391_v25, %s9676_s10  ;;  %1756 = vrot.lane.b32.xlu0 %v10392_v24, %s9676_s10  ;;  %v10399_v25 = vld [vmem:[#allocation87_spill] sm:$0xff]  ;;  %v10400_v24 = vld [vmem:[#allocation88_spill] sm:$0xff]  ;;  %s9680_s10 = smov 70  }
 0x2a2   :  { %v5897_v18 = vpop.permute.xlu1 %1553  ;;  %v5899_v22 = vpop.permute.xlu0 %1551 }
 0x2a3   :  { %10393 = vst [vmem:[#allocation95_spill] sm:$0xff] %v5897_v18  ;;  %10394 = vst [vmem:[#allocation96_spill] sm:$0xff] %v5899_v22 }
 0x2a4   :  { %1765 = vrot.lane.b32.xlu1 %v10395_v30, %s9678_s11  ;;  %1763 = vrot.lane.b32.xlu0 %v10396_v20, %s9678_s11  ;;  %v10404_v30 = vld [vmem:[#allocation84_spill] sm:$0xff] }
 0x2a6   :  { %v5905_v21 = vpop.permute.xlu1 %1560  ;;  %v5907_v10 = vpop.permute.xlu0 %1558 }
 0x2a7   :  { %10397 = vst [vmem:[#allocation67_spill] sm:$0xff] %v5905_v21  ;;  %10398 = vst [vmem:[#allocation68_spill] sm:$0xff] %v5907_v10  ;;  %v10415_v10 = vld [vmem:[#allocation71_spill] sm:$0xff] }
 0x2a8   :  { %1773 = vrot.lane.b32.xlu1 %v10399_v25, %s9678_s11  ;;  %1771 = vrot.lane.b32.xlu0 %v10400_v24, %s9678_s11  ;;  %v10407_v25 = vld [vmem:[#allocation59_spill] sm:$0xff]  ;;  %v10408_v24 = vld [vmem:[#allocation60_spill] sm:$0xff] }
 0x2aa   :  { %v5913_v18 = vpop.permute.xlu1 %1567  ;;  %v5915_v22 = vpop.permute.xlu0 %1565 }
 0x2ab   :  { %10401 = vst [vmem:[#allocation87_spill] sm:$0xff] %v5913_v18  ;;  %10402 = vst [vmem:[#allocation88_spill] sm:$0xff] %v5915_v22 }
 0x2ac   :  { %1780 = vrot.lane.b32.xlu1 %v10403_v31, %s9678_s11  ;;  %1778 = vrot.lane.b32.xlu0 %v10404_v30, %s9678_s11  ;;  %v10411_v31 = vld [vmem:[#allocation75_spill] sm:$0xff]  ;;  %v10412_v30 = vld [vmem:[#allocation76_spill] sm:$0xff]  ;;  %s9682_s11 = smov 69  }
 0x2ae   :  { %v5921_v20 = vpop.permute.xlu1 %1575  ;;  %v5923_v21 = vpop.permute.xlu0 %1573 }
 0x2af   :  { %10405 = vst [vmem:[#allocation83_spill] sm:$0xff] %v5921_v20  ;;  %10406 = vst [vmem:[#allocation84_spill] sm:$0xff] %v5923_v21 }
 0x2b0   :  { %1787 = vrot.lane.b32.xlu1 %v10407_v25, %s9680_s10  ;;  %1785 = vrot.lane.b32.xlu0 %v10408_v24, %s9680_s10  ;;  %v10416_v25 = vld [vmem:[#allocation72_spill] sm:$0xff] }
 0x2b2   :  { %v5929_v18 = vpop.permute.xlu1 %1582  ;;  %v5931_v22 = vpop.permute.xlu0 %1580 }
 0x2b3   :  { %10409 = vst [vmem:[#allocation59_spill] sm:$0xff] %v5929_v18  ;;  %10410 = vst [vmem:[#allocation60_spill] sm:$0xff] %v5931_v22  ;;  %v10427_v22 = vld [vmem:[#allocation61_spill] sm:$0xff] }
 0x2b4   :  { %1795 = vrot.lane.b32.xlu1 %v10411_v31, %s9680_s10  ;;  %1793 = vrot.lane.b32.xlu0 %v10412_v30, %s9680_s10  ;;  %v10419_v31 = vld [vmem:[#allocation53_spill] sm:$0xff]  ;;  %v10420_v30 = vld [vmem:[#allocation54_spill] sm:$0xff] }
 0x2b6   :  { %v5937_v20 = vpop.permute.xlu1 %1589  ;;  %v5939_v21 = vpop.permute.xlu0 %1587 }
 0x2b7   :  { %10413 = vst [vmem:[#allocation75_spill] sm:$0xff] %v5937_v20  ;;  %10414 = vst [vmem:[#allocation76_spill] sm:$0xff] %v5939_v21 }
 0x2b8   :  { %1802 = vrot.lane.b32.xlu1 %v10415_v10, %s9680_s10  ;;  %1800 = vrot.lane.b32.xlu0 %v10416_v25, %s9680_s10  ;;  %v10423_v10 = vld [vmem:[#allocation63_spill] sm:$0xff]  ;;  %v10424_v25 = vld [vmem:[#allocation64_spill] sm:$0xff]  ;;  %s9684_s10 = smov 68  }
 0x2ba   :  { %v5945_v24 = vpop.permute.xlu1 %1597  ;;  %v5947_v18 = vpop.permute.xlu0 %1595 }
 0x2bb   :  { %10417 = vst [vmem:[#allocation71_spill] sm:$0xff] %v5945_v24  ;;  %10418 = vst [vmem:[#allocation72_spill] sm:$0xff] %v5947_v18 }
 0x2bc   :  { %1809 = vrot.lane.b32.xlu1 %v10419_v31, %s9682_s11  ;;  %1807 = vrot.lane.b32.xlu0 %v10420_v30, %s9682_s11  ;;  %v10428_v31 = vld [vmem:[#allocation62_spill] sm:$0xff] }
 0x2be   :  { %v5953_v20 = vpop.permute.xlu1 %1604  ;;  %v5955_v21 = vpop.permute.xlu0 %1602 }
 0x2bf   :  { %10421 = vst [vmem:[#allocation53_spill] sm:$0xff] %v5953_v20  ;;  %10422 = vst [vmem:[#allocation54_spill] sm:$0xff] %v5955_v21  ;;  %v10439_v21 = vld [vmem:[#allocation55_spill] sm:$0xff] }
 0x2c0   :  { %1817 = vrot.lane.b32.xlu1 %v10423_v10, %s9682_s11  ;;  %1815 = vrot.lane.b32.xlu0 %v10424_v25, %s9682_s11  ;;  %v10431_v10 = vld [vmem:[#allocation47_spill] sm:$0xff]  ;;  %v10432_v25 = vld [vmem:[#allocation48_spill] sm:$0xff] }
 0x2c2   :  { %v5961_v24 = vpop.permute.xlu1 %1611  ;;  %v5963_v18 = vpop.permute.xlu0 %1609 }
 0x2c3   :  { %10425 = vst [vmem:[#allocation63_spill] sm:$0xff] %v5961_v24  ;;  %10426 = vst [vmem:[#allocation64_spill] sm:$0xff] %v5963_v18 }
 0x2c4   :  { %1824 = vrot.lane.b32.xlu1 %v10427_v22, %s9682_s11  ;;  %1822 = vrot.lane.b32.xlu0 %v10428_v31, %s9682_s11  ;;  %v10435_v22 = vld [vmem:[#allocation57_spill] sm:$0xff]  ;;  %v10436_v31 = vld [vmem:[#allocation58_spill] sm:$0xff]  ;;  %s9686_s11 = smov 67  }
 0x2c6   :  { %v5969_v30 = vpop.permute.xlu1 %1619  ;;  %v5971_v20 = vpop.permute.xlu0 %1617 }
 0x2c7   :  { %10429 = vst [vmem:[#allocation61_spill] sm:$0xff] %v5969_v30  ;;  %10430 = vst [vmem:[#allocation62_spill] sm:$0xff] %v5971_v20 }
 0x2c8   :  { %1831 = vrot.lane.b32.xlu1 %v10431_v10, %s9684_s10  ;;  %1829 = vrot.lane.b32.xlu0 %v10432_v25, %s9684_s10  ;;  %v10440_v10 = vld [vmem:[#allocation56_spill] sm:$0xff] }
 0x2ca   :  { %v5977_v24 = vpop.permute.xlu1 %1626  ;;  %v5979_v18 = vpop.permute.xlu0 %1624 }
 0x2cb   :  { %10433 = vst [vmem:[#allocation47_spill] sm:$0xff] %v5977_v24  ;;  %10434 = vst [vmem:[#allocation48_spill] sm:$0xff] %v5979_v18  ;;  %v10451_v18 = vld [vmem:[#allocation49_spill] sm:$0xff] }
 0x2cc   :  { %1839 = vrot.lane.b32.xlu1 %v10435_v22, %s9684_s10  ;;  %1837 = vrot.lane.b32.xlu0 %v10436_v31, %s9684_s10  ;;  %v10443_v22 = vld [vmem:[#allocation41_spill] sm:$0xff]  ;;  %v10444_v31 = vld [vmem:[#allocation42_spill] sm:$0xff] }
 0x2ce   :  { %v5985_v30 = vpop.permute.xlu1 %1633  ;;  %v5987_v20 = vpop.permute.xlu0 %1631 }
 0x2cf   :  { %10437 = vst [vmem:[#allocation57_spill] sm:$0xff] %v5985_v30  ;;  %10438 = vst [vmem:[#allocation58_spill] sm:$0xff] %v5987_v20 }
 0x2d0   :  { %1846 = vrot.lane.b32.xlu1 %v10439_v21, %s9684_s10  ;;  %1844 = vrot.lane.b32.xlu0 %v10440_v10, %s9684_s10  ;;  %v10447_v21 = vld [vmem:[#allocation51_spill] sm:$0xff]  ;;  %v10448_v10 = vld [vmem:[#allocation52_spill] sm:$0xff]  ;;  %s9688_s10 = smov 66  }
 0x2d2   :  { %v5993_v25 = vpop.permute.xlu1 %1641  ;;  %v5995_v24 = vpop.permute.xlu0 %1639 }
 0x2d3   :  { %10441 = vst [vmem:[#allocation55_spill] sm:$0xff] %v5993_v25  ;;  %10442 = vst [vmem:[#allocation56_spill] sm:$0xff] %v5995_v24 }
 0x2d4   :  { %1853 = vrot.lane.b32.xlu1 %v10443_v22, %s9686_s11  ;;  %1851 = vrot.lane.b32.xlu0 %v10444_v31, %s9686_s11  ;;  %v10452_v22 = vld [vmem:[#allocation50_spill] sm:$0xff] }
 0x2d6   :  { %v6001_v30 = vpop.permute.xlu1 %1648  ;;  %v6003_v20 = vpop.permute.xlu0 %1646 }
 0x2d7   :  { %10445 = vst [vmem:[#allocation41_spill] sm:$0xff] %v6001_v30  ;;  %10446 = vst [vmem:[#allocation42_spill] sm:$0xff] %v6003_v20  ;;  %v10463_v20 = vld [vmem:[#allocation43_spill] sm:$0xff] }
 0x2d8   :  { %1861 = vrot.lane.b32.xlu1 %v10447_v21, %s9686_s11  ;;  %1859 = vrot.lane.b32.xlu0 %v10448_v10, %s9686_s11  ;;  %v10455_v21 = vld [vmem:[#allocation35_spill] sm:$0xff]  ;;  %v10456_v10 = vld [vmem:[#allocation36_spill] sm:$0xff] }
 0x2da   :  { %v6009_v25 = vpop.permute.xlu1 %1655  ;;  %v6011_v24 = vpop.permute.xlu0 %1653 }
 0x2db   :  { %10449 = vst [vmem:[#allocation51_spill] sm:$0xff] %v6009_v25  ;;  %10450 = vst [vmem:[#allocation52_spill] sm:$0xff] %v6011_v24 }
 0x2dc   :  { %1868 = vrot.lane.b32.xlu1 %v10451_v18, %s9686_s11  ;;  %1866 = vrot.lane.b32.xlu0 %v10452_v22, %s9686_s11  ;;  %v10459_v18 = vld [vmem:[#allocation45_spill] sm:$0xff]  ;;  %v10460_v22 = vld [vmem:[#allocation46_spill] sm:$0xff]  ;;  %s9690_s11 = smov 65  }
 0x2de   :  { %v6017_v31 = vpop.permute.xlu1 %1663  ;;  %v6019_v30 = vpop.permute.xlu0 %1661 }
 0x2df   :  { %10453 = vst [vmem:[#allocation49_spill] sm:$0xff] %v6017_v31  ;;  %10454 = vst [vmem:[#allocation50_spill] sm:$0xff] %v6019_v30 }
 0x2e0   :  { %1875 = vrot.lane.b32.xlu1 %v10455_v21, %s9688_s10  ;;  %1873 = vrot.lane.b32.xlu0 %v10456_v10, %s9688_s10  ;;  %v10464_v21 = vld [vmem:[#allocation44_spill] sm:$0xff] }
 0x2e2   :  { %v6025_v25 = vpop.permute.xlu1 %1670  ;;  %v6027_v24 = vpop.permute.xlu0 %1668 }
 0x2e3   :  { %10457 = vst [vmem:[#allocation35_spill] sm:$0xff] %v6025_v25  ;;  %10458 = vst [vmem:[#allocation36_spill] sm:$0xff] %v6027_v24  ;;  %v10475_v24 = vld [vmem:[#allocation37_spill] sm:$0xff] }
 0x2e4   :  { %1883 = vrot.lane.b32.xlu1 %v10459_v18, %s9688_s10  ;;  %1881 = vrot.lane.b32.xlu0 %v10460_v22, %s9688_s10  ;;  %v10467_v18 = vld [vmem:[#allocation29_spill] sm:$0xff]  ;;  %v10468_v22 = vld [vmem:[#allocation30_spill] sm:$0xff] }
 0x2e6   :  { %v6033_v31 = vpop.permute.xlu1 %1677  ;;  %v6035_v30 = vpop.permute.xlu0 %1675 }
 0x2e7   :  { %10461 = vst [vmem:[#allocation45_spill] sm:$0xff] %v6033_v31  ;;  %10462 = vst [vmem:[#allocation46_spill] sm:$0xff] %v6035_v30 }
 0x2e8   :  { %1890 = vrot.lane.b32.xlu1 %v10463_v20, %s9688_s10  ;;  %1888 = vrot.lane.b32.xlu0 %v10464_v21, %s9688_s10  ;;  %v10471_v20 = vld [vmem:[#allocation39_spill] sm:$0xff]  ;;  %v10472_v21 = vld [vmem:[#allocation40_spill] sm:$0xff]  ;;  %s9692_s10 = smov 64  }
 0x2ea   :  { %v6041_v10 = vpop.permute.xlu1 %1685  ;;  %v6043_v25 = vpop.permute.xlu0 %1683 }
 0x2eb   :  { %10465 = vst [vmem:[#allocation43_spill] sm:$0xff] %v6041_v10  ;;  %10466 = vst [vmem:[#allocation44_spill] sm:$0xff] %v6043_v25 }
 0x2ec   :  { %1897 = vrot.lane.b32.xlu1 %v10467_v18, %s9690_s11  ;;  %1895 = vrot.lane.b32.xlu0 %v10468_v22, %s9690_s11  ;;  %v10476_v18 = vld [vmem:[#allocation38_spill] sm:$0xff] }
 0x2ee   :  { %v6049_v31 = vpop.permute.xlu1 %1692  ;;  %v6051_v30 = vpop.permute.xlu0 %1690 }
 0x2ef   :  { %10469 = vst [vmem:[#allocation29_spill] sm:$0xff] %v6049_v31  ;;  %10470 = vst [vmem:[#allocation30_spill] sm:$0xff] %v6051_v30  ;;  %v10487_v30 = vld [vmem:[#allocation31_spill] sm:$0xff] }
 0x2f0   :  { %1905 = vrot.lane.b32.xlu1 %v10471_v20, %s9690_s11  ;;  %1903 = vrot.lane.b32.xlu0 %v10472_v21, %s9690_s11  ;;  %v10479_v20 = vld [vmem:[#allocation23_spill] sm:$0xff]  ;;  %v10480_v21 = vld [vmem:[#allocation24_spill] sm:$0xff] }
 0x2f2   :  { %v6057_v10 = vpop.permute.xlu1 %1699  ;;  %v6059_v25 = vpop.permute.xlu0 %1697 }
 0x2f3   :  { %10473 = vst [vmem:[#allocation39_spill] sm:$0xff] %v6057_v10  ;;  %10474 = vst [vmem:[#allocation40_spill] sm:$0xff] %v6059_v25 }
 0x2f4   :  { %1912 = vrot.lane.b32.xlu1 %v10475_v24, %s9690_s11  ;;  %1910 = vrot.lane.b32.xlu0 %v10476_v18, %s9690_s11  ;;  %v10483_v24 = vld [vmem:[#allocation33_spill] sm:$0xff]  ;;  %v10484_v18 = vld [vmem:[#allocation34_spill] sm:$0xff]  ;;  %s9694_s11 = smov 63  }
 0x2f6   :  { %v6065_v22 = vpop.permute.xlu1 %1707  ;;  %v6067_v31 = vpop.permute.xlu0 %1705 }
 0x2f7   :  { %10477 = vst [vmem:[#allocation37_spill] sm:$0xff] %v6065_v22  ;;  %10478 = vst [vmem:[#allocation38_spill] sm:$0xff] %v6067_v31 }
 0x2f8   :  { %1919 = vrot.lane.b32.xlu1 %v10479_v20, %s9692_s10  ;;  %1917 = vrot.lane.b32.xlu0 %v10480_v21, %s9692_s10  ;;  %v10488_v20 = vld [vmem:[#allocation32_spill] sm:$0xff] }
 0x2fa   :  { %v6073_v10 = vpop.permute.xlu1 %1714  ;;  %v6075_v25 = vpop.permute.xlu0 %1712 }
 0x2fb   :  { %10481 = vst [vmem:[#allocation23_spill] sm:$0xff] %v6073_v10  ;;  %10482 = vst [vmem:[#allocation24_spill] sm:$0xff] %v6075_v25  ;;  %v10499_v25 = vld [vmem:[#allocation25_spill] sm:$0xff] }
 0x2fc   :  { %1927 = vrot.lane.b32.xlu1 %v10483_v24, %s9692_s10  ;;  %1925 = vrot.lane.b32.xlu0 %v10484_v18, %s9692_s10  ;;  %v10491_v24 = vld [vmem:[#allocation17_spill] sm:$0xff]  ;;  %v10492_v18 = vld [vmem:[#allocation18_spill] sm:$0xff] }
 0x2fe   :  { %v6081_v22 = vpop.permute.xlu1 %1721  ;;  %v6083_v31 = vpop.permute.xlu0 %1719 }
 0x2ff   :  { %10485 = vst [vmem:[#allocation33_spill] sm:$0xff] %v6081_v22  ;;  %10486 = vst [vmem:[#allocation34_spill] sm:$0xff] %v6083_v31 }
 0x300   :  { %1934 = vrot.lane.b32.xlu1 %v10487_v30, %s9692_s10  ;;  %1932 = vrot.lane.b32.xlu0 %v10488_v20, %s9692_s10  ;;  %v10495_v30 = vld [vmem:[#allocation27_spill] sm:$0xff]  ;;  %v10496_v20 = vld [vmem:[#allocation28_spill] sm:$0xff]  ;;  %s9696_s10 = smov 62  }
 0x302   :  { %v6089_v21 = vpop.permute.xlu1 %1729  ;;  %v6091_v10 = vpop.permute.xlu0 %1727 }
 0x303   :  { %10489 = vst [vmem:[#allocation31_spill] sm:$0xff] %v6089_v21  ;;  %10490 = vst [vmem:[#allocation32_spill] sm:$0xff] %v6091_v10 }
 0x304   :  { %1941 = vrot.lane.b32.xlu1 %v10491_v24, %s9694_s11  ;;  %1939 = vrot.lane.b32.xlu0 %v10492_v18, %s9694_s11  ;;  %v10500_v24 = vld [vmem:[#allocation26_spill] sm:$0xff] }
 0x306   :  { %v6097_v22 = vpop.permute.xlu1 %1736  ;;  %v6099_v31 = vpop.permute.xlu0 %1734 }
 0x307   :  { %10493 = vst [vmem:[#allocation17_spill] sm:$0xff] %v6097_v22  ;;  %10494 = vst [vmem:[#allocation18_spill] sm:$0xff] %v6099_v31  ;;  %v10511_v31 = vld [vmem:[#allocation19_spill] sm:$0xff] }
 0x308   :  { %1949 = vrot.lane.b32.xlu1 %v10495_v30, %s9694_s11  ;;  %1947 = vrot.lane.b32.xlu0 %v10496_v20, %s9694_s11  ;;  %v10503_v30 = vld [vmem:[#allocation11_spill] sm:$0xff]  ;;  %v10504_v20 = vld [vmem:[#allocation12_spill] sm:$0xff] }
 0x30a   :  { %v6105_v21 = vpop.permute.xlu1 %1743  ;;  %v6107_v10 = vpop.permute.xlu0 %1741 }
 0x30b   :  { %10497 = vst [vmem:[#allocation27_spill] sm:$0xff] %v6105_v21  ;;  %10498 = vst [vmem:[#allocation28_spill] sm:$0xff] %v6107_v10 }
 0x30c   :  { %1956 = vrot.lane.b32.xlu1 %v10499_v25, %s9694_s11  ;;  %1954 = vrot.lane.b32.xlu0 %v10500_v24, %s9694_s11  ;;  %v10507_v25 = vld [vmem:[#allocation21_spill] sm:$0xff]  ;;  %v10508_v24 = vld [vmem:[#allocation22_spill] sm:$0xff]  ;;  %s4058_s11 = smov 61  }
 0x30e   :  { %v6113_v18 = vpop.permute.xlu1 %1751  ;;  %v6115_v22 = vpop.permute.xlu0 %1749 }
 0x30f   :  { %10501 = vst [vmem:[#allocation25_spill] sm:$0xff] %v6113_v18  ;;  %10502 = vst [vmem:[#allocation26_spill] sm:$0xff] %v6115_v22 }
 0x310   :  { %1963 = vrot.lane.b32.xlu1 %v10503_v30, %s9696_s10  ;;  %1961 = vrot.lane.b32.xlu0 %v10504_v20, %s9696_s10  ;;  %v10512_v30 = vld [vmem:[#allocation20_spill] sm:$0xff] }
 0x312   :  { %v6121_v21 = vpop.permute.xlu1 %1758  ;;  %v6123_v10 = vpop.permute.xlu0 %1756 }
 0x313   :  { %10505 = vst [vmem:[#allocation11_spill] sm:$0xff] %v6121_v21  ;;  %10506 = vst [vmem:[#allocation12_spill] sm:$0xff] %v6123_v10  ;;  %v10523_v10 = vld [vmem:[#allocation13_spill] sm:$0xff] }
 0x314   :  { %1971 = vrot.lane.b32.xlu1 %v10507_v25, %s9696_s10  ;;  %1969 = vrot.lane.b32.xlu0 %v10508_v24, %s9696_s10  ;;  %v10515_v25 = vld [vmem:[#allocation8_spill] sm:$0xff]  ;;  %v10516_v24 = vld [vmem:[#allocation6_spill] sm:$0xff] }
 0x316   :  { %v6129_v18 = vpop.permute.xlu1 %1765  ;;  %v6131_v22 = vpop.permute.xlu0 %1763 }
 0x317   :  { %10509 = vst [vmem:[#allocation21_spill] sm:$0xff] %v6129_v18  ;;  %10510 = vst [vmem:[#allocation22_spill] sm:$0xff] %v6131_v22 }
 0x318   :  { %1978 = vrot.lane.b32.xlu1 %v10511_v31, %s9696_s10  ;;  %1976 = vrot.lane.b32.xlu0 %v10512_v30, %s9696_s10  ;;  %v10519_v31 = vld [vmem:[#allocation15_spill] sm:$0xff]  ;;  %v10520_v30 = vld [vmem:[#allocation16_spill] sm:$0xff]  ;;  %s11947_s10 = smov 62  }
 0x31a   :  { %v6137_v20 = vpop.permute.xlu1 %1773  ;;  %v6139_v21 = vpop.permute.xlu0 %1771 }
 0x31b   :  { %10513 = vst [vmem:[#allocation19_spill] sm:$0xff] %v6137_v20  ;;  %10514 = vst [vmem:[#allocation20_spill] sm:$0xff] %v6139_v21 }
 0x31c   :  { %1985 = vrot.lane.b32.xlu1 %v10515_v25, %s4058_s11  ;;  %1983 = vrot.lane.b32.xlu0 %v10516_v24, %s4058_s11  ;;  %v10524_v25 = vld [vmem:[#allocation14_spill] sm:$0xff] }
 0x31d   :  { %v3984_v24 = vld [vmem:[%s9475_s1 + $0x8] sm:$0xff] }
 0x31e   :  { %v6145_v18 = vpop.permute.xlu1 %1780  ;;  %v6147_v22 = vpop.permute.xlu0 %1778 }
 0x31f   :  { %10517 = vst [vmem:[#allocation8_spill] sm:$0xff] %v6145_v18  ;;  %10518 = vst [vmem:[#allocation6_spill] sm:$0xff] %v6147_v22  ;;  %v2005_v22 = vmul.f32 0.0, %v3984_v24  ;;  %v10529_v24 = vld [vmem:[#allocation9_spill] sm:$0xff] }
 0x320   :  { %1993 = vrot.lane.b32.xlu1 %v10519_v31, %s4058_s11  ;;  %1991 = vrot.lane.b32.xlu0 %v10520_v30, %s4058_s11  ;;  %v3985_v31 = vld [vmem:[%s9474_s0] sm:$0xff] }
 0x321   :  { %v6167_v30 = vmul.f32 0.0, %v3985_v31  ;;  %v10530_v31 = vld [vmem:[#allocation10_spill] sm:$0xff] }
 0x322   :  { %v6153_v20 = vpop.permute.xlu1 %1787  ;;  %v6155_v21 = vpop.permute.xlu0 %1785 }
 0x323   :  { %10521 = vst [vmem:[#allocation15_spill] sm:$0xff] %v6153_v20  ;;  %10522 = vst [vmem:[#allocation16_spill] sm:$0xff] %v6155_v21 }
 0x324   :  { %2000 = vrot.lane.b32.xlu1 %v10523_v10, %s4058_s11  ;;  %1998 = vrot.lane.b32.xlu0 %v10524_v25, %s4058_s11 }
 0x326   :  { %v6169_v20 = vpop.permute.xlu1 %1795  ;;  %v6171_v21 = vpop.permute.xlu0 %1793 }
 0x327   :  { %10525 = vst [vmem:[#allocation13_spill] sm:$0xff] %v6169_v20  ;;  %10526 = vst [vmem:[#allocation14_spill] sm:$0xff] %v6171_v21  ;;  %v6187_v21 = vld [vmem:[%s9475_s1 + $0x18] sm:$0xff] }
 0x328   :  { %2010 = vrot.lane.b32.xlu1 %v2005_v22, %s4059_s7  ;;  %2008 = vrot.lane.b32.xlu0 %v6167_v30, %s4059_s7  ;;  %v6192_v22 = vld [vmem:[%s9474_s0 + $0x10] sm:$0xff] }
 0x329   :  { %v6206_v18 = vmul.f32 -3.3332586e-07, %v6192_v22 }
 0x32a   :  { %v6176_v10 = vpop.permute.xlu1 %1802  ;;  %v6178_v25 = vpop.permute.xlu0 %1800 }
 0x32b   :  { %10527 = vst [vmem:[#allocation355_spill] sm:$0xff] %v6176_v10  ;;  %10528 = vst [vmem:[#allocation356_spill] sm:$0xff] %v6178_v25  ;;  %v10533_v25 = vld [vmem:[#allocation7_spill] sm:$0xff] }
 0x32c   :  { %2018 = vrot.lane.b32.xlu1 %v10529_v24, %s4059_s7  ;;  %2016 = vrot.lane.b32.xlu0 %v10530_v31, %s4059_s7  ;;  %v10534_v24 = vld [vmem:[#allocation5_spill] sm:$0xff]  ;;  %v6203_v31 = vmul.f32 -3.3332586e-07, %v6187_v21 }
 0x32d   :  { %10536 = vst [vmem:[#allocation5_spill] sm:$0xff] %v6206_v18 }
 0x32e   :  { %v6194_v20 = vpop.permute.xlu1 %1809  ;;  %v6196_v10 = vpop.permute.xlu0 %1807  ;;  %10535 = vst [vmem:[#allocation7_spill] sm:$0xff] %v6203_v31 }
 0x32f   :  { %10531 = vst [vmem:[#allocation9_spill] sm:$0xff] %v6194_v20  ;;  %10532 = vst [vmem:[#allocation10_spill] sm:$0xff] %v6196_v10 }
 0x330   :  { %2025 = vrot.lane.b32.xlu1 %v10533_v25, %s4059_s7  ;;  %2023 = vrot.lane.b32.xlu0 %v10534_v24, %s4059_s7  ;;  %v6217_v25 = vmul.f32 2.893866e-07, %v6187_v21  ;;  %v6220_v24 = vmul.f32 2.893866e-07, %v6192_v22 }
 0x332   :  { %v6208_v27 = vpop.permute.xlu1 %1817  ;;  %v6210_v26 = vpop.permute.xlu0 %1815  ;;  %10539 = vst [vmem:[#allocation359_spill] sm:$0xff] %v6217_v25  ;;  %10540 = vst [vmem:[#allocation360_spill] sm:$0xff] %v6220_v24 }
 0x333   :  { %10537 = vst [vmem:[#allocation357_spill] sm:$0xff] %v6208_v27  ;;  %10538 = vst [vmem:[#allocation358_spill] sm:$0xff] %v6210_v26 }
 0x334   :  { %2045 = vrot.lane.b32.xlu1 %v6203_v31, %s3992_s13  ;;  %2043 = vrot.lane.b32.xlu0 %v6206_v18, %s3992_s13  ;;  %v6231_v31 = vmul.f32 -1.0113653e-08, %v6187_v21  ;;  %v6234_v18 = vmul.f32 -1.0113653e-08, %v6192_v22 }
 0x336   :  { %v6222_v10 = vpop.permute.xlu1 %1824  ;;  %v6224_v20 = vpop.permute.xlu0 %1822  ;;  %10543 = vst [vmem:[#allocation363_spill] sm:$0xff] %v6231_v31  ;;  %10544 = vst [vmem:[#allocation364_spill] sm:$0xff] %v6234_v18 }
 0x337   :  { %10541 = vst [vmem:[#allocation361_spill] sm:$0xff] %v6222_v10  ;;  %10542 = vst [vmem:[#allocation362_spill] sm:$0xff] %v6224_v20 }
 0x338   :  { %2056 = vrot.lane.b32.xlu1 %v6217_v25, %s3992_s13  ;;  %2054 = vrot.lane.b32.xlu0 %v6220_v24, %s3992_s13  ;;  %v6245_v25 = vmul.f32 -6.145231e-07, %v6187_v21  ;;  %v6248_v24 = vmul.f32 -6.145231e-07, %v6192_v22 }
 0x33a   :  { %v6236_v26 = vpop.permute.xlu1 %1831  ;;  %v6238_v27 = vpop.permute.xlu0 %1829  ;;  %10547 = vst [vmem:[#allocation367_spill] sm:$0xff] %v6245_v25  ;;  %10548 = vst [vmem:[#allocation368_spill] sm:$0xff] %v6248_v24 }
 0x33b   :  { %10545 = vst [vmem:[#allocation365_spill] sm:$0xff] %v6236_v26  ;;  %10546 = vst [vmem:[#allocation366_spill] sm:$0xff] %v6238_v27 }
 0x33c   :  { %2067 = vrot.lane.b32.xlu1 %v6231_v31, %s3992_s13  ;;  %2065 = vrot.lane.b32.xlu0 %v6234_v18, %s3992_s13  ;;  %v6259_v31 = vmul.f32 9.765183e-07, %v6187_v21  ;;  %v6262_v18 = vmul.f32 9.765183e-07, %v6192_v22  ;;  %s10803_s13 = smov 105  }
 0x33e   :  { %v6250_v20 = vpop.permute.xlu1 %1839  ;;  %v6252_v10 = vpop.permute.xlu0 %1837  ;;  %10551 = vst [vmem:[#allocation371_spill] sm:$0xff] %v6259_v31  ;;  %10552 = vst [vmem:[#allocation372_spill] sm:$0xff] %v6262_v18 }
 0x33f   :  { %10549 = vst [vmem:[#allocation369_spill] sm:$0xff] %v6250_v20  ;;  %10550 = vst [vmem:[#allocation370_spill] sm:$0xff] %v6252_v10 }
 0x340   :  { %2078 = vrot.lane.b32.xlu1 %v6245_v25, %s3993_s14  ;;  %2076 = vrot.lane.b32.xlu0 %v6248_v24, %s3993_s14  ;;  %v6273_v25 = vmul.f32 -2.4703675e-07, %v6187_v21  ;;  %v6276_v24 = vmul.f32 -2.4703675e-07, %v6192_v22 }
 0x342   :  { %v6264_v27 = vpop.permute.xlu1 %1846  ;;  %v6266_v26 = vpop.permute.xlu0 %1844  ;;  %10555 = vst [vmem:[#allocation375_spill] sm:$0xff] %v6273_v25  ;;  %10556 = vst [vmem:[#allocation376_spill] sm:$0xff] %v6276_v24 }
 0x343   :  { %10553 = vst [vmem:[#allocation373_spill] sm:$0xff] %v6264_v27  ;;  %10554 = vst [vmem:[#allocation374_spill] sm:$0xff] %v6266_v26 }
 0x344   :  { %2089 = vrot.lane.b32.xlu1 %v6259_v31, %s3993_s14  ;;  %2087 = vrot.lane.b32.xlu0 %v6262_v18, %s3993_s14  ;;  %v6287_v31 = vmul.f32 -5.0298127e-07, %v6187_v21  ;;  %v6290_v18 = vmul.f32 -5.0298127e-07, %v6192_v22 }
 0x346   :  { %v6278_v10 = vpop.permute.xlu1 %1853  ;;  %v6280_v20 = vpop.permute.xlu0 %1851  ;;  %10559 = vst [vmem:[#allocation379_spill] sm:$0xff] %v6287_v31  ;;  %10560 = vst [vmem:[#allocation380_spill] sm:$0xff] %v6290_v18 }
 0x347   :  { %10557 = vst [vmem:[#allocation377_spill] sm:$0xff] %v6278_v10  ;;  %10558 = vst [vmem:[#allocation378_spill] sm:$0xff] %v6280_v20 }
 0x348   :  { %2100 = vrot.lane.b32.xlu1 %v6273_v25, %s3993_s14  ;;  %2098 = vrot.lane.b32.xlu0 %v6276_v24, %s3993_s14  ;;  %v6301_v25 = vmul.f32 2.3644823e-06, %v6187_v21  ;;  %v6304_v24 = vmul.f32 2.3644823e-06, %v6192_v22  ;;  %s10814_s14 = smov 104  }
 0x34a   :  { %v6292_v26 = vpop.permute.xlu1 %1861  ;;  %v6294_v27 = vpop.permute.xlu0 %1859  ;;  %10563 = vst [vmem:[#allocation383_spill] sm:$0xff] %v6301_v25  ;;  %10564 = vst [vmem:[#allocation384_spill] sm:$0xff] %v6304_v24 }
 0x34b   :  { %10561 = vst [vmem:[#allocation381_spill] sm:$0xff] %v6292_v26  ;;  %10562 = vst [vmem:[#allocation382_spill] sm:$0xff] %v6294_v27 }
 0x34c   :  { %2111 = vrot.lane.b32.xlu1 %v6287_v31, %s3994_s15  ;;  %2109 = vrot.lane.b32.xlu0 %v6290_v18, %s3994_s15  ;;  %v6315_v31 = vmul.f32 -1.1554592e-06, %v6187_v21  ;;  %v6318_v18 = vmul.f32 -1.1554592e-06, %v6192_v22 }
 0x34e   :  { %v6306_v20 = vpop.permute.xlu1 %1868  ;;  %v6308_v10 = vpop.permute.xlu0 %1866  ;;  %10567 = vst [vmem:[#allocation387_spill] sm:$0xff] %v6315_v31  ;;  %10568 = vst [vmem:[#allocation388_spill] sm:$0xff] %v6318_v18 }
 0x34f   :  { %10565 = vst [vmem:[#allocation385_spill] sm:$0xff] %v6306_v20  ;;  %10566 = vst [vmem:[#allocation386_spill] sm:$0xff] %v6308_v10 }
 0x350   :  { %2122 = vrot.lane.b32.xlu1 %v6301_v25, %s3994_s15  ;;  %2120 = vrot.lane.b32.xlu0 %v6304_v24, %s3994_s15  ;;  %v6329_v25 = vmul.f32 1.0600529e-06, %v6187_v21  ;;  %v6332_v24 = vmul.f32 1.0600529e-06, %v6192_v22 }
 0x352   :  { %v6320_v27 = vpop.permute.xlu1 %1875  ;;  %v6322_v26 = vpop.permute.xlu0 %1873  ;;  %10571 = vst [vmem:[#allocation391_spill] sm:$0xff] %v6329_v25  ;;  %10572 = vst [vmem:[#allocation392_spill] sm:$0xff] %v6332_v24 }
 0x353   :  { %10569 = vst [vmem:[#allocation389_spill] sm:$0xff] %v6320_v27  ;;  %10570 = vst [vmem:[#allocation390_spill] sm:$0xff] %v6322_v26 }
 0x354   :  { %2133 = vrot.lane.b32.xlu1 %v6315_v31, %s3994_s15  ;;  %2131 = vrot.lane.b32.xlu0 %v6318_v18, %s3994_s15  ;;  %v6343_v31 = vmul.f32 4.480519e-06, %v6187_v21  ;;  %v6346_v18 = vmul.f32 4.480519e-06, %v6192_v22  ;;  %s10825_s15 = smov 103  }
 0x356   :  { %v6334_v10 = vpop.permute.xlu1 %1883  ;;  %v6336_v20 = vpop.permute.xlu0 %1881  ;;  %10575 = vst [vmem:[#allocation395_spill] sm:$0xff] %v6343_v31  ;;  %10576 = vst [vmem:[#allocation396_spill] sm:$0xff] %v6346_v18 }
 0x357   :  { %10573 = vst [vmem:[#allocation393_spill] sm:$0xff] %v6334_v10  ;;  %10574 = vst [vmem:[#allocation394_spill] sm:$0xff] %v6336_v20 }
 0x358   :  { %2144 = vrot.lane.b32.xlu1 %v6329_v25, %s3995_s16  ;;  %2142 = vrot.lane.b32.xlu0 %v6332_v24, %s3995_s16  ;;  %v6357_v25 = vmul.f32 -3.4961722e-06, %v6187_v21  ;;  %v6360_v24 = vmul.f32 -3.4961722e-06, %v6192_v22 }
 0x35a   :  { %v6348_v26 = vpop.permute.xlu1 %1890  ;;  %v6350_v27 = vpop.permute.xlu0 %1888  ;;  %10579 = vst [vmem:[#allocation399_spill] sm:$0xff] %v6357_v25  ;;  %10580 = vst [vmem:[#allocation400_spill] sm:$0xff] %v6360_v24 }
 0x35b   :  { %10577 = vst [vmem:[#allocation397_spill] sm:$0xff] %v6348_v26  ;;  %10578 = vst [vmem:[#allocation398_spill] sm:$0xff] %v6350_v27 }
 0x35c   :  { %2155 = vrot.lane.b32.xlu1 %v6343_v31, %s3995_s16  ;;  %2153 = vrot.lane.b32.xlu0 %v6346_v18, %s3995_s16  ;;  %v6371_v31 = vmul.f32 5.9531285e-06, %v6187_v21  ;;  %v6374_v18 = vmul.f32 5.9531285e-06, %v6192_v22 }
 0x35e   :  { %v6362_v20 = vpop.permute.xlu1 %1897  ;;  %v6364_v10 = vpop.permute.xlu0 %1895  ;;  %10583 = vst [vmem:[#allocation403_spill] sm:$0xff] %v6371_v31  ;;  %10584 = vst [vmem:[#allocation404_spill] sm:$0xff] %v6374_v18 }
 0x35f   :  { %10581 = vst [vmem:[#allocation401_spill] sm:$0xff] %v6362_v20  ;;  %10582 = vst [vmem:[#allocation402_spill] sm:$0xff] %v6364_v10 }
 0x360   :  { %2166 = vrot.lane.b32.xlu1 %v6357_v25, %s3995_s16  ;;  %2164 = vrot.lane.b32.xlu0 %v6360_v24, %s3995_s16  ;;  %v6385_v25 = vmul.f32 6.6757e-06, %v6187_v21  ;;  %v6388_v24 = vmul.f32 6.6757e-06, %v6192_v22  ;;  %s10832_s16 = smov 102  }
 0x362   :  { %v6376_v27 = vpop.permute.xlu1 %1905  ;;  %v6378_v26 = vpop.permute.xlu0 %1903  ;;  %10587 = vst [vmem:[#allocation407_spill] sm:$0xff] %v6385_v25  ;;  %10588 = vst [vmem:[#allocation408_spill] sm:$0xff] %v6388_v24 }
 0x363   :  { %10585 = vst [vmem:[#allocation405_spill] sm:$0xff] %v6376_v27  ;;  %10586 = vst [vmem:[#allocation406_spill] sm:$0xff] %v6378_v26 }
 0x364   :  { %2177 = vrot.lane.b32.xlu1 %v6371_v31, %s3996_s17  ;;  %2175 = vrot.lane.b32.xlu0 %v6374_v18, %s3996_s17  ;;  %v6399_v31 = vmul.f32 -8.224281e-06, %v6187_v21  ;;  %v6402_v18 = vmul.f32 -8.224281e-06, %v6192_v22 }
 0x366   :  { %v6390_v10 = vpop.permute.xlu1 %1912  ;;  %v6392_v20 = vpop.permute.xlu0 %1910  ;;  %10591 = vst [vmem:[#allocation411_spill] sm:$0xff] %v6399_v31  ;;  %10592 = vst [vmem:[#allocation412_spill] sm:$0xff] %v6402_v18 }
 0x367   :  { %10589 = vst [vmem:[#allocation409_spill] sm:$0xff] %v6390_v10  ;;  %10590 = vst [vmem:[#allocation410_spill] sm:$0xff] %v6392_v20 }
 0x368   :  { %2188 = vrot.lane.b32.xlu1 %v6385_v25, %s3996_s17  ;;  %2186 = vrot.lane.b32.xlu0 %v6388_v24, %s3996_s17  ;;  %v6413_v25 = vmul.f32 1.6811291e-05, %v6187_v21  ;;  %v6416_v24 = vmul.f32 1.6811291e-05, %v6192_v22 }
 0x36a   :  { %v6404_v26 = vpop.permute.xlu1 %1919  ;;  %v6406_v27 = vpop.permute.xlu0 %1917  ;;  %10595 = vst [vmem:[#allocation415_spill] sm:$0xff] %v6413_v25  ;;  %10596 = vst [vmem:[#allocation416_spill] sm:$0xff] %v6416_v24 }
 0x36b   :  { %10593 = vst [vmem:[#allocation413_spill] sm:$0xff] %v6404_v26  ;;  %10594 = vst [vmem:[#allocation414_spill] sm:$0xff] %v6406_v27 }
 0x36c   :  { %2199 = vrot.lane.b32.xlu1 %v6399_v31, %s3996_s17  ;;  %2197 = vrot.lane.b32.xlu0 %v6402_v18, %s3996_s17  ;;  %v6427_v31 = vmul.f32 7.0313927e-06, %v6187_v21  ;;  %v6430_v18 = vmul.f32 7.0313927e-06, %v6192_v22  ;;  %s10839_s17 = smov 101  }
 0x36e   :  { %v6418_v20 = vpop.permute.xlu1 %1927  ;;  %v6420_v10 = vpop.permute.xlu0 %1925  ;;  %10599 = vst [vmem:[#allocation419_spill] sm:$0xff] %v6427_v31  ;;  %10600 = vst [vmem:[#allocation420_spill] sm:$0xff] %v6430_v18 }
 0x36f   :  { %10597 = vst [vmem:[#allocation417_spill] sm:$0xff] %v6418_v20  ;;  %10598 = vst [vmem:[#allocation418_spill] sm:$0xff] %v6420_v10 }
 0x370   :  { %2210 = vrot.lane.b32.xlu1 %v6413_v25, %s3997_s18  ;;  %2208 = vrot.lane.b32.xlu0 %v6416_v24, %s3997_s18  ;;  %v6441_v25 = vmul.f32 -1.6071968e-05, %v6187_v21  ;;  %v6444_v24 = vmul.f32 -1.6071968e-05, %v6192_v22 }
 0x372   :  { %v6432_v27 = vpop.permute.xlu1 %1934  ;;  %v6434_v26 = vpop.permute.xlu0 %1932  ;;  %10603 = vst [vmem:[#allocation423_spill] sm:$0xff] %v6441_v25  ;;  %10604 = vst [vmem:[#allocation424_spill] sm:$0xff] %v6444_v24 }
 0x373   :  { %10601 = vst [vmem:[#allocation421_spill] sm:$0xff] %v6432_v27  ;;  %10602 = vst [vmem:[#allocation422_spill] sm:$0xff] %v6434_v26 }
 0x374   :  { %2221 = vrot.lane.b32.xlu1 %v6427_v31, %s3997_s18  ;;  %2219 = vrot.lane.b32.xlu0 %v6430_v18, %s3997_s18  ;;  %v6455_v31 = vmul.f32 3.6450398e-05, %v6187_v21  ;;  %v6458_v18 = vmul.f32 3.6450398e-05, %v6192_v22 }
 0x376   :  { %v6446_v10 = vpop.permute.xlu1 %1941  ;;  %v6448_v20 = vpop.permute.xlu0 %1939  ;;  %10607 = vst [vmem:[#allocation427_spill] sm:$0xff] %v6455_v31  ;;  %10608 = vst [vmem:[#allocation428_spill] sm:$0xff] %v6458_v18 }
 0x377   :  { %10605 = vst [vmem:[#allocation425_spill] sm:$0xff] %v6446_v10  ;;  %10606 = vst [vmem:[#allocation426_spill] sm:$0xff] %v6448_v20 }
 0x378   :  { %2232 = vrot.lane.b32.xlu1 %v6441_v25, %s3997_s18  ;;  %2230 = vrot.lane.b32.xlu0 %v6444_v24, %s3997_s18  ;;  %v6469_v25 = vmul.f32 1.7958853e-06, %v6187_v21  ;;  %v6472_v24 = vmul.f32 1.7958853e-06, %v6192_v22  ;;  %s10846_s18 = smov 100  }
 0x37a   :  { %v6460_v26 = vpop.permute.xlu1 %1949  ;;  %v6462_v27 = vpop.permute.xlu0 %1947  ;;  %10611 = vst [vmem:[#allocation431_spill] sm:$0xff] %v6469_v25  ;;  %10612 = vst [vmem:[#allocation432_spill] sm:$0xff] %v6472_v24 }
 0x37b   :  { %10609 = vst [vmem:[#allocation429_spill] sm:$0xff] %v6460_v26  ;;  %10610 = vst [vmem:[#allocation430_spill] sm:$0xff] %v6462_v27 }
 0x37c   :  { %2243 = vrot.lane.b32.xlu1 %v6455_v31, %s3998_s19  ;;  %2241 = vrot.lane.b32.xlu0 %v6458_v18, %s3998_s19  ;;  %v6483_v31 = vmul.f32 -2.6738515e-05, %v6187_v21  ;;  %v6486_v18 = vmul.f32 -2.6738515e-05, %v6192_v22 }
 0x37e   :  { %v6474_v20 = vpop.permute.xlu1 %1956  ;;  %v6476_v10 = vpop.permute.xlu0 %1954  ;;  %10615 = vst [vmem:[#allocation435_spill] sm:$0xff] %v6483_v31  ;;  %10616 = vst [vmem:[#allocation436_spill] sm:$0xff] %v6486_v18 }
 0x37f   :  { %10613 = vst [vmem:[#allocation433_spill] sm:$0xff] %v6474_v20  ;;  %10614 = vst [vmem:[#allocation434_spill] sm:$0xff] %v6476_v10 }
 0x380   :  { %2254 = vrot.lane.b32.xlu1 %v6469_v25, %s3998_s19  ;;  %2252 = vrot.lane.b32.xlu0 %v6472_v24, %s3998_s19  ;;  %v6497_v25 = vmul.f32 6.6581095e-05, %v6187_v21  ;;  %v6500_v24 = vmul.f32 6.6581095e-05, %v6192_v22 }
 0x382   :  { %v6488_v27 = vpop.permute.xlu1 %1963  ;;  %v6490_v26 = vpop.permute.xlu0 %1961  ;;  %10619 = vst [vmem:[#allocation439_spill] sm:$0xff] %v6497_v25  ;;  %10620 = vst [vmem:[#allocation440_spill] sm:$0xff] %v6500_v24 }
 0x383   :  { %10617 = vst [vmem:[#allocation437_spill] sm:$0xff] %v6488_v27  ;;  %10618 = vst [vmem:[#allocation438_spill] sm:$0xff] %v6490_v26 }
 0x384   :  { %2265 = vrot.lane.b32.xlu1 %v6483_v31, %s3998_s19  ;;  %2263 = vrot.lane.b32.xlu0 %v6486_v18, %s3998_s19  ;;  %v6511_v31 = vmul.f32 -1.4836428e-05, %v6187_v21  ;;  %v6514_v18 = vmul.f32 -1.4836428e-05, %v6192_v22  ;;  %s10853_s19 = smov 99  }
 0x386   :  { %v6502_v10 = vpop.permute.xlu1 %1971  ;;  %v6504_v20 = vpop.permute.xlu0 %1969  ;;  %10623 = vst [vmem:[#allocation443_spill] sm:$0xff] %v6511_v31  ;;  %10624 = vst [vmem:[#allocation444_spill] sm:$0xff] %v6514_v18 }
 0x387   :  { %10621 = vst [vmem:[#allocation441_spill] sm:$0xff] %v6502_v10  ;;  %10622 = vst [vmem:[#allocation442_spill] sm:$0xff] %v6504_v20 }
 0x388   :  { %2276 = vrot.lane.b32.xlu1 %v6497_v25, %s3999_s20  ;;  %2274 = vrot.lane.b32.xlu0 %v6500_v24, %s3999_s20  ;;  %v6525_v25 = vmul.f32 -3.771897e-05, %v6187_v21  ;;  %v6528_v24 = vmul.f32 -3.771897e-05, %v6192_v22 }
 0x38a   :  { %v6516_v26 = vpop.permute.xlu1 %1978  ;;  %v6518_v27 = vpop.permute.xlu0 %1976  ;;  %10627 = vst [vmem:[#allocation447_spill] sm:$0xff] %v6525_v25  ;;  %10628 = vst [vmem:[#allocation448_spill] sm:$0xff] %v6528_v24 }
 0x38b   :  { %10625 = vst [vmem:[#allocation445_spill] sm:$0xff] %v6516_v26  ;;  %10626 = vst [vmem:[#allocation446_spill] sm:$0xff] %v6518_v27 }
 0x38c   :  { %2287 = vrot.lane.b32.xlu1 %v6511_v31, %s3999_s20  ;;  %2285 = vrot.lane.b32.xlu0 %v6514_v18, %s3999_s20  ;;  %v6539_v31 = vmul.f32 0.000105753636, %v6187_v21  ;;  %v6542_v18 = vmul.f32 0.000105753636, %v6192_v22 }
 0x38e   :  { %v6530_v20 = vpop.permute.xlu1 %1985  ;;  %v6532_v10 = vpop.permute.xlu0 %1983  ;;  %10631 = vst [vmem:[#allocation451_spill] sm:$0xff] %v6539_v31  ;;  %10632 = vst [vmem:[#allocation452_spill] sm:$0xff] %v6542_v18 }
 0x38f   :  { %10629 = vst [vmem:[#allocation449_spill] sm:$0xff] %v6530_v20  ;;  %10630 = vst [vmem:[#allocation450_spill] sm:$0xff] %v6532_v10 }
 0x390   :  { %2298 = vrot.lane.b32.xlu1 %v6525_v25, %s3999_s20  ;;  %2296 = vrot.lane.b32.xlu0 %v6528_v24, %s3999_s20  ;;  %v6553_v25 = vmul.f32 -5.0169023e-05, %v6187_v21  ;;  %v6556_v24 = vmul.f32 -5.0169023e-05, %v6192_v22  ;;  %s11253_s20 = smov 78  }
 0x392   :  { %v6544_v27 = vpop.permute.xlu1 %1993  ;;  %v6546_v26 = vpop.permute.xlu0 %1991  ;;  %10635 = vst [vmem:[#allocation455_spill] sm:$0xff] %v6553_v25  ;;  %10636 = vst [vmem:[#allocation456_spill] sm:$0xff] %v6556_v24 }
 0x393   :  { %10633 = vst [vmem:[#allocation453_spill] sm:$0xff] %v6544_v27  ;;  %10634 = vst [vmem:[#allocation454_spill] sm:$0xff] %v6546_v26 }
 0x394   :  { %2309 = vrot.lane.b32.xlu1 %v6539_v31, %s4000_s21  ;;  %2307 = vrot.lane.b32.xlu0 %v6542_v18, %s4000_s21  ;;  %v6567_v31 = vmul.f32 -4.3000786e-05, %v6187_v21  ;;  %v6570_v18 = vmul.f32 -4.3000786e-05, %v6192_v22 }
 0x396   :  { %v6558_v10 = vpop.permute.xlu1 %2000  ;;  %v6560_v20 = vpop.permute.xlu0 %1998  ;;  %10639 = vst [vmem:[#allocation459_spill] sm:$0xff] %v6567_v31  ;;  %10640 = vst [vmem:[#allocation460_spill] sm:$0xff] %v6570_v18 }
 0x397   :  { %10637 = vst [vmem:[#allocation457_spill] sm:$0xff] %v6558_v10  ;;  %10638 = vst [vmem:[#allocation458_spill] sm:$0xff] %v6560_v20 }
 0x398   :  { %2320 = vrot.lane.b32.xlu1 %v6553_v25, %s4000_s21  ;;  %2318 = vrot.lane.b32.xlu0 %v6556_v24, %s4000_s21  ;;  %v6581_v25 = vmul.f32 0.00014678841, %v6187_v21  ;;  %v6584_v24 = vmul.f32 0.00014678841, %v6192_v22 }
 0x39a   :  { %v6572_v26 = vpop.permute.xlu1 %2010  ;;  %v6574_v27 = vpop.permute.xlu0 %2008  ;;  %10643 = vst [vmem:[#allocation463_spill] sm:$0xff] %v6581_v25  ;;  %10644 = vst [vmem:[#allocation464_spill] sm:$0xff] %v6584_v24 }
 0x39b   :  { %10641 = vst [vmem:[#allocation461_spill] sm:$0xff] %v6572_v26  ;;  %10642 = vst [vmem:[#allocation462_spill] sm:$0xff] %v6574_v27 }
 0x39c   :  { %2331 = vrot.lane.b32.xlu1 %v6567_v31, %s4000_s21  ;;  %2329 = vrot.lane.b32.xlu0 %v6570_v18, %s4000_s21  ;;  %v6595_v31 = vmul.f32 -0.00011126512, %v6187_v21  ;;  %v6598_v18 = vmul.f32 -0.00011126512, %v6192_v22  ;;  %s11302_s21 = smov 77  }
 0x39e   :  { %v6586_v20 = vpop.permute.xlu1 %2018  ;;  %v6588_v10 = vpop.permute.xlu0 %2016  ;;  %10647 = vst [vmem:[#allocation467_spill] sm:$0xff] %v6595_v31  ;;  %10648 = vst [vmem:[#allocation468_spill] sm:$0xff] %v6598_v18 }
 0x39f   :  { %10645 = vst [vmem:[#allocation465_spill] sm:$0xff] %v6586_v20  ;;  %10646 = vst [vmem:[#allocation466_spill] sm:$0xff] %v6588_v10 }
 0x3a0   :  { %2342 = vrot.lane.b32.xlu1 %v6581_v25, %s4001_s22  ;;  %2340 = vrot.lane.b32.xlu0 %v6584_v24, %s4001_s22  ;;  %v6609_v25 = vmul.f32 -3.2098797e-05, %v6187_v21  ;;  %v6612_v24 = vmul.f32 -3.2098797e-05, %v6192_v22 }
 0x3a2   :  { %v6600_v27 = vpop.permute.xlu1 %2025  ;;  %v6602_v26 = vpop.permute.xlu0 %2023  ;;  %10651 = vst [vmem:[#allocation471_spill] sm:$0xff] %v6609_v25  ;;  %10652 = vst [vmem:[#allocation472_spill] sm:$0xff] %v6612_v24 }
 0x3a3   :  { %10649 = vst [vmem:[#allocation469_spill] sm:$0xff] %v6600_v27  ;;  %10650 = vst [vmem:[#allocation470_spill] sm:$0xff] %v6602_v26 }
 0x3a4   :  { %2353 = vrot.lane.b32.xlu1 %v6595_v31, %s4001_s22  ;;  %2351 = vrot.lane.b32.xlu0 %v6598_v18, %s4001_s22  ;;  %v6623_v31 = vmul.f32 0.00017430572, %v6187_v21  ;;  %v6626_v18 = vmul.f32 0.00017430572, %v6192_v22 }
 0x3a6   :  { %v6614_v10 = vpop.permute.xlu1 %2045  ;;  %v6616_v20 = vpop.permute.xlu0 %2043  ;;  %10655 = vst [vmem:[#allocation475_spill] sm:$0xff] %v6623_v31  ;;  %10656 = vst [vmem:[#allocation476_spill] sm:$0xff] %v6626_v18 }
 0x3a7   :  { %10653 = vst [vmem:[#allocation473_spill] sm:$0xff] %v6614_v10  ;;  %10654 = vst [vmem:[#allocation474_spill] sm:$0xff] %v6616_v20 }
 0x3a8   :  { %2364 = vrot.lane.b32.xlu1 %v6609_v25, %s4001_s22  ;;  %2362 = vrot.lane.b32.xlu0 %v6612_v24, %s4001_s22  ;;  %v6637_v25 = vmul.f32 -0.000201789, %v6187_v21  ;;  %v6640_v24 = vmul.f32 -0.000201789, %v6192_v22  ;;  %s11351_s22 = smov 76  }
 0x3aa   :  { %v6628_v26 = vpop.permute.xlu1 %2056  ;;  %v6630_v27 = vpop.permute.xlu0 %2054  ;;  %10659 = vst [vmem:[#allocation479_spill] sm:$0xff] %v6637_v25  ;;  %10660 = vst [vmem:[#allocation480_spill] sm:$0xff] %v6640_v24 }
 0x3ab   :  { %10657 = vst [vmem:[#allocation477_spill] sm:$0xff] %v6628_v26  ;;  %10658 = vst [vmem:[#allocation478_spill] sm:$0xff] %v6630_v27 }
 0x3ac   :  { %2375 = vrot.lane.b32.xlu1 %v6623_v31, %s4002_s23  ;;  %2373 = vrot.lane.b32.xlu0 %v6626_v18, %s4002_s23  ;;  %v6651_v31 = vmul.f32 9.891269e-06, %v6187_v21  ;;  %v6654_v18 = vmul.f32 9.891269e-06, %v6192_v22 }
 0x3ae   :  { %v6642_v20 = vpop.permute.xlu1 %2067  ;;  %v6644_v10 = vpop.permute.xlu0 %2065  ;;  %10663 = vst [vmem:[#allocation483_spill] sm:$0xff] %v6651_v31  ;;  %10664 = vst [vmem:[#allocation484_spill] sm:$0xff] %v6654_v18 }
 0x3af   :  { %10661 = vst [vmem:[#allocation481_spill] sm:$0xff] %v6642_v20  ;;  %10662 = vst [vmem:[#allocation482_spill] sm:$0xff] %v6644_v10 }
 0x3b0   :  { %2386 = vrot.lane.b32.xlu1 %v6637_v25, %s4002_s23  ;;  %2384 = vrot.lane.b32.xlu0 %v6640_v24, %s4002_s23  ;;  %v6665_v25 = vmul.f32 0.00016335421, %v6187_v21  ;;  %v6668_v24 = vmul.f32 0.00016335421, %v6192_v22 }
 0x3b2   :  { %v6656_v27 = vpop.permute.xlu1 %2078  ;;  %v6658_v26 = vpop.permute.xlu0 %2076  ;;  %10667 = vst [vmem:[#allocation487_spill] sm:$0xff] %v6665_v25  ;;  %10668 = vst [vmem:[#allocation488_spill] sm:$0xff] %v6668_v24 }
 0x3b3   :  { %10665 = vst [vmem:[#allocation485_spill] sm:$0xff] %v6656_v27  ;;  %10666 = vst [vmem:[#allocation486_spill] sm:$0xff] %v6658_v26 }
 0x3b4   :  { %2397 = vrot.lane.b32.xlu1 %v6651_v31, %s4002_s23  ;;  %2395 = vrot.lane.b32.xlu0 %v6654_v18, %s4002_s23  ;;  %v6679_v31 = vmul.f32 -0.00031758338, %v6187_v21  ;;  %v6682_v18 = vmul.f32 -0.00031758338, %v6192_v22  ;;  %s11400_s23 = smov 75  }
 0x3b6   :  { %v6670_v10 = vpop.permute.xlu1 %2089  ;;  %v6672_v20 = vpop.permute.xlu0 %2087  ;;  %10671 = vst [vmem:[#allocation491_spill] sm:$0xff] %v6679_v31  ;;  %10672 = vst [vmem:[#allocation492_spill] sm:$0xff] %v6682_v18 }
 0x3b7   :  { %10669 = vst [vmem:[#allocation489_spill] sm:$0xff] %v6670_v10  ;;  %10670 = vst [vmem:[#allocation490_spill] sm:$0xff] %v6672_v20  ;;  %v6693_v20 = vmul.f32 0.00010047296, %v6187_v21  ;;  %v6696_v10 = vmul.f32 0.00010047296, %v6192_v22 }
 0x3b8   :  { %2408 = vrot.lane.b32.xlu1 %v6665_v25, %s4003_s24  ;;  %2406 = vrot.lane.b32.xlu0 %v6668_v24, %s4003_s24 }
 0x3b9   :  { %10675 = vst [vmem:[#allocation495_spill] sm:$0xff] %v6693_v20  ;;  %10676 = vst [vmem:[#allocation496_spill] sm:$0xff] %v6696_v10 }
 0x3ba   :  { %v6684_v26 = vpop.permute.xlu1 %2100  ;;  %v6686_v27 = vpop.permute.xlu0 %2098 }
 0x3bb   :  { %10673 = vst [vmem:[#allocation493_spill] sm:$0xff] %v6684_v26  ;;  %10674 = vst [vmem:[#allocation494_spill] sm:$0xff] %v6686_v27 }
 0x3bc   :  { %2419 = vrot.lane.b32.xlu1 %v6679_v31, %s4003_s24  ;;  %2417 = vrot.lane.b32.xlu0 %v6682_v18, %s4003_s24  ;;  %v6707_v31 = vmul.f32 8.035919e-05, %v6187_v21  ;;  %v6710_v18 = vmul.f32 8.035919e-05, %v6192_v22 }
 0x3be   :  { %v6698_v24 = vpop.permute.xlu1 %2111  ;;  %v6700_v25 = vpop.permute.xlu0 %2109  ;;  %10679 = vst [vmem:[#allocation499_spill] sm:$0xff] %v6707_v31  ;;  %10680 = vst [vmem:[#allocation500_spill] sm:$0xff] %v6710_v18 }
 0x3bf   :  { %10677 = vst [vmem:[#allocation497_spill] sm:$0xff] %v6698_v24  ;;  %10678 = vst [vmem:[#allocation498_spill] sm:$0xff] %v6700_v25 }
 0x3c0   :  { %2430 = vrot.lane.b32.xlu1 %v6693_v20, %s4003_s24  ;;  %2428 = vrot.lane.b32.xlu0 %v6696_v10, %s4003_s24  ;;  %v6721_v20 = vmul.f32 -0.00044169105, %v6187_v21  ;;  %v6724_v10 = vmul.f32 -0.00044169105, %v6192_v22  ;;  %s10860_s24 = smov 98  }
 0x3c2   :  { %v6712_v27 = vpop.permute.xlu1 %2122  ;;  %v6714_v26 = vpop.permute.xlu0 %2120  ;;  %10683 = vst [vmem:[#allocation503_spill] sm:$0xff] %v6721_v20  ;;  %10684 = vst [vmem:[#allocation504_spill] sm:$0xff] %v6724_v10 }
 0x3c3   :  { %10681 = vst [vmem:[#allocation501_spill] sm:$0xff] %v6712_v27  ;;  %10682 = vst [vmem:[#allocation502_spill] sm:$0xff] %v6714_v26  ;;  %v6735_v26 = vmul.f32 0.00025557194, %v6187_v21  ;;  %v6738_v27 = vmul.f32 0.00025557194, %v6192_v22 }
 0x3c4   :  { %2441 = vrot.lane.b32.xlu1 %v6707_v31, %s4004_s25  ;;  %2439 = vrot.lane.b32.xlu0 %v6710_v18, %s4004_s25 }
 0x3c5   :  { %10687 = vst [vmem:[#allocation507_spill] sm:$0xff] %v6735_v26  ;;  %10688 = vst [vmem:[#allocation508_spill] sm:$0xff] %v6738_v27 }
 0x3c6   :  { %v6726_v25 = vpop.permute.xlu1 %2133  ;;  %v6728_v24 = vpop.permute.xlu0 %2131 }
 0x3c7   :  { %10685 = vst [vmem:[#allocation505_spill] sm:$0xff] %v6726_v25  ;;  %10686 = vst [vmem:[#allocation506_spill] sm:$0xff] %v6728_v24 }
 0x3c8   :  { %2452 = vrot.lane.b32.xlu1 %v6721_v20, %s4004_s25  ;;  %2450 = vrot.lane.b32.xlu0 %v6724_v10, %s4004_s25  ;;  %v6749_v20 = vmul.f32 -0.00011245872, %v6187_v21  ;;  %v6752_v10 = vmul.f32 -0.00011245872, %v6192_v22 }
 0x3ca   :  { %v6740_v18 = vpop.permute.xlu1 %2144  ;;  %v6742_v31 = vpop.permute.xlu0 %2142  ;;  %10691 = vst [vmem:[#allocation511_spill] sm:$0xff] %v6749_v20  ;;  %10692 = vst [vmem:[#allocation512_spill] sm:$0xff] %v6752_v10 }
 0x3cb   :  { %10689 = vst [vmem:[#allocation509_spill] sm:$0xff] %v6740_v18  ;;  %10690 = vst [vmem:[#allocation510_spill] sm:$0xff] %v6742_v31 }
 0x3cc   :  { %2463 = vrot.lane.b32.xlu1 %v6735_v26, %s4004_s25  ;;  %2461 = vrot.lane.b32.xlu0 %v6738_v27, %s4004_s25  ;;  %v6763_v26 = vmul.f32 -0.0005401386, %v6187_v21  ;;  %v6766_v27 = vmul.f32 -0.0005401386, %v6192_v22  ;;  %s10867_s25 = smov 97  }
 0x3ce   :  { %v6754_v24 = vpop.permute.xlu1 %2155  ;;  %v6756_v25 = vpop.permute.xlu0 %2153  ;;  %10695 = vst [vmem:[#allocation515_spill] sm:$0xff] %v6763_v26  ;;  %10696 = vst [vmem:[#allocation516_spill] sm:$0xff] %v6766_v27 }
 0x3cf   :  { %10693 = vst [vmem:[#allocation513_spill] sm:$0xff] %v6754_v24  ;;  %10694 = vst [vmem:[#allocation514_spill] sm:$0xff] %v6756_v25  ;;  %v6777_v25 = vmul.f32 0.00048291383, %v6187_v21  ;;  %v6780_v24 = vmul.f32 0.00048291383, %v6192_v22 }
 0x3d0   :  { %2474 = vrot.lane.b32.xlu1 %v6749_v20, %s4005_s26  ;;  %2472 = vrot.lane.b32.xlu0 %v6752_v10, %s4005_s26 }
 0x3d1   :  { %10699 = vst [vmem:[#allocation519_spill] sm:$0xff] %v6777_v25  ;;  %10700 = vst [vmem:[#allocation520_spill] sm:$0xff] %v6780_v24 }
 0x3d2   :  { %v6768_v31 = vpop.permute.xlu1 %2166  ;;  %v6770_v18 = vpop.permute.xlu0 %2164 }
 0x3d3   :  { %10697 = vst [vmem:[#allocation517_spill] sm:$0xff] %v6768_v31  ;;  %10698 = vst [vmem:[#allocation518_spill] sm:$0xff] %v6770_v18  ;;  %v6791_v18 = vmul.f32 -0.00044851314, %v6187_v21  ;;  %v6794_v31 = vmul.f32 -0.00044851314, %v6192_v22 }
 0x3d4   :  { %2485 = vrot.lane.b32.xlu1 %v6763_v26, %s4005_s26  ;;  %2483 = vrot.lane.b32.xlu0 %v6766_v27, %s4005_s26 }
 0x3d5   :  { %10703 = vst [vmem:[#allocation523_spill] sm:$0xff] %v6791_v18  ;;  %10704 = vst [vmem:[#allocation524_spill] sm:$0xff] %v6794_v31 }
 0x3d6   :  { %v6782_v10 = vpop.permute.xlu1 %2177  ;;  %v6784_v20 = vpop.permute.xlu0 %2175 }
 0x3d7   :  { %10701 = vst [vmem:[#allocation521_spill] sm:$0xff] %v6782_v10  ;;  %10702 = vst [vmem:[#allocation522_spill] sm:$0xff] %v6784_v20  ;;  %v6805_v20 = vmul.f32 -0.00056027767, %v6187_v21  ;;  %v6808_v10 = vmul.f32 -0.00056027767, %v6192_v22 }
 0x3d8   :  { %2496 = vrot.lane.b32.xlu1 %v6777_v25, %s4005_s26  ;;  %2494 = vrot.lane.b32.xlu0 %v6780_v24, %s4005_s26  ;;  %s10874_s26 = smov 96  }
 0x3d9   :  { %10707 = vst [vmem:[#allocation527_spill] sm:$0xff] %v6805_v20  ;;  %10708 = vst [vmem:[#allocation528_spill] sm:$0xff] %v6808_v10 }
 0x3da   :  { %v6796_v27 = vpop.permute.xlu1 %2188  ;;  %v6798_v26 = vpop.permute.xlu0 %2186 }
 0x3db   :  { %10705 = vst [vmem:[#allocation525_spill] sm:$0xff] %v6796_v27  ;;  %10706 = vst [vmem:[#allocation526_spill] sm:$0xff] %v6798_v26  ;;  %v6819_v26 = vmul.f32 0.00077349396, %v6187_v21  ;;  %v6822_v27 = vmul.f32 0.00077349396, %v6192_v22 }
 0x3dc   :  { %2507 = vrot.lane.b32.xlu1 %v6791_v18, %s4006_s27  ;;  %2505 = vrot.lane.b32.xlu0 %v6794_v31, %s4006_s27 }
 0x3dd   :  { %10711 = vst [vmem:[#allocation531_spill] sm:$0xff] %v6819_v26  ;;  %10712 = vst [vmem:[#allocation532_spill] sm:$0xff] %v6822_v27 }
 0x3de   :  { %v6810_v24 = vpop.permute.xlu1 %2199  ;;  %v6812_v25 = vpop.permute.xlu0 %2197 }
 0x3df   :  { %10709 = vst [vmem:[#allocation529_spill] sm:$0xff] %v6810_v24  ;;  %10710 = vst [vmem:[#allocation530_spill] sm:$0xff] %v6812_v25  ;;  %v6833_v25 = vmul.f32 -0.00094441214, %v6187_v21  ;;  %v6836_v24 = vmul.f32 -0.00094441214, %v6192_v22 }
 0x3e0   :  { %2518 = vrot.lane.b32.xlu1 %v6805_v20, %s4006_s27  ;;  %2516 = vrot.lane.b32.xlu0 %v6808_v10, %s4006_s27 }
 0x3e1   :  { %10715 = vst [vmem:[#allocation535_spill] sm:$0xff] %v6833_v25  ;;  %10716 = vst [vmem:[#allocation536_spill] sm:$0xff] %v6836_v24 }
 0x3e2   :  { %v6824_v31 = vpop.permute.xlu1 %2210  ;;  %v6826_v18 = vpop.permute.xlu0 %2208 }
 0x3e3   :  { %10713 = vst [vmem:[#allocation533_spill] sm:$0xff] %v6824_v31  ;;  %10714 = vst [vmem:[#allocation534_spill] sm:$0xff] %v6826_v18  ;;  %v6847_v18 = vmul.f32 -0.00043360752, %v6187_v21  ;;  %v6850_v31 = vmul.f32 -0.00043360752, %v6192_v22 }
 0x3e4   :  { %2529 = vrot.lane.b32.xlu1 %v6819_v26, %s4006_s27  ;;  %2527 = vrot.lane.b32.xlu0 %v6822_v27, %s4006_s27  ;;  %s10881_s27 = smov 95  }
 0x3e5   :  { %10719 = vst [vmem:[#allocation539_spill] sm:$0xff] %v6847_v18  ;;  %10720 = vst [vmem:[#allocation540_spill] sm:$0xff] %v6850_v31 }
 0x3e6   :  { %v6838_v10 = vpop.permute.xlu1 %2221  ;;  %v6840_v20 = vpop.permute.xlu0 %2219 }
 0x3e7   :  { %10717 = vst [vmem:[#allocation537_spill] sm:$0xff] %v6838_v10  ;;  %10718 = vst [vmem:[#allocation538_spill] sm:$0xff] %v6840_v20  ;;  %v6861_v20 = vmul.f32 0.001092803, %v6187_v21  ;;  %v6864_v10 = vmul.f32 0.001092803, %v6192_v22 }
 0x3e8   :  { %2540 = vrot.lane.b32.xlu1 %v6833_v25, %s4007_s28  ;;  %2538 = vrot.lane.b32.xlu0 %v6836_v24, %s4007_s28 }
 0x3e9   :  { %10723 = vst [vmem:[#allocation543_spill] sm:$0xff] %v6861_v20  ;;  %10724 = vst [vmem:[#allocation544_spill] sm:$0xff] %v6864_v10 }
 0x3ea   :  { %v6852_v27 = vpop.permute.xlu1 %2232  ;;  %v6854_v26 = vpop.permute.xlu0 %2230 }
 0x3eb   :  { %10721 = vst [vmem:[#allocation541_spill] sm:$0xff] %v6852_v27  ;;  %10722 = vst [vmem:[#allocation542_spill] sm:$0xff] %v6854_v26  ;;  %v6875_v26 = vmul.f32 -0.0015849671, %v6187_v21  ;;  %v6878_v27 = vmul.f32 -0.0015849671, %v6192_v22 }
 0x3ec   :  { %2551 = vrot.lane.b32.xlu1 %v6847_v18, %s4007_s28  ;;  %2549 = vrot.lane.b32.xlu0 %v6850_v31, %s4007_s28 }
 0x3ed   :  { %10727 = vst [vmem:[#allocation547_spill] sm:$0xff] %v6875_v26  ;;  %10728 = vst [vmem:[#allocation548_spill] sm:$0xff] %v6878_v27 }
 0x3ee   :  { %v6866_v24 = vpop.permute.xlu1 %2243  ;;  %v6868_v25 = vpop.permute.xlu0 %2241 }
 0x3ef   :  { %10725 = vst [vmem:[#allocation545_spill] sm:$0xff] %v6866_v24  ;;  %10726 = vst [vmem:[#allocation546_spill] sm:$0xff] %v6868_v25  ;;  %v6889_v25 = vmul.f32 -8.474487e-05, %v6187_v21  ;;  %v6892_v24 = vmul.f32 -8.474487e-05, %v6192_v22 }
 0x3f0   :  { %2562 = vrot.lane.b32.xlu1 %v6861_v20, %s4007_s28  ;;  %2560 = vrot.lane.b32.xlu0 %v6864_v10, %s4007_s28  ;;  %s10888_s28 = smov 94  }
 0x3f1   :  { %10731 = vst [vmem:[#allocation551_spill] sm:$0xff] %v6889_v25  ;;  %10732 = vst [vmem:[#allocation552_spill] sm:$0xff] %v6892_v24 }
 0x3f2   :  { %v6880_v31 = vpop.permute.xlu1 %2254  ;;  %v6882_v18 = vpop.permute.xlu0 %2252 }
 0x3f3   :  { %10729 = vst [vmem:[#allocation549_spill] sm:$0xff] %v6880_v31  ;;  %10730 = vst [vmem:[#allocation550_spill] sm:$0xff] %v6882_v18  ;;  %v6903_v18 = vmul.f32 0.0013740512, %v6187_v21  ;;  %v6906_v31 = vmul.f32 0.0013740512, %v6192_v22 }
 0x3f4   :  { %2573 = vrot.lane.b32.xlu1 %v6875_v26, %s4008_s29  ;;  %2571 = vrot.lane.b32.xlu0 %v6878_v27, %s4008_s29 }
 0x3f5   :  { %10735 = vst [vmem:[#allocation555_spill] sm:$0xff] %v6903_v18  ;;  %10736 = vst [vmem:[#allocation556_spill] sm:$0xff] %v6906_v31 }
 0x3f6   :  { %v6894_v10 = vpop.permute.xlu1 %2265  ;;  %v6896_v20 = vpop.permute.xlu0 %2263 }
 0x3f7   :  { %10733 = vst [vmem:[#allocation553_spill] sm:$0xff] %v6894_v10  ;;  %10734 = vst [vmem:[#allocation554_spill] sm:$0xff] %v6896_v20  ;;  %v6917_v20 = vmul.f32 -0.0023086295, %v6187_v21  ;;  %v6920_v10 = vmul.f32 -0.0023086295, %v6192_v22 }
 0x3f8   :  { %2584 = vrot.lane.b32.xlu1 %v6889_v25, %s4008_s29  ;;  %2582 = vrot.lane.b32.xlu0 %v6892_v24, %s4008_s29 }
 0x3f9   :  { %10739 = vst [vmem:[#allocation559_spill] sm:$0xff] %v6917_v20  ;;  %10740 = vst [vmem:[#allocation560_spill] sm:$0xff] %v6920_v10 }
 0x3fa   :  { %v6908_v27 = vpop.permute.xlu1 %2276  ;;  %v6910_v26 = vpop.permute.xlu0 %2274 }
 0x3fb   :  { %10737 = vst [vmem:[#allocation557_spill] sm:$0xff] %v6908_v27  ;;  %10738 = vst [vmem:[#allocation558_spill] sm:$0xff] %v6910_v26  ;;  %v6931_v26 = vmul.f32 0.00055310444, %v6187_v21  ;;  %v6934_v27 = vmul.f32 0.00055310444, %v6192_v22 }
 0x3fc   :  { %2595 = vrot.lane.b32.xlu1 %v6903_v18, %s4008_s29  ;;  %2593 = vrot.lane.b32.xlu0 %v6906_v31, %s4008_s29  ;;  %s10892_s29 = smov 93  }
 0x3fd   :  { %10743 = vst [vmem:[#allocation563_spill] sm:$0xff] %v6931_v26  ;;  %10744 = vst [vmem:[#allocation564_spill] sm:$0xff] %v6934_v27 }
 0x3fe   :  { %v6922_v24 = vpop.permute.xlu1 %2287  ;;  %v6924_v25 = vpop.permute.xlu0 %2285 }
 0x3ff   :  { %10741 = vst [vmem:[#allocation561_spill] sm:$0xff] %v6922_v24  ;;  %10742 = vst [vmem:[#allocation562_spill] sm:$0xff] %v6924_v25  ;;  %v6945_v25 = vmul.f32 0.0015163377, %v6187_v21  ;;  %v6948_v24 = vmul.f32 0.0015163377, %v6192_v22 }
 0x400   :  { %2606 = vrot.lane.b32.xlu1 %v6917_v20, %s4009_s30  ;;  %2604 = vrot.lane.b32.xlu0 %v6920_v10, %s4009_s30 }
 0x401   :  { %10747 = vst [vmem:[#allocation567_spill] sm:$0xff] %v6945_v25  ;;  %10748 = vst [vmem:[#allocation568_spill] sm:$0xff] %v6948_v24 }
 0x402   :  { %v6936_v31 = vpop.permute.xlu1 %2298  ;;  %v6938_v18 = vpop.permute.xlu0 %2296 }
 0x403   :  { %10745 = vst [vmem:[#allocation565_spill] sm:$0xff] %v6936_v31  ;;  %10746 = vst [vmem:[#allocation566_spill] sm:$0xff] %v6938_v18  ;;  %v6959_v18 = vmul.f32 -0.0029968754, %v6187_v21  ;;  %v6962_v31 = vmul.f32 -0.0029968754, %v6192_v22 }
 0x404   :  { %2617 = vrot.lane.b32.xlu1 %v6931_v26, %s4009_s30  ;;  %2615 = vrot.lane.b32.xlu0 %v6934_v27, %s4009_s30 }
 0x405   :  { %10751 = vst [vmem:[#allocation571_spill] sm:$0xff] %v6959_v18  ;;  %10752 = vst [vmem:[#allocation572_spill] sm:$0xff] %v6962_v31 }
 0x406   :  { %v6950_v10 = vpop.permute.xlu1 %2309  ;;  %v6952_v20 = vpop.permute.xlu0 %2307 }
 0x407   :  { %10749 = vst [vmem:[#allocation569_spill] sm:$0xff] %v6950_v10  ;;  %10750 = vst [vmem:[#allocation570_spill] sm:$0xff] %v6952_v20  ;;  %v6973_v20 = vmul.f32 0.0015168241, %v6187_v21  ;;  %v6976_v10 = vmul.f32 0.0015168241, %v6192_v22 }
 0x408   :  { %2628 = vrot.lane.b32.xlu1 %v6945_v25, %s4009_s30  ;;  %2626 = vrot.lane.b32.xlu0 %v6948_v24, %s4009_s30  ;;  %s10893_s30 = smov 92  }
 0x409   :  { %10755 = vst [vmem:[#allocation575_spill] sm:$0xff] %v6973_v20  ;;  %10756 = vst [vmem:[#allocation576_spill] sm:$0xff] %v6976_v10 }
 0x40a   :  { %v6964_v27 = vpop.permute.xlu1 %2320  ;;  %v6966_v26 = vpop.permute.xlu0 %2318 }
 0x40b   :  { %10753 = vst [vmem:[#allocation573_spill] sm:$0xff] %v6964_v27  ;;  %10754 = vst [vmem:[#allocation574_spill] sm:$0xff] %v6966_v26  ;;  %v6987_v26 = vmul.f32 0.0013904902, %v6187_v21  ;;  %v6990_v27 = vmul.f32 0.0013904902, %v6192_v22 }
 0x40c   :  { %2639 = vrot.lane.b32.xlu1 %v6959_v18, %s4010_s3  ;;  %2637 = vrot.lane.b32.xlu0 %v6962_v31, %s4010_s3 }
 0x40d   :  { %10759 = vst [vmem:[#allocation579_spill] sm:$0xff] %v6987_v26  ;;  %10760 = vst [vmem:[#allocation580_spill] sm:$0xff] %v6990_v27 }
 0x40e   :  { %v6978_v24 = vpop.permute.xlu1 %2331  ;;  %v6980_v25 = vpop.permute.xlu0 %2329 }
 0x40f   :  { %10757 = vst [vmem:[#allocation577_spill] sm:$0xff] %v6978_v24  ;;  %10758 = vst [vmem:[#allocation578_spill] sm:$0xff] %v6980_v25  ;;  %v7001_v25 = vmul.f32 -0.0034717058, %v6187_v21  ;;  %v7004_v24 = vmul.f32 -0.0034717058, %v6192_v22 }
 0x410   :  { %2650 = vrot.lane.b32.xlu1 %v6973_v20, %s4010_s3  ;;  %2648 = vrot.lane.b32.xlu0 %v6976_v10, %s4010_s3 }
 0x411   :  { %10763 = vst [vmem:[#allocation583_spill] sm:$0xff] %v7001_v25  ;;  %10764 = vst [vmem:[#allocation584_spill] sm:$0xff] %v7004_v24 }
 0x412   :  { %v6992_v37 = vpop.permute.xlu1 %2342  ;;  %v6994_v36 = vpop.permute.xlu0 %2340 }
 0x413   :  { %10761 = vst [vmem:[#allocation581_spill] sm:$0xff] %v6992_v37  ;;  %10762 = vst [vmem:[#allocation582_spill] sm:$0xff] %v6994_v36  ;;  %v7015_v36 = vmul.f32 0.0027889863, %v6187_v21  ;;  %v7018_v37 = vmul.f32 0.0027889863, %v6192_v22 }
 0x414   :  { %2661 = vrot.lane.b32.xlu1 %v6987_v26, %s4010_s3  ;;  %2659 = vrot.lane.b32.xlu0 %v6990_v27, %s4010_s3  ;;  %s10894_s3 = smov 91  }
 0x415   :  { %10767 = vst [vmem:[#allocation587_spill] sm:$0xff] %v7015_v36  ;;  %10768 = vst [vmem:[#allocation588_spill] sm:$0xff] %v7018_v37 }
 0x416   :  { %v7006_v10 = vpop.permute.xlu1 %2353  ;;  %v7008_v20 = vpop.permute.xlu0 %2351 }
 0x417   :  { %10765 = vst [vmem:[#allocation585_spill] sm:$0xff] %v7006_v10  ;;  %10766 = vst [vmem:[#allocation586_spill] sm:$0xff] %v7008_v20  ;;  %v7029_v20 = vmul.f32 0.00085455814, %v6187_v21  ;;  %v7032_v10 = vmul.f32 0.00085455814, %v6192_v22 }
 0x418   :  { %2672 = vrot.lane.b32.xlu1 %v7001_v25, %s4011_s4  ;;  %2670 = vrot.lane.b32.xlu0 %v7004_v24, %s4011_s4 }
 0x419   :  { %10771 = vst [vmem:[#allocation591_spill] sm:$0xff] %v7029_v20  ;;  %10772 = vst [vmem:[#allocation592_spill] sm:$0xff] %v7032_v10 }
 0x41a   :  { %v7020_v27 = vpop.permute.xlu1 %2364  ;;  %v7022_v26 = vpop.permute.xlu0 %2362 }
 0x41b   :  { %10769 = vst [vmem:[#allocation589_spill] sm:$0xff] %v7020_v27  ;;  %10770 = vst [vmem:[#allocation590_spill] sm:$0xff] %v7022_v26  ;;  %v7043_v26 = vmul.f32 -0.0035047475, %v6187_v21  ;;  %v7046_v27 = vmul.f32 -0.0035047475, %v6192_v22 }
 0x41c   :  { %2683 = vrot.lane.b32.xlu1 %v7015_v36, %s4011_s4  ;;  %2681 = vrot.lane.b32.xlu0 %v7018_v37, %s4011_s4 }
 0x41d   :  { %10775 = vst [vmem:[#allocation595_spill] sm:$0xff] %v7043_v26  ;;  %10776 = vst [vmem:[#allocation596_spill] sm:$0xff] %v7046_v27 }
 0x41e   :  { %v7034_v11 = vpop.permute.xlu1 %2375  ;;  %v7036_v23 = vpop.permute.xlu0 %2373 }
 0x41f   :  { %10773 = vst [vmem:[#allocation593_spill] sm:$0xff] %v7034_v11  ;;  %10774 = vst [vmem:[#allocation594_spill] sm:$0xff] %v7036_v23  ;;  %v7057_v23 = vmul.f32 0.004274708, %v6187_v21  ;;  %v7060_v11 = vmul.f32 0.004274708, %v6192_v22 }
 0x420   :  { %2694 = vrot.lane.b32.xlu1 %v7029_v20, %s4011_s4  ;;  %2692 = vrot.lane.b32.xlu0 %v7032_v10, %s4011_s4  ;;  %s10895_s4 = smov 90  }
 0x421   :  { %10779 = vst [vmem:[#allocation599_spill] sm:$0xff] %v7057_v23  ;;  %10780 = vst [vmem:[#allocation600_spill] sm:$0xff] %v7060_v11 }
 0x422   :  { %v7048_v37 = vpop.permute.xlu1 %2386  ;;  %v7050_v36 = vpop.permute.xlu0 %2384 }
 0x423   :  { %10777 = vst [vmem:[#allocation597_spill] sm:$0xff] %v7048_v37  ;;  %10778 = vst [vmem:[#allocation598_spill] sm:$0xff] %v7050_v36  ;;  %v7071_v36 = vmul.f32 -0.00022117872, %v6187_v21  ;;  %v7074_v37 = vmul.f32 -0.00022117872, %v6192_v22 }
 0x424   :  { %2705 = vrot.lane.b32.xlu1 %v7043_v26, %s4012_s5  ;;  %2703 = vrot.lane.b32.xlu0 %v7046_v27, %s4012_s5 }
 0x425   :  { %10783 = vst [vmem:[#allocation603_spill] sm:$0xff] %v7071_v36  ;;  %10784 = vst [vmem:[#allocation604_spill] sm:$0xff] %v7074_v37 }
 0x426   :  { %v7062_v33 = vpop.permute.xlu1 %2397  ;;  %v7064_v32 = vpop.permute.xlu0 %2395 }
 0x427   :  { %10781 = vst [vmem:[#allocation601_spill] sm:$0xff] %v7062_v33  ;;  %10782 = vst [vmem:[#allocation602_spill] sm:$0xff] %v7064_v32  ;;  %v7085_v32 = vmul.f32 -0.0028396894, %v6187_v21  ;;  %v7088_v33 = vmul.f32 -0.0028396894, %v6192_v22 }
 0x428   :  { %2716 = vrot.lane.b32.xlu1 %v7057_v23, %s4012_s5  ;;  %2714 = vrot.lane.b32.xlu0 %v7060_v11, %s4012_s5 }
 0x429   :  { %10787 = vst [vmem:[#allocation607_spill] sm:$0xff] %v7085_v32  ;;  %10788 = vst [vmem:[#allocation608_spill] sm:$0xff] %v7088_v33 }
 0x42a   :  { %v7076_v43 = vpop.permute.xlu1 %2408  ;;  %v7078_v42 = vpop.permute.xlu0 %2406 }
 0x42b   :  { %10785 = vst [vmem:[#allocation605_spill] sm:$0xff] %v7076_v43  ;;  %10786 = vst [vmem:[#allocation606_spill] sm:$0xff] %v7078_v42  ;;  %v7099_v42 = vmul.f32 0.0057847854, %v6187_v21  ;;  %v7102_v43 = vmul.f32 0.0057847854, %v6192_v22 }
 0x42c   :  { %2727 = vrot.lane.b32.xlu1 %v7071_v36, %s4012_s5  ;;  %2725 = vrot.lane.b32.xlu0 %v7074_v37, %s4012_s5  ;;  %s10896_s5 = smov 89  }
 0x42d   :  { %10791 = vst [vmem:[#allocation611_spill] sm:$0xff] %v7099_v42  ;;  %10792 = vst [vmem:[#allocation612_spill] sm:$0xff] %v7102_v43 }
 0x42e   :  { %v7090_v10 = vpop.permute.xlu1 %2419  ;;  %v7092_v20 = vpop.permute.xlu0 %2417 }
 0x42f   :  { %10789 = vst [vmem:[#allocation609_spill] sm:$0xff] %v7090_v10  ;;  %10790 = vst [vmem:[#allocation610_spill] sm:$0xff] %v7092_v20  ;;  %v7113_v20 = vmul.f32 -0.001921063, %v6187_v21  ;;  %v7116_v10 = vmul.f32 -0.001921063, %v6192_v22 }
 0x430   :  { %2738 = vrot.lane.b32.xlu1 %v7085_v32, %s4013_s6  ;;  %2736 = vrot.lane.b32.xlu0 %v7088_v33, %s4013_s6 }
 0x431   :  { %10795 = vst [vmem:[#allocation615_spill] sm:$0xff] %v7113_v20  ;;  %10796 = vst [vmem:[#allocation616_spill] sm:$0xff] %v7116_v10 }
 0x432   :  { %v7104_v29 = vpop.permute.xlu1 %2430  ;;  %v7106_v28 = vpop.permute.xlu0 %2428 }
 0x433   :  { %10793 = vst [vmem:[#allocation613_spill] sm:$0xff] %v7104_v29  ;;  %10794 = vst [vmem:[#allocation614_spill] sm:$0xff] %v7106_v28  ;;  %v7127_v28 = vmul.f32 -0.0012270714, %v6187_v21  ;;  %v7130_v29 = vmul.f32 -0.0012270714, %v6192_v22 }
 0x434   :  { %2749 = vrot.lane.b32.xlu1 %v7099_v42, %s4013_s6  ;;  %2747 = vrot.lane.b32.xlu0 %v7102_v43, %s4013_s6 }
 0x435   :  { %10799 = vst [vmem:[#allocation619_spill] sm:$0xff] %v7127_v28  ;;  %10800 = vst [vmem:[#allocation620_spill] sm:$0xff] %v7130_v29 }
 0x436   :  { %v7118_v39 = vpop.permute.xlu1 %2441  ;;  %v7120_v38 = vpop.permute.xlu0 %2439 }
 0x437   :  { %10797 = vst [vmem:[#allocation617_spill] sm:$0xff] %v7118_v39  ;;  %10798 = vst [vmem:[#allocation618_spill] sm:$0xff] %v7120_v38  ;;  %v7141_v38 = vmul.f32 0.0070300926, %v6187_v21  ;;  %v7144_v39 = vmul.f32 0.0070300926, %v6192_v22 }
 0x438   :  { %2760 = vrot.lane.b32.xlu1 %v7113_v20, %s4013_s6  ;;  %2758 = vrot.lane.b32.xlu0 %v7116_v10, %s4013_s6  ;;  %s10899_s6 = smov 88  }
 0x439   :  { %10804 = vst [vmem:[#allocation623_spill] sm:$0xff] %v7141_v38  ;;  %10805 = vst [vmem:[#allocation624_spill] sm:$0xff] %v7144_v39 }
 0x43a   :  { %v7132_v49 = vpop.permute.xlu1 %2452  ;;  %v7134_v48 = vpop.permute.xlu0 %2450 }
 0x43b   :  { %10801 = vst [vmem:[#allocation621_spill] sm:$0xff] %v7132_v49  ;;  %10802 = vst [vmem:[#allocation622_spill] sm:$0xff] %v7134_v48  ;;  %v7155_v48 = vmul.f32 -0.004247494, %v6187_v21  ;;  %v7158_v49 = vmul.f32 -0.004247494, %v6192_v22 }
 0x43c   :  { %2771 = vrot.lane.b32.xlu1 %v7127_v28, %s10803_s13  ;;  %2769 = vrot.lane.b32.xlu0 %v7130_v29, %s10803_s13 }
 0x43d   :  { %10808 = vst [vmem:[#allocation627_spill] sm:$0xff] %v7155_v48  ;;  %10809 = vst [vmem:[#allocation628_spill] sm:$0xff] %v7158_v49 }
 0x43e   :  { %v7146_v35 = vpop.permute.xlu1 %2463  ;;  %v7148_v34 = vpop.permute.xlu0 %2461 }
 0x43f   :  { %10806 = vst [vmem:[#allocation625_spill] sm:$0xff] %v7146_v35  ;;  %10807 = vst [vmem:[#allocation626_spill] sm:$0xff] %v7148_v34  ;;  %v7169_v34 = vmul.f32 0.0015320082, %v6187_v21  ;;  %v7172_v35 = vmul.f32 0.0015320082, %v6192_v22 }
 0x440   :  { %2782 = vrot.lane.b32.xlu1 %v7141_v38, %s10803_s13  ;;  %2780 = vrot.lane.b32.xlu0 %v7144_v39, %s10803_s13 }
 0x442   :  { %v7160_v45 = vpop.permute.xlu1 %2474  ;;  %v7162_v44 = vpop.permute.xlu0 %2472 }
 0x443   :  { %10810 = vst [vmem:[#allocation629_spill] sm:$0xff] %v7160_v45  ;;  %10811 = vst [vmem:[#allocation630_spill] sm:$0xff] %v7162_v44  ;;  %v7183_v44 = vmul.f32 0.0076303035, %v6187_v21  ;;  %v7186_v45 = vmul.f32 0.0076303035, %v6192_v22 }
 0x444   :  { %2793 = vrot.lane.b32.xlu1 %v7155_v48, %s10803_s13  ;;  %2791 = vrot.lane.b32.xlu0 %v7158_v49, %s10803_s13  ;;  %s10919_s13 = smov 85  }
 0x445   :  { %10815 = vst [vmem:[#allocation633_spill] sm:$0xff] %v7183_v44  ;;  %10816 = vst [vmem:[#allocation634_spill] sm:$0xff] %v7186_v45 }
 0x446   :  { %v7174_v55 = vpop.permute.xlu1 %2485  ;;  %v7176_v54 = vpop.permute.xlu0 %2483 }
 0x447   :  { %10812 = vst [vmem:[#allocation631_spill] sm:$0xff] %v7174_v55  ;;  %10813 = vst [vmem:[#allocation632_spill] sm:$0xff] %v7176_v54  ;;  %v7197_v54 = vmul.f32 -0.0070863296, %v6187_v21  ;;  %v7200_v55 = vmul.f32 -0.0070863296, %v6192_v22 }
 0x448   :  { %2804 = vrot.lane.b32.xlu1 %v7169_v34, %s10814_s14  ;;  %2802 = vrot.lane.b32.xlu0 %v7172_v35, %s10814_s14 }
 0x449   :  { %10819 = vst [vmem:[#allocation637_spill] sm:$0xff] %v7197_v54  ;;  %10820 = vst [vmem:[#allocation638_spill] sm:$0xff] %v7200_v55 }
 0x44a   :  { %v7188_v31 = vpop.permute.xlu1 %2496  ;;  %v7190_v18 = vpop.permute.xlu0 %2494 }
 0x44b   :  { %10817 = vst [vmem:[#allocation635_spill] sm:$0xff] %v7188_v31  ;;  %10818 = vst [vmem:[#allocation636_spill] sm:$0xff] %v7190_v18  ;;  %v7211_v18 = vmul.f32 0.0055401735, %v6187_v21  ;;  %v7214_v31 = vmul.f32 0.0055401735, %v6192_v22 }
 0x44c   :  { %2815 = vrot.lane.b32.xlu1 %v7183_v44, %s10814_s14  ;;  %2813 = vrot.lane.b32.xlu0 %v7186_v45, %s10814_s14 }
 0x44e   :  { %v7202_v41 = vpop.permute.xlu1 %2507  ;;  %v7204_v40 = vpop.permute.xlu0 %2505 }
 0x44f   :  { %10821 = vst [vmem:[#allocation639_spill] sm:$0xff] %v7202_v41  ;;  %10822 = vst [vmem:[#allocation640_spill] sm:$0xff] %v7204_v40  ;;  %v7225_v40 = vmul.f32 0.0071370727, %v6187_v21  ;;  %v7228_v41 = vmul.f32 0.0071370727, %v6192_v22 }
 0x450   :  { %2826 = vrot.lane.b32.xlu1 %v7197_v54, %s10814_s14  ;;  %2824 = vrot.lane.b32.xlu0 %v7200_v55, %s10814_s14  ;;  %s10960_s14 = smov 84  }
 0x452   :  { %v7216_v51 = vpop.permute.xlu1 %2518  ;;  %v7218_v50 = vpop.permute.xlu0 %2516 }
 0x453   :  { %10823 = vst [vmem:[#allocation641_spill] sm:$0xff] %v7216_v51  ;;  %10824 = vst [vmem:[#allocation642_spill] sm:$0xff] %v7218_v50  ;;  %v7239_v50 = vmul.f32 -0.010180335, %v6187_v21  ;;  %v7242_v51 = vmul.f32 -0.010180335, %v6192_v22 }
 0x454   :  { %2837 = vrot.lane.b32.xlu1 %v7211_v18, %s10825_s15  ;;  %2835 = vrot.lane.b32.xlu0 %v7214_v31, %s10825_s15 }
 0x456   :  { %v7230_v61 = vpop.permute.xlu1 %2529  ;;  %v7232_v60 = vpop.permute.xlu0 %2527 }
 0x457   :  { %10826 = vst [vmem:[#allocation643_spill] sm:$0xff] %v7230_v61  ;;  %10827 = vst [vmem:[#allocation644_spill] sm:$0xff] %v7232_v60  ;;  %v7253_v60 = vmul.f32 0.010764517, %v6187_v21  ;;  %v7256_v61 = vmul.f32 0.010764517, %v6192_v22 }
 0x458   :  { %2848 = vrot.lane.b32.xlu1 %v7225_v40, %s10825_s15  ;;  %2846 = vrot.lane.b32.xlu0 %v7228_v41, %s10825_s15 }
 0x45a   :  { %v7244_v47 = vpop.permute.xlu1 %2540  ;;  %v7246_v46 = vpop.permute.xlu0 %2538 }
 0x45b   :  { %10828 = vst [vmem:[#allocation645_spill] sm:$0xff] %v7244_v47  ;;  %10829 = vst [vmem:[#allocation646_spill] sm:$0xff] %v7246_v46  ;;  %v7267_v46 = vmul.f32 0.00506609, %v6187_v21  ;;  %v7270_v47 = vmul.f32 0.00506609, %v6192_v22 }
 0x45c   :  { %2859 = vrot.lane.b32.xlu1 %v7239_v50, %s10825_s15  ;;  %2857 = vrot.lane.b32.xlu0 %v7242_v51, %s10825_s15  ;;  %s11008_s15 = smov 83  }
 0x45e   :  { %v7258_v59 = vpop.permute.xlu1 %2551  ;;  %v7260_v58 = vpop.permute.xlu0 %2549 }
 0x45f   :  { %10830 = vst [vmem:[#allocation647_spill] sm:$0xff] %v7258_v59  ;;  %10831 = vst [vmem:[#allocation648_spill] sm:$0xff] %v7260_v58  ;;  %v7281_v58 = vmul.f32 -0.013114711, %v6187_v21  ;;  %v7284_v59 = vmul.f32 -0.013114711, %v6192_v22 }
 0x460   :  { %2870 = vrot.lane.b32.xlu1 %v7253_v60, %s10832_s16  ;;  %2868 = vrot.lane.b32.xlu0 %v7256_v61, %s10832_s16 }
 0x462   :  { %v7272_v1 = vpop.permute.xlu1 %2562  ;;  %v7274_v56 = vpop.permute.xlu0 %2560 }
 0x463   :  { %10833 = vst [vmem:[#allocation649_spill] sm:$0xff] %v7272_v1  ;;  %10834 = vst [vmem:[#allocation650_spill] sm:$0xff] %v7274_v56  ;;  %v7295_v56 = vmul.f32 0.017012373, %v6187_v21  ;;  %v7298_v1 = vmul.f32 0.017012373, %v6192_v22 }
 0x464   :  { %2881 = vrot.lane.b32.xlu1 %v7267_v46, %s10832_s16  ;;  %2879 = vrot.lane.b32.xlu0 %v7270_v47, %s10832_s16 }
 0x466   :  { %v7286_v11 = vpop.permute.xlu1 %2573  ;;  %v7288_v23 = vpop.permute.xlu0 %2571 }
 0x467   :  { %10835 = vst [vmem:[#allocation651_spill] sm:$0xff] %v7286_v11  ;;  %10836 = vst [vmem:[#allocation652_spill] sm:$0xff] %v7288_v23  ;;  %v7309_v23 = vmul.f32 0.00092572585, %v6187_v21  ;;  %v7312_v11 = vmul.f32 0.00092572585, %v6192_v22 }
 0x468   :  { %2892 = vrot.lane.b32.xlu1 %v7281_v58, %s10832_s16  ;;  %2890 = vrot.lane.b32.xlu0 %v7284_v59, %s10832_s16  ;;  %s11057_s16 = smov 82  }
 0x46a   :  { %v7300_v53 = vpop.permute.xlu1 %2584  ;;  %v7302_v52 = vpop.permute.xlu0 %2582 }
 0x46b   :  { %10837 = vst [vmem:[#allocation653_spill] sm:$0xff] %v7300_v53  ;;  %10838 = vst [vmem:[#allocation654_spill] sm:$0xff] %v7302_v52  ;;  %v7323_v52 = vmul.f32 -0.0153137455, %v6187_v21  ;;  %v7326_v53 = vmul.f32 -0.0153137455, %v6192_v22 }
 0x46c   :  { %2903 = vrot.lane.b32.xlu1 %v7295_v56, %s10839_s17  ;;  %2901 = vrot.lane.b32.xlu0 %v7298_v1, %s10839_s17 }
 0x46e   :  { %v7314_v4 = vpop.permute.xlu1 %2595  ;;  %v7316_v2 = vpop.permute.xlu0 %2593 }
 0x46f   :  { %10840 = vst [vmem:[#allocation655_spill] sm:$0xff] %v7314_v4  ;;  %10841 = vst [vmem:[#allocation656_spill] sm:$0xff] %v7316_v2  ;;  %v7337_v2 = vmul.f32 0.023929471, %v6187_v21  ;;  %v7340_v4 = vmul.f32 0.023929471, %v6192_v22 }
 0x470   :  { %2914 = vrot.lane.b32.xlu1 %v7309_v23, %s10839_s17  ;;  %2912 = vrot.lane.b32.xlu0 %v7312_v11, %s10839_s17 }
 0x472   :  { %v7328_v13 = vpop.permute.xlu1 %2606  ;;  %v7330_v3 = vpop.permute.xlu0 %2604 }
 0x473   :  { %10842 = vst [vmem:[#allocation657_spill] sm:$0xff] %v7328_v13  ;;  %10843 = vst [vmem:[#allocation658_spill] sm:$0xff] %v7330_v3  ;;  %v7351_v3 = vmul.f32 -0.0057816897, %v6187_v21  ;;  %v7354_v13 = vmul.f32 -0.0057816897, %v6192_v22 }
 0x474   :  { %2925 = vrot.lane.b32.xlu1 %v7323_v52, %s10839_s17  ;;  %2923 = vrot.lane.b32.xlu0 %v7326_v53, %s10839_s17  ;;  %s11106_s17 = smov 81  }
 0x476   :  { %v7342_v57 = vpop.permute.xlu1 %2617  ;;  %v7344_v6 = vpop.permute.xlu0 %2615 }
 0x477   :  { %10844 = vst [vmem:[#allocation659_spill] sm:$0xff] %v7342_v57  ;;  %10845 = vst [vmem:[#allocation660_spill] sm:$0xff] %v7344_v6  ;;  %v7365_v6 = vmul.f32 -0.016037337, %v6187_v21  ;;  %v7368_v57 = vmul.f32 -0.016037337, %v6192_v22 }
 0x478   :  { %2936 = vrot.lane.b32.xlu1 %v7337_v2, %s10846_s18  ;;  %2934 = vrot.lane.b32.xlu0 %v7340_v4, %s10846_s18 }
 0x47a   :  { %v7356_v16 = vpop.permute.xlu1 %2628  ;;  %v7358_v14 = vpop.permute.xlu0 %2626 }
 0x47b   :  { %10847 = vst [vmem:[#allocation661_spill] sm:$0xff] %v7356_v16  ;;  %10848 = vst [vmem:[#allocation662_spill] sm:$0xff] %v7358_v14  ;;  %v7379_v14 = vmul.f32 0.031023748, %v6187_v21  ;;  %v7382_v16 = vmul.f32 0.031023748, %v6192_v22 }
 0x47c   :  { %2947 = vrot.lane.b32.xlu1 %v7351_v3, %s10846_s18  ;;  %2945 = vrot.lane.b32.xlu0 %v7354_v13, %s10846_s18  ;;  %v7403_v22 = vld [vmem:[%s9474_s0 + $0x10] sm:$0xff] }
 0x47d   :  { %v7420_v5 = vmul.f32 -0.014344748, %v7403_v22 }
 0x47e   :  { %v7370_v37 = vpop.permute.xlu1 %2639  ;;  %v7372_v36 = vpop.permute.xlu0 %2637 }
 0x47f   :  { %10849 = vst [vmem:[#allocation663_spill] sm:$0xff] %v7370_v37  ;;  %10850 = vst [vmem:[#allocation664_spill] sm:$0xff] %v7372_v36  ;;  %v7395_v36 = vld [vmem:[%s9475_s1 + $0x18] sm:$0xff] }
 0x480   :  { %2958 = vrot.lane.b32.xlu1 %v7365_v6, %s10846_s18  ;;  %2956 = vrot.lane.b32.xlu0 %v7368_v57, %s10846_s18  ;;  %v7398_v21 = vmul.f32 -0.015638452, %v7395_v36  ;;  %v7417_v9 = vmul.f32 -0.014344748, %v7395_v36  ;;  %s11155_s18 = smov 80  }
 0x482   :  { %v7384_v63 = vpop.permute.xlu1 %2650  ;;  %v7386_v62 = vpop.permute.xlu0 %2648 }
 0x483   :  { %10851 = vst [vmem:[#allocation665_spill] sm:$0xff] %v7384_v63  ;;  %10852 = vst [vmem:[#allocation666_spill] sm:$0xff] %v7386_v62  ;;  %v7406_v62 = vmul.f32 -0.015638452, %v7403_v22 }
 0x484   :  { %2969 = vrot.lane.b32.xlu1 %v7379_v14, %s10853_s19  ;;  %2967 = vrot.lane.b32.xlu0 %v7382_v16, %s10853_s19 }
 0x486   :  { %v7408_v63 = vpop.permute.xlu1 %2661  ;;  %v7410_v37 = vpop.permute.xlu0 %2659 }
 0x487   :  { %10854 = vst [vmem:[#allocation667_spill] sm:$0xff] %v7408_v63  ;;  %10855 = vst [vmem:[#allocation668_spill] sm:$0xff] %v7410_v37  ;;  %v7431_v37 = vmul.f32 0.03771471, %v7395_v36  ;;  %v7434_v63 = vmul.f32 0.03771471, %v7403_v22 }
 0x488   :  { %2980 = vrot.lane.b32.xlu1 %v7398_v21, %s10853_s19  ;;  %2978 = vrot.lane.b32.xlu0 %v7406_v62, %s10853_s19 }
 0x48a   :  { %v7422_v0 = vpop.permute.xlu1 %2672  ;;  %v7424_v7 = vpop.permute.xlu0 %2670 }
 0x48b   :  { %10856 = vst [vmem:[#allocation669_spill] sm:$0xff] %v7422_v0  ;;  %10857 = vst [vmem:[#allocation670_spill] sm:$0xff] %v7424_v7  ;;  %v7445_v7 = vmul.f32 -0.029607046, %v7395_v36  ;;  %v7448_v0 = vmul.f32 -0.029607046, %v7403_v22 }
 0x48c   :  { %2991 = vrot.lane.b32.xlu1 %v7417_v9, %s10853_s19  ;;  %2989 = vrot.lane.b32.xlu0 %v7420_v5, %s10853_s19  ;;  %s11204_s19 = smov 79  }
 0x48e   :  { %v7436_v24 = vpop.permute.xlu1 %2683  ;;  %v7438_v25 = vpop.permute.xlu0 %2681 }
 0x48f   :  { %10858 = vst [vmem:[#allocation671_spill] sm:$0xff] %v7436_v24  ;;  %10859 = vst [vmem:[#allocation672_spill] sm:$0xff] %v7438_v25  ;;  %v7459_v25 = vmul.f32 -0.008930467, %v7395_v36  ;;  %v7462_v24 = vmul.f32 -0.008930467, %v7403_v22 }
 0x490   :  { %3002 = vrot.lane.b32.xlu1 %v7431_v37, %s10860_s24  ;;  %3000 = vrot.lane.b32.xlu0 %v7434_v63, %s10860_s24 }
 0x492   :  { %v7450_v19 = vpop.permute.xlu1 %2694  ;;  %v7452_v8 = vpop.permute.xlu0 %2692 }
 0x493   :  { %10861 = vst [vmem:[#allocation673_spill] sm:$0xff] %v7450_v19  ;;  %10862 = vst [vmem:[#allocation674_spill] sm:$0xff] %v7452_v8  ;;  %v7473_v8 = vmul.f32 0.043401666, %v7395_v36  ;;  %v7476_v19 = vmul.f32 0.043401666, %v7403_v22 }
 0x494   :  { %3013 = vrot.lane.b32.xlu1 %v7445_v7, %s10860_s24  ;;  %3011 = vrot.lane.b32.xlu0 %v7448_v0, %s10860_s24 }
 0x496   :  { %v7464_v15 = vpop.permute.xlu1 %2705  ;;  %v7466_v17 = vpop.permute.xlu0 %2703 }
 0x497   :  { %10863 = vst [vmem:[#allocation675_spill] sm:$0xff] %v7464_v15  ;;  %10864 = vst [vmem:[#allocation676_spill] sm:$0xff] %v7466_v17  ;;  %v7487_v17 = vmul.f32 -0.05003769, %v7395_v36  ;;  %v7490_v15 = vmul.f32 -0.05003769, %v7403_v22 }
 0x498   :  { %3024 = vrot.lane.b32.xlu1 %v7459_v25, %s10860_s24  ;;  %3022 = vrot.lane.b32.xlu0 %v7462_v24, %s10860_s24  ;;  %s11449_s24 = smov 74  }
 0x49a   :  { %v7478_v43 = vpop.permute.xlu1 %2716  ;;  %v7480_v42 = vpop.permute.xlu0 %2714 }
 0x49b   :  { %10865 = vst [vmem:[#allocation677_spill] sm:$0xff] %v7478_v43  ;;  %10866 = vst [vmem:[#allocation678_spill] sm:$0xff] %v7480_v42  ;;  %v7501_v42 = vmul.f32 0.0024806152, %v7395_v36  ;;  %v7504_v43 = vmul.f32 0.0024806152, %v7403_v22 }
 0x49c   :  { %3035 = vrot.lane.b32.xlu1 %v7473_v8, %s10867_s25  ;;  %3033 = vrot.lane.b32.xlu0 %v7476_v19, %s10867_s25 }
 0x49e   :  { %v7492_v12 = vpop.permute.xlu1 %2727  ;;  %v7494_v10 = vpop.permute.xlu0 %2725 }
 0x49f   :  { %10868 = vst [vmem:[#allocation679_spill] sm:$0xff] %v7492_v12  ;;  %10869 = vst [vmem:[#allocation680_spill] sm:$0xff] %v7494_v10  ;;  %v3063_v10 = vmul.f32 0.04754135, %v7395_v36  ;;  %v3062_v12 = vmul.f32 0.04754135, %v7403_v22 }
 0x4a0   :  { %3046 = vrot.lane.b32.xlu1 %v7487_v17, %s10867_s25  ;;  %3044 = vrot.lane.b32.xlu0 %v7490_v15, %s10867_s25 }
 0x4a2   :  { %v7506_v20 = vpop.permute.xlu1 %2738  ;;  %v7508_v27 = vpop.permute.xlu0 %2736 }
 0x4a3   :  { %10870 = vst [vmem:[#allocation681_spill] sm:$0xff] %v7506_v20  ;;  %10871 = vst [vmem:[#allocation682_spill] sm:$0xff] %v7508_v27  ;;  %v7523_v27 = vmul.f32 -0.08500798, %v7395_v36  ;;  %v7526_v20 = vmul.f32 -0.08500798, %v7403_v22 }
 0x4a4   :  { %3057 = vrot.lane.b32.xlu1 %v7501_v42, %s10867_s25  ;;  %3055 = vrot.lane.b32.xlu0 %v7504_v43, %s10867_s25 }
 0x4a6   :  { %v7516_v26 = vpop.permute.xlu1 %2749  ;;  %v7518_v39 = vpop.permute.xlu0 %2747 }
 0x4a7   :  { %10872 = vst [vmem:[#allocation683_spill] sm:$0xff] %v7516_v26  ;;  %10873 = vst [vmem:[#allocation684_spill] sm:$0xff] %v7518_v39  ;;  %v3085_v39 = vmul.f32 0.025612421, %v7395_v36  ;;  %v3084_v26 = vmul.f32 0.025612421, %v7403_v22 }
 0x4a8   :  { %3068 = vrot.lane.b32.xlu1 %v3063_v10, %s10874_s26  ;;  %3066 = vrot.lane.b32.xlu0 %v3062_v12, %s10874_s26 }
 0x4aa   :  { %v7528_v38 = vpop.permute.xlu1 %2760  ;;  %v7530_v49 = vpop.permute.xlu0 %2758 }
 0x4ab   :  { %10875 = vst [vmem:[#allocation685_spill] sm:$0xff] %v7528_v38  ;;  %10876 = vst [vmem:[#allocation686_spill] sm:$0xff] %v7530_v49  ;;  %v3096_v49 = vmul.f32 0.049722064, %v7395_v36  ;;  %v3095_v38 = vmul.f32 0.049722064, %v7403_v22 }
 0x4ac   :  { %3079 = vrot.lane.b32.xlu1 %v7523_v27, %s10874_s26  ;;  %3077 = vrot.lane.b32.xlu0 %v7526_v20, %s10874_s26 }
 0x4ae   :  { %v7538_v48 = vpop.permute.xlu1 %2771  ;;  %v7540_v33 = vpop.permute.xlu0 %2769 }
 0x4af   :  { %10877 = vst [vmem:[#allocation687_spill] sm:$0xff] %v7538_v48  ;;  %10878 = vst [vmem:[#allocation688_spill] sm:$0xff] %v7540_v33  ;;  %v3107_v48 = vmul.f32 -0.1837321, %v7395_v36  ;;  %v3106_v33 = vmul.f32 -0.1837321, %v7403_v22 }
 0x4b0   :  { %3090 = vrot.lane.b32.xlu1 %v3085_v39, %s10874_s26  ;;  %3088 = vrot.lane.b32.xlu0 %v3084_v26, %s10874_s26 }
 0x4b2   :  { %v7546_v32 = vpop.permute.xlu1 %2782  ;;  %v7548_v45 = vpop.permute.xlu0 %2780 }
 0x4b3   :  { %10879 = vst [vmem:[#allocation689_spill] sm:$0xff] %v7546_v32  ;;  %10880 = vst [vmem:[#allocation690_spill] sm:$0xff] %v7548_v45  ;;  %v3118_v32 = vmul.f32 0.08517164, %v7395_v36  ;;  %v3117_v45 = vmul.f32 0.08517164, %v7403_v22 }
 0x4b4   :  { %3101 = vrot.lane.b32.xlu1 %v3096_v49, %s10881_s27  ;;  %3099 = vrot.lane.b32.xlu0 %v3095_v38, %s10881_s27 }
 0x4b6   :  { %v7554_v44 = vpop.permute.xlu1 %2793  ;;  %v7556_v55 = vpop.permute.xlu0 %2791 }
 0x4b7   :  { %10882 = vst [vmem:[#allocation691_spill] sm:$0xff] %v7554_v44  ;;  %10883 = vst [vmem:[#allocation692_spill] sm:$0xff] %v7556_v55 }
 0x4b8   :  { %3112 = vrot.lane.b32.xlu1 %v3107_v48, %s10881_s27  ;;  %3110 = vrot.lane.b32.xlu0 %v3106_v33, %s10881_s27  ;;  %v3136_v48 = vmul.f32 0.80074126, %v7395_v36  ;;  %v3135_v33 = vmul.f32 0.80074126, %v7403_v22 }
 0x4ba   :  { %v7562_v54 = vpop.permute.xlu1 %2804  ;;  %v7564_v29 = vpop.permute.xlu0 %2802 }
 0x4bb   :  { %10884 = vst [vmem:[#allocation693_spill] sm:$0xff] %v7562_v54  ;;  %10885 = vst [vmem:[#allocation694_spill] sm:$0xff] %v7564_v29 }
 0x4bc   :  { %3123 = vrot.lane.b32.xlu1 %v3118_v32, %s10881_s27  ;;  %3121 = vrot.lane.b32.xlu0 %v3117_v45, %s10881_s27  ;;  %v3147_v45 = vmul.f32 0.80074114, %v7395_v36  ;;  %v3146_v32 = vmul.f32 0.80074114, %v7403_v22  ;;  %s11489_s27 = smov 73  }
 0x4be   :  { %v7568_v28 = vpop.permute.xlu1 %2815  ;;  %v7570_v44 = vpop.permute.xlu0 %2813 }
 0x4bf   :  { %10886 = vst [vmem:[#allocation695_spill] sm:$0xff] %v7568_v28  ;;  %10887 = vst [vmem:[#allocation696_spill] sm:$0xff] %v7570_v44 }
 0x4c0   :  { %3130 = vrot.lane.b32.xlu1 %v3096_v49, %s10888_s28  ;;  %3128 = vrot.lane.b32.xlu0 %v3095_v38, %s10888_s28 }
 0x4c2   :  { %v7576_v55 = vpop.permute.xlu1 %2826  ;;  %v7578_v54 = vpop.permute.xlu0 %2824 }
 0x4c4   :  { %3141 = vrot.lane.b32.xlu1 %v3136_v48, %s10888_s28  ;;  %3139 = vrot.lane.b32.xlu0 %v3135_v33, %s10888_s28  ;;  %v3165_v48 = vmul.f32 0.085171595, %v7395_v36  ;;  %v3164_v33 = vmul.f32 0.085171595, %v7403_v22 }
 0x4c6   :  { %v7584_v44 = vpop.permute.xlu1 %2837  ;;  %v7586_v49 = vpop.permute.xlu0 %2835 }
 0x4c7   :  { %10889 = vst [vmem:[#allocation697_spill] sm:$0xff] %v7584_v44 }
 0x4c8   :  { %3152 = vrot.lane.b32.xlu1 %v3147_v45, %s10888_s28  ;;  %3150 = vrot.lane.b32.xlu0 %v3146_v32, %s10888_s28  ;;  %v3176_v45 = vmul.f32 -0.18373215, %v7395_v36  ;;  %v3175_v32 = vmul.f32 -0.18373215, %v7403_v22  ;;  %s11538_s28 = smov 72  }
 0x4ca   :  { %v7590_v38 = vpop.permute.xlu1 %2848  ;;  %v7592_v28 = vpop.permute.xlu0 %2846 }
 0x4cb   :  { %10890 = vst [vmem:[#allocation698_spill] sm:$0xff] %v7590_v38  ;;  %10891 = vst [vmem:[#allocation699_spill] sm:$0xff] %v7592_v28 }
 0x4cc   :  { %3159 = vrot.lane.b32.xlu1 %v3063_v10, %s10892_s29  ;;  %3157 = vrot.lane.b32.xlu0 %v3062_v12, %s10892_s29 }
 0x4ce   :  { %v7598_v29 = vpop.permute.xlu1 %2859  ;;  %v7600_v44 = vpop.permute.xlu0 %2857 }
 0x4d0   :  { %3170 = vrot.lane.b32.xlu1 %v3165_v48, %s10892_s29  ;;  %3168 = vrot.lane.b32.xlu0 %v3164_v33, %s10892_s29 }
 0x4d2   :  { %v7606_v28 = vpop.permute.xlu1 %2870  ;;  %v7608_v10 = vpop.permute.xlu0 %2868 }
 0x4d4   :  { %3181 = vrot.lane.b32.xlu1 %v3176_v45, %s10892_s29  ;;  %3179 = vrot.lane.b32.xlu0 %v3175_v32, %s10892_s29  ;;  %s11598_s29 = smov 71  }
 0x4d6   :  { %v7612_v12 = vpop.permute.xlu1 %2881  ;;  %v7614_v38 = vpop.permute.xlu0 %2879 }
 0x4d8   :  { %3188 = vrot.lane.b32.xlu1 %v7473_v8, %s10893_s30  ;;  %3186 = vrot.lane.b32.xlu0 %v7476_v19, %s10893_s30 }
 0x4da   :  { %v7620_v36 = vpop.permute.xlu1 %2892  ;;  %v7622_v22 = vpop.permute.xlu0 %2890 }
 0x4dc   :  { %3195 = vrot.lane.b32.xlu1 %v3085_v39, %s10893_s30  ;;  %3193 = vrot.lane.b32.xlu0 %v3084_v26, %s10893_s30 }
 0x4de   :  { %v7626_v48 = vpop.permute.xlu1 %2903  ;;  %v7628_v33 = vpop.permute.xlu0 %2901 }
 0x4e0   :  { %3202 = vrot.lane.b32.xlu1 %v7523_v27, %s10893_s30  ;;  %3200 = vrot.lane.b32.xlu0 %v7526_v20, %s10893_s30  ;;  %s11664_s30 = smov 70  }
 0x4e2   :  { %v7634_v8 = vpop.permute.xlu1 %2914  ;;  %v7636_v19 = vpop.permute.xlu0 %2912 }
 0x4e4   :  { %3209 = vrot.lane.b32.xlu1 %v7431_v37, %s10894_s3  ;;  %3207 = vrot.lane.b32.xlu0 %v7434_v63, %s10894_s3 }
 0x4e6   :  { %v7642_v39 = vpop.permute.xlu1 %2925  ;;  %v7644_v26 = vpop.permute.xlu0 %2923 }
 0x4e8   :  { %3216 = vrot.lane.b32.xlu1 %v7501_v42, %s10894_s3  ;;  %3214 = vrot.lane.b32.xlu0 %v7504_v43, %s10894_s3 }
 0x4ea   :  { %v7650_v27 = vpop.permute.xlu1 %2936  ;;  %v7652_v20 = vpop.permute.xlu0 %2934 }
 0x4ec   :  { %3223 = vrot.lane.b32.xlu1 %v7487_v17, %s10894_s3  ;;  %3221 = vrot.lane.b32.xlu0 %v7490_v15, %s10894_s3  ;;  %s11710_s3 = smov 69  }
 0x4ee   :  { %v7658_v63 = vpop.permute.xlu1 %2947  ;;  %v7660_v37 = vpop.permute.xlu0 %2945 }
 0x4f0   :  { %3230 = vrot.lane.b32.xlu1 %v7379_v14, %s10895_s4  ;;  %3228 = vrot.lane.b32.xlu0 %v7382_v16, %s10895_s4 }
 0x4f2   :  { %v7666_v42 = vpop.permute.xlu1 %2958  ;;  %v7668_v43 = vpop.permute.xlu0 %2956 }
 0x4f4   :  { %3237 = vrot.lane.b32.xlu1 %v7459_v25, %s10895_s4  ;;  %3235 = vrot.lane.b32.xlu0 %v7462_v24, %s10895_s4 }
 0x4f6   :  { %v7674_v17 = vpop.permute.xlu1 %2969  ;;  %v7676_v15 = vpop.permute.xlu0 %2967 }
 0x4f8   :  { %3244 = vrot.lane.b32.xlu1 %v7445_v7, %s10895_s4  ;;  %3242 = vrot.lane.b32.xlu0 %v7448_v0, %s10895_s4  ;;  %s11747_s4 = smov 68  }
 0x4fa   :  { %v7682_v14 = vpop.permute.xlu1 %2980  ;;  %v7684_v16 = vpop.permute.xlu0 %2978 }
 0x4fc   :  { %3251 = vrot.lane.b32.xlu1 %v7337_v2, %s10896_s5  ;;  %3249 = vrot.lane.b32.xlu0 %v7340_v4, %s10896_s5 }
 0x4fe   :  { %v7690_v25 = vpop.permute.xlu1 %2991  ;;  %v7692_v24 = vpop.permute.xlu0 %2989 }
 0x500   :  { %3258 = vrot.lane.b32.xlu1 %v7417_v9, %s10896_s5  ;;  %3256 = vrot.lane.b32.xlu0 %v7420_v5, %s10896_s5 }
 0x502   :  { %v7698_v7 = vpop.permute.xlu1 %3002  ;;  %v7700_v0 = vpop.permute.xlu0 %3000 }
 0x504   :  { %3265 = vrot.lane.b32.xlu1 %v7398_v21, %s10896_s5  ;;  %3263 = vrot.lane.b32.xlu0 %v7406_v62, %s10896_s5  ;;  %s11808_s5 = smov 67  }
 0x506   :  { %v7706_v2 = vpop.permute.xlu1 %3013  ;;  %v7708_v4 = vpop.permute.xlu0 %3011 }
 0x507   :  { %10897 = vst [vmem:[#allocation700_spill] sm:$0xff] %v7706_v2  ;;  %10898 = vst [vmem:[#allocation701_spill] sm:$0xff] %v7708_v4  ;;  %v10929_v4 = vld [vmem:[#allocation90_spill] sm:$0xff] }
 0x508   :  { %3272 = vrot.lane.b32.xlu1 %v7295_v56, %s10899_s6  ;;  %3270 = vrot.lane.b32.xlu0 %v7298_v1, %s10899_s6  ;;  %v10931_v2 = vld [vmem:[#allocation110_spill] sm:$0xff] }
 0x50a   :  { %v7714_v9 = vpop.permute.xlu1 %3024  ;;  %v7716_v5 = vpop.permute.xlu0 %3022 }
 0x50c   :  { %3279 = vrot.lane.b32.xlu1 %v7365_v6, %s10899_s6  ;;  %3277 = vrot.lane.b32.xlu0 %v7368_v57, %s10899_s6 }
 0x50e   :  { %v7722_v62 = vpop.permute.xlu1 %3035  ;;  %v7724_v21 = vpop.permute.xlu0 %3033 }
 0x510   :  { %3286 = vrot.lane.b32.xlu1 %v7351_v3, %s10899_s6  ;;  %3284 = vrot.lane.b32.xlu0 %v7354_v13, %s10899_s6  ;;  %s11869_s6 = smov 66  }
 0x512   :  { %v7730_v56 = vpop.permute.xlu1 %3046  ;;  %v7732_v1 = vpop.permute.xlu0 %3044 }
 0x513   :  { %10900 = vst [vmem:[#allocation702_spill] sm:$0xff] %v7730_v56  ;;  %10901 = vst [vmem:[#allocation703_spill] sm:$0xff] %v7732_v1 }
 0x514   :  { %3293 = vrot.lane.b32.xlu1 %v7253_v60, %s10902_s12  ;;  %3291 = vrot.lane.b32.xlu0 %v7256_v61, %s10902_s12 }
 0x516   :  { %v7738_v6 = vpop.permute.xlu1 %3057  ;;  %v7740_v57 = vpop.permute.xlu0 %3055 }
 0x518   :  { %3300 = vrot.lane.b32.xlu1 %v7323_v52, %s10902_s12  ;;  %3298 = vrot.lane.b32.xlu0 %v7326_v53, %s10902_s12 }
 0x51a   :  { %v7746_v13 = vpop.permute.xlu1 %3068  ;;  %v7748_v3 = vpop.permute.xlu0 %3066 }
 0x51b   :  { %10903 = vst [vmem:[#allocation704_spill] sm:$0xff] %v7746_v13  ;;  %10904 = vst [vmem:[#allocation705_spill] sm:$0xff] %v7748_v3  ;;  %v10928_v13 = vld [vmem:[#allocation89_spill] sm:$0xff] }
 0x51c   :  { %3307 = vrot.lane.b32.xlu1 %v7309_v23, %s10902_s12  ;;  %3305 = vrot.lane.b32.xlu0 %v7312_v11, %s10902_s12  ;;  %s11913_s12 = smov 65  }
 0x51e   :  { %v7754_v60 = vpop.permute.xlu1 %3079  ;;  %v7756_v61 = vpop.permute.xlu0 %3077 }
 0x51f   :  { %10905 = vst [vmem:[#allocation706_spill] sm:$0xff] %v7754_v60  ;;  %10906 = vst [vmem:[#allocation707_spill] sm:$0xff] %v7756_v61  ;;  %v10915_v60 = vld [vmem:[#allocation70_spill] sm:$0xff] }
 0x520   :  { %3314 = vrot.lane.b32.xlu1 %v7211_v18, %s10907_s8  ;;  %3312 = vrot.lane.b32.xlu0 %v7214_v31, %s10907_s8  ;;  %v10911_v18 = vld [vmem:[#allocation73_spill] sm:$0xff]  ;;  %v10912_v31 = vld [vmem:[#allocation74_spill] sm:$0xff] }
 0x521   :  { %v138_v45 = vsel %vm115_vm0, %v10912_v31, %v10911_v18  ;;  %v10920_v18 = vld [vmem:[#allocation77_spill] sm:$0xff]  ;;  %v10921_v31 = vld [vmem:[#allocation78_spill] sm:$0xff] }
 0x522   :  { %v7762_v52 = vpop.permute.xlu1 %3090  ;;  %v7764_v53 = vpop.permute.xlu0 %3088 }
 0x523   :  { %10908 = vst [vmem:[#allocation708_spill] sm:$0xff] %v7764_v53  ;;  %v10945_v53 = vld [vmem:[#allocation134_spill] sm:$0xff] }
 0x524   :  { %3321 = vrot.lane.b32.xlu1 %v7281_v58, %s10907_s8  ;;  %3319 = vrot.lane.b32.xlu0 %v7284_v59, %s10907_s8  ;;  %v3988_v58 = vld [vmem:[%s9474_s0] sm:$0xff] }
 0x525   :  { %v104_v59 = vmul.f32 -0.0, %v3988_v58  ;;  %v150_v58 = vsel %vm149_vm1, %v10921_v31, %v10920_v18  ;;  %v184_v18 = vsel %vm183_vm2, %v10929_v4, %v10928_v13  ;;  %v10930_v31 = vld [vmem:[#allocation109_spill] sm:$0xff] }
 0x526   :  { %v7770_v23 = vpop.permute.xlu1 %3101  ;;  %v7772_v11 = vpop.permute.xlu0 %3099  ;;  %v10936_v13 = vld [vmem:[#allocation121_spill] sm:$0xff] }
 0x527   :  { %10909 = vst [vmem:[#allocation709_spill] sm:$0xff] %v7770_v23  ;;  %10910 = vst [vmem:[#allocation710_spill] sm:$0xff] %v7772_v11  ;;  %v10916_v11 = vld [vmem:[#allocation66_spill] sm:$0xff]  ;;  %v10917_v23 = vld [vmem:[#allocation85_spill] sm:$0xff]  ;;  %v140_v56 = vadd.f32 %v138_v45, %v104_v59 }
 0x528   :  { %3328 = vrot.lane.b32.xlu1 %v7267_v46, %s10907_s8  ;;  %3326 = vrot.lane.b32.xlu0 %v7270_v47, %s10907_s8  ;;  %v116_v46 = vsel %vm115_vm0, %v10916_v11, %v10915_v60  ;;  %v10918_v47 = vld [vmem:[#allocation86_spill] sm:$0xff]  ;;  %s11927_s8 = smov 64  }
 0x529   :  { %v172_v1 = vsel %vm149_vm1, %v10918_v47, %v10917_v23  ;;  %v118_v11 = vadd.f32 %v116_v46, %v6167_v30  ;;  %v10927_v47 = vld [vmem:[#allocation65_spill] sm:$0xff] }
 0x52a   :  { %v7784_v32 = vpop.permute.xlu1 %3112  ;;  %v7786_v61 = vpop.permute.xlu0 %3110  ;;  %v174_v3 = vadd.f32 %v172_v1, %v140_v56  ;;  %v10932_v56 = vld [vmem:[#allocation81_spill] sm:$0xff]  ;;  %v10933_v1 = vld [vmem:[#allocation82_spill] sm:$0xff] }
 0x52b   :  { %10913 = vst [vmem:[#allocation73_spill] sm:$0xff] %v7784_v32  ;;  %10914 = vst [vmem:[#allocation74_spill] sm:$0xff] %v7786_v61  ;;  %v10922_v61 = vld [vmem:[#allocation97_spill] sm:$0xff]  ;;  %v10923_v32 = vld [vmem:[#allocation98_spill] sm:$0xff]  ;;  %v161_v46 = vsel %vm149_vm1, %v10933_v1, %v10932_v56 }
 0x52c   :  { %3335 = vrot.lane.b32.xlu1 %v7169_v34, %s10919_s13  ;;  %3333 = vrot.lane.b32.xlu0 %v7172_v35, %s10919_s13  ;;  %v206_v60 = vsel %vm183_vm2, %v10923_v32, %v10922_v61  ;;  %v10926_v34 = vld [vmem:[#allocation69_spill] sm:$0xff]  ;;  %v240_v61 = vsel %vm217_vm3, %v10931_v2, %v10930_v31  ;;  %v152_v32 = vadd.f32 %v150_v58, %v118_v11  ;;  %v10941_v31 = vld [vmem:[#allocation94_spill] sm:$0xff] }
 0x52d   :  { %v127_v35 = vsel %vm115_vm0, %v10927_v47, %v10926_v34  ;;  %v208_v30 = vadd.f32 %v206_v60, %v174_v3  ;;  %v10934_v34 = vld [vmem:[#allocation101_spill] sm:$0xff]  ;;  %v10935_v47 = vld [vmem:[#allocation102_spill] sm:$0xff] }
 0x52e   :  { %v7805_v23 = vpop.permute.xlu1 %3123  ;;  %v7807_v45 = vpop.permute.xlu0 %3121  ;;  %v218_v4 = vsel %vm217_vm3, %v10935_v47, %v10934_v34  ;;  %v129_v3 = vadd.f32 %v127_v35, %v104_v59  ;;  %v186_v58 = vadd.f32 %v184_v18, %v152_v32  ;;  %v10942_v1 = vld [vmem:[#allocation113_spill] sm:$0xff]  ;;  %v10947_v32 = vld [vmem:[#allocation106_spill] sm:$0xff] }
 0x52f   :  { %10924 = vst [vmem:[#allocation70_spill] sm:$0xff] %v7805_v23  ;;  %10925 = vst [vmem:[#allocation66_spill] sm:$0xff] %v7807_v45  ;;  %v10937_v45 = vld [vmem:[#allocation122_spill] sm:$0xff]  ;;  %v242_v60 = vadd.f32 %v240_v61, %v208_v30  ;;  %v10944_v47 = vld [vmem:[#allocation133_spill] sm:$0xff] }
 0x530   :  { %3342 = vrot.lane.b32.xlu1 %v7239_v50, %s10919_s13  ;;  %3340 = vrot.lane.b32.xlu0 %v7242_v51, %s10919_s13  ;;  %v274_v2 = vsel %vm251_vm4, %v10937_v45, %v10936_v13  ;;  %v10940_v51 = vld [vmem:[#allocation93_spill] sm:$0xff]  ;;  %v10943_v23 = vld [vmem:[#allocation114_spill] sm:$0xff]  ;;  %v308_v45 = vsel %vm285_vm5, %v10945_v53, %v10944_v47  ;;  %v163_v59 = vadd.f32 %v161_v46, %v129_v3 }
 0x531   :  { %v195_v56 = vsel %vm183_vm2, %v10941_v31, %v10940_v51  ;;  %v252_v34 = vsel %vm251_vm4, %v10943_v23, %v10942_v1  ;;  %v220_v35 = vadd.f32 %v218_v4, %v186_v58  ;;  %v276_v18 = vadd.f32 %v274_v2, %v242_v60  ;;  %v10946_v61 = vld [vmem:[#allocation105_spill] sm:$0xff]  ;;  %v10949_v23 = vld [vmem:[#allocation126_spill] sm:$0xff] }
 0x532   :  { %v7831_v50 = vpop.permute.xlu1 %3130  ;;  %v7833_v11 = vpop.permute.xlu0 %3128  ;;  %v229_v30 = vsel %vm217_vm3, %v10947_v32, %v10946_v61  ;;  %v10948_v13 = vld [vmem:[#allocation125_spill] sm:$0xff]  ;;  %v10951_v53 = vld [vmem:[#allocation146_spill] sm:$0xff]  ;;  %v197_v4 = vadd.f32 %v195_v56, %v163_v59  ;;  %v10961_v59 = vld [vmem:[#allocation619_spill] sm:$0xff] }
 0x533   :  { %10938 = vst [vmem:[#allocation85_spill] sm:$0xff] %v7831_v50  ;;  %10939 = vst [vmem:[#allocation86_spill] sm:$0xff] %v7833_v11  ;;  %v286_v51 = vsel %vm285_vm5, %v10949_v23, %v10948_v13  ;;  %v10950_v31 = vld [vmem:[#allocation145_spill] sm:$0xff]  ;;  %v254_v2 = vadd.f32 %v252_v34, %v220_v35  ;;  %v310_v3 = vadd.f32 %v308_v45, %v276_v18  ;;  %v10955_v60 = vld [vmem:[#allocation118_spill] sm:$0xff] }
 0x534   :  { %3349 = vrot.lane.b32.xlu1 %v7225_v40, %s10919_s13  ;;  %3347 = vrot.lane.b32.xlu0 %v7228_v41, %s10919_s13  ;;  %v342_v46 = vsel %vm319_vm6, %v10951_v53, %v10950_v31  ;;  %v10954_v41 = vld [vmem:[#allocation117_spill] sm:$0xff]  ;;  %v10957_v61 = vld [vmem:[#allocation138_spill] sm:$0xff]  ;;  %v231_v56 = vadd.f32 %v229_v30, %v197_v4  ;;  %v10962_v35 = vld [vmem:[#allocation620_spill] sm:$0xff] }
 0x535   :  { %v263_v1 = vsel %vm251_vm4, %v10955_v60, %v10954_v41  ;;  %v10956_v47 = vld [vmem:[#allocation137_spill] sm:$0xff]  ;;  %v10959_v23 = vld [vmem:[#allocation158_spill] sm:$0xff]  ;;  %v288_v34 = vadd.f32 %v286_v51, %v254_v2  ;;  %v344_v45 = vadd.f32 %v342_v46, %v310_v3 }
 0x536   :  { %v7857_v40 = vpop.permute.xlu1 %3141  ;;  %v7859_v58 = vpop.permute.xlu0 %3139  ;;  %v320_v32 = vsel %vm319_vm6, %v10957_v61, %v10956_v47  ;;  %v10958_v13 = vld [vmem:[#allocation157_spill] sm:$0xff]  ;;  %v10964_v53 = vld [vmem:[#allocation130_spill] sm:$0xff]  ;;  %v265_v51 = vadd.f32 %v263_v1, %v231_v56 }
 0x537   :  { %10952 = vst [vmem:[#allocation77_spill] sm:$0xff] %v7857_v40  ;;  %10953 = vst [vmem:[#allocation78_spill] sm:$0xff] %v7859_v58  ;;  %v376_v31 = vsel %vm353_vm7, %v10959_v23, %v10958_v13  ;;  %v10963_v18 = vld [vmem:[#allocation129_spill] sm:$0xff]  ;;  %v10966_v47 = vld [vmem:[#allocation150_spill] sm:$0xff]  ;;  %v322_v46 = vadd.f32 %v320_v32, %v288_v34 }
 0x538   :  { %3356 = vrot.lane.b32.xlu1 %v10961_v59, %s10960_s14  ;;  %3354 = vrot.lane.b32.xlu0 %v10962_v35, %s10960_s14  ;;  %v297_v41 = vsel %vm285_vm5, %v10964_v53, %v10963_v18  ;;  %v10965_v60 = vld [vmem:[#allocation149_spill] sm:$0xff]  ;;  %v10968_v13 = vld [vmem:[#allocation170_spill] sm:$0xff]  ;;  %v378_v4 = vadd.f32 %v376_v31, %v344_v45 }
 0x539   :  { %v354_v61 = vsel %vm353_vm7, %v10966_v47, %v10965_v60  ;;  %v10967_v58 = vld [vmem:[#allocation169_spill] sm:$0xff]  ;;  %v10971_v59 = vld [vmem:[#allocation142_spill] sm:$0xff]  ;;  %v299_v1 = vadd.f32 %v297_v41, %v265_v51 }
 0x53a   :  { %v410_v30 = vsel %vm387_vm8, %v10968_v13, %v10967_v58  ;;  %v7883_v2 = vpop.permute.xlu1 %3152  ;;  %v7885_v3 = vpop.permute.xlu0 %3150  ;;  %v10970_v23 = vld [vmem:[#allocation141_spill] sm:$0xff]  ;;  %v10973_v53 = vld [vmem:[#allocation162_spill] sm:$0xff]  ;;  %v356_v32 = vadd.f32 %v354_v61, %v322_v46 }
 0x53b   :  { %10969 = vst [vmem:[#allocation97_spill] sm:$0xff] %v7885_v3  ;;  %v331_v35 = vsel %vm319_vm6, %v10971_v59, %v10970_v23  ;;  %v10972_v18 = vld [vmem:[#allocation161_spill] sm:$0xff]  ;;  %v10975_v40 = vld [vmem:[#allocation182_spill] sm:$0xff]  ;;  %v412_v31 = vadd.f32 %v410_v30, %v378_v4 }
 0x53c   :  { %v388_v60 = vsel %vm387_vm8, %v10973_v53, %v10972_v18  ;;  %v10974_v47 = vld [vmem:[#allocation181_spill] sm:$0xff]  ;;  %v10977_v34 = vld [vmem:[#allocation638_spill] sm:$0xff]  ;;  %v333_v61 = vadd.f32 %v331_v35, %v299_v1 }
 0x53d   :  { %v444_v58 = vsel %vm421_vm9, %v10975_v40, %v10974_v47  ;;  %v10976_v56 = vld [vmem:[#allocation637_spill] sm:$0xff]  ;;  %3361 = vrot.lane.b32.xlu0 %v10977_v34, %s10960_s14  ;;  %v10979_v13 = vld [vmem:[#allocation154_spill] sm:$0xff]  ;;  %v390_v30 = vadd.f32 %v388_v60, %v356_v32 }
 0x53e   :  { %3363 = vrot.lane.b32.xlu1 %v10976_v56, %s10960_s14  ;;  %v10978_v45 = vld [vmem:[#allocation153_spill] sm:$0xff]  ;;  %v10981_v18 = vld [vmem:[#allocation174_spill] sm:$0xff]  ;;  %v446_v51 = vadd.f32 %v444_v58, %v412_v31  ;;  %v7909_v46 = vpop.permute.xlu1 %3159  ;;  %v7911_v4 = vpop.permute.xlu0 %3157 }
 0x53f   :  { %v365_v23 = vsel %vm353_vm7, %v10979_v13, %v10978_v45  ;;  %v10980_v59 = vld [vmem:[#allocation173_spill] sm:$0xff]  ;;  %v10983_v40 = vld [vmem:[#allocation194_spill] sm:$0xff]  ;;  %10984 = vst [vmem:[#allocation98_spill] sm:$0xff] %v7909_v46  ;;  %10985 = vst [vmem:[#allocation69_spill] sm:$0xff] %v7911_v4 }
 0x540   :  { %v422_v53 = vsel %vm421_vm9, %v10981_v18, %v10980_v59  ;;  %v10982_v11 = vld [vmem:[#allocation193_spill] sm:$0xff]  ;;  %v10987_v56 = vld [vmem:[#allocation166_spill] sm:$0xff]  ;;  %v367_v35 = vadd.f32 %v365_v23, %v333_v61  ;;  %v10998_v4 = vld [vmem:[#allocation216_spill] sm:$0xff] }
 0x541   :  { %v478_v41 = vsel %vm455_vm10, %v10983_v40, %v10982_v11  ;;  %v10986_v47 = vld [vmem:[#allocation165_spill] sm:$0xff]  ;;  %v10989_v13 = vld [vmem:[#allocation186_spill] sm:$0xff]  ;;  %v424_v60 = vadd.f32 %v422_v53, %v390_v30  ;;  %v11007_v46 = vld [vmem:[#allocation227_spill] sm:$0xff] }
 0x542   :  { %v399_v34 = vsel %vm387_vm8, %v10987_v56, %v10986_v47  ;;  %v10988_v45 = vld [vmem:[#allocation185_spill] sm:$0xff]  ;;  %v10991_v50 = vld [vmem:[#allocation206_spill] sm:$0xff]  ;;  %v480_v58 = vadd.f32 %v478_v41, %v446_v51  ;;  %v7935_v30 = vpop.permute.xlu1 %3170  ;;  %v7937_v51 = vpop.permute.xlu0 %3168 }
 0x543   :  { %v456_v59 = vsel %vm455_vm10, %v10989_v13, %v10988_v45  ;;  %v10990_v18 = vld [vmem:[#allocation205_spill] sm:$0xff]  ;;  %v10993_v32 = vld [vmem:[#allocation634_spill] sm:$0xff]  ;;  %v401_v53 = vadd.f32 %v399_v34, %v367_v35  ;;  %11000 = vst [vmem:[#allocation65_spill] sm:$0xff] %v7935_v30  ;;  %11001 = vst [vmem:[#allocation89_spill] sm:$0xff] %v7937_v51 }
 0x544   :  { %v512_v11 = vsel %vm9848_vm11, %v10991_v50, %v10990_v18  ;;  %v10992_v1 = vld [vmem:[#allocation633_spill] sm:$0xff]  ;;  %3368 = vrot.lane.b32.xlu0 %v10993_v32, %s10960_s14  ;;  %v10995_v40 = vld [vmem:[#allocation178_spill] sm:$0xff]  ;;  %v458_v41 = vadd.f32 %v456_v59, %v424_v60  ;;  %v11009_v35 = vld [vmem:[#allocation607_spill] sm:$0xff] }
 0x545   :  { %3370 = vrot.lane.b32.xlu1 %v10992_v1, %s10960_s14  ;;  %v10994_v31 = vld [vmem:[#allocation177_spill] sm:$0xff]  ;;  %v10997_v45 = vld [vmem:[#allocation198_spill] sm:$0xff]  ;;  %v514_v61 = vadd.f32 %v512_v11, %v480_v58  ;;  %v11010_v60 = vld [vmem:[#allocation608_spill] sm:$0xff] }
 0x546   :  { %v433_v47 = vsel %vm421_vm9, %v10995_v40, %v10994_v31  ;;  %v10996_v56 = vld [vmem:[#allocation197_spill] sm:$0xff]  ;;  %v11003_v1 = vld [vmem:[#allocation190_spill] sm:$0xff] }
 0x547   :  { %v490_v13 = vsel %vm9848_vm11, %v10997_v45, %v10996_v56  ;;  %v10999_v50 = vld [vmem:[#allocation217_spill] sm:$0xff]  ;;  %v11005_v40 = vld [vmem:[#allocation210_spill] sm:$0xff]  ;;  %v435_v34 = vadd.f32 %v433_v47, %v401_v53 }
 0x548   :  { %v546_v23 = vsel %vm9849_vm12, %v10999_v50, %v10998_v4  ;;  %v11002_v18 = vld [vmem:[#allocation189_spill] sm:$0xff]  ;;  %v11006_v45 = vld [vmem:[#allocation226_spill] sm:$0xff]  ;;  %v492_v59 = vadd.f32 %v490_v13, %v458_v41  ;;  %3375 = vrot.lane.b32.xlu0 %v11010_v60, %s11008_s15  ;;  %v7961_v41 = vpop.permute.xlu1 %3181 }
 0x549   :  { %v467_v32 = vsel %vm455_vm10, %v11003_v1, %v11002_v18  ;;  %v11004_v31 = vld [vmem:[#allocation209_spill] sm:$0xff]  ;;  %v580_v4 = vsel %vm9850_vm13, %v11007_v46, %v11006_v45  ;;  %v548_v11 = vadd.f32 %v546_v23, %v514_v61  ;;  %3377 = vrot.lane.b32.xlu1 %v11009_v35, %s11008_s15  ;;  %v11012_v50 = vld [vmem:[#allocation202_spill] sm:$0xff]  ;;  %v11013_v1 = vld [vmem:[#allocation220_spill] sm:$0xff]  ;;  %11017 = vst [vmem:[#allocation90_spill] sm:$0xff] %v7961_v41  ;;  %v7963_v61 = vpop.permute.xlu0 %3179 }
 0x54a   :  { %v524_v56 = vsel %vm9849_vm12, %v11005_v40, %v11004_v31  ;;  %v11011_v58 = vld [vmem:[#allocation201_spill] sm:$0xff]  ;;  %v11015_v51 = vld [vmem:[#allocation234_spill] sm:$0xff]  ;;  %v11016_v46 = vld [vmem:[#allocation235_spill] sm:$0xff]  ;;  %v469_v13 = vadd.f32 %v467_v32, %v435_v34  ;;  %11018 = vst [vmem:[#allocation109_spill] sm:$0xff] %v7963_v61 }
 0x54b   :  { %v501_v18 = vsel %vm9848_vm11, %v11012_v50, %v11011_v58  ;;  %v11014_v31 = vld [vmem:[#allocation221_spill] sm:$0xff]  ;;  %v614_v47 = vsel %vm9851_vm14, %v11016_v46, %v11015_v51  ;;  %v526_v23 = vadd.f32 %v524_v56, %v492_v59  ;;  %v582_v53 = vadd.f32 %v580_v4, %v548_v11  ;;  %v11019_v45 = vld [vmem:[#allocation212_spill] sm:$0xff]  ;;  %v11021_v58 = vld [vmem:[#allocation230_spill] sm:$0xff] }
 0x54c   :  { %v558_v40 = vsel %vm9850_vm13, %v11014_v31, %v11013_v1  ;;  %v11020_v35 = vld [vmem:[#allocation213_spill] sm:$0xff]  ;;  %v11022_v50 = vld [vmem:[#allocation231_spill] sm:$0xff]  ;;  %v11023_v31 = vld [vmem:[#allocation240_spill] sm:$0xff]  ;;  %v503_v32 = vadd.f32 %v501_v18, %v469_v13  ;;  %vm9853_vm11 = vcmask 908288  }
 0x54d   :  { %v535_v60 = vsel %vm9849_vm12, %v11020_v35, %v11019_v45  ;;  %v592_v1 = vsel %vm9851_vm14, %v11022_v50, %v11021_v58  ;;  %v11024_v30 = vld [vmem:[#allocation241_spill] sm:$0xff]  ;;  %v560_v56 = vadd.f32 %v558_v40, %v526_v23  ;;  %v616_v4 = vadd.f32 %v614_v47, %v582_v53  ;;  %v11025_v34 = vld [vmem:[#allocation627_spill] sm:$0xff]  ;;  %v11026_v59 = vld [vmem:[#allocation628_spill] sm:$0xff]  ;;  %v7987_v23 = vpop.permute.xlu1 %3188  ;;  %v7989_v53 = vpop.permute.xlu0 %3186 }
 0x54e   :  { %v648_v51 = vsel %vm9852_vm15, %v11024_v30, %v11023_v31  ;;  %3384 = vrot.lane.b32.xlu1 %v11025_v34, %s11008_s15  ;;  %3382 = vrot.lane.b32.xlu0 %v11026_v59, %s11008_s15  ;;  %v11027_v11 = vld [vmem:[#allocation222_spill] sm:$0xff]  ;;  %v11028_v46 = vld [vmem:[#allocation223_spill] sm:$0xff]  ;;  %v11029_v35 = vld [vmem:[#allocation236_spill] sm:$0xff]  ;;  %v537_v40 = vadd.f32 %v535_v60, %v503_v32  ;;  %vm9854_vm12 = vcmask 900096   ;;  %11033 = vst [vmem:[#allocation110_spill] sm:$0xff] %v7987_v23 }
 0x54f   :  { %v569_v45 = vsel %vm9850_vm13, %v11028_v46, %v11027_v11  ;;  %v11030_v58 = vld [vmem:[#allocation237_spill] sm:$0xff]  ;;  %v11031_v61 = vld [vmem:[#allocation246_spill] sm:$0xff]  ;;  %v11032_v30 = vld [vmem:[#allocation247_spill] sm:$0xff]  ;;  %v594_v47 = vadd.f32 %v592_v1, %v560_v56  ;;  %v650_v13 = vadd.f32 %v648_v51, %v616_v4  ;;  %11034 = vst [vmem:[#allocation81_spill] sm:$0xff] %v7989_v53  ;;  %vm9855_vm13 = vcmask 891904  }
 0x550   :  { %v626_v50 = vsel %vm9852_vm15, %v11030_v58, %v11029_v35  ;;  %v682_v18 = vsel %vm9853_vm11, %v11032_v30, %v11031_v61  ;;  %v11035_v31 = vld [vmem:[#allocation232_spill] sm:$0xff]  ;;  %v11036_v34 = vld [vmem:[#allocation233_spill] sm:$0xff]  ;;  %v11037_v11 = vld [vmem:[#allocation242_spill] sm:$0xff]  ;;  %v571_v60 = vadd.f32 %v569_v45, %v537_v40 }
 0x551   :  { %v603_v59 = vsel %vm9851_vm14, %v11036_v34, %v11035_v31  ;;  %v11038_v46 = vld [vmem:[#allocation243_spill] sm:$0xff]  ;;  %v11039_v58 = vld [vmem:[#allocation252_spill] sm:$0xff]  ;;  %v11040_v41 = vld [vmem:[#allocation253_spill] sm:$0xff]  ;;  %v628_v1 = vadd.f32 %v626_v50, %v594_v47  ;;  %v684_v51 = vadd.f32 %v682_v18, %v650_v13  ;;  %vm9856_vm14 = vcmask 883712   ;;  %v8013_v47 = vpop.permute.xlu1 %3195  ;;  %v8015_v13 = vpop.permute.xlu0 %3193 }
 0x552   :  { %v660_v35 = vsel %vm9853_vm11, %v11038_v46, %v11037_v11  ;;  %v716_v61 = vsel %vm9854_vm12, %v11040_v41, %v11039_v58  ;;  %v11041_v32 = vld [vmem:[#allocation623_spill] sm:$0xff]  ;;  %v11042_v56 = vld [vmem:[#allocation624_spill] sm:$0xff]  ;;  %v11043_v4 = vld [vmem:[#allocation238_spill] sm:$0xff]  ;;  %v605_v50 = vadd.f32 %v603_v59, %v571_v60  ;;  %11049 = vst [vmem:[#allocation82_spill] sm:$0xff] %v8013_v47 }
 0x553   :  { %3391 = vrot.lane.b32.xlu1 %v11041_v32, %s11008_s15  ;;  %3389 = vrot.lane.b32.xlu0 %v11042_v56, %s11008_s15  ;;  %v11044_v30 = vld [vmem:[#allocation239_spill] sm:$0xff]  ;;  %v11045_v34 = vld [vmem:[#allocation248_spill] sm:$0xff]  ;;  %v11046_v11 = vld [vmem:[#allocation249_spill] sm:$0xff]  ;;  %v662_v18 = vadd.f32 %v660_v35, %v628_v1  ;;  %v718_v40 = vadd.f32 %v716_v61, %v684_v51  ;;  %11050 = vst [vmem:[#allocation101_spill] sm:$0xff] %v8015_v13 }
 0x554   :  { %v637_v31 = vsel %vm9852_vm15, %v11044_v30, %v11043_v4  ;;  %v694_v46 = vsel %vm9854_vm12, %v11046_v11, %v11045_v34  ;;  %v11047_v53 = vld [vmem:[#allocation258_spill] sm:$0xff]  ;;  %v11048_v41 = vld [vmem:[#allocation259_spill] sm:$0xff]  ;;  %v11051_v58 = vld [vmem:[#allocation244_spill] sm:$0xff]  ;;  %vm9857_vm15 = vcmask 875520  }
 0x555   :  { %v750_v45 = vsel %vm9855_vm13, %v11048_v41, %v11047_v53  ;;  %v11052_v32 = vld [vmem:[#allocation245_spill] sm:$0xff]  ;;  %v11053_v4 = vld [vmem:[#allocation254_spill] sm:$0xff]  ;;  %v11054_v30 = vld [vmem:[#allocation255_spill] sm:$0xff]  ;;  %v639_v59 = vadd.f32 %v637_v31, %v605_v50  ;;  %v696_v35 = vadd.f32 %v694_v46, %v662_v18  ;;  %v8039_v18 = vpop.permute.xlu1 %3202 }
 0x556   :  { %v671_v56 = vsel %vm9853_vm11, %v11052_v32, %v11051_v58  ;;  %v728_v34 = vsel %vm9855_vm13, %v11054_v30, %v11053_v4  ;;  %v11055_v11 = vld [vmem:[#allocation264_spill] sm:$0xff]  ;;  %v11056_v23 = vld [vmem:[#allocation265_spill] sm:$0xff]  ;;  %v752_v61 = vadd.f32 %v750_v45, %v718_v40  ;;  %v11058_v60 = vld [vmem:[#allocation595_spill] sm:$0xff]  ;;  %vm9858_vm11 = vcmask 867328   ;;  %11066 = vst [vmem:[#allocation102_spill] sm:$0xff] %v8039_v18  ;;  %v8041_v40 = vpop.permute.xlu0 %3200 }
 0x557   :  { %v784_v53 = vsel %vm9856_vm14, %v11056_v23, %v11055_v11  ;;  %3398 = vrot.lane.b32.xlu1 %v11058_v60, %s11057_s16  ;;  %v11059_v1 = vld [vmem:[#allocation596_spill] sm:$0xff]  ;;  %v11060_v51 = vld [vmem:[#allocation250_spill] sm:$0xff]  ;;  %v11061_v41 = vld [vmem:[#allocation251_spill] sm:$0xff]  ;;  %v673_v46 = vadd.f32 %v671_v56, %v639_v59  ;;  %v730_v45 = vadd.f32 %v728_v34, %v696_v35  ;;  %11067 = vst [vmem:[#allocation121_spill] sm:$0xff] %v8041_v40 }
 0x558   :  { %3396 = vrot.lane.b32.xlu0 %v11059_v1, %s11057_s16  ;;  %v705_v58 = vsel %vm9854_vm12, %v11061_v41, %v11060_v51  ;;  %v11062_v32 = vld [vmem:[#allocation260_spill] sm:$0xff]  ;;  %v11063_v4 = vld [vmem:[#allocation261_spill] sm:$0xff]  ;;  %v11064_v13 = vld [vmem:[#allocation270_spill] sm:$0xff]  ;;  %v786_v50 = vadd.f32 %v784_v53, %v752_v61  ;;  %vm9859_vm12 = vcmask 859136  }
 0x559   :  { %v762_v30 = vsel %vm9856_vm14, %v11063_v4, %v11062_v32  ;;  %v11065_v23 = vld [vmem:[#allocation271_spill] sm:$0xff]  ;;  %v11068_v11 = vld [vmem:[#allocation256_spill] sm:$0xff]  ;;  %v11069_v60 = vld [vmem:[#allocation257_spill] sm:$0xff]  ;;  %v707_v56 = vadd.f32 %v705_v58, %v673_v46 }
 0x55a   :  { %v818_v31 = vsel %vm9857_vm15, %v11065_v23, %v11064_v13  ;;  %v739_v1 = vsel %vm9855_vm13, %v11069_v60, %v11068_v11  ;;  %v11070_v51 = vld [vmem:[#allocation266_spill] sm:$0xff]  ;;  %v11071_v41 = vld [vmem:[#allocation267_spill] sm:$0xff]  ;;  %v11072_v4 = vld [vmem:[#allocation276_spill] sm:$0xff]  ;;  %v764_v34 = vadd.f32 %v762_v30, %v730_v45  ;;  %vm9860_vm13 = vcmask 850944   ;;  %v8065_v45 = vpop.permute.xlu1 %3209 }
 0x55b   :  { %v796_v32 = vsel %vm9857_vm15, %v11071_v41, %v11070_v51  ;;  %v11073_v47 = vld [vmem:[#allocation277_spill] sm:$0xff]  ;;  %v820_v53 = vadd.f32 %v818_v31, %v786_v50  ;;  %v11074_v59 = vld [vmem:[#allocation615_spill] sm:$0xff]  ;;  %v11075_v35 = vld [vmem:[#allocation616_spill] sm:$0xff]  ;;  %v741_v30 = vadd.f32 %v739_v1, %v707_v56  ;;  %11082 = vst [vmem:[#allocation122_spill] sm:$0xff] %v8065_v45  ;;  %v8067_v50 = vpop.permute.xlu0 %3207 }
 0x55c   :  { %v852_v13 = vsel %vm9858_vm11, %v11073_v47, %v11072_v4  ;;  %3405 = vrot.lane.b32.xlu1 %v11074_v59, %s11057_s16  ;;  %3403 = vrot.lane.b32.xlu0 %v11075_v35, %s11057_s16  ;;  %v11076_v61 = vld [vmem:[#allocation262_spill] sm:$0xff]  ;;  %v11077_v23 = vld [vmem:[#allocation263_spill] sm:$0xff]  ;;  %v11078_v60 = vld [vmem:[#allocation272_spill] sm:$0xff]  ;;  %v798_v31 = vadd.f32 %v796_v32, %v764_v34  ;;  %11083 = vst [vmem:[#allocation93_spill] sm:$0xff] %v8067_v50 }
 0x55d   :  { %v773_v11 = vsel %vm9856_vm14, %v11077_v23, %v11076_v61  ;;  %v11079_v51 = vld [vmem:[#allocation273_spill] sm:$0xff]  ;;  %v11080_v40 = vld [vmem:[#allocation282_spill] sm:$0xff]  ;;  %v11081_v47 = vld [vmem:[#allocation283_spill] sm:$0xff]  ;;  %v854_v46 = vadd.f32 %v852_v13, %v820_v53  ;;  %vm9861_vm14 = vcmask 842752  }
 0x55e   :  { %v830_v41 = vsel %vm9858_vm11, %v11079_v51, %v11078_v60  ;;  %v886_v58 = vsel %vm9859_vm12, %v11081_v47, %v11080_v40  ;;  %v11084_v4 = vld [vmem:[#allocation268_spill] sm:$0xff]  ;;  %v11085_v59 = vld [vmem:[#allocation269_spill] sm:$0xff]  ;;  %v11086_v61 = vld [vmem:[#allocation278_spill] sm:$0xff]  ;;  %v775_v1 = vadd.f32 %v773_v11, %v741_v30 }
 0x55f   :  { %v807_v35 = vsel %vm9857_vm15, %v11085_v59, %v11084_v4  ;;  %v11087_v23 = vld [vmem:[#allocation279_spill] sm:$0xff]  ;;  %v11088_v51 = vld [vmem:[#allocation288_spill] sm:$0xff]  ;;  %v11089_v18 = vld [vmem:[#allocation289_spill] sm:$0xff]  ;;  %v832_v32 = vadd.f32 %v830_v41, %v798_v31  ;;  %v888_v13 = vadd.f32 %v886_v58, %v854_v46  ;;  %vm9862_vm15 = vcmask 834560   ;;  %v8091_v31 = vpop.permute.xlu1 %3216  ;;  %v8093_v46 = vpop.permute.xlu0 %3214 }
 0x560   :  { %v864_v60 = vsel %vm9859_vm12, %v11087_v23, %v11086_v61  ;;  %v920_v40 = vsel %vm9860_vm13, %v11089_v18, %v11088_v51  ;;  %v11090_v56 = vld [vmem:[#allocation611_spill] sm:$0xff]  ;;  %v11091_v34 = vld [vmem:[#allocation612_spill] sm:$0xff]  ;;  %v11092_v53 = vld [vmem:[#allocation274_spill] sm:$0xff]  ;;  %v809_v41 = vadd.f32 %v807_v35, %v775_v1  ;;  %11098 = vst [vmem:[#allocation94_spill] sm:$0xff] %v8091_v31 }
 0x561   :  { %3412 = vrot.lane.b32.xlu1 %v11090_v56, %s11057_s16  ;;  %3410 = vrot.lane.b32.xlu0 %v11091_v34, %s11057_s16  ;;  %v11093_v47 = vld [vmem:[#allocation275_spill] sm:$0xff]  ;;  %v11094_v59 = vld [vmem:[#allocation284_spill] sm:$0xff]  ;;  %v11095_v61 = vld [vmem:[#allocation285_spill] sm:$0xff]  ;;  %v866_v58 = vadd.f32 %v864_v60, %v832_v32  ;;  %v922_v30 = vadd.f32 %v920_v40, %v888_v13  ;;  %11099 = vst [vmem:[#allocation113_spill] sm:$0xff] %v8093_v46 }
 0x562   :  { %v841_v4 = vsel %vm9858_vm11, %v11093_v47, %v11092_v53  ;;  %v898_v23 = vsel %vm9860_vm13, %v11095_v61, %v11094_v59  ;;  %v11096_v50 = vld [vmem:[#allocation294_spill] sm:$0xff]  ;;  %v11097_v18 = vld [vmem:[#allocation295_spill] sm:$0xff]  ;;  %v11100_v51 = vld [vmem:[#allocation280_spill] sm:$0xff]  ;;  %vm9863_vm11 = vcmask 826368  }
 0x563   :  { %v954_v11 = vsel %vm9861_vm14, %v11097_v18, %v11096_v50  ;;  %v11101_v56 = vld [vmem:[#allocation281_spill] sm:$0xff]  ;;  %v11102_v53 = vld [vmem:[#allocation290_spill] sm:$0xff]  ;;  %v11103_v47 = vld [vmem:[#allocation291_spill] sm:$0xff]  ;;  %v843_v35 = vadd.f32 %v841_v4, %v809_v41  ;;  %v900_v60 = vadd.f32 %v898_v23, %v866_v58  ;;  %v8117_v58 = vpop.permute.xlu1 %3223 }
 0x564   :  { %v875_v34 = vsel %vm9859_vm12, %v11101_v56, %v11100_v51  ;;  %v932_v59 = vsel %vm9861_vm14, %v11103_v47, %v11102_v53  ;;  %v11104_v61 = vld [vmem:[#allocation300_spill] sm:$0xff]  ;;  %v11105_v45 = vld [vmem:[#allocation301_spill] sm:$0xff]  ;;  %v956_v40 = vadd.f32 %v954_v11, %v922_v30  ;;  %v11107_v1 = vld [vmem:[#allocation583_spill] sm:$0xff]  ;;  %vm9864_vm12 = vcmask 818176   ;;  %11115 = vst [vmem:[#allocation114_spill] sm:$0xff] %v8117_v58  ;;  %v8119_v30 = vpop.permute.xlu0 %3221 }
 0x565   :  { %v988_v50 = vsel %vm9862_vm15, %v11105_v45, %v11104_v61  ;;  %3419 = vrot.lane.b32.xlu1 %v11107_v1, %s11106_s17  ;;  %v11108_v32 = vld [vmem:[#allocation584_spill] sm:$0xff]  ;;  %v11109_v13 = vld [vmem:[#allocation286_spill] sm:$0xff]  ;;  %v11110_v18 = vld [vmem:[#allocation287_spill] sm:$0xff]  ;;  %v877_v23 = vadd.f32 %v875_v34, %v843_v35  ;;  %v934_v11 = vadd.f32 %v932_v59, %v900_v60  ;;  %11116 = vst [vmem:[#allocation133_spill] sm:$0xff] %v8119_v30 }
 0x566   :  { %3417 = vrot.lane.b32.xlu0 %v11108_v32, %s11106_s17  ;;  %v909_v51 = vsel %vm9860_vm13, %v11110_v18, %v11109_v13  ;;  %v11111_v56 = vld [vmem:[#allocation296_spill] sm:$0xff]  ;;  %v11112_v53 = vld [vmem:[#allocation297_spill] sm:$0xff]  ;;  %v11113_v46 = vld [vmem:[#allocation306_spill] sm:$0xff]  ;;  %v990_v41 = vadd.f32 %v988_v50, %v956_v40  ;;  %vm9865_vm13 = vcmask 809984  }
 0x567   :  { %v966_v47 = vsel %vm9862_vm15, %v11112_v53, %v11111_v56  ;;  %v11114_v45 = vld [vmem:[#allocation307_spill] sm:$0xff]  ;;  %v11117_v61 = vld [vmem:[#allocation292_spill] sm:$0xff]  ;;  %v11118_v1 = vld [vmem:[#allocation293_spill] sm:$0xff]  ;;  %v911_v34 = vadd.f32 %v909_v51, %v877_v23 }
 0x568   :  { %v1022_v4 = vsel %vm9863_vm11, %v11114_v45, %v11113_v46  ;;  %v943_v32 = vsel %vm9861_vm14, %v11118_v1, %v11117_v61  ;;  %v11119_v13 = vld [vmem:[#allocation302_spill] sm:$0xff]  ;;  %v11120_v18 = vld [vmem:[#allocation303_spill] sm:$0xff]  ;;  %v11121_v53 = vld [vmem:[#allocation312_spill] sm:$0xff]  ;;  %v968_v59 = vadd.f32 %v966_v47, %v934_v11  ;;  %vm9866_vm14 = vcmask 801792   ;;  %v8143_v11 = vpop.permute.xlu1 %3230 }
 0x569   :  { %v1000_v56 = vsel %vm9863_vm11, %v11120_v18, %v11119_v13  ;;  %v11122_v31 = vld [vmem:[#allocation313_spill] sm:$0xff]  ;;  %v1024_v50 = vadd.f32 %v1022_v4, %v990_v41  ;;  %v11123_v35 = vld [vmem:[#allocation603_spill] sm:$0xff]  ;;  %v11124_v60 = vld [vmem:[#allocation604_spill] sm:$0xff]  ;;  %v945_v47 = vadd.f32 %v943_v32, %v911_v34  ;;  %11131 = vst [vmem:[#allocation134_spill] sm:$0xff] %v8143_v11  ;;  %v8145_v41 = vpop.permute.xlu0 %3228 }
 0x56a   :  { %v1056_v46 = vsel %vm9864_vm12, %v11122_v31, %v11121_v53  ;;  %3426 = vrot.lane.b32.xlu1 %v11123_v35, %s11106_s17  ;;  %3424 = vrot.lane.b32.xlu0 %v11124_v60, %s11106_s17  ;;  %v11125_v40 = vld [vmem:[#allocation298_spill] sm:$0xff]  ;;  %v11126_v45 = vld [vmem:[#allocation299_spill] sm:$0xff]  ;;  %v11127_v1 = vld [vmem:[#allocation308_spill] sm:$0xff]  ;;  %v1002_v4 = vadd.f32 %v1000_v56, %v968_v59  ;;  %11132 = vst [vmem:[#allocation105_spill] sm:$0xff] %v8145_v41 }
 0x56b   :  { %v977_v61 = vsel %vm9862_vm15, %v11126_v45, %v11125_v40  ;;  %v11128_v13 = vld [vmem:[#allocation309_spill] sm:$0xff]  ;;  %v11129_v30 = vld [vmem:[#allocation318_spill] sm:$0xff]  ;;  %v11130_v31 = vld [vmem:[#allocation319_spill] sm:$0xff]  ;;  %v1058_v23 = vadd.f32 %v1056_v46, %v1024_v50  ;;  %vm9867_vm15 = vcmask 793600  }
 0x56c   :  { %v1034_v18 = vsel %vm9864_vm12, %v11128_v13, %v11127_v1  ;;  %v1090_v51 = vsel %vm9865_vm13, %v11130_v31, %v11129_v30  ;;  %v11133_v53 = vld [vmem:[#allocation304_spill] sm:$0xff]  ;;  %v11134_v35 = vld [vmem:[#allocation305_spill] sm:$0xff]  ;;  %v11135_v40 = vld [vmem:[#allocation314_spill] sm:$0xff]  ;;  %v979_v32 = vadd.f32 %v977_v61, %v945_v47 }
 0x56d   :  { %v1011_v60 = vsel %vm9863_vm11, %v11134_v35, %v11133_v53  ;;  %v11136_v45 = vld [vmem:[#allocation315_spill] sm:$0xff]  ;;  %v11137_v13 = vld [vmem:[#allocation324_spill] sm:$0xff]  ;;  %v11138_v58 = vld [vmem:[#allocation325_spill] sm:$0xff]  ;;  %v1036_v56 = vadd.f32 %v1034_v18, %v1002_v4  ;;  %v1092_v46 = vadd.f32 %v1090_v51, %v1058_v23  ;;  %vm9868_vm11 = vcmask 785408   ;;  %v8169_v4 = vpop.permute.xlu1 %3237  ;;  %v8171_v23 = vpop.permute.xlu0 %3235 }
 0x56e   :  { %v1068_v1 = vsel %vm9865_vm13, %v11136_v45, %v11135_v40  ;;  %v1124_v30 = vsel %vm9866_vm14, %v11138_v58, %v11137_v13  ;;  %v11139_v34 = vld [vmem:[#allocation599_spill] sm:$0xff]  ;;  %v11140_v59 = vld [vmem:[#allocation600_spill] sm:$0xff]  ;;  %v11141_v50 = vld [vmem:[#allocation310_spill] sm:$0xff]  ;;  %v1013_v18 = vadd.f32 %v1011_v60, %v979_v32  ;;  %11147 = vst [vmem:[#allocation106_spill] sm:$0xff] %v8169_v4 }
 0x56f   :  { %3433 = vrot.lane.b32.xlu1 %v11139_v34, %s11106_s17  ;;  %3431 = vrot.lane.b32.xlu0 %v11140_v59, %s11106_s17  ;;  %v11142_v31 = vld [vmem:[#allocation311_spill] sm:$0xff]  ;;  %v11143_v35 = vld [vmem:[#allocation320_spill] sm:$0xff]  ;;  %v11144_v40 = vld [vmem:[#allocation321_spill] sm:$0xff]  ;;  %v1070_v51 = vadd.f32 %v1068_v1, %v1036_v56  ;;  %v1126_v47 = vadd.f32 %v1124_v30, %v1092_v46  ;;  %11148 = vst [vmem:[#allocation125_spill] sm:$0xff] %v8171_v23 }
 0x570   :  { %v1045_v53 = vsel %vm9864_vm12, %v11142_v31, %v11141_v50  ;;  %v1102_v45 = vsel %vm9866_vm14, %v11144_v40, %v11143_v35  ;;  %v11145_v41 = vld [vmem:[#allocation330_spill] sm:$0xff]  ;;  %v11146_v58 = vld [vmem:[#allocation331_spill] sm:$0xff]  ;;  %v11149_v13 = vld [vmem:[#allocation316_spill] sm:$0xff]  ;;  %vm9869_vm12 = vcmask 777216  }
 0x571   :  { %v1158_v61 = vsel %vm9867_vm15, %v11146_v58, %v11145_v41  ;;  %v11150_v34 = vld [vmem:[#allocation317_spill] sm:$0xff]  ;;  %v11151_v50 = vld [vmem:[#allocation326_spill] sm:$0xff]  ;;  %v11152_v31 = vld [vmem:[#allocation327_spill] sm:$0xff]  ;;  %v1047_v60 = vadd.f32 %v1045_v53, %v1013_v18  ;;  %v1104_v1 = vadd.f32 %v1102_v45, %v1070_v51  ;;  %v8195_v51 = vpop.permute.xlu1 %3244 }
 0x572   :  { %v1079_v59 = vsel %vm9865_vm13, %v11150_v34, %v11149_v13  ;;  %v1136_v35 = vsel %vm9867_vm15, %v11152_v31, %v11151_v50  ;;  %v11153_v40 = vld [vmem:[#allocation336_spill] sm:$0xff]  ;;  %v11154_v11 = vld [vmem:[#allocation337_spill] sm:$0xff]  ;;  %v1160_v30 = vadd.f32 %v1158_v61, %v1126_v47  ;;  %v11156_v32 = vld [vmem:[#allocation571_spill] sm:$0xff]  ;;  %vm9870_vm13 = vcmask 769024   ;;  %11164 = vst [vmem:[#allocation126_spill] sm:$0xff] %v8195_v51  ;;  %v8197_v47 = vpop.permute.xlu0 %3242 }
 0x573   :  { %v1192_v41 = vsel %vm9868_vm11, %v11154_v11, %v11153_v40  ;;  %3440 = vrot.lane.b32.xlu1 %v11156_v32, %s11155_s18  ;;  %v11157_v56 = vld [vmem:[#allocation572_spill] sm:$0xff]  ;;  %v11158_v46 = vld [vmem:[#allocation322_spill] sm:$0xff]  ;;  %v11159_v58 = vld [vmem:[#allocation323_spill] sm:$0xff]  ;;  %v1081_v45 = vadd.f32 %v1079_v59, %v1047_v60  ;;  %v1138_v61 = vadd.f32 %v1136_v35, %v1104_v1  ;;  %11165 = vst [vmem:[#allocation145_spill] sm:$0xff] %v8197_v47 }
 0x574   :  { %3438 = vrot.lane.b32.xlu0 %v11157_v56, %s11155_s18  ;;  %v1113_v13 = vsel %vm9866_vm14, %v11159_v58, %v11158_v46  ;;  %v11160_v34 = vld [vmem:[#allocation332_spill] sm:$0xff]  ;;  %v11161_v50 = vld [vmem:[#allocation333_spill] sm:$0xff]  ;;  %v11162_v23 = vld [vmem:[#allocation342_spill] sm:$0xff]  ;;  %v1194_v18 = vadd.f32 %v1192_v41, %v1160_v30  ;;  %vm9871_vm14 = vcmask 760832  }
 0x575   :  { %v1170_v31 = vsel %vm9868_vm11, %v11161_v50, %v11160_v34  ;;  %v11163_v11 = vld [vmem:[#allocation343_spill] sm:$0xff]  ;;  %v11166_v40 = vld [vmem:[#allocation328_spill] sm:$0xff]  ;;  %v11167_v32 = vld [vmem:[#allocation329_spill] sm:$0xff]  ;;  %v1115_v59 = vadd.f32 %v1113_v13, %v1081_v45 }
 0x576   :  { %v1226_v53 = vsel %vm9869_vm12, %v11163_v11, %v11162_v23  ;;  %v1147_v56 = vsel %vm9867_vm15, %v11167_v32, %v11166_v40  ;;  %v11168_v46 = vld [vmem:[#allocation338_spill] sm:$0xff]  ;;  %v11169_v58 = vld [vmem:[#allocation339_spill] sm:$0xff]  ;;  %v11170_v50 = vld [vmem:[#allocation348_spill] sm:$0xff]  ;;  %v1172_v35 = vadd.f32 %v1170_v31, %v1138_v61  ;;  %vm9872_vm15 = vcmask 752640   ;;  %v8221_v61 = vpop.permute.xlu1 %3251 }
 0x577   :  { %v1204_v34 = vsel %vm9869_vm12, %v11169_v58, %v11168_v46  ;;  %v11171_v4 = vld [vmem:[#allocation349_spill] sm:$0xff]  ;;  %v1228_v41 = vadd.f32 %v1226_v53, %v1194_v18  ;;  %v11172_v60 = vld [vmem:[#allocation591_spill] sm:$0xff]  ;;  %v11173_v1 = vld [vmem:[#allocation592_spill] sm:$0xff]  ;;  %v1149_v31 = vadd.f32 %v1147_v56, %v1115_v59  ;;  %11180 = vst [vmem:[#allocation146_spill] sm:$0xff] %v8221_v61  ;;  %v8223_v18 = vpop.permute.xlu0 %3249 }
 0x578   :  { %v1260_v23 = vsel %vm9870_vm13, %v11171_v4, %v11170_v50  ;;  %3447 = vrot.lane.b32.xlu1 %v11172_v60, %s11155_s18  ;;  %3445 = vrot.lane.b32.xlu0 %v11173_v1, %s11155_s18  ;;  %v11174_v30 = vld [vmem:[#allocation334_spill] sm:$0xff]  ;;  %v11175_v11 = vld [vmem:[#allocation335_spill] sm:$0xff]  ;;  %v11176_v32 = vld [vmem:[#allocation344_spill] sm:$0xff]  ;;  %v1206_v53 = vadd.f32 %v1204_v34, %v1172_v35  ;;  %11181 = vst [vmem:[#allocation117_spill] sm:$0xff] %v8223_v18 }
 0x579   :  { %v1181_v40 = vsel %vm9868_vm11, %v11175_v11, %v11174_v30  ;;  %v11177_v46 = vld [vmem:[#allocation345_spill] sm:$0xff]  ;;  %v11178_v47 = vld [vmem:[#allocation211_spill] sm:$0xff]  ;;  %v11179_v4 = vld [vmem:[#allocation354_spill] sm:$0xff]  ;;  %v1262_v45 = vadd.f32 %v1260_v23, %v1228_v41  ;;  %vm9873_vm11 = vcmask 744448  }
 0x57a   :  { %v1238_v58 = vsel %vm9870_vm13, %v11177_v46, %v11176_v32  ;;  %v1290_v13 = vsel %vm9871_vm14, %v11179_v4, %v11178_v47  ;;  %v11182_v50 = vld [vmem:[#allocation340_spill] sm:$0xff]  ;;  %v11183_v60 = vld [vmem:[#allocation341_spill] sm:$0xff]  ;;  %v11184_v30 = vld [vmem:[#allocation350_spill] sm:$0xff]  ;;  %v1183_v56 = vadd.f32 %v1181_v40, %v1149_v31 }
 0x57b   :  { %v1215_v1 = vsel %vm9869_vm12, %v11183_v60, %v11182_v50  ;;  %v11185_v11 = vld [vmem:[#allocation351_spill] sm:$0xff]  ;;  %v11187_v51 = vld [vmem:[#allocation200_spill] sm:$0xff]  ;;  %v1240_v34 = vadd.f32 %v1238_v58, %v1206_v53  ;;  %v1292_v23 = vadd.f32 %v1290_v13, %v1262_v45  ;;  %v11190_v41 = vld [vmem:[#allocation346_spill] sm:$0xff]  ;;  %vm9874_vm12 = vcmask 736256   ;;  %v8247_v53 = vpop.permute.xlu1 %3258  ;;  %v8249_v45 = vpop.permute.xlu0 %3256 }
 0x57c   :  { %v1268_v32 = vsel %vm9871_vm14, %v11185_v11, %v11184_v30  ;;  %v11186_v46 = vld [vmem:[#allocation199_spill] sm:$0xff]  ;;  %v11189_v35 = vld [vmem:[#allocation588_spill] sm:$0xff]  ;;  %v11193_v30 = vld [vmem:[#allocation229_spill] sm:$0xff]  ;;  %v1217_v58 = vadd.f32 %v1215_v1, %v1183_v56  ;;  %11196 = vst [vmem:[#allocation118_spill] sm:$0xff] %v8247_v53 }
 0x57d   :  { %v1320_v47 = vsel %vm9872_vm15, %v11187_v51, %v11186_v46  ;;  %v11188_v59 = vld [vmem:[#allocation587_spill] sm:$0xff]  ;;  %3452 = vrot.lane.b32.xlu0 %v11189_v35, %s11155_s18  ;;  %v11192_v60 = vld [vmem:[#allocation228_spill] sm:$0xff]  ;;  %v1270_v13 = vadd.f32 %v1268_v32, %v1240_v34  ;;  %11197 = vst [vmem:[#allocation137_spill] sm:$0xff] %v8249_v45 }
 0x57e   :  { %3454 = vrot.lane.b32.xlu1 %v11188_v59, %s11155_s18  ;;  %v11191_v4 = vld [vmem:[#allocation347_spill] sm:$0xff]  ;;  %v1298_v11 = vsel %vm9872_vm15, %v11193_v30, %v11192_v60  ;;  %v11195_v51 = vld [vmem:[#allocation188_spill] sm:$0xff]  ;;  %v1322_v31 = vadd.f32 %v1320_v47, %v1292_v23  ;;  %v11199_v59 = vld [vmem:[#allocation353_spill] sm:$0xff] }
 0x57f   :  { %v1249_v50 = vsel %vm9870_vm13, %v11191_v4, %v11190_v41  ;;  %v11194_v18 = vld [vmem:[#allocation187_spill] sm:$0xff]  ;;  %v11198_v46 = vld [vmem:[#allocation352_spill] sm:$0xff]  ;;  %v11200_v41 = vld [vmem:[#allocation218_spill] sm:$0xff]  ;;  %v1300_v32 = vadd.f32 %v1298_v11, %v1270_v13  ;;  %vm9875_vm13 = vcmask 728064   ;;  %v8273_v13 = vpop.permute.xlu1 %3265 }
 0x580   :  { %v1342_v40 = vsel %vm9873_vm11, %v11195_v51, %v11194_v18  ;;  %v1279_v35 = vsel %vm9871_vm14, %v11199_v59, %v11198_v46  ;;  %v11201_v4 = vld [vmem:[#allocation219_spill] sm:$0xff]  ;;  %v11203_v61 = vld [vmem:[#allocation176_spill] sm:$0xff]  ;;  %v1251_v1 = vadd.f32 %v1249_v50, %v1217_v58  ;;  %v11208_v51 = vld [vmem:[#allocation225_spill] sm:$0xff]  ;;  %vm9876_vm14 = vcmask 719872   ;;  %11213 = vst [vmem:[#allocation138_spill] sm:$0xff] %v8273_v13 }
 0x581   :  { %v1328_v60 = vsel %vm9873_vm11, %v11201_v4, %v11200_v41  ;;  %v11202_v30 = vld [vmem:[#allocation175_spill] sm:$0xff]  ;;  %v1344_v47 = vadd.f32 %v1342_v40, %v1322_v31  ;;  %v11206_v34 = vld [vmem:[#allocation560_spill] sm:$0xff]  ;;  %v8275_v31 = vpop.permute.xlu0 %3263 }
 0x582   :  { %v1364_v18 = vsel %vm9874_vm12, %v11203_v61, %v11202_v30  ;;  %v11205_v56 = vld [vmem:[#allocation559_spill] sm:$0xff]  ;;  %3459 = vrot.lane.b32.xlu0 %v11206_v34, %s11204_s19  ;;  %v11207_v23 = vld [vmem:[#allocation224_spill] sm:$0xff]  ;;  %v1281_v11 = vadd.f32 %v1279_v35, %v1251_v1  ;;  %v1330_v40 = vadd.f32 %v1328_v60, %v1300_v32  ;;  %11214 = vst [vmem:[#allocation157_spill] sm:$0xff] %v8275_v31  ;;  %v11215_v30 = vld [vmem:[#allocation214_spill] sm:$0xff] }
 0x583   :  { %3461 = vrot.lane.b32.xlu1 %v11205_v56, %s11204_s19  ;;  %v1309_v46 = vsel %vm9872_vm15, %v11208_v51, %v11207_v23  ;;  %v11209_v59 = vld [vmem:[#allocation207_spill] sm:$0xff]  ;;  %v11210_v41 = vld [vmem:[#allocation208_spill] sm:$0xff]  ;;  %v1366_v58 = vadd.f32 %v1364_v18, %v1344_v47  ;;  %vm9877_vm15 = vcmask 711680  }
 0x584   :  { %v1350_v4 = vsel %vm9874_vm12, %v11210_v41, %v11209_v59  ;;  %v11211_v45 = vld [vmem:[#allocation163_spill] sm:$0xff]  ;;  %v11212_v61 = vld [vmem:[#allocation164_spill] sm:$0xff]  ;;  %v1311_v35 = vadd.f32 %v1309_v46, %v1281_v11 }
 0x585   :  { %v1386_v50 = vsel %vm9875_vm13, %v11212_v61, %v11211_v45  ;;  %v11216_v56 = vld [vmem:[#allocation215_spill] sm:$0xff]  ;;  %v11218_v51 = vld [vmem:[#allocation196_spill] sm:$0xff]  ;;  %v1352_v60 = vadd.f32 %v1350_v4, %v1330_v40  ;;  %v8299_v40 = vpop.permute.xlu1 %3272 }
 0x586   :  { %v1335_v34 = vsel %vm9873_vm11, %v11216_v56, %v11215_v30  ;;  %v11217_v23 = vld [vmem:[#allocation195_spill] sm:$0xff]  ;;  %v11220_v53 = vld [vmem:[#allocation152_spill] sm:$0xff]  ;;  %v1388_v18 = vadd.f32 %v1386_v50, %v1366_v58  ;;  %vm9878_vm11 = vcmask 703488   ;;  %11229 = vst [vmem:[#allocation158_spill] sm:$0xff] %v8299_v40  ;;  %v8301_v58 = vpop.permute.xlu0 %3270 }
 0x587   :  { %v1372_v59 = vsel %vm9875_vm13, %v11218_v51, %v11217_v23  ;;  %v11219_v41 = vld [vmem:[#allocation151_spill] sm:$0xff]  ;;  %v11222_v32 = vld [vmem:[#allocation580_spill] sm:$0xff]  ;;  %v1337_v4 = vadd.f32 %v1335_v34, %v1311_v35  ;;  %11230 = vst [vmem:[#allocation619_spill] sm:$0xff] %v8301_v58 }
 0x588   :  { %v1408_v45 = vsel %vm9876_vm14, %v11220_v53, %v11219_v41  ;;  %v11221_v1 = vld [vmem:[#allocation579_spill] sm:$0xff]  ;;  %3466 = vrot.lane.b32.xlu0 %v11222_v32, %s11204_s19  ;;  %v11224_v61 = vld [vmem:[#allocation204_spill] sm:$0xff]  ;;  %v1374_v50 = vadd.f32 %v1372_v59, %v1352_v60 }
 0x589   :  { %3468 = vrot.lane.b32.xlu1 %v11221_v1, %s11204_s19  ;;  %v11223_v47 = vld [vmem:[#allocation203_spill] sm:$0xff]  ;;  %v11226_v23 = vld [vmem:[#allocation184_spill] sm:$0xff]  ;;  %v1410_v11 = vadd.f32 %v1408_v45, %v1388_v18 }
 0x58a   :  { %v1357_v30 = vsel %vm9874_vm12, %v11224_v61, %v11223_v47  ;;  %v11225_v56 = vld [vmem:[#allocation183_spill] sm:$0xff]  ;;  %v11228_v53 = vld [vmem:[#allocation140_spill] sm:$0xff]  ;;  %vm9879_vm12 = vcmask 695296  }
 0x58b   :  { %v1394_v51 = vsel %vm9876_vm14, %v11226_v23, %v11225_v56  ;;  %v11227_v31 = vld [vmem:[#allocation139_spill] sm:$0xff]  ;;  %v11232_v1 = vld [vmem:[#allocation192_spill] sm:$0xff]  ;;  %v1359_v34 = vadd.f32 %v1357_v30, %v1337_v4 }
 0x58c   :  { %v1430_v46 = vsel %vm9877_vm15, %v11228_v53, %v11227_v31  ;;  %v11231_v41 = vld [vmem:[#allocation191_spill] sm:$0xff]  ;;  %v11234_v61 = vld [vmem:[#allocation172_spill] sm:$0xff]  ;;  %v1396_v59 = vadd.f32 %v1394_v51, %v1374_v50  ;;  %v8325_v50 = vpop.permute.xlu1 %3279 }
 0x58d   :  { %v1379_v32 = vsel %vm9875_vm13, %v11232_v1, %v11231_v41  ;;  %v11233_v47 = vld [vmem:[#allocation171_spill] sm:$0xff]  ;;  %v11236_v13 = vld [vmem:[#allocation128_spill] sm:$0xff]  ;;  %v1432_v45 = vadd.f32 %v1430_v46, %v1410_v11  ;;  %vm9880_vm13 = vcmask 687104   ;;  %11245 = vst [vmem:[#allocation620_spill] sm:$0xff] %v8325_v50  ;;  %v8327_v11 = vpop.permute.xlu0 %3277 }
 0x58e   :  { %v1416_v56 = vsel %vm9877_vm15, %v11234_v61, %v11233_v47  ;;  %v11235_v23 = vld [vmem:[#allocation127_spill] sm:$0xff]  ;;  %v11238_v60 = vld [vmem:[#allocation576_spill] sm:$0xff]  ;;  %v1381_v51 = vadd.f32 %v1379_v32, %v1359_v34  ;;  %11246 = vst [vmem:[#allocation129_spill] sm:$0xff] %v8327_v11 }
 0x58f   :  { %v1452_v31 = vsel %vm9878_vm11, %v11236_v13, %v11235_v23  ;;  %v11237_v35 = vld [vmem:[#allocation575_spill] sm:$0xff]  ;;  %3473 = vrot.lane.b32.xlu0 %v11238_v60, %s11204_s19  ;;  %v11240_v53 = vld [vmem:[#allocation180_spill] sm:$0xff]  ;;  %v1418_v46 = vadd.f32 %v1416_v56, %v1396_v59 }
 0x590   :  { %3475 = vrot.lane.b32.xlu1 %v11237_v35, %s11204_s19  ;;  %v11239_v18 = vld [vmem:[#allocation179_spill] sm:$0xff]  ;;  %v11242_v47 = vld [vmem:[#allocation160_spill] sm:$0xff]  ;;  %v1454_v4 = vadd.f32 %v1452_v31, %v1432_v45 }
 0x591   :  { %v1401_v41 = vsel %vm9876_vm14, %v11240_v53, %v11239_v18  ;;  %v11241_v1 = vld [vmem:[#allocation159_spill] sm:$0xff]  ;;  %v11244_v13 = vld [vmem:[#allocation116_spill] sm:$0xff]  ;;  %vm9881_vm14 = vcmask 678912  }
 0x592   :  { %v1438_v61 = vsel %vm9878_vm11, %v11242_v47, %v11241_v1  ;;  %v11243_v58 = vld [vmem:[#allocation115_spill] sm:$0xff]  ;;  %v11248_v35 = vld [vmem:[#allocation168_spill] sm:$0xff]  ;;  %v1403_v32 = vadd.f32 %v1401_v41, %v1381_v51 }
 0x593   :  { %v1474_v30 = vsel %vm9879_vm12, %v11244_v13, %v11243_v58  ;;  %v11247_v23 = vld [vmem:[#allocation167_spill] sm:$0xff]  ;;  %v11250_v53 = vld [vmem:[#allocation148_spill] sm:$0xff]  ;;  %v1440_v56 = vadd.f32 %v1438_v61, %v1418_v46  ;;  %v8351_v46 = vpop.permute.xlu1 %3286 }
 0x594   :  { %v1423_v60 = vsel %vm9877_vm15, %v11248_v35, %v11247_v23  ;;  %v11249_v18 = vld [vmem:[#allocation147_spill] sm:$0xff]  ;;  %v11252_v40 = vld [vmem:[#allocation104_spill] sm:$0xff]  ;;  %v1476_v31 = vadd.f32 %v1474_v30, %v1454_v4  ;;  %vm9882_vm15 = vcmask 670720   ;;  %11262 = vst [vmem:[#allocation130_spill] sm:$0xff] %v8351_v46  ;;  %v8353_v4 = vpop.permute.xlu0 %3284 }
 0x595   :  { %v1460_v1 = vsel %vm9879_vm12, %v11250_v53, %v11249_v18  ;;  %v11251_v47 = vld [vmem:[#allocation103_spill] sm:$0xff]  ;;  %v11255_v59 = vld [vmem:[#allocation548_spill] sm:$0xff]  ;;  %v1425_v61 = vadd.f32 %v1423_v60, %v1403_v32  ;;  %11263 = vst [vmem:[#allocation149_spill] sm:$0xff] %v8353_v4 }
 0x596   :  { %v1496_v58 = vsel %vm9880_vm13, %v11252_v40, %v11251_v47  ;;  %v11254_v34 = vld [vmem:[#allocation547_spill] sm:$0xff]  ;;  %3480 = vrot.lane.b32.xlu0 %v11255_v59, %s11253_s20  ;;  %v11257_v13 = vld [vmem:[#allocation156_spill] sm:$0xff]  ;;  %v1462_v30 = vadd.f32 %v1460_v1, %v1440_v56 }
 0x597   :  { %3482 = vrot.lane.b32.xlu1 %v11254_v34, %s11253_s20  ;;  %v11256_v45 = vld [vmem:[#allocation155_spill] sm:$0xff]  ;;  %v11259_v18 = vld [vmem:[#allocation136_spill] sm:$0xff]  ;;  %v1498_v51 = vadd.f32 %v1496_v58, %v1476_v31 }
 0x598   :  { %v1445_v23 = vsel %vm9878_vm11, %v11257_v13, %v11256_v45  ;;  %v11258_v35 = vld [vmem:[#allocation135_spill] sm:$0xff]  ;;  %v11261_v40 = vld [vmem:[#allocation92_spill] sm:$0xff]  ;;  %vm9883_vm11 = vcmask 662528  }
 0x599   :  { %v1482_v53 = vsel %vm9880_vm13, %v11259_v18, %v11258_v35  ;;  %v11260_v11 = vld [vmem:[#allocation91_spill] sm:$0xff]  ;;  %v11265_v34 = vld [vmem:[#allocation144_spill] sm:$0xff]  ;;  %v1447_v60 = vadd.f32 %v1445_v23, %v1425_v61 }
 0x59a   :  { %v1518_v41 = vsel %vm9881_vm14, %v11261_v40, %v11260_v11  ;;  %v11264_v47 = vld [vmem:[#allocation143_spill] sm:$0xff]  ;;  %v11267_v13 = vld [vmem:[#allocation124_spill] sm:$0xff]  ;;  %v1484_v1 = vadd.f32 %v1482_v53, %v1462_v30  ;;  %v8377_v30 = vpop.permute.xlu1 %3293 }
 0x59b   :  { %v1467_v59 = vsel %vm9879_vm12, %v11265_v34, %v11264_v47  ;;  %v11266_v45 = vld [vmem:[#allocation123_spill] sm:$0xff]  ;;  %v11269_v50 = vld [vmem:[#allocation80_spill] sm:$0xff]  ;;  %v1520_v58 = vadd.f32 %v1518_v41, %v1498_v51  ;;  %vm9884_vm12 = vcmask 654336   ;;  %11278 = vst [vmem:[#allocation150_spill] sm:$0xff] %v8377_v30  ;;  %v8379_v51 = vpop.permute.xlu0 %3291 }
 0x59c   :  { %v1504_v35 = vsel %vm9881_vm14, %v11267_v13, %v11266_v45  ;;  %v11268_v18 = vld [vmem:[#allocation79_spill] sm:$0xff]  ;;  %v11271_v56 = vld [vmem:[#allocation568_spill] sm:$0xff]  ;;  %v1469_v53 = vadd.f32 %v1467_v59, %v1447_v60  ;;  %11279 = vst [vmem:[#allocation169_spill] sm:$0xff] %v8379_v51  ;;  %v11292_v51 = vld [vmem:[#allocation53_spill] sm:$0xff] }
 0x59d   :  { %v1540_v11 = vsel %vm9882_vm15, %v11269_v50, %v11268_v18  ;;  %v11270_v32 = vld [vmem:[#allocation567_spill] sm:$0xff]  ;;  %3487 = vrot.lane.b32.xlu0 %v11271_v56, %s11253_s20  ;;  %v11273_v40 = vld [vmem:[#allocation132_spill] sm:$0xff]  ;;  %v1506_v41 = vadd.f32 %v1504_v35, %v1484_v1 }
 0x59e   :  { %3489 = vrot.lane.b32.xlu1 %v11270_v32, %s11253_s20  ;;  %v11272_v31 = vld [vmem:[#allocation131_spill] sm:$0xff]  ;;  %v11275_v45 = vld [vmem:[#allocation112_spill] sm:$0xff]  ;;  %v1542_v61 = vadd.f32 %v1540_v11, %v1520_v58 }
 0x59f   :  { %v1489_v47 = vsel %vm9880_vm13, %v11273_v40, %v11272_v31  ;;  %v11274_v34 = vld [vmem:[#allocation111_spill] sm:$0xff]  ;;  %v11277_v50 = vld [vmem:[#allocation68_spill] sm:$0xff]  ;;  %vm9885_vm13 = vcmask 646144  }
 0x5a0   :  { %v1526_v13 = vsel %vm9882_vm15, %v11275_v45, %v11274_v34  ;;  %v11276_v4 = vld [vmem:[#allocation67_spill] sm:$0xff]  ;;  %v11281_v32 = vld [vmem:[#allocation120_spill] sm:$0xff]  ;;  %v1491_v59 = vadd.f32 %v1489_v47, %v1469_v53 }
 0x5a1   :  { %v1562_v23 = vsel %vm9883_vm11, %v11277_v50, %v11276_v4  ;;  %v11280_v18 = vld [vmem:[#allocation119_spill] sm:$0xff]  ;;  %v11283_v40 = vld [vmem:[#allocation100_spill] sm:$0xff]  ;;  %v1528_v35 = vadd.f32 %v1526_v13, %v1506_v41  ;;  %v8403_v41 = vpop.permute.xlu1 %3300 }
 0x5a2   :  { %v1511_v56 = vsel %vm9881_vm14, %v11281_v32, %v11280_v18  ;;  %v11282_v31 = vld [vmem:[#allocation99_spill] sm:$0xff]  ;;  %v11285_v46 = vld [vmem:[#allocation60_spill] sm:$0xff]  ;;  %v1564_v11 = vadd.f32 %v1562_v23, %v1542_v61  ;;  %vm9886_vm14 = vcmask 637952   ;;  %11294 = vst [vmem:[#allocation170_spill] sm:$0xff] %v8403_v41  ;;  %v8405_v61 = vpop.permute.xlu0 %3298 }
 0x5a3   :  { %v1548_v34 = vsel %vm9883_vm11, %v11283_v40, %v11282_v31  ;;  %v11284_v45 = vld [vmem:[#allocation59_spill] sm:$0xff]  ;;  %v11287_v1 = vld [vmem:[#allocation564_spill] sm:$0xff]  ;;  %v1513_v13 = vadd.f32 %v1511_v56, %v1491_v59  ;;  %11295 = vst [vmem:[#allocation141_spill] sm:$0xff] %v8405_v61  ;;  %v11309_v61 = vld [vmem:[#allocation41_spill] sm:$0xff] }
 0x5a4   :  { %v1584_v4 = vsel %vm9884_vm12, %v11285_v46, %v11284_v45  ;;  %v11286_v60 = vld [vmem:[#allocation563_spill] sm:$0xff]  ;;  %3494 = vrot.lane.b32.xlu0 %v11287_v1, %s11253_s20  ;;  %v11289_v50 = vld [vmem:[#allocation108_spill] sm:$0xff]  ;;  %v11293_v46 = vld [vmem:[#allocation54_spill] sm:$0xff]  ;;  %v1550_v23 = vadd.f32 %v1548_v34, %v1528_v35 }
 0x5a5   :  { %3496 = vrot.lane.b32.xlu1 %v11286_v60, %s11253_s20  ;;  %v11288_v58 = vld [vmem:[#allocation107_spill] sm:$0xff]  ;;  %v11291_v31 = vld [vmem:[#allocation88_spill] sm:$0xff]  ;;  %v1606_v47 = vsel %vm9885_vm13, %v11293_v46, %v11292_v51  ;;  %v1586_v53 = vadd.f32 %v1584_v4, %v1564_v11 }
 0x5a6   :  { %v1533_v18 = vsel %vm9882_vm15, %v11289_v50, %v11288_v58  ;;  %v11290_v32 = vld [vmem:[#allocation87_spill] sm:$0xff]  ;;  %v11297_v60 = vld [vmem:[#allocation96_spill] sm:$0xff]  ;;  %vm9887_vm15 = vcmask 629760  }
 0x5a7   :  { %v1570_v40 = vsel %vm9884_vm12, %v11291_v31, %v11290_v32  ;;  %v11296_v45 = vld [vmem:[#allocation95_spill] sm:$0xff]  ;;  %v11299_v50 = vld [vmem:[#allocation76_spill] sm:$0xff]  ;;  %v1535_v56 = vadd.f32 %v1533_v18, %v1513_v13  ;;  %v1608_v4 = vadd.f32 %v1606_v47, %v1586_v53  ;;  %v8431_v53 = vpop.permute.xlu0 %3305 }
 0x5a8   :  { %v1555_v1 = vsel %vm9883_vm11, %v11297_v60, %v11296_v45  ;;  %v11298_v58 = vld [vmem:[#allocation75_spill] sm:$0xff]  ;;  %v11301_v30 = vld [vmem:[#allocation48_spill] sm:$0xff]  ;;  %v1572_v34 = vadd.f32 %v1570_v40, %v1550_v23  ;;  %vm9888_vm11 = vcmask 621568   ;;  %v8429_v23 = vpop.permute.xlu1 %3307  ;;  %11312 = vst [vmem:[#allocation161_spill] sm:$0xff] %v8431_v53  ;;  %v11325_v53 = vld [vmem:[#allocation29_spill] sm:$0xff] }
 0x5a9   :  { %v1592_v32 = vsel %vm9885_vm13, %v11299_v50, %v11298_v58  ;;  %v11300_v31 = vld [vmem:[#allocation47_spill] sm:$0xff]  ;;  %v11304_v35 = vld [vmem:[#allocation536_spill] sm:$0xff]  ;;  %v1557_v40 = vadd.f32 %v1555_v1, %v1535_v56  ;;  %11311 = vst [vmem:[#allocation142_spill] sm:$0xff] %v8429_v23 }
 0x5aa   :  { %v1628_v51 = vsel %vm9886_vm14, %v11301_v30, %v11300_v31  ;;  %v11303_v59 = vld [vmem:[#allocation535_spill] sm:$0xff]  ;;  %3501 = vrot.lane.b32.xlu0 %v11304_v35, %s11302_s21  ;;  %v11306_v46 = vld [vmem:[#allocation84_spill] sm:$0xff]  ;;  %v11310_v30 = vld [vmem:[#allocation42_spill] sm:$0xff]  ;;  %v1594_v47 = vadd.f32 %v1592_v32, %v1572_v34 }
 0x5ab   :  { %3503 = vrot.lane.b32.xlu1 %v11303_v59, %s11302_s21  ;;  %v11305_v11 = vld [vmem:[#allocation83_spill] sm:$0xff]  ;;  %v11308_v58 = vld [vmem:[#allocation64_spill] sm:$0xff]  ;;  %v1650_v18 = vsel %vm9887_vm15, %v11310_v30, %v11309_v61  ;;  %v1630_v13 = vadd.f32 %v1628_v51, %v1608_v4  ;;  %v11321_v4 = vld [vmem:[#allocation61_spill] sm:$0xff] }
 0x5ac   :  { %v1577_v45 = vsel %vm9884_vm12, %v11306_v46, %v11305_v11  ;;  %v11307_v60 = vld [vmem:[#allocation63_spill] sm:$0xff]  ;;  %v11314_v59 = vld [vmem:[#allocation72_spill] sm:$0xff]  ;;  %v11315_v11 = vld [vmem:[#allocation57_spill] sm:$0xff]  ;;  %vm9889_vm12 = vcmask 613376  }
 0x5ad   :  { %v1614_v50 = vsel %vm9886_vm14, %v11308_v58, %v11307_v60  ;;  %v11313_v31 = vld [vmem:[#allocation71_spill] sm:$0xff]  ;;  %v11316_v46 = vld [vmem:[#allocation58_spill] sm:$0xff]  ;;  %v11318_v41 = vld [vmem:[#allocation36_spill] sm:$0xff]  ;;  %v1579_v1 = vadd.f32 %v1577_v45, %v1557_v40  ;;  %v1652_v51 = vadd.f32 %v1650_v18, %v1630_v13  ;;  %v8457_v13 = vpop.permute.xlu0 %3312 }
 0x5ae   :  { %v1599_v35 = vsel %vm9885_vm13, %v11314_v59, %v11313_v31  ;;  %v1636_v60 = vsel %vm9887_vm15, %v11316_v46, %v11315_v11  ;;  %v11317_v58 = vld [vmem:[#allocation35_spill] sm:$0xff]  ;;  %v1616_v32 = vadd.f32 %v1614_v50, %v1594_v47  ;;  %v11320_v34 = vld [vmem:[#allocation556_spill] sm:$0xff]  ;;  %v11322_v30 = vld [vmem:[#allocation62_spill] sm:$0xff]  ;;  %vm9890_vm13 = vcmask 605184   ;;  %v8455_v47 = vpop.permute.xlu1 %3314  ;;  %11328 = vst [vmem:[#allocation181_spill] sm:$0xff] %v8457_v13 }
 0x5af   :  { %v1672_v61 = vsel %vm9888_vm11, %v11318_v41, %v11317_v58  ;;  %v11319_v56 = vld [vmem:[#allocation555_spill] sm:$0xff]  ;;  %3508 = vrot.lane.b32.xlu0 %v11320_v34, %s11302_s21  ;;  %v1621_v31 = vsel %vm9886_vm14, %v11322_v30, %v11321_v4  ;;  %v11324_v11 = vld [vmem:[#allocation52_spill] sm:$0xff]  ;;  %v11326_v41 = vld [vmem:[#allocation30_spill] sm:$0xff]  ;;  %v1601_v50 = vadd.f32 %v1599_v35, %v1579_v1  ;;  %11327 = vst [vmem:[#allocation162_spill] sm:$0xff] %v8455_v47  ;;  %vm9891_vm14 = vcmask 596992  }
 0x5b0   :  { %3510 = vrot.lane.b32.xlu1 %v11319_v56, %s11302_s21  ;;  %v11323_v59 = vld [vmem:[#allocation51_spill] sm:$0xff]  ;;  %v1694_v45 = vsel %vm9889_vm12, %v11326_v41, %v11325_v53  ;;  %v1638_v18 = vadd.f32 %v1636_v60, %v1616_v32  ;;  %v1674_v40 = vadd.f32 %v1672_v61, %v1652_v51  ;;  %v11330_v56 = vld [vmem:[#allocation56_spill] sm:$0xff]  ;;  %v11331_v4 = vld [vmem:[#allocation45_spill] sm:$0xff] }
 0x5b1   :  { %v1658_v46 = vsel %vm9888_vm11, %v11324_v11, %v11323_v59  ;;  %v11329_v58 = vld [vmem:[#allocation55_spill] sm:$0xff]  ;;  %v11332_v30 = vld [vmem:[#allocation46_spill] sm:$0xff]  ;;  %v11334_v23 = vld [vmem:[#allocation24_spill] sm:$0xff]  ;;  %v1623_v35 = vadd.f32 %v1621_v31, %v1601_v50 }
 0x5b2   :  { %v1643_v34 = vsel %vm9887_vm15, %v11330_v56, %v11329_v58  ;;  %v1680_v59 = vsel %vm9889_vm12, %v11332_v30, %v11331_v4  ;;  %v11333_v11 = vld [vmem:[#allocation23_spill] sm:$0xff]  ;;  %v1660_v60 = vadd.f32 %v1658_v46, %v1638_v18  ;;  %v1696_v61 = vadd.f32 %v1694_v45, %v1674_v40  ;;  %v11336_v32 = vld [vmem:[#allocation552_spill] sm:$0xff]  ;;  %v11337_v51 = vld [vmem:[#allocation49_spill] sm:$0xff]  ;;  %v8481_v18 = vpop.permute.xlu1 %3321  ;;  %v8483_v40 = vpop.permute.xlu0 %3319 }
 0x5b3   :  { %v1716_v53 = vsel %vm9890_vm13, %v11334_v23, %v11333_v11  ;;  %v11335_v1 = vld [vmem:[#allocation551_spill] sm:$0xff]  ;;  %3515 = vrot.lane.b32.xlu0 %v11336_v32, %s11302_s21  ;;  %v11338_v41 = vld [vmem:[#allocation50_spill] sm:$0xff]  ;;  %v11340_v4 = vld [vmem:[#allocation40_spill] sm:$0xff]  ;;  %v1645_v46 = vadd.f32 %v1643_v34, %v1623_v35  ;;  %vm9892_vm15 = vcmask 588800   ;;  %11343 = vst [vmem:[#allocation182_spill] sm:$0xff] %v8481_v18 }
 0x5b4   :  { %3517 = vrot.lane.b32.xlu1 %v11335_v1, %s11302_s21  ;;  %v1665_v58 = vsel %vm9888_vm11, %v11338_v41, %v11337_v51  ;;  %v11339_v56 = vld [vmem:[#allocation39_spill] sm:$0xff]  ;;  %v11341_v13 = vld [vmem:[#allocation17_spill] sm:$0xff]  ;;  %v11342_v23 = vld [vmem:[#allocation18_spill] sm:$0xff]  ;;  %v1682_v45 = vadd.f32 %v1680_v59, %v1660_v60  ;;  %v1718_v50 = vadd.f32 %v1716_v53, %v1696_v61  ;;  %11344 = vst [vmem:[#allocation637_spill] sm:$0xff] %v8483_v40  ;;  %vm9893_vm11 = vcmask 580608  }
 0x5b5   :  { %v1702_v30 = vsel %vm9890_vm13, %v11340_v4, %v11339_v56  ;;  %v1738_v31 = vsel %vm9891_vm14, %v11342_v23, %v11341_v13  ;;  %v11345_v11 = vld [vmem:[#allocation43_spill] sm:$0xff]  ;;  %v11346_v1 = vld [vmem:[#allocation44_spill] sm:$0xff]  ;;  %v11347_v51 = vld [vmem:[#allocation33_spill] sm:$0xff]  ;;  %v1667_v34 = vadd.f32 %v1665_v58, %v1645_v46 }
 0x5b6   :  { %v1687_v32 = vsel %vm9889_vm12, %v11346_v1, %v11345_v11  ;;  %v11348_v41 = vld [vmem:[#allocation34_spill] sm:$0xff]  ;;  %v11349_v4 = vld [vmem:[#allocation11_spill] sm:$0xff]  ;;  %v11350_v47 = vld [vmem:[#allocation12_spill] sm:$0xff]  ;;  %v1704_v59 = vadd.f32 %v1702_v30, %v1682_v45  ;;  %v1740_v53 = vadd.f32 %v1738_v31, %v1718_v50  ;;  %vm9894_vm12 = vcmask 572416   ;;  %v8507_v45 = vpop.permute.xlu1 %3328  ;;  %v8509_v50 = vpop.permute.xlu0 %3326 }
 0x5b7   :  { %v1724_v56 = vsel %vm9891_vm14, %v11348_v41, %v11347_v51  ;;  %v1760_v13 = vsel %vm9892_vm15, %v11350_v47, %v11349_v4  ;;  %v11352_v35 = vld [vmem:[#allocation523_spill] sm:$0xff]  ;;  %v11353_v60 = vld [vmem:[#allocation524_spill] sm:$0xff]  ;;  %v11354_v61 = vld [vmem:[#allocation37_spill] sm:$0xff]  ;;  %v1689_v30 = vadd.f32 %v1687_v32, %v1667_v34  ;;  %11360 = vst [vmem:[#allocation638_spill] sm:$0xff] %v8507_v45 }
 0x5b8   :  { %3524 = vrot.lane.b32.xlu1 %v11352_v35, %s11351_s22  ;;  %3522 = vrot.lane.b32.xlu0 %v11353_v60, %s11351_s22  ;;  %v11355_v23 = vld [vmem:[#allocation38_spill] sm:$0xff]  ;;  %v11356_v1 = vld [vmem:[#allocation27_spill] sm:$0xff]  ;;  %v11357_v51 = vld [vmem:[#allocation28_spill] sm:$0xff]  ;;  %v1726_v31 = vadd.f32 %v1724_v56, %v1704_v59  ;;  %v1762_v46 = vadd.f32 %v1760_v13, %v1740_v53  ;;  %11361 = vst [vmem:[#allocation153_spill] sm:$0xff] %v8509_v50 }
 0x5b9   :  { %v1709_v11 = vsel %vm9890_vm13, %v11355_v23, %v11354_v61  ;;  %v1746_v41 = vsel %vm9892_vm15, %v11357_v51, %v11356_v1  ;;  %v11358_v40 = vld [vmem:[#allocation8_spill] sm:$0xff]  ;;  %v11359_v47 = vld [vmem:[#allocation6_spill] sm:$0xff]  ;;  %v11362_v4 = vld [vmem:[#allocation31_spill] sm:$0xff]  ;;  %vm9895_vm13 = vcmask 564224  }
 0x5ba   :  { %v1782_v58 = vsel %vm9893_vm11, %v11359_v47, %v11358_v40  ;;  %v11363_v35 = vld [vmem:[#allocation32_spill] sm:$0xff]  ;;  %v11364_v61 = vld [vmem:[#allocation21_spill] sm:$0xff]  ;;  %v11365_v23 = vld [vmem:[#allocation22_spill] sm:$0xff]  ;;  %v1711_v32 = vadd.f32 %v1709_v11, %v1689_v30  ;;  %v1748_v56 = vadd.f32 %v1746_v41, %v1726_v31  ;;  %v8533_v31 = vpop.permute.xlu1 %3335 }
 0x5bb   :  { %v1731_v60 = vsel %vm9891_vm14, %v11363_v35, %v11362_v4  ;;  %v1768_v1 = vsel %vm9893_vm11, %v11365_v23, %v11364_v61  ;;  %v11366_v51 = vld [vmem:[#allocation355_spill] sm:$0xff]  ;;  %v11367_v18 = vld [vmem:[#allocation356_spill] sm:$0xff]  ;;  %v1784_v13 = vadd.f32 %v1782_v58, %v1762_v46  ;;  %v11370_v53 = vld [vmem:[#allocation25_spill] sm:$0xff]  ;;  %vm9896_vm14 = vcmask 556032   ;;  %11376 = vst [vmem:[#allocation154_spill] sm:$0xff] %v8533_v31  ;;  %v8535_v46 = vpop.permute.xlu0 %3333 }
 0x5bc   :  { %v1804_v40 = vsel %vm9894_vm12, %v11367_v18, %v11366_v51  ;;  %v11368_v34 = vld [vmem:[#allocation543_spill] sm:$0xff]  ;;  %v11369_v59 = vld [vmem:[#allocation544_spill] sm:$0xff]  ;;  %v11371_v47 = vld [vmem:[#allocation26_spill] sm:$0xff]  ;;  %v1733_v41 = vadd.f32 %v1731_v60, %v1711_v32  ;;  %v1770_v58 = vadd.f32 %v1768_v1, %v1748_v56  ;;  %11377 = vst [vmem:[#allocation173_spill] sm:$0xff] %v8535_v46 }
 0x5bd   :  { %3531 = vrot.lane.b32.xlu1 %v11368_v34, %s11351_s22  ;;  %3529 = vrot.lane.b32.xlu0 %v11369_v59, %s11351_s22  ;;  %v1753_v4 = vsel %vm9892_vm15, %v11371_v47, %v11370_v53  ;;  %v11372_v35 = vld [vmem:[#allocation15_spill] sm:$0xff]  ;;  %v11373_v61 = vld [vmem:[#allocation16_spill] sm:$0xff]  ;;  %v11374_v50 = vld [vmem:[#allocation361_spill] sm:$0xff]  ;;  %v1806_v30 = vadd.f32 %v1804_v40, %v1784_v13  ;;  %vm9897_vm15 = vcmask 547840  }
 0x5be   :  { %v1790_v23 = vsel %vm9894_vm12, %v11373_v61, %v11372_v35  ;;  %v11375_v18 = vld [vmem:[#allocation362_spill] sm:$0xff]  ;;  %v11378_v51 = vld [vmem:[#allocation19_spill] sm:$0xff]  ;;  %v11379_v34 = vld [vmem:[#allocation20_spill] sm:$0xff]  ;;  %v1755_v60 = vadd.f32 %v1753_v4, %v1733_v41 }
 0x5bf   :  { %v1826_v11 = vsel %vm9895_vm13, %v11375_v18, %v11374_v50  ;;  %v1775_v59 = vsel %vm9893_vm11, %v11379_v34, %v11378_v51  ;;  %v11380_v53 = vld [vmem:[#allocation9_spill] sm:$0xff]  ;;  %v11381_v47 = vld [vmem:[#allocation10_spill] sm:$0xff]  ;;  %v1792_v1 = vadd.f32 %v1790_v23, %v1770_v58  ;;  %v11384_v32 = vld [vmem:[#allocation539_spill] sm:$0xff]  ;;  %vm9898_vm11 = vcmask 539648   ;;  %v8559_v58 = vpop.permute.xlu1 %3342 }
 0x5c0   :  { %v1812_v35 = vsel %vm9895_vm13, %v11381_v47, %v11380_v53  ;;  %v11382_v61 = vld [vmem:[#allocation373_spill] sm:$0xff]  ;;  %v11383_v45 = vld [vmem:[#allocation374_spill] sm:$0xff]  ;;  %v1828_v40 = vadd.f32 %v1826_v11, %v1806_v30  ;;  %v11385_v56 = vld [vmem:[#allocation540_spill] sm:$0xff]  ;;  %v1777_v23 = vadd.f32 %v1775_v59, %v1755_v60  ;;  %11392 = vst [vmem:[#allocation174_spill] sm:$0xff] %v8559_v58  ;;  %v8561_v30 = vpop.permute.xlu0 %3340 }
 0x5c1   :  { %v1848_v50 = vsel %vm9896_vm14, %v11383_v45, %v11382_v61  ;;  %3538 = vrot.lane.b32.xlu1 %v11384_v32, %s11351_s22  ;;  %3536 = vrot.lane.b32.xlu0 %v11385_v56, %s11351_s22  ;;  %v11386_v13 = vld [vmem:[#allocation13_spill] sm:$0xff]  ;;  %v11387_v18 = vld [vmem:[#allocation14_spill] sm:$0xff]  ;;  %v1814_v11 = vadd.f32 %v1812_v35, %v1792_v1  ;;  %11393 = vst [vmem:[#allocation193_spill] sm:$0xff] %v8561_v30  ;;  %v11401_v60 = vld [vmem:[#allocation511_spill] sm:$0xff] }
 0x5c2   :  { %v1797_v51 = vsel %vm9894_vm12, %v11387_v18, %v11386_v13  ;;  %v11388_v34 = vld [vmem:[#allocation365_spill] sm:$0xff]  ;;  %v11389_v53 = vld [vmem:[#allocation366_spill] sm:$0xff]  ;;  %v1850_v41 = vadd.f32 %v1848_v50, %v1828_v40  ;;  %vm9899_vm12 = vcmask 531456   ;;  %v11402_v1 = vld [vmem:[#allocation512_spill] sm:$0xff] }
 0x5c3   :  { %v1834_v47 = vsel %vm9896_vm14, %v11389_v53, %v11388_v34  ;;  %v11390_v46 = vld [vmem:[#allocation385_spill] sm:$0xff]  ;;  %v11391_v45 = vld [vmem:[#allocation386_spill] sm:$0xff]  ;;  %v1799_v59 = vadd.f32 %v1797_v51, %v1777_v23 }
 0x5c4   :  { %v1870_v4 = vsel %vm9897_vm15, %v11391_v45, %v11390_v46  ;;  %v11394_v61 = vld [vmem:[#allocation357_spill] sm:$0xff]  ;;  %v11395_v32 = vld [vmem:[#allocation358_spill] sm:$0xff]  ;;  %v1836_v35 = vadd.f32 %v1834_v47, %v1814_v11  ;;  %v8585_v11 = vpop.permute.xlu1 %3349 }
 0x5c5   :  { %v1819_v56 = vsel %vm9895_vm13, %v11395_v32, %v11394_v61  ;;  %v11396_v13 = vld [vmem:[#allocation377_spill] sm:$0xff]  ;;  %v11397_v18 = vld [vmem:[#allocation378_spill] sm:$0xff]  ;;  %v1872_v50 = vadd.f32 %v1870_v4, %v1850_v41  ;;  %3545 = vrot.lane.b32.xlu1 %v11401_v60, %s11400_s23  ;;  %3543 = vrot.lane.b32.xlu0 %v11402_v1, %s11400_s23  ;;  %vm1921_vm13 = vcmask 523264   ;;  %11409 = vst [vmem:[#allocation194_spill] sm:$0xff] %v8585_v11  ;;  %v8587_v41 = vpop.permute.xlu0 %3347 }
 0x5c6   :  { %v1856_v34 = vsel %vm9897_vm15, %v11397_v18, %v11396_v13  ;;  %v11398_v53 = vld [vmem:[#allocation397_spill] sm:$0xff]  ;;  %v11399_v31 = vld [vmem:[#allocation398_spill] sm:$0xff]  ;;  %v1821_v47 = vadd.f32 %v1819_v56, %v1799_v59  ;;  %11410 = vst [vmem:[#allocation165_spill] sm:$0xff] %v8587_v41  ;;  %v11417_v59 = vld [vmem:[#allocation531_spill] sm:$0xff] }
 0x5c7   :  { %v1892_v46 = vsel %vm9898_vm11, %v11399_v31, %v11398_v53  ;;  %v11403_v40 = vld [vmem:[#allocation369_spill] sm:$0xff]  ;;  %v11404_v45 = vld [vmem:[#allocation370_spill] sm:$0xff]  ;;  %v1858_v4 = vadd.f32 %v1856_v34, %v1836_v35  ;;  %v11418_v35 = vld [vmem:[#allocation532_spill] sm:$0xff] }
 0x5c8   :  { %v1841_v61 = vsel %vm9896_vm14, %v11404_v45, %v11403_v40  ;;  %v11405_v32 = vld [vmem:[#allocation389_spill] sm:$0xff]  ;;  %v11406_v13 = vld [vmem:[#allocation390_spill] sm:$0xff]  ;;  %v1894_v23 = vadd.f32 %v1892_v46, %v1872_v50  ;;  %vm1943_vm14 = vcmask 515072  }
 0x5c9   :  { %v1878_v18 = vsel %vm9898_vm11, %v11406_v13, %v11405_v32  ;;  %v11407_v30 = vld [vmem:[#allocation409_spill] sm:$0xff]  ;;  %v11408_v31 = vld [vmem:[#allocation410_spill] sm:$0xff]  ;;  %v1843_v56 = vadd.f32 %v1841_v61, %v1821_v47  ;;  %3552 = vrot.lane.b32.xlu1 %v11417_v59, %s11400_s23  ;;  %3550 = vrot.lane.b32.xlu0 %v11418_v35, %s11400_s23 }
 0x5ca   :  { %v1914_v51 = vsel %vm9899_vm12, %v11408_v31, %v11407_v30  ;;  %v11411_v53 = vld [vmem:[#allocation381_spill] sm:$0xff]  ;;  %v11412_v60 = vld [vmem:[#allocation382_spill] sm:$0xff]  ;;  %v1880_v34 = vadd.f32 %v1878_v18, %v1858_v4  ;;  %v8611_v4 = vpop.permute.xlu1 %3356 }
 0x5cb   :  { %v1863_v1 = vsel %vm9897_vm15, %v11412_v60, %v11411_v53  ;;  %v11413_v40 = vld [vmem:[#allocation401_spill] sm:$0xff]  ;;  %v11414_v45 = vld [vmem:[#allocation402_spill] sm:$0xff]  ;;  %v1916_v46 = vadd.f32 %v1914_v51, %v1894_v23  ;;  %vm1965_vm15 = vcmask 506880   ;;  %11425 = vst [vmem:[#allocation166_spill] sm:$0xff] %v8611_v4  ;;  %v8613_v23 = vpop.permute.xlu0 %3354 }
 0x5cc   :  { %v1900_v32 = vsel %vm9899_vm12, %v11414_v45, %v11413_v40  ;;  %v11415_v13 = vld [vmem:[#allocation421_spill] sm:$0xff]  ;;  %v11416_v58 = vld [vmem:[#allocation422_spill] sm:$0xff]  ;;  %v1865_v18 = vadd.f32 %v1863_v1, %v1843_v56  ;;  %11426 = vst [vmem:[#allocation185_spill] sm:$0xff] %v8613_v23  ;;  %v11433_v56 = vld [vmem:[#allocation527_spill] sm:$0xff] }
 0x5cd   :  { %v1936_v30 = vsel %vm1921_vm13, %v11416_v58, %v11415_v13  ;;  %v11419_v50 = vld [vmem:[#allocation393_spill] sm:$0xff]  ;;  %v11420_v31 = vld [vmem:[#allocation394_spill] sm:$0xff]  ;;  %v1902_v51 = vadd.f32 %v1900_v32, %v1880_v34  ;;  %3559 = vrot.lane.b32.xlu1 %v11433_v56, %s11400_s23  ;;  %v11434_v34 = vld [vmem:[#allocation528_spill] sm:$0xff] }
 0x5ce   :  { %v1885_v53 = vsel %vm9898_vm11, %v11420_v31, %v11419_v50  ;;  %v11421_v60 = vld [vmem:[#allocation413_spill] sm:$0xff]  ;;  %v11422_v40 = vld [vmem:[#allocation414_spill] sm:$0xff]  ;;  %v1938_v47 = vadd.f32 %v1936_v30, %v1916_v46  ;;  %vm1987_vm11 = vcmask 498688   ;;  %3557 = vrot.lane.b32.xlu0 %v11434_v34, %s11400_s23 }
 0x5cf   :  { %v1922_v45 = vsel %vm1921_vm13, %v11422_v40, %v11421_v60  ;;  %v11423_v41 = vld [vmem:[#allocation433_spill] sm:$0xff]  ;;  %v11424_v58 = vld [vmem:[#allocation434_spill] sm:$0xff]  ;;  %v1887_v1 = vadd.f32 %v1885_v53, %v1865_v18 }
 0x5d0   :  { %v1958_v61 = vsel %vm1943_vm14, %v11424_v58, %v11423_v41  ;;  %v11427_v13 = vld [vmem:[#allocation405_spill] sm:$0xff]  ;;  %v11428_v59 = vld [vmem:[#allocation406_spill] sm:$0xff]  ;;  %v1924_v32 = vadd.f32 %v1922_v45, %v1902_v51  ;;  %v8637_v51 = vpop.permute.xlu1 %3363 }
 0x5d1   :  { %v1907_v35 = vsel %vm9899_vm12, %v11428_v59, %v11427_v13  ;;  %v11429_v50 = vld [vmem:[#allocation425_spill] sm:$0xff]  ;;  %v11430_v31 = vld [vmem:[#allocation426_spill] sm:$0xff]  ;;  %v1960_v30 = vadd.f32 %v1958_v61, %v1938_v47  ;;  %vm2012_vm12 = vcmask 490496   ;;  %11441 = vst [vmem:[#allocation186_spill] sm:$0xff] %v8637_v51  ;;  %v8639_v47 = vpop.permute.xlu0 %3361 }
 0x5d2   :  { %v1944_v60 = vsel %vm1943_vm14, %v11430_v31, %v11429_v50  ;;  %v11431_v40 = vld [vmem:[#allocation445_spill] sm:$0xff]  ;;  %v11432_v11 = vld [vmem:[#allocation446_spill] sm:$0xff]  ;;  %v1909_v45 = vadd.f32 %v1907_v35, %v1887_v1  ;;  %11442 = vst [vmem:[#allocation205_spill] sm:$0xff] %v8639_v47  ;;  %v11450_v1 = vld [vmem:[#allocation499_spill] sm:$0xff] }
 0x5d3   :  { %v1980_v41 = vsel %vm1965_vm15, %v11432_v11, %v11431_v40  ;;  %v11435_v46 = vld [vmem:[#allocation417_spill] sm:$0xff]  ;;  %v11436_v58 = vld [vmem:[#allocation418_spill] sm:$0xff]  ;;  %v1946_v61 = vadd.f32 %v1944_v60, %v1924_v32  ;;  %3566 = vrot.lane.b32.xlu1 %v11450_v1, %s11449_s24  ;;  %v11451_v32 = vld [vmem:[#allocation500_spill] sm:$0xff] }
 0x5d4   :  { %v1929_v13 = vsel %vm1921_vm13, %v11436_v58, %v11435_v46  ;;  %v11437_v59 = vld [vmem:[#allocation437_spill] sm:$0xff]  ;;  %v11438_v50 = vld [vmem:[#allocation438_spill] sm:$0xff]  ;;  %v1982_v18 = vadd.f32 %v1980_v41, %v1960_v30  ;;  %3564 = vrot.lane.b32.xlu0 %v11451_v32, %s11449_s24 }
 0x5d5   :  { %v1966_v31 = vsel %vm1965_vm15, %v11438_v50, %v11437_v59  ;;  %v11439_v23 = vld [vmem:[#allocation457_spill] sm:$0xff]  ;;  %v11440_v11 = vld [vmem:[#allocation458_spill] sm:$0xff]  ;;  %v1931_v35 = vadd.f32 %v1929_v13, %v1909_v45  ;;  %v8667_v45 = vpop.permute.xlu0 %3368 }
 0x5d6   :  { %v2002_v53 = vsel %vm1987_vm11, %v11440_v11, %v11439_v23  ;;  %v11443_v40 = vld [vmem:[#allocation429_spill] sm:$0xff]  ;;  %v11444_v56 = vld [vmem:[#allocation430_spill] sm:$0xff]  ;;  %v1968_v60 = vadd.f32 %v1966_v31, %v1946_v61  ;;  %11458 = vst [vmem:[#allocation634_spill] sm:$0xff] %v8667_v45 }
 0x5d7   :  { %v1951_v34 = vsel %vm1943_vm14, %v11444_v56, %v11443_v40  ;;  %v11445_v46 = vld [vmem:[#allocation449_spill] sm:$0xff]  ;;  %v11446_v58 = vld [vmem:[#allocation450_spill] sm:$0xff]  ;;  %v2004_v41 = vadd.f32 %v2002_v53, %v1982_v18  ;;  %v8665_v53 = vpop.permute.xlu1 %3370 }
 0x5d8   :  { %v1988_v59 = vsel %vm1987_vm11, %v11446_v58, %v11445_v46  ;;  %v11447_v50 = vld [vmem:[#allocation469_spill] sm:$0xff]  ;;  %v11448_v4 = vld [vmem:[#allocation470_spill] sm:$0xff]  ;;  %v1953_v58 = vadd.f32 %v1951_v34, %v1931_v35  ;;  %11457 = vst [vmem:[#allocation633_spill] sm:$0xff] %v8665_v53  ;;  %v11462_v34 = vld [vmem:[#allocation519_spill] sm:$0xff] }
 0x5d9   :  { %v2027_v23 = vsel %vm2012_vm12, %v11448_v4, %v11447_v50  ;;  %v11452_v30 = vld [vmem:[#allocation441_spill] sm:$0xff]  ;;  %v11453_v11 = vld [vmem:[#allocation442_spill] sm:$0xff]  ;;  %v1990_v51 = vadd.f32 %v1988_v59, %v1968_v60  ;;  %v3989_v4 = vld [vmem:[%s9474_s0 + $0x10] sm:$0xff]  ;;  %3573 = vrot.lane.b32.xlu1 %v11462_v34, %s11449_s24 }
 0x5da   :  { %v1973_v40 = vsel %vm1965_vm15, %v11453_v11, %v11452_v30  ;;  %v11454_v56 = vld [vmem:[#allocation461_spill] sm:$0xff]  ;;  %v11455_v47 = vld [vmem:[#allocation462_spill] sm:$0xff]  ;;  %v8663_v13 = vmul.f32 0.0, %v3989_v4  ;;  %v2029_v31 = vadd.f32 %v2027_v23, %v2004_v41  ;;  %v8672_v32 = vmul.f32 -9.91476e-08, %v3989_v4  ;;  %v11463_v59 = vld [vmem:[#allocation520_spill] sm:$0xff] }
 0x5db   :  { %v2013_v46 = vsel %vm2012_vm12, %v11455_v47, %v11454_v56  ;;  %v11459_v61 = vld [vmem:[#allocation453_spill] sm:$0xff]  ;;  %v11460_v18 = vld [vmem:[#allocation454_spill] sm:$0xff]  ;;  %v1975_v1 = vadd.f32 %v1973_v40, %v1953_v58  ;;  %3571 = vrot.lane.b32.xlu0 %v11463_v59, %s11449_s24  ;;  %v8685_v58 = vpop.permute.xlu1 %3377 }
 0x5dc   :  { %11456 = vst [vmem:[#allocation206_spill] sm:$0xff] %v8663_v13  ;;  %v1995_v50 = vsel %vm1987_vm11, %v11460_v18, %v11459_v61  ;;  %11461 = vst [vmem:[#allocation177_spill] sm:$0xff] %v8672_v32  ;;  %v2015_v47 = vadd.f32 %v2013_v46, %v1990_v51  ;;  %v11464_v35 = vld [vmem:[#allocation465_spill] sm:$0xff]  ;;  %v11465_v23 = vld [vmem:[#allocation466_spill] sm:$0xff]  ;;  %v2037_v40 = vadd.f32 %v8663_v13, %v2029_v31  ;;  %v8687_v51 = vpop.permute.xlu0 %3375 }
 0x5dd   :  { %v2020_v60 = vsel %vm2012_vm12, %v11465_v23, %v11464_v35  ;;  %v11466_v41 = vld [vmem:[#allocation481_spill] sm:$0xff]  ;;  %v11467_v30 = vld [vmem:[#allocation482_spill] sm:$0xff]  ;;  %v1997_v56 = vadd.f32 %v1995_v50, %v1975_v1  ;;  %11468 = vst [vmem:[#allocation178_spill] sm:$0xff] %v8685_v58  ;;  %11469 = vst [vmem:[#allocation197_spill] sm:$0xff] %v8687_v51  ;;  %v8696_v23 = vmul.f32 4.3495472e-08, %v3989_v4 }
 0x5de   :  { %v2069_v11 = vsel %vm115_vm0, %v11467_v30, %v11466_v41  ;;  %v11470_v46 = vld [vmem:[#allocation473_spill] sm:$0xff]  ;;  %v11471_v61 = vld [vmem:[#allocation474_spill] sm:$0xff]  ;;  %v2033_v35 = vadd.f32 %v8672_v32, %v2015_v47  ;;  %v11475_v31 = vld [vmem:[#allocation515_spill] sm:$0xff] }
 0x5df   :  { %v2047_v18 = vsel %vm115_vm0, %v11471_v61, %v11470_v46  ;;  %v11472_v34 = vld [vmem:[#allocation493_spill] sm:$0xff]  ;;  %v11473_v59 = vld [vmem:[#allocation494_spill] sm:$0xff]  ;;  %11474 = vst [vmem:[#allocation198_spill] sm:$0xff] %v8696_v23  ;;  %v2022_v41 = vadd.f32 %v2020_v60, %v1997_v56  ;;  %v2071_v50 = vadd.f32 %v2069_v11, %v2037_v40  ;;  %3580 = vrot.lane.b32.xlu1 %v11475_v31, %s11449_s24  ;;  %v11476_v1 = vld [vmem:[#allocation516_spill] sm:$0xff]  ;;  %v8708_v4 = vpop.permute.xlu1 %3384 }
 0x5e0   :  { %v2102_v45 = vsel %vm149_vm1, %v11473_v59, %v11472_v34  ;;  %3578 = vrot.lane.b32.xlu0 %v11476_v1, %s11449_s24  ;;  %v11477_v30 = vld [vmem:[#allocation485_spill] sm:$0xff]  ;;  %v11478_v13 = vld [vmem:[#allocation486_spill] sm:$0xff]  ;;  %v2049_v59 = vadd.f32 %v2047_v18, %v2033_v35  ;;  %11481 = vst [vmem:[#allocation216_spill] sm:$0xff] %v8708_v4  ;;  %v8710_v60 = vpop.permute.xlu0 %3382  ;;  %v11490_v35 = vld [vmem:[#allocation487_spill] sm:$0xff] }
 0x5e1   :  { %v2080_v46 = vsel %vm149_vm1, %v11478_v13, %v11477_v30  ;;  %v11479_v61 = vld [vmem:[#allocation505_spill] sm:$0xff]  ;;  %v11480_v51 = vld [vmem:[#allocation506_spill] sm:$0xff]  ;;  %v2104_v47 = vadd.f32 %v2102_v45, %v2071_v50  ;;  %11482 = vst [vmem:[#allocation217_spill] sm:$0xff] %v8710_v60  ;;  %v11491_v50 = vld [vmem:[#allocation488_spill] sm:$0xff] }
 0x5e2   :  { %v2135_v34 = vsel %vm183_vm2, %v11480_v51, %v11479_v61  ;;  %v11483_v11 = vld [vmem:[#allocation477_spill] sm:$0xff]  ;;  %v11484_v56 = vld [vmem:[#allocation478_spill] sm:$0xff]  ;;  %v2035_v51 = vadd.f32 %v8696_v23, %v2022_v41  ;;  %v2082_v18 = vadd.f32 %v2080_v46, %v2049_v59 }
 0x5e3   :  { %v2058_v40 = vsel %vm115_vm0, %v11484_v56, %v11483_v11  ;;  %v11485_v31 = vld [vmem:[#allocation497_spill] sm:$0xff]  ;;  %v11486_v1 = vld [vmem:[#allocation498_spill] sm:$0xff]  ;;  %v2137_v45 = vadd.f32 %v2135_v34, %v2104_v47  ;;  %3587 = vrot.lane.b32.xlu1 %v11490_v35, %s11489_s27  ;;  %v8735_v47 = vpop.permute.xlu1 %3391  ;;  %vm11555_vm0 = vcmask 949248  }
 0x5e4   :  { %v2113_v32 = vsel %vm183_vm2, %v11486_v1, %v11485_v31  ;;  %v11487_v58 = vld [vmem:[#allocation517_spill] sm:$0xff]  ;;  %v11488_v13 = vld [vmem:[#allocation518_spill] sm:$0xff]  ;;  %3585 = vrot.lane.b32.xlu0 %v11491_v50, %s11489_s27  ;;  %v2060_v46 = vadd.f32 %v2058_v40, %v2035_v51  ;;  %11498 = vst [vmem:[#allocation189_spill] sm:$0xff] %v8735_v47  ;;  %v11507_v51 = vld [vmem:[#allocation508_spill] sm:$0xff] }
 0x5e5   :  { %v2168_v30 = vsel %vm217_vm3, %v11488_v13, %v11487_v58  ;;  %v11492_v61 = vld [vmem:[#allocation489_spill] sm:$0xff]  ;;  %v11493_v11 = vld [vmem:[#allocation490_spill] sm:$0xff]  ;;  %v2115_v34 = vadd.f32 %v2113_v32, %v2082_v18  ;;  %v8737_v13 = vpop.permute.xlu0 %3389 }
 0x5e6   :  { %v2091_v56 = vsel %vm149_vm1, %v11493_v11, %v11492_v61  ;;  %v11494_v60 = vld [vmem:[#allocation509_spill] sm:$0xff]  ;;  %v11495_v31 = vld [vmem:[#allocation510_spill] sm:$0xff]  ;;  %v2170_v59 = vadd.f32 %v2168_v30, %v2137_v45  ;;  %11499 = vst [vmem:[#allocation190_spill] sm:$0xff] %v8737_v13  ;;  %v11506_v30 = vld [vmem:[#allocation507_spill] sm:$0xff] }
 0x5e7   :  { %v2146_v1 = vsel %vm217_vm3, %v11495_v31, %v11494_v60  ;;  %v11496_v4 = vld [vmem:[#allocation529_spill] sm:$0xff]  ;;  %v11497_v58 = vld [vmem:[#allocation530_spill] sm:$0xff]  ;;  %3594 = vrot.lane.b32.xlu1 %v11506_v30, %s11489_s27  ;;  %vm11562_vm1 = vmmov %vm11555_vm0 }
 0x5e8   :  { %v2201_v41 = vsel %vm251_vm4, %v11497_v58, %v11496_v4  ;;  %v11500_v35 = vld [vmem:[#allocation501_spill] sm:$0xff]  ;;  %v11501_v50 = vld [vmem:[#allocation502_spill] sm:$0xff]  ;;  %v2093_v4 = vadd.f32 %v2091_v56, %v2060_v46  ;;  %v2148_v40 = vadd.f32 %v2146_v1, %v2115_v34  ;;  %3592 = vrot.lane.b32.xlu0 %v11507_v51, %s11489_s27  ;;  %v8761_v34 = vpop.permute.xlu1 %3398 }
 0x5e9   :  { %v2124_v23 = vsel %vm183_vm2, %v11501_v50, %v11500_v35  ;;  %v11502_v61 = vld [vmem:[#allocation521_spill] sm:$0xff]  ;;  %v11503_v11 = vld [vmem:[#allocation522_spill] sm:$0xff]  ;;  %v2203_v32 = vadd.f32 %v2201_v41, %v2170_v59  ;;  %11514 = vst [vmem:[#allocation209_spill] sm:$0xff] %v8761_v34  ;;  %v8763_v59 = vpop.permute.xlu0 %3396  ;;  %vm11565_vm2 = vcmask 941056  }
 0x5ea   :  { %v2179_v53 = vsel %vm251_vm4, %v11503_v11, %v11502_v61  ;;  %v11504_v60 = vld [vmem:[#allocation541_spill] sm:$0xff]  ;;  %v11505_v31 = vld [vmem:[#allocation542_spill] sm:$0xff]  ;;  %v2126_v1 = vadd.f32 %v2124_v23, %v2093_v4  ;;  %11515 = vst [vmem:[#allocation210_spill] sm:$0xff] %v8763_v59  ;;  %v11523_v4 = vld [vmem:[#allocation504_spill] sm:$0xff] }
 0x5eb   :  { %v2234_v3 = vsel %vm285_vm5, %v11505_v31, %v11504_v60  ;;  %v11508_v18 = vld [vmem:[#allocation513_spill] sm:$0xff]  ;;  %v11509_v45 = vld [vmem:[#allocation514_spill] sm:$0xff]  ;;  %v2181_v41 = vadd.f32 %v2179_v53, %v2148_v40 }
 0x5ec   :  { %v2157_v58 = vsel %vm217_vm3, %v11509_v45, %v11508_v18  ;;  %v11510_v35 = vld [vmem:[#allocation533_spill] sm:$0xff]  ;;  %v11511_v50 = vld [vmem:[#allocation534_spill] sm:$0xff]  ;;  %v2236_v46 = vadd.f32 %v2234_v3, %v2203_v32  ;;  %v11522_v3 = vld [vmem:[#allocation503_spill] sm:$0xff]  ;;  %3599 = vrot.lane.b32.xlu0 %v11523_v4, %s11489_s27 }
 0x5ed   :  { %v2212_v61 = vsel %vm285_vm5, %v11511_v50, %v11510_v35  ;;  %v11512_v11 = vld [vmem:[#allocation553_spill] sm:$0xff]  ;;  %v11513_v13 = vld [vmem:[#allocation554_spill] sm:$0xff]  ;;  %3601 = vrot.lane.b32.xlu1 %v11522_v3, %s11489_s27  ;;  %vm11572_vm3 = vmmov %vm11565_vm2 }
 0x5ee   :  { %v2267_v56 = vsel %vm319_vm6, %v11513_v13, %v11512_v11  ;;  %v11516_v60 = vld [vmem:[#allocation525_spill] sm:$0xff]  ;;  %v11517_v31 = vld [vmem:[#allocation526_spill] sm:$0xff]  ;;  %v2159_v13 = vadd.f32 %v2157_v58, %v2126_v1  ;;  %v2214_v23 = vadd.f32 %v2212_v61, %v2181_v41  ;;  %v8787_v41 = vpop.permute.xlu1 %3405 }
 0x5ef   :  { %v2190_v30 = vsel %vm251_vm4, %v11517_v31, %v11516_v60  ;;  %v11518_v51 = vld [vmem:[#allocation545_spill] sm:$0xff]  ;;  %v11519_v18 = vld [vmem:[#allocation546_spill] sm:$0xff]  ;;  %v2269_v53 = vadd.f32 %v2267_v56, %v2236_v46  ;;  %11530 = vst [vmem:[#allocation226_spill] sm:$0xff] %v8787_v41  ;;  %v8789_v46 = vpop.permute.xlu0 %3403  ;;  %vm11575_vm4 = vcmask 932864  }
 0x5f0   :  { %v2245_v45 = vsel %vm319_vm6, %v11519_v18, %v11518_v51  ;;  %v11520_v35 = vld [vmem:[#allocation565_spill] sm:$0xff]  ;;  %v11521_v50 = vld [vmem:[#allocation566_spill] sm:$0xff]  ;;  %v2192_v61 = vadd.f32 %v2190_v30, %v2159_v13  ;;  %11531 = vst [vmem:[#allocation227_spill] sm:$0xff] %v8789_v46  ;;  %v11540_v13 = vld [vmem:[#allocation476_spill] sm:$0xff] }
 0x5f1   :  { %v2300_v47 = vsel %vm353_vm7, %v11521_v50, %v11520_v35  ;;  %v11524_v40 = vld [vmem:[#allocation537_spill] sm:$0xff]  ;;  %v11525_v32 = vld [vmem:[#allocation538_spill] sm:$0xff]  ;;  %v2247_v56 = vadd.f32 %v2245_v45, %v2214_v23  ;;  %3606 = vrot.lane.b32.xlu0 %v11540_v13, %s11538_s28 }
 0x5f2   :  { %v2223_v11 = vsel %vm285_vm5, %v11525_v32, %v11524_v40  ;;  %v11526_v60 = vld [vmem:[#allocation557_spill] sm:$0xff]  ;;  %v11527_v31 = vld [vmem:[#allocation558_spill] sm:$0xff]  ;;  %v2302_v1 = vadd.f32 %v2300_v47, %v2269_v53  ;;  %v11539_v47 = vld [vmem:[#allocation475_spill] sm:$0xff] }
 0x5f3   :  { %v2278_v51 = vsel %vm353_vm7, %v11527_v31, %v11526_v60  ;;  %v11528_v18 = vld [vmem:[#allocation577_spill] sm:$0xff]  ;;  %v11529_v59 = vld [vmem:[#allocation578_spill] sm:$0xff]  ;;  %3608 = vrot.lane.b32.xlu1 %v11539_v47, %s11538_s28  ;;  %vm11580_vm5 = vmmov %vm11555_vm0 }
 0x5f4   :  { %v2333_v58 = vsel %vm387_vm8, %v11529_v59, %v11528_v18  ;;  %v11532_v35 = vld [vmem:[#allocation549_spill] sm:$0xff]  ;;  %v11533_v50 = vld [vmem:[#allocation550_spill] sm:$0xff]  ;;  %v2225_v59 = vadd.f32 %v2223_v11, %v2192_v61  ;;  %v2280_v30 = vadd.f32 %v2278_v51, %v2247_v56  ;;  %v8813_v56 = vpop.permute.xlu1 %3412 }
 0x5f5   :  { %v2256_v3 = vsel %vm319_vm6, %v11533_v50, %v11532_v35  ;;  %v11534_v4 = vld [vmem:[#allocation569_spill] sm:$0xff]  ;;  %v11535_v40 = vld [vmem:[#allocation570_spill] sm:$0xff]  ;;  %v2335_v45 = vadd.f32 %v2333_v58, %v2302_v1  ;;  %11547 = vst [vmem:[#allocation607_spill] sm:$0xff] %v8813_v56  ;;  %v8815_v1 = vpop.permute.xlu0 %3410  ;;  %vm11583_vm6 = vmmov %vm11575_vm4 }
 0x5f6   :  { %v2311_v32 = vsel %vm387_vm8, %v11535_v40, %v11534_v4  ;;  %v11536_v60 = vld [vmem:[#allocation589_spill] sm:$0xff]  ;;  %v11537_v31 = vld [vmem:[#allocation590_spill] sm:$0xff]  ;;  %v2258_v51 = vadd.f32 %v2256_v3, %v2225_v59  ;;  %11548 = vst [vmem:[#allocation608_spill] sm:$0xff] %v8815_v1  ;;  %v11557_v59 = vld [vmem:[#allocation496_spill] sm:$0xff] }
 0x5f7   :  { %v2366_v34 = vsel %vm421_vm9, %v11537_v31, %v11536_v60  ;;  %v11541_v23 = vld [vmem:[#allocation561_spill] sm:$0xff]  ;;  %v11542_v53 = vld [vmem:[#allocation562_spill] sm:$0xff]  ;;  %v2313_v58 = vadd.f32 %v2311_v32, %v2280_v30  ;;  %3613 = vrot.lane.b32.xlu0 %v11557_v59, %s11538_s28 }
 0x5f8   :  { %v2289_v18 = vsel %vm353_vm7, %v11542_v53, %v11541_v23  ;;  %v11543_v35 = vld [vmem:[#allocation581_spill] sm:$0xff]  ;;  %v11544_v50 = vld [vmem:[#allocation582_spill] sm:$0xff]  ;;  %v2368_v61 = vadd.f32 %v2366_v34, %v2335_v45  ;;  %v11556_v34 = vld [vmem:[#allocation495_spill] sm:$0xff]  ;;  %vm11586_vm7 = vcmask 924672  }
 0x5f9   :  { %v2344_v4 = vsel %vm421_vm9, %v11544_v50, %v11543_v35  ;;  %v11545_v40 = vld [vmem:[#allocation601_spill] sm:$0xff]  ;;  %v11546_v46 = vld [vmem:[#allocation602_spill] sm:$0xff]  ;;  %3615 = vrot.lane.b32.xlu1 %v11556_v34, %s11538_s28 }
 0x5fa   :  { %v2399_v11 = vsel %vm455_vm10, %v11546_v46, %v11545_v40  ;;  %v11549_v60 = vld [vmem:[#allocation573_spill] sm:$0xff]  ;;  %v11550_v31 = vld [vmem:[#allocation574_spill] sm:$0xff]  ;;  %v2291_v46 = vadd.f32 %v2289_v18, %v2258_v51  ;;  %v2346_v3 = vadd.f32 %v2344_v4, %v2313_v58  ;;  %v8839_v58 = vpop.permute.xlu1 %3419 }
 0x5fb   :  { %v2322_v47 = vsel %vm387_vm8, %v11550_v31, %v11549_v60  ;;  %v11551_v13 = vld [vmem:[#allocation593_spill] sm:$0xff]  ;;  %v11552_v23 = vld [vmem:[#allocation594_spill] sm:$0xff]  ;;  %v2401_v32 = vadd.f32 %v2399_v11, %v2368_v61  ;;  %11566 = vst [vmem:[#allocation201_spill] sm:$0xff] %v8839_v58  ;;  %v8841_v61 = vpop.permute.xlu0 %3417  ;;  %vm11591_vm8 = vmmov %vm11565_vm2 }
 0x5fc   :  { %v2377_v53 = vsel %vm455_vm10, %v11552_v23, %v11551_v13  ;;  %v11553_v35 = vld [vmem:[#allocation613_spill] sm:$0xff]  ;;  %v11554_v50 = vld [vmem:[#allocation614_spill] sm:$0xff]  ;;  %v2324_v4 = vadd.f32 %v2322_v47, %v2291_v46  ;;  %11567 = vst [vmem:[#allocation202_spill] sm:$0xff] %v8841_v61  ;;  %v11577_v46 = vld [vmem:[#allocation492_spill] sm:$0xff] }
 0x5fd   :  { %v2432_v41 = vsel %vm11555_vm0, %v11554_v50, %v11553_v35  ;;  %v11558_v30 = vld [vmem:[#allocation585_spill] sm:$0xff]  ;;  %v11559_v45 = vld [vmem:[#allocation586_spill] sm:$0xff]  ;;  %v2379_v11 = vadd.f32 %v2377_v53, %v2346_v3  ;;  %3620 = vrot.lane.b32.xlu0 %v11577_v46, %s11538_s28  ;;  %v11585_v61 = vld [vmem:[#allocation644_spill] sm:$0xff] }
 0x5fe   :  { %v2355_v40 = vsel %vm421_vm9, %v11559_v45, %v11558_v30  ;;  %v11560_v60 = vld [vmem:[#allocation605_spill] sm:$0xff]  ;;  %v11561_v31 = vld [vmem:[#allocation606_spill] sm:$0xff]  ;;  %v2434_v51 = vadd.f32 %v2432_v41, %v2401_v32  ;;  %v11576_v41 = vld [vmem:[#allocation491_spill] sm:$0xff] }
 0x5ff   :  { %v2410_v13 = vsel %vm11562_vm1, %v11561_v31, %v11560_v60  ;;  %v11563_v23 = vld [vmem:[#allocation625_spill] sm:$0xff]  ;;  %v11564_v1 = vld [vmem:[#allocation626_spill] sm:$0xff]  ;;  %v11573_v60 = vld [vmem:[#allocation635_spill] sm:$0xff]  ;;  %3622 = vrot.lane.b32.xlu1 %v11576_v41, %s11538_s28 }
 0x600   :  { %v2465_v18 = vsel %vm11565_vm2, %v11564_v1, %v11563_v23  ;;  %v11568_v35 = vld [vmem:[#allocation597_spill] sm:$0xff]  ;;  %v11569_v50 = vld [vmem:[#allocation598_spill] sm:$0xff]  ;;  %v11574_v31 = vld [vmem:[#allocation636_spill] sm:$0xff]  ;;  %v2357_v1 = vadd.f32 %v2355_v40, %v2324_v4  ;;  %v2412_v47 = vadd.f32 %v2410_v13, %v2379_v11  ;;  %v8865_v11 = vpop.permute.xlu1 %3426  ;;  %vm11609_vm2 = vcmask 908288  }
 0x601   :  { %v2388_v34 = vsel %vm455_vm10, %v11569_v50, %v11568_v35  ;;  %v11570_v59 = vld [vmem:[#allocation617_spill] sm:$0xff]  ;;  %v11571_v30 = vld [vmem:[#allocation618_spill] sm:$0xff]  ;;  %v2498_v56 = vsel %vm11575_vm4, %v11574_v31, %v11573_v60  ;;  %v2467_v53 = vadd.f32 %v2465_v18, %v2434_v51  ;;  %11587 = vst [vmem:[#allocation220_spill] sm:$0xff] %v8865_v11  ;;  %v8867_v51 = vpop.permute.xlu0 %3424  ;;  %v11592_v46 = vld [vmem:[#allocation639_spill] sm:$0xff]  ;;  %vm11597_vm10 = vcmask 916480  }
 0x602   :  { %v2443_v45 = vsel %vm11572_vm3, %v11571_v30, %v11570_v59  ;;  %v11578_v3 = vld [vmem:[#allocation609_spill] sm:$0xff]  ;;  %v11579_v32 = vld [vmem:[#allocation610_spill] sm:$0xff]  ;;  %v11584_v30 = vld [vmem:[#allocation643_spill] sm:$0xff]  ;;  %v2390_v13 = vadd.f32 %v2388_v34, %v2357_v1  ;;  %11588 = vst [vmem:[#allocation221_spill] sm:$0xff] %v8867_v51 }
 0x603   :  { %v2421_v23 = vsel %vm11580_vm5, %v11579_v32, %v11578_v3  ;;  %v11581_v35 = vld [vmem:[#allocation629_spill] sm:$0xff]  ;;  %v11582_v50 = vld [vmem:[#allocation630_spill] sm:$0xff]  ;;  %v2531_v40 = vsel %vm11586_vm7, %v11585_v61, %v11584_v30  ;;  %v2445_v18 = vadd.f32 %v2443_v45, %v2412_v47  ;;  %v2500_v4 = vadd.f32 %v2498_v56, %v2467_v53  ;;  %v11593_v3 = vld [vmem:[#allocation640_spill] sm:$0xff] }
 0x604   :  { %v2476_v59 = vsel %vm11583_vm6, %v11582_v50, %v11581_v35  ;;  %v11589_v60 = vld [vmem:[#allocation621_spill] sm:$0xff]  ;;  %v11590_v31 = vld [vmem:[#allocation622_spill] sm:$0xff]  ;;  %vm11594_vm9 = vmmov %vm11586_vm7  ;;  %v2423_v61 = vadd.f32 %v2421_v23, %v2390_v13  ;;  %vm11620_vm5 = vcmask 900096  }
 0x605   :  { %v2454_v41 = vsel %vm11591_vm8, %v11590_v31, %v11589_v60  ;;  %v2509_v32 = vsel %vm11594_vm9, %v11593_v3, %v11592_v46  ;;  %v11595_v35 = vld [vmem:[#allocation649_spill] sm:$0xff]  ;;  %v11596_v50 = vld [vmem:[#allocation650_spill] sm:$0xff]  ;;  %v2478_v34 = vadd.f32 %v2476_v59, %v2445_v18  ;;  %v2533_v45 = vadd.f32 %v2531_v40, %v2500_v4  ;;  %v11599_v56 = vld [vmem:[#allocation463_spill] sm:$0xff]  ;;  %v8891_v18 = vpop.permute.xlu1 %3433  ;;  %v8893_v4 = vpop.permute.xlu0 %3431 }
 0x606   :  { %v2564_v58 = vsel %vm11597_vm10, %v11596_v50, %v11595_v35  ;;  %3629 = vrot.lane.b32.xlu1 %v11599_v56, %s11598_s29  ;;  %v11600_v1 = vld [vmem:[#allocation464_spill] sm:$0xff]  ;;  %v11601_v47 = vld [vmem:[#allocation631_spill] sm:$0xff]  ;;  %vm11603_vm0 = vmmov %vm11575_vm4  ;;  %v2456_v59 = vadd.f32 %v2454_v41, %v2423_v61  ;;  %11610 = vst [vmem:[#allocation234_spill] sm:$0xff] %v8891_v18  ;;  %vm11631_vm8 = vcmask 891904  }
 0x607   :  { %3627 = vrot.lane.b32.xlu0 %v11600_v1, %s11598_s29  ;;  %v11602_v53 = vld [vmem:[#allocation632_spill] sm:$0xff]  ;;  %v11604_v60 = vld [vmem:[#allocation645_spill] sm:$0xff]  ;;  %v11605_v31 = vld [vmem:[#allocation646_spill] sm:$0xff]  ;;  %v2511_v40 = vadd.f32 %v2509_v32, %v2478_v34  ;;  %v2566_v13 = vadd.f32 %v2564_v58, %v2533_v45  ;;  %11611 = vst [vmem:[#allocation235_spill] sm:$0xff] %v8893_v4 }
 0x608   :  { %v2487_v30 = vsel %vm11603_vm0, %v11602_v53, %v11601_v47  ;;  %vm11606_vm1 = vmmov %vm11597_vm10  ;;  %v11607_v3 = vld [vmem:[#allocation655_spill] sm:$0xff]  ;;  %v11608_v51 = vld [vmem:[#allocation656_spill] sm:$0xff]  ;;  %vm11642_vm0 = vcmask 883712  }
 0x609   :  { %v2542_v46 = vsel %vm11606_vm1, %v11605_v31, %v11604_v60  ;;  %v2597_v23 = vsel %vm11609_vm2, %v11608_v51, %v11607_v3  ;;  %v11612_v35 = vld [vmem:[#allocation641_spill] sm:$0xff]  ;;  %v11613_v50 = vld [vmem:[#allocation642_spill] sm:$0xff]  ;;  %vm11614_vm3 = vmmov %vm11586_vm7  ;;  %v2489_v51 = vadd.f32 %v2487_v30, %v2456_v59 }
 0x60a   :  { %v2520_v56 = vsel %vm11614_vm3, %v11613_v50, %v11612_v35  ;;  %v11615_v1 = vld [vmem:[#allocation651_spill] sm:$0xff]  ;;  %v11616_v47 = vld [vmem:[#allocation652_spill] sm:$0xff]  ;;  %vm11617_vm4 = vmmov %vm11609_vm2  ;;  %v2544_v41 = vadd.f32 %v2542_v46, %v2511_v40  ;;  %v2599_v32 = vadd.f32 %v2597_v23, %v2566_v13  ;;  %v8917_v40 = vpop.permute.xlu1 %3440  ;;  %v8919_v13 = vpop.permute.xlu0 %3438  ;;  %vm11653_vm3 = vcmask 875520  }
 0x60b   :  { %v2575_v53 = vsel %vm11617_vm4, %v11616_v47, %v11615_v1  ;;  %v11618_v60 = vld [vmem:[#allocation661_spill] sm:$0xff]  ;;  %v11619_v31 = vld [vmem:[#allocation662_spill] sm:$0xff]  ;;  %v11621_v58 = vld [vmem:[#allocation483_spill] sm:$0xff]  ;;  %v2522_v46 = vadd.f32 %v2520_v56, %v2489_v51  ;;  %11632 = vst [vmem:[#allocation212_spill] sm:$0xff] %v8917_v40 }
 0x60c   :  { %v2630_v11 = vsel %vm11620_vm5, %v11619_v31, %v11618_v60  ;;  %3636 = vrot.lane.b32.xlu1 %v11621_v58, %s11598_s29  ;;  %v11622_v61 = vld [vmem:[#allocation484_spill] sm:$0xff]  ;;  %v11623_v34 = vld [vmem:[#allocation647_spill] sm:$0xff]  ;;  %vm11625_vm6 = vmmov %vm11606_vm1  ;;  %v2577_v23 = vadd.f32 %v2575_v53, %v2544_v41  ;;  %11633 = vst [vmem:[#allocation213_spill] sm:$0xff] %v8919_v13 }
 0x60d   :  { %3634 = vrot.lane.b32.xlu0 %v11622_v61, %s11598_s29  ;;  %v11624_v45 = vld [vmem:[#allocation648_spill] sm:$0xff]  ;;  %v11626_v35 = vld [vmem:[#allocation657_spill] sm:$0xff]  ;;  %v11627_v50 = vld [vmem:[#allocation658_spill] sm:$0xff]  ;;  %v2632_v59 = vadd.f32 %v2630_v11, %v2599_v32 }
 0x60e   :  { %v2553_v3 = vsel %vm11625_vm6, %v11624_v45, %v11623_v34  ;;  %vm11628_vm7 = vmmov %vm11620_vm5  ;;  %v11629_v47 = vld [vmem:[#allocation667_spill] sm:$0xff]  ;;  %v11630_v4 = vld [vmem:[#allocation668_spill] sm:$0xff]  ;;  %vm11663_vm6 = vcmask 867328  }
 0x60f   :  { %v2608_v1 = vsel %vm11628_vm7, %v11627_v50, %v11626_v35  ;;  %v2663_v30 = vsel %vm11631_vm8, %v11630_v4, %v11629_v47  ;;  %v11634_v60 = vld [vmem:[#allocation653_spill] sm:$0xff]  ;;  %v11635_v31 = vld [vmem:[#allocation654_spill] sm:$0xff]  ;;  %vm11636_vm9 = vmmov %vm11609_vm2  ;;  %v2555_v4 = vadd.f32 %v2553_v3, %v2522_v46 }
 0x610   :  { %v2586_v58 = vsel %vm11636_vm9, %v11635_v31, %v11634_v60  ;;  %v11637_v61 = vld [vmem:[#allocation663_spill] sm:$0xff]  ;;  %v11638_v34 = vld [vmem:[#allocation664_spill] sm:$0xff]  ;;  %vm11639_vm10 = vmmov %vm11631_vm8  ;;  %v2610_v56 = vadd.f32 %v2608_v1, %v2577_v23  ;;  %v2665_v53 = vadd.f32 %v2663_v30, %v2632_v59  ;;  %v8943_v23 = vpop.permute.xlu1 %3447  ;;  %v8945_v59 = vpop.permute.xlu0 %3445  ;;  %vm11675_vm9 = vcmask 859136  }
 0x611   :  { %v2641_v45 = vsel %vm11639_vm10, %v11638_v34, %v11637_v61  ;;  %v11640_v35 = vld [vmem:[#allocation673_spill] sm:$0xff]  ;;  %v11641_v50 = vld [vmem:[#allocation674_spill] sm:$0xff]  ;;  %v11643_v11 = vld [vmem:[#allocation479_spill] sm:$0xff]  ;;  %v2588_v1 = vadd.f32 %v2586_v58, %v2555_v4  ;;  %11654 = vst [vmem:[#allocation230_spill] sm:$0xff] %v8945_v59 }
 0x612   :  { %v2696_v18 = vsel %vm11642_vm0, %v11641_v50, %v11640_v35  ;;  %3643 = vrot.lane.b32.xlu1 %v11643_v11, %s11598_s29  ;;  %v11644_v51 = vld [vmem:[#allocation480_spill] sm:$0xff]  ;;  %v11645_v41 = vld [vmem:[#allocation659_spill] sm:$0xff]  ;;  %vm11647_vm1 = vmmov %vm11620_vm5  ;;  %v2643_v30 = vadd.f32 %v2641_v45, %v2610_v56 }
 0x613   :  { %3641 = vrot.lane.b32.xlu0 %v11644_v51, %s11598_s29  ;;  %v11646_v32 = vld [vmem:[#allocation660_spill] sm:$0xff]  ;;  %v11648_v60 = vld [vmem:[#allocation669_spill] sm:$0xff]  ;;  %v11649_v31 = vld [vmem:[#allocation670_spill] sm:$0xff]  ;;  %v2698_v46 = vadd.f32 %v2696_v18, %v2665_v53 }
 0x614   :  { %v2619_v47 = vsel %vm11647_vm1, %v11646_v32, %v11645_v41  ;;  %vm11650_vm2 = vmmov %vm11642_vm0  ;;  %v11651_v34 = vld [vmem:[#allocation679_spill] sm:$0xff]  ;;  %v11652_v13 = vld [vmem:[#allocation680_spill] sm:$0xff]  ;;  %vm11682_vm1 = vcmask 850944  }
 0x615   :  { %v2674_v61 = vsel %vm11650_vm2, %v11649_v31, %v11648_v60  ;;  %v2729_v3 = vsel %vm11653_vm3, %v11652_v13, %v11651_v34  ;;  %v11655_v35 = vld [vmem:[#allocation665_spill] sm:$0xff]  ;;  %v11656_v50 = vld [vmem:[#allocation666_spill] sm:$0xff]  ;;  %vm11657_vm4 = vmmov %vm11631_vm8  ;;  %v2621_v13 = vadd.f32 %v2619_v47, %v2588_v1 }
 0x616   :  { %v2652_v11 = vsel %vm11657_vm4, %v11656_v50, %v11655_v35  ;;  %v11658_v51 = vld [vmem:[#allocation675_spill] sm:$0xff]  ;;  %v11659_v41 = vld [vmem:[#allocation676_spill] sm:$0xff]  ;;  %vm11660_vm5 = vmmov %vm11653_vm3  ;;  %v2676_v58 = vadd.f32 %v2674_v61, %v2643_v30  ;;  %v2731_v45 = vadd.f32 %v2729_v3, %v2698_v46  ;;  %v8969_v30 = vpop.permute.xlu1 %3454  ;;  %v8971_v46 = vpop.permute.xlu0 %3452  ;;  %vm11691_vm4 = vcmask 842752  }
 0x617   :  { %v2707_v32 = vsel %vm11660_vm5, %v11659_v41, %v11658_v51  ;;  %v11661_v60 = vld [vmem:[#allocation685_spill] sm:$0xff]  ;;  %v11662_v31 = vld [vmem:[#allocation686_spill] sm:$0xff]  ;;  %v11665_v18 = vld [vmem:[#allocation451_spill] sm:$0xff]  ;;  %v2654_v61 = vadd.f32 %v2652_v11, %v2621_v13 }
 0x618   :  { %v2762_v40 = vsel %vm11663_vm6, %v11662_v31, %v11661_v60  ;;  %3650 = vrot.lane.b32.xlu1 %v11665_v18, %s11664_s30  ;;  %v11666_v4 = vld [vmem:[#allocation452_spill] sm:$0xff]  ;;  %v11667_v56 = vld [vmem:[#allocation671_spill] sm:$0xff]  ;;  %vm11669_vm7 = vmmov %vm11642_vm0  ;;  %v2709_v3 = vadd.f32 %v2707_v32, %v2676_v58 }
 0x619   :  { %3648 = vrot.lane.b32.xlu0 %v11666_v4, %s11664_s30  ;;  %v11668_v53 = vld [vmem:[#allocation672_spill] sm:$0xff]  ;;  %v11670_v35 = vld [vmem:[#allocation681_spill] sm:$0xff]  ;;  %v11671_v50 = vld [vmem:[#allocation682_spill] sm:$0xff]  ;;  %v2764_v1 = vadd.f32 %v2762_v40, %v2731_v45 }
 0x61a   :  { %v2685_v34 = vsel %vm11669_vm7, %v11668_v53, %v11667_v56  ;;  %vm11672_vm8 = vmmov %vm11663_vm6  ;;  %v11673_v41 = vld [vmem:[#allocation691_spill] sm:$0xff]  ;;  %v11674_v59 = vld [vmem:[#allocation692_spill] sm:$0xff]  ;;  %vm11697_vm7 = vcmask 834560  }
 0x61b   :  { %v2740_v51 = vsel %vm11672_vm8, %v11671_v50, %v11670_v35  ;;  %v2795_v47 = vsel %vm11675_vm9, %v11674_v59, %v11673_v41  ;;  %v11676_v60 = vld [vmem:[#allocation677_spill] sm:$0xff]  ;;  %v11677_v31 = vld [vmem:[#allocation678_spill] sm:$0xff]  ;;  %vm11678_vm10 = vmmov %vm11653_vm3  ;;  %v2828_v35 = vsel %vm11682_vm1, %v7578_v54, %v7576_v55  ;;  %v2687_v59 = vadd.f32 %v2685_v34, %v2654_v61  ;;  %v8997_v61 = vpop.permute.xlu0 %3459 }
 0x61c   :  { %v2718_v18 = vsel %vm11678_vm10, %v11677_v31, %v11676_v60  ;;  %v11679_v4 = vld [vmem:[#allocation687_spill] sm:$0xff]  ;;  %v11680_v56 = vld [vmem:[#allocation688_spill] sm:$0xff]  ;;  %vm11681_vm0 = vmmov %vm11675_vm9  ;;  %v2742_v11 = vadd.f32 %v2740_v51, %v2709_v3  ;;  %v2797_v32 = vadd.f32 %v2795_v47, %v2764_v1  ;;  %v2861_v54 = vsel %vm11691_vm4, %v7600_v44, %v7598_v29  ;;  %v8995_v47 = vpop.permute.xlu1 %3461 }
 0x61d   :  { %v2773_v53 = vsel %vm11681_vm0, %v11680_v56, %v11679_v4  ;;  %v11683_v40 = vld [vmem:[#allocation471_spill] sm:$0xff]  ;;  %v11684_v13 = vld [vmem:[#allocation472_spill] sm:$0xff]  ;;  %vm11687_vm2 = vmmov %vm11663_vm6  ;;  %v2720_v55 = vadd.f32 %v2718_v18, %v2687_v59  ;;  %vm11704_vm10 = vcmask 826368  }
 0x61e   :  { %3657 = vrot.lane.b32.xlu1 %v11683_v40, %s11664_s30  ;;  %3655 = vrot.lane.b32.xlu0 %v11684_v13, %s11664_s30  ;;  %v11685_v58 = vld [vmem:[#allocation683_spill] sm:$0xff]  ;;  %v11686_v45 = vld [vmem:[#allocation684_spill] sm:$0xff]  ;;  %v11688_v41 = vld [vmem:[#allocation693_spill] sm:$0xff]  ;;  %v2775_v34 = vadd.f32 %v2773_v53, %v2742_v11  ;;  %v2830_v51 = vadd.f32 %v2828_v35, %v2797_v32  ;;  %v2894_v13 = vsel %vm11697_vm7, %v7622_v22, %v7620_v36 }
 0x61f   :  { %v2751_v50 = vsel %vm11687_vm2, %v11686_v45, %v11685_v58  ;;  %v11689_v60 = vld [vmem:[#allocation694_spill] sm:$0xff]  ;;  %vm11690_vm3 = vmmov %vm11682_vm1  ;;  %v11692_v3 = vld [vmem:[#allocation689_spill] sm:$0xff]  ;;  %v2927_v36 = vsel %vm11704_vm10, %v7644_v26, %v7642_v39  ;;  %vm11709_vm2 = vcmask 818176  }
 0x620   :  { %v2806_v31 = vsel %vm11690_vm3, %v11689_v60, %v11688_v41  ;;  %v11693_v1 = vld [vmem:[#allocation690_spill] sm:$0xff]  ;;  %vm11694_vm5 = vmmov %vm11681_vm0  ;;  %v11695_v56 = vld [vmem:[#allocation697_spill] sm:$0xff]  ;;  %v2753_v44 = vadd.f32 %v2751_v50, %v2720_v55  ;;  %v2863_v18 = vadd.f32 %v2861_v54, %v2830_v51  ;;  %v9021_v50 = vpop.permute.xlu1 %3468  ;;  %v9023_v41 = vpop.permute.xlu0 %3466 }
 0x621   :  { %v2784_v4 = vsel %vm11694_vm5, %v11693_v1, %v11692_v3  ;;  %vm11696_vm6 = vmmov %vm11691_vm4  ;;  %v2808_v29 = vadd.f32 %v2806_v31, %v2775_v34  ;;  %v11698_v53 = vld [vmem:[#allocation467_spill] sm:$0xff]  ;;  %v11699_v35 = vld [vmem:[#allocation468_spill] sm:$0xff]  ;;  %vm11715_vm5 = vcmask 809984  }
 0x622   :  { %v2839_v40 = vsel %vm11696_vm6, %v7586_v49, %v11695_v56  ;;  %3664 = vrot.lane.b32.xlu1 %v11698_v53, %s11664_s30  ;;  %3662 = vrot.lane.b32.xlu0 %v11699_v35, %s11664_s30  ;;  %v11700_v59 = vld [vmem:[#allocation695_spill] sm:$0xff]  ;;  %v11701_v11 = vld [vmem:[#allocation696_spill] sm:$0xff]  ;;  %vm11702_vm8 = vmmov %vm11682_vm1  ;;  %v2786_v22 = vadd.f32 %v2784_v4, %v2753_v44  ;;  %v2896_v45 = vadd.f32 %v2894_v13, %v2863_v18 }
 0x623   :  { %v2817_v32 = vsel %vm11702_vm8, %v11701_v11, %v11700_v59  ;;  %vm11703_vm9 = vmmov %vm11697_vm7  ;;  %v2841_v58 = vadd.f32 %v2839_v40, %v2808_v29  ;;  %v11705_v60 = vld [vmem:[#allocation698_spill] sm:$0xff]  ;;  %v11706_v31 = vld [vmem:[#allocation699_spill] sm:$0xff]  ;;  %vm11718_vm8 = vcmask 801792  }
 0x624   :  { %v2872_v49 = vsel %vm11703_vm9, %v7608_v10, %v7606_v28  ;;  %vm11707_vm0 = vmmov %vm11691_vm4  ;;  %v2960_v28 = vsel %vm11709_vm2, %v7668_v43, %v7666_v42  ;;  %v2819_v10 = vadd.f32 %v2817_v32, %v2786_v22  ;;  %v2929_v26 = vadd.f32 %v2927_v36, %v2896_v45  ;;  %v11711_v34 = vld [vmem:[#allocation439_spill] sm:$0xff]  ;;  %v11712_v51 = vld [vmem:[#allocation440_spill] sm:$0xff]  ;;  %v9047_v4 = vpop.permute.xlu1 %3475  ;;  %v9049_v56 = vpop.permute.xlu0 %3473 }
 0x625   :  { %v2850_v54 = vsel %vm11707_vm0, %v11706_v31, %v11705_v60  ;;  %vm11708_vm1 = vmmov %vm11704_vm10  ;;  %v2874_v39 = vadd.f32 %v2872_v49, %v2841_v58  ;;  %v11720_v13 = vld [vmem:[#allocation460_spill] sm:$0xff]  ;;  %vm11723_vm0 = vcmask 793600   ;;  %v11728_v53 = vld [vmem:[#allocation455_spill] sm:$0xff] }
 0x626   :  { %v2905_v55 = vsel %vm11708_vm1, %v7628_v33, %v7626_v48  ;;  %3671 = vrot.lane.b32.xlu1 %v11711_v34, %s11710_s3  ;;  %3669 = vrot.lane.b32.xlu0 %v11712_v51, %s11710_s3  ;;  %vm11713_vm3 = vmmov %vm11697_vm7  ;;  %v2993_v33 = vsel %vm11715_vm5, %v7692_v24, %v7690_v25  ;;  %v2852_v42 = vadd.f32 %v2850_v54, %v2819_v10  ;;  %v11719_v24 = vld [vmem:[#allocation459_spill] sm:$0xff]  ;;  %v11729_v35 = vld [vmem:[#allocation456_spill] sm:$0xff] }
 0x627   :  { %v2883_v3 = vsel %vm11713_vm3, %v7614_v38, %v7612_v12  ;;  %vm11714_vm4 = vmmov %vm11709_vm2  ;;  %v2907_v43 = vadd.f32 %v2905_v55, %v2874_v39  ;;  %v2962_v1 = vadd.f32 %v2960_v28, %v2929_v26  ;;  %v3026_v12 = vsel %vm11718_vm8, %v7716_v5, %v7714_v9  ;;  %v11730_v59 = vld [vmem:[#allocation700_spill] sm:$0xff]  ;;  %v11731_v11 = vld [vmem:[#allocation701_spill] sm:$0xff] }
 0x628   :  { %v2938_v48 = vsel %vm11714_vm4, %v7652_v20, %v7650_v27  ;;  %vm11716_vm6 = vmmov %vm11708_vm1  ;;  %v2885_v27 = vadd.f32 %v2883_v3, %v2852_v42  ;;  %v9073_v44 = vpop.permute.xlu1 %3482  ;;  %v9075_v29 = vpop.permute.xlu0 %3480  ;;  %vm11727_vm3 = vcmask 785408   ;;  %v11734_v32 = vld [vmem:[#allocation705_spill] sm:$0xff]  ;;  %v11737_v49 = vld [vmem:[#allocation66_spill] sm:$0xff] }
 0x629   :  { %v2916_v40 = vsel %vm11716_vm6, %v7636_v19, %v7634_v8  ;;  %vm11717_vm7 = vmmov %vm11715_vm5  ;;  %v2940_v20 = vadd.f32 %v2938_v48, %v2907_v43  ;;  %v2995_v25 = vadd.f32 %v2993_v33, %v2962_v1  ;;  %vm11738_vm6 = vcmask 777216   ;;  %v11739_v31 = vld [vmem:[#allocation702_spill] sm:$0xff]  ;;  %v11740_v54 = vld [vmem:[#allocation703_spill] sm:$0xff] }
 0x62a   :  { %v2971_v38 = vsel %vm11717_vm7, %v7676_v15, %v7674_v17  ;;  %3678 = vrot.lane.b32.xlu1 %v11719_v24, %s11710_s3  ;;  %3676 = vrot.lane.b32.xlu0 %v11720_v13, %s11710_s3  ;;  %vm11721_vm9 = vmmov %vm11709_vm2  ;;  %v3059_v17 = vsel %vm11723_vm0, %v7740_v57, %v7738_v6  ;;  %v2918_v15 = vadd.f32 %v2916_v40, %v2885_v27  ;;  %v11742_v28 = vld [vmem:[#allocation709_spill] sm:$0xff]  ;;  %v11743_v10 = vld [vmem:[#allocation710_spill] sm:$0xff] }
 0x62b   :  { %v2949_v8 = vsel %vm11721_vm9, %v7660_v37, %v7658_v63  ;;  %vm11722_vm10 = vmmov %vm11718_vm8  ;;  %v2973_v9 = vadd.f32 %v2971_v38, %v2940_v20  ;;  %v3028_v5 = vadd.f32 %v3026_v12, %v2995_v25  ;;  %v11726_v37 = vld [vmem:[#allocation708_spill] sm:$0xff]  ;;  %v11745_v26 = vld [vmem:[#allocation97_spill] sm:$0xff]  ;;  %vm11746_vm9 = vcmask 769024  }
 0x62c   :  { %v3004_v19 = vsel %vm11722_vm10, %v7700_v0, %v7698_v7  ;;  %vm11724_vm1 = vmmov %vm11715_vm5  ;;  %v3092_v7 = vsel %vm11727_vm3, %v11726_v37, %v7762_v52  ;;  %v2951_v0 = vadd.f32 %v2949_v8, %v2918_v15  ;;  %v9099_v45 = vpop.permute.xlu1 %3489  ;;  %v9101_v60 = vpop.permute.xlu0 %3487  ;;  %v3154_v34 = vsel %vm11746_vm9, %v11745_v26, %v7883_v2  ;;  %v11748_v33 = vld [vmem:[#allocation427_spill] sm:$0xff]  ;;  %v11749_v42 = vld [vmem:[#allocation428_spill] sm:$0xff] }
 0x62d   :  { %v2982_v18 = vsel %vm11724_vm1, %v7684_v16, %v7682_v14  ;;  %vm11725_vm2 = vmmov %vm11723_vm0  ;;  %v3006_v6 = vadd.f32 %v3004_v19, %v2973_v9  ;;  %v3061_v57 = vadd.f32 %v3059_v17, %v3028_v5  ;;  %v11733_v16 = vld [vmem:[#allocation704_spill] sm:$0xff]  ;;  %v11750_v43 = vld [vmem:[#allocation706_spill] sm:$0xff]  ;;  %vm11758_vm1 = vcmask 760832  }
 0x62e   :  { %v3037_v63 = vsel %vm11725_vm2, %v7724_v21, %v7722_v62  ;;  %3685 = vrot.lane.b32.xlu1 %v11728_v53, %s11710_s3  ;;  %3683 = vrot.lane.b32.xlu0 %v11729_v35, %s11710_s3  ;;  %vm11732_vm4 = vmmov %vm11718_vm8  ;;  %v11736_v21 = vld [vmem:[#allocation70_spill] sm:$0xff]  ;;  %v2984_v36 = vadd.f32 %v2982_v18, %v2951_v0  ;;  %v11751_v1 = vld [vmem:[#allocation707_spill] sm:$0xff] }
 0x62f   :  { %v3015_v14 = vsel %vm11732_vm4, %v11731_v11, %v11730_v59  ;;  %vm11735_vm5 = vmmov %vm11727_vm3  ;;  %v3125_v52 = vsel %vm11738_vm6, %v11737_v49, %v11736_v21  ;;  %v3039_v22 = vadd.f32 %v3037_v63, %v3006_v6  ;;  %v3094_v58 = vadd.f32 %v3092_v7, %v3061_v57  ;;  %v11753_v38 = vld [vmem:[#allocation85_spill] sm:$0xff]  ;;  %v11754_v12 = vld [vmem:[#allocation86_spill] sm:$0xff] }
 0x630   :  { %v3070_v62 = vsel %vm11735_vm5, %v11734_v32, %v11733_v16  ;;  %vm11741_vm7 = vmmov %vm11723_vm0  ;;  %v3017_v51 = vadd.f32 %v3015_v14, %v2984_v36  ;;  %v11756_v20 = vld [vmem:[#allocation90_spill] sm:$0xff]  ;;  %v11757_v25 = vld [vmem:[#allocation109_spill] sm:$0xff]  ;;  %v9125_v19 = vpop.permute.xlu1 %3496  ;;  %v9127_v17 = vpop.permute.xlu0 %3494  ;;  %vm11767_vm4 = vcmask 752640  }
 0x631   :  { %v3048_v55 = vsel %vm11741_vm7, %v11740_v54, %v11739_v31  ;;  %vm11744_vm8 = vmmov %vm11738_vm6  ;;  %v3072_v3 = vadd.f32 %v3070_v62, %v3039_v22  ;;  %v3127_v48 = vadd.f32 %v3125_v52, %v3094_v58  ;;  %v3183_v2 = vsel %vm11758_vm1, %v11757_v25, %v11756_v20  ;;  %v11759_v15 = vld [vmem:[#allocation73_spill] sm:$0xff]  ;;  %v11760_v9 = vld [vmem:[#allocation74_spill] sm:$0xff] }
 0x632   :  { %v3103_v39 = vsel %vm11744_vm8, %v11743_v10, %v11742_v28  ;;  %3692 = vrot.lane.b32.xlu1 %v11748_v33, %s11747_s4  ;;  %3690 = vrot.lane.b32.xlu0 %v11749_v42, %s11747_s4  ;;  %vm11752_vm10 = vmmov %vm11727_vm3  ;;  %v3050_v24 = vadd.f32 %v3048_v55, %v3017_v51  ;;  %v11762_v18 = vld [vmem:[#allocation98_spill] sm:$0xff]  ;;  %v11763_v63 = vld [vmem:[#allocation69_spill] sm:$0xff]  ;;  %vm11778_vm7 = vcmask 744448  }
 0x633   :  { %v3081_v40 = vsel %vm11752_vm10, %v11751_v1, %v11750_v43  ;;  %vm11755_vm0 = vmmov %vm11746_vm9  ;;  %v3105_v13 = vadd.f32 %v3103_v39, %v3072_v3  ;;  %v3156_v8 = vadd.f32 %v3154_v34, %v3127_v48  ;;  %v11765_v7 = vld [vmem:[#allocation102_spill] sm:$0xff]  ;;  %v11766_v0 = vld [vmem:[#allocation121_spill] sm:$0xff]  ;;  %vm11787_vm10 = vcmask 736256  }
 0x634   :  { %v3132_v27 = vsel %vm11755_vm0, %v11754_v12, %v11753_v38  ;;  %vm11761_vm2 = vmmov %vm11738_vm6  ;;  %v3204_v6 = vsel %vm11767_vm4, %v11766_v0, %v11765_v7  ;;  %v3083_v57 = vadd.f32 %v3081_v40, %v3050_v24  ;;  %v11768_v59 = vld [vmem:[#allocation447_spill] sm:$0xff]  ;;  %v11769_v11 = vld [vmem:[#allocation448_spill] sm:$0xff]  ;;  %v9151_v55 = vpop.permute.xlu1 %3503  ;;  %v9153_v28 = vpop.permute.xlu0 %3501 }
 0x635   :  { %v3114_v5 = vsel %vm11761_vm2, %v11760_v9, %v11759_v15  ;;  %vm11764_vm3 = vmmov %vm11758_vm1  ;;  %v3134_v53 = vadd.f32 %v3132_v27, %v3105_v13  ;;  %v3185_v35 = vadd.f32 %v3183_v2, %v3156_v8  ;;  %v11770_v14 = vld [vmem:[#allocation77_spill] sm:$0xff]  ;;  %v11771_v16 = vld [vmem:[#allocation78_spill] sm:$0xff]  ;;  %vm11798_vm2 = vcmask 728064  }
 0x636   :  { %v3161_v37 = vsel %vm11764_vm3, %v11763_v63, %v11762_v18  ;;  %3699 = vrot.lane.b32.xlu1 %v11768_v59, %s11747_s4  ;;  %3697 = vrot.lane.b32.xlu0 %v11769_v11, %s11747_s4  ;;  %vm11772_vm5 = vmmov %vm11755_vm0  ;;  %v11773_v62 = vld [vmem:[#allocation110_spill] sm:$0xff]  ;;  %v11774_v21 = vld [vmem:[#allocation81_spill] sm:$0xff]  ;;  %v3116_v58 = vadd.f32 %v3114_v5, %v3083_v57 }
 0x637   :  { %v3143_v32 = vsel %vm11772_vm5, %v11771_v16, %v11770_v14  ;;  %vm11775_vm6 = vmmov %vm11767_vm4  ;;  %v11776_v52 = vld [vmem:[#allocation114_spill] sm:$0xff]  ;;  %v11777_v36 = vld [vmem:[#allocation133_spill] sm:$0xff]  ;;  %v3163_v31 = vadd.f32 %v3161_v37, %v3134_v53  ;;  %v3206_v54 = vadd.f32 %v3204_v6, %v3185_v35  ;;  %vm11807_vm5 = vcmask 719872  }
 0x638   :  { %v3190_v49 = vsel %vm11775_vm6, %v11774_v21, %v11773_v62  ;;  %v3225_v22 = vsel %vm11778_vm7, %v11777_v36, %v11776_v52  ;;  %v11779_v10 = vld [vmem:[#allocation65_spill] sm:$0xff]  ;;  %vm11781_vm8 = vmmov %vm11758_vm1  ;;  %v11782_v34 = vld [vmem:[#allocation122_spill] sm:$0xff]  ;;  %v3145_v43 = vadd.f32 %v3143_v32, %v3116_v58  ;;  %v9177_v37 = vpop.permute.xlu1 %3510  ;;  %v9179_v7 = vpop.permute.xlu0 %3508 }
 0x639   :  { %v11780_v39 = vld [vmem:[#allocation89_spill] sm:$0xff]  ;;  %vm11784_vm9 = vmmov %vm11778_vm7  ;;  %v11785_v48 = vld [vmem:[#allocation126_spill] sm:$0xff]  ;;  %v3192_v1 = vadd.f32 %v3190_v49, %v3163_v31  ;;  %v3227_v40 = vadd.f32 %v3225_v22, %v3206_v54 }
 0x63a   :  { %v3172_v26 = vsel %vm11781_vm8, %v11780_v39, %v11779_v10  ;;  %v11783_v51 = vld [vmem:[#allocation93_spill] sm:$0xff]  ;;  %v11788_v38 = vld [vmem:[#allocation443_spill] sm:$0xff]  ;;  %v11789_v12 = vld [vmem:[#allocation444_spill] sm:$0xff]  ;;  %vm11819_vm8 = vcmask 711680  }
 0x63b   :  { %v3211_v3 = vsel %vm11784_vm9, %v11783_v51, %v11782_v34  ;;  %v11786_v33 = vld [vmem:[#allocation145_spill] sm:$0xff]  ;;  %3706 = vrot.lane.b32.xlu1 %v11788_v38, %s11747_s4  ;;  %3704 = vrot.lane.b32.xlu0 %v11789_v12, %s11747_s4  ;;  %v11790_v27 = vld [vmem:[#allocation82_spill] sm:$0xff]  ;;  %vm11792_vm0 = vmmov %vm11767_vm4  ;;  %v3174_v5 = vadd.f32 %v3172_v26, %v3145_v43 }
 0x63c   :  { %v3246_v42 = vsel %vm11787_vm10, %v11786_v33, %v11785_v48  ;;  %v11791_v20 = vld [vmem:[#allocation101_spill] sm:$0xff]  ;;  %v11793_v2 = vld [vmem:[#allocation134_spill] sm:$0xff]  ;;  %vm11795_vm1 = vmmov %vm11787_vm10  ;;  %v3213_v18 = vadd.f32 %v3211_v3, %v3192_v1  ;;  %v9203_v33 = vpop.permute.xlu1 %3517 }
 0x63d   :  { %v3197_v25 = vsel %vm11792_vm0, %v11791_v20, %v11790_v27  ;;  %v11794_v24 = vld [vmem:[#allocation105_spill] sm:$0xff]  ;;  %v11796_v8 = vld [vmem:[#allocation138_spill] sm:$0xff]  ;;  %v3248_v63 = vadd.f32 %v3246_v42, %v3227_v40  ;;  %vm11801_vm3 = vmmov %vm11778_vm7  ;;  %v9205_v42 = vpop.permute.xlu0 %3515  ;;  %vm11828_vm0 = vcmask 703488  }
 0x63e   :  { %v3232_v13 = vsel %vm11795_vm1, %v11794_v24, %v11793_v2  ;;  %v11797_v15 = vld [vmem:[#allocation157_spill] sm:$0xff]  ;;  %v11799_v0 = vld [vmem:[#allocation94_spill] sm:$0xff]  ;;  %vm11804_vm4 = vmmov %vm11798_vm2  ;;  %v3199_v32 = vadd.f32 %v3197_v25, %v3174_v5 }
 0x63f   :  { %v3267_v9 = vsel %vm11798_vm2, %v11797_v15, %v11796_v8  ;;  %v11800_v6 = vld [vmem:[#allocation113_spill] sm:$0xff]  ;;  %v11802_v53 = vld [vmem:[#allocation146_spill] sm:$0xff]  ;;  %v3234_v62 = vadd.f32 %v3232_v13, %v3213_v18  ;;  %v11809_v49 = vld [vmem:[#allocation415_spill] sm:$0xff] }
 0x640   :  { %v3218_v57 = vsel %vm11801_vm3, %v11800_v6, %v11799_v0  ;;  %v11803_v35 = vld [vmem:[#allocation117_spill] sm:$0xff]  ;;  %v11805_v11 = vld [vmem:[#allocation130_spill] sm:$0xff]  ;;  %v3269_v21 = vadd.f32 %v3267_v9, %v3248_v63  ;;  %3713 = vrot.lane.b32.xlu1 %v11809_v49, %s11808_s5  ;;  %v11810_v52 = vld [vmem:[#allocation416_spill] sm:$0xff]  ;;  %vm11839_vm3 = vcmask 695296  }
 0x641   :  { %v3253_v59 = vsel %vm11804_vm4, %v11803_v35, %v11802_v53  ;;  %v11806_v14 = vld [vmem:[#allocation149_spill] sm:$0xff]  ;;  %3711 = vrot.lane.b32.xlu0 %v11810_v52, %s11808_s5  ;;  %v11811_v36 = vld [vmem:[#allocation106_spill] sm:$0xff]  ;;  %vm11813_vm6 = vmmov %vm11795_vm1  ;;  %v3220_v51 = vadd.f32 %v3218_v57, %v3199_v32  ;;  %v9229_v32 = vpop.permute.xlu1 %3524 }
 0x642   :  { %v3288_v16 = vsel %vm11807_vm5, %v11806_v14, %v11805_v11  ;;  %v11812_v22 = vld [vmem:[#allocation125_spill] sm:$0xff]  ;;  %v11814_v31 = vld [vmem:[#allocation158_spill] sm:$0xff]  ;;  %v11815_v54 = vld [vmem:[#allocation619_spill] sm:$0xff]  ;;  %v3255_v3 = vadd.f32 %v3253_v59, %v3234_v62  ;;  %v9231_v62 = vpop.permute.xlu0 %3522 }
 0x643   :  { %v3239_v58 = vsel %vm11813_vm6, %v11812_v22, %v11811_v36  ;;  %vm11816_vm7 = vmmov %vm11807_vm5  ;;  %v11817_v39 = vld [vmem:[#allocation142_spill] sm:$0xff]  ;;  %v11818_v26 = vld [vmem:[#allocation161_spill] sm:$0xff]  ;;  %v3290_v48 = vadd.f32 %v3288_v16, %v3269_v21  ;;  %vm11848_vm6 = vcmask 687104  }
 0x644   :  { %v3274_v10 = vsel %vm11816_vm7, %v11815_v54, %v11814_v31  ;;  %v3309_v34 = vsel %vm11819_vm8, %v11818_v26, %v11817_v39  ;;  %v11820_v43 = vld [vmem:[#allocation118_spill] sm:$0xff]  ;;  %v11821_v1 = vld [vmem:[#allocation137_spill] sm:$0xff]  ;;  %vm11822_vm9 = vmmov %vm11798_vm2  ;;  %v3241_v24 = vadd.f32 %v3239_v58, %v3220_v51 }
 0x645   :  { %v3260_v40 = vsel %vm11822_vm9, %v11821_v1, %v11820_v43  ;;  %v11823_v38 = vld [vmem:[#allocation150_spill] sm:$0xff]  ;;  %v11824_v12 = vld [vmem:[#allocation169_spill] sm:$0xff]  ;;  %vm11825_vm10 = vmmov %vm11819_vm8  ;;  %v3276_v13 = vadd.f32 %v3274_v10, %v3255_v3  ;;  %v3311_v8 = vadd.f32 %v3309_v34, %v3290_v48  ;;  %vm11859_vm9 = vcmask 678912  }
 0x646   :  { %v3295_v27 = vsel %vm11825_vm10, %v11824_v12, %v11823_v38  ;;  %v11826_v20 = vld [vmem:[#allocation638_spill] sm:$0xff]  ;;  %v11827_v25 = vld [vmem:[#allocation153_spill] sm:$0xff]  ;;  %v11829_v15 = vld [vmem:[#allocation435_spill] sm:$0xff]  ;;  %v3262_v11 = vadd.f32 %v3260_v40, %v3241_v24 }
 0x647   :  { %v3330_v2 = vsel %vm11828_vm0, %v11827_v25, %v11826_v20  ;;  %3720 = vrot.lane.b32.xlu1 %v11829_v15, %s11808_s5  ;;  %v11830_v9 = vld [vmem:[#allocation436_spill] sm:$0xff]  ;;  %v11832_v18 = vld [vmem:[#allocation129_spill] sm:$0xff]  ;;  %vm11833_vm1 = vmmov %vm11807_vm5  ;;  %v3297_v14 = vadd.f32 %v3295_v27, %v3276_v13  ;;  %v9257_v15 = vpop.permute.xlu0 %3529 }
 0x648   :  { %3718 = vrot.lane.b32.xlu0 %v11830_v9, %s11808_s5  ;;  %v11831_v5 = vld [vmem:[#allocation620_spill] sm:$0xff]  ;;  %v11834_v0 = vld [vmem:[#allocation162_spill] sm:$0xff]  ;;  %v11835_v6 = vld [vmem:[#allocation181_spill] sm:$0xff]  ;;  %v3332_v16 = vadd.f32 %v3330_v2, %v3311_v8  ;;  %v9255_v8 = vpop.permute.xlu1 %3531 }
 0x649   :  { %v3281_v63 = vsel %vm11833_vm1, %v11832_v18, %v11831_v5  ;;  %vm11836_vm2 = vmmov %vm11828_vm0  ;;  %v11837_v53 = vld [vmem:[#allocation194_spill] sm:$0xff]  ;;  %v11838_v35 = vld [vmem:[#allocation165_spill] sm:$0xff]  ;;  %vm11868_vm1 = vcmask 670720  }
 0x64a   :  { %v3316_v57 = vsel %vm11836_vm2, %v11835_v6, %v11834_v0  ;;  %v3351_v59 = vsel %vm11839_vm3, %v11838_v35, %v11837_v53  ;;  %v11840_v21 = vld [vmem:[#allocation170_spill] sm:$0xff]  ;;  %v11841_v49 = vld [vmem:[#allocation141_spill] sm:$0xff]  ;;  %vm11842_vm4 = vmmov %vm11819_vm8  ;;  %v3283_v39 = vadd.f32 %v3281_v63, %v3262_v11 }
 0x64b   :  { %v3302_v52 = vsel %vm11842_vm4, %v11841_v49, %v11840_v21  ;;  %v11843_v36 = vld [vmem:[#allocation154_spill] sm:$0xff]  ;;  %v11844_v22 = vld [vmem:[#allocation173_spill] sm:$0xff]  ;;  %vm11845_vm5 = vmmov %vm11839_vm3  ;;  %v3318_v26 = vadd.f32 %v3316_v57, %v3297_v14  ;;  %v3353_v34 = vadd.f32 %v3351_v59, %v3332_v16  ;;  %vm11880_vm4 = vcmask 662528  }
 0x64c   :  { %v3337_v58 = vsel %vm11845_vm5, %v11844_v22, %v11843_v36  ;;  %v11846_v31 = vld [vmem:[#allocation633_spill] sm:$0xff]  ;;  %v11847_v54 = vld [vmem:[#allocation634_spill] sm:$0xff]  ;;  %v11849_v51 = vld [vmem:[#allocation431_spill] sm:$0xff]  ;;  %v3304_v2 = vadd.f32 %v3302_v52, %v3283_v39 }
 0x64d   :  { %v3372_v10 = vsel %vm11848_vm6, %v11847_v54, %v11846_v31  ;;  %3727 = vrot.lane.b32.xlu1 %v11849_v51, %s11808_s5  ;;  %v11850_v3 = vld [vmem:[#allocation432_spill] sm:$0xff]  ;;  %v11851_v48 = vld [vmem:[#allocation182_spill] sm:$0xff]  ;;  %v11852_v43 = vld [vmem:[#allocation637_spill] sm:$0xff]  ;;  %v3339_v24 = vadd.f32 %v3337_v58, %v3318_v26 }
 0x64e   :  { %3725 = vrot.lane.b32.xlu0 %v11850_v3, %s11808_s5  ;;  %vm11853_vm7 = vmmov %vm11828_vm0  ;;  %v11854_v40 = vld [vmem:[#allocation166_spill] sm:$0xff]  ;;  %v11855_v38 = vld [vmem:[#allocation185_spill] sm:$0xff]  ;;  %v3374_v13 = vadd.f32 %v3372_v10, %v3353_v34  ;;  %v3539_v3 = vpop.permute.xlu1 %3538 }
 0x64f   :  { %v3323_v1 = vsel %vm11853_vm7, %v11852_v43, %v11851_v48  ;;  %vm11856_vm8 = vmmov %vm11848_vm6  ;;  %v11857_v27 = vld [vmem:[#allocation189_spill] sm:$0xff]  ;;  %v11858_v20 = vld [vmem:[#allocation190_spill] sm:$0xff]  ;;  %v3537_v48 = vpop.permute.xlu0 %3536  ;;  %vm11887_vm7 = vcmask 654336  }
 0x650   :  { %v3358_v12 = vsel %vm11856_vm8, %v11855_v38, %v11854_v40  ;;  %v3393_v25 = vsel %vm11859_vm9, %v11858_v20, %v11857_v27  ;;  %v11860_v9 = vld [vmem:[#allocation174_spill] sm:$0xff]  ;;  %v11861_v5 = vld [vmem:[#allocation193_spill] sm:$0xff]  ;;  %vm11862_vm10 = vmmov %vm11839_vm3  ;;  %v3325_v59 = vadd.f32 %v3323_v1, %v3304_v2  ;;  %v3456_v20 = vsel %vm11887_vm7, %v8971_v46, %v8969_v30 }
 0x651   :  { %v3344_v18 = vsel %vm11862_vm10, %v11861_v5, %v11860_v9  ;;  %v11863_v63 = vld [vmem:[#allocation178_spill] sm:$0xff]  ;;  %v11864_v0 = vld [vmem:[#allocation197_spill] sm:$0xff]  ;;  %vm11865_vm0 = vmmov %vm11859_vm9  ;;  %v3360_v11 = vadd.f32 %v3358_v12, %v3339_v24  ;;  %v3395_v14 = vadd.f32 %v3393_v25, %v3374_v13  ;;  %vm11888_vm8 = vcmask 621568  }
 0x652   :  { %v3379_v6 = vsel %vm11865_vm0, %v11864_v0, %v11863_v63  ;;  %v11866_v57 = vld [vmem:[#allocation607_spill] sm:$0xff]  ;;  %v11867_v53 = vld [vmem:[#allocation608_spill] sm:$0xff]  ;;  %v11872_v49 = vld [vmem:[#allocation186_spill] sm:$0xff]  ;;  %v3346_v26 = vadd.f32 %v3344_v18, %v3325_v59  ;;  %v3540_v25 = vsel %vm11888_vm8, %v3537_v48, %v3539_v3 }
 0x653   :  { %v3414_v35 = vsel %vm11868_vm1, %v11867_v53, %v11866_v57  ;;  %v11870_v16 = vld [vmem:[#allocation403_spill] sm:$0xff]  ;;  %v11871_v21 = vld [vmem:[#allocation404_spill] sm:$0xff]  ;;  %v11873_v52 = vld [vmem:[#allocation205_spill] sm:$0xff]  ;;  %v3381_v34 = vadd.f32 %v3379_v6, %v3360_v11  ;;  %v3546_v11 = vpop.permute.xlu1 %3545 }
 0x654   :  { %3734 = vrot.lane.b32.xlu1 %v11870_v16, %s11869_s6  ;;  %3732 = vrot.lane.b32.xlu0 %v11871_v21, %s11869_s6  ;;  %vm11874_vm2 = vmmov %vm11848_vm6  ;;  %v11875_v22 = vld [vmem:[#allocation209_spill] sm:$0xff]  ;;  %v11876_v58 = vld [vmem:[#allocation210_spill] sm:$0xff]  ;;  %v3416_v51 = vadd.f32 %v3414_v35, %v3395_v14  ;;  %v3544_v14 = vpop.permute.xlu0 %3543 }
 0x655   :  { %v3365_v36 = vsel %vm11874_vm2, %v11873_v52, %v11872_v49  ;;  %vm11877_vm3 = vmmov %vm11868_vm1  ;;  %v11878_v54 = vld [vmem:[#allocation234_spill] sm:$0xff]  ;;  %v11879_v10 = vld [vmem:[#allocation235_spill] sm:$0xff] }
 0x656   :  { %v3400_v31 = vsel %vm11877_vm3, %v11876_v58, %v11875_v22  ;;  %v3435_v39 = vsel %vm11880_vm4, %v11879_v10, %v11878_v54  ;;  %v11881_v43 = vld [vmem:[#allocation216_spill] sm:$0xff]  ;;  %v11882_v1 = vld [vmem:[#allocation217_spill] sm:$0xff]  ;;  %vm11883_vm5 = vmmov %vm11865_vm0  ;;  %v3367_v2 = vadd.f32 %v3365_v36, %v3346_v26  ;;  %vm11897_vm0 = vcmask 646144  }
 0x657   :  { %v3386_v40 = vsel %vm11883_vm5, %v11882_v1, %v11881_v43  ;;  %v11884_v38 = vld [vmem:[#allocation201_spill] sm:$0xff]  ;;  %v11885_v12 = vld [vmem:[#allocation202_spill] sm:$0xff]  ;;  %vm11886_vm6 = vmmov %vm11880_vm4  ;;  %v3402_v24 = vadd.f32 %v3400_v31, %v3381_v34  ;;  %v3437_v13 = vadd.f32 %v3435_v39, %v3416_v51  ;;  %v3477_v30 = vsel %vm11897_vm0, %v9049_v56, %v9047_v4  ;;  %v3553_v34 = vpop.permute.xlu1 %3552 }
 0x658   :  { %v3421_v27 = vsel %vm11886_vm6, %v11885_v12, %v11884_v38  ;;  %v11889_v9 = vld [vmem:[#allocation423_spill] sm:$0xff]  ;;  %v11890_v5 = vld [vmem:[#allocation424_spill] sm:$0xff]  ;;  %v11891_v18 = vld [vmem:[#allocation226_spill] sm:$0xff]  ;;  %v3388_v46 = vadd.f32 %v3386_v40, %v3367_v2  ;;  %vm11902_vm3 = vcmask 637952   ;;  %v3551_v51 = vpop.permute.xlu0 %3550 }
 0x659   :  { %3741 = vrot.lane.b32.xlu1 %v11889_v9, %s11869_s6  ;;  %3739 = vrot.lane.b32.xlu0 %v11890_v5, %s11869_s6  ;;  %v11892_v63 = vld [vmem:[#allocation227_spill] sm:$0xff]  ;;  %vm11893_vm9 = vmmov %vm11868_vm1  ;;  %v11894_v6 = vld [vmem:[#allocation212_spill] sm:$0xff]  ;;  %v3423_v35 = vadd.f32 %v3421_v27, %v3402_v24  ;;  %v3458_v59 = vadd.f32 %v3456_v20, %v3437_v13  ;;  %v3498_v36 = vsel %vm11902_vm3, %v9127_v17, %v9125_v19 }
 0x65a   :  { %v3407_v0 = vsel %vm11893_vm9, %v11892_v63, %v11891_v18  ;;  %v11895_v57 = vld [vmem:[#allocation213_spill] sm:$0xff]  ;;  %vm11896_vm10 = vmmov %vm11887_vm7  ;;  %v11898_v16 = vld [vmem:[#allocation220_spill] sm:$0xff] }
 0x65b   :  { %v3442_v53 = vsel %vm11896_vm10, %v11895_v57, %v11894_v6  ;;  %v11899_v21 = vld [vmem:[#allocation221_spill] sm:$0xff]  ;;  %vm11900_vm1 = vmmov %vm11880_vm4  ;;  %vm11903_vm4 = vcmask 613376   ;;  %v3409_v4 = vadd.f32 %v3407_v0, %v3388_v46  ;;  %v3479_v58 = vadd.f32 %v3477_v30, %v3458_v59  ;;  %v11904_v31 = vld [vmem:[#allocation419_spill] sm:$0xff]  ;;  %v3560_v40 = vpop.permute.xlu1 %3559 }
 0x65c   :  { %v3428_v49 = vsel %vm11900_vm1, %v11899_v21, %v11898_v16  ;;  %vm11901_vm2 = vmmov %vm11897_vm0  ;;  %v3547_v22 = vsel %vm11903_vm4, %v3544_v14, %v3546_v11  ;;  %v3444_v56 = vadd.f32 %v3442_v53, %v3423_v35  ;;  %v11905_v54 = vld [vmem:[#allocation420_spill] sm:$0xff]  ;;  %v11906_v10 = vld [vmem:[#allocation230_spill] sm:$0xff]  ;;  %vm11917_vm1 = vcmask 621568   ;;  %v3558_v38 = vpop.permute.xlu0 %3557 }
 0x65d   :  { %v3463_v52 = vsel %vm11901_vm2, %v8997_v61, %v8995_v47  ;;  %3748 = vrot.lane.b32.xlu1 %v11904_v31, %s11869_s6  ;;  %3746 = vrot.lane.b32.xlu0 %v11905_v54, %s11869_s6  ;;  %vm11907_vm5 = vmmov %vm11887_vm7  ;;  %vm11909_vm7 = vcmask 629760   ;;  %v3430_v19 = vadd.f32 %v3428_v49, %v3409_v4  ;;  %v3500_v26 = vadd.f32 %v3498_v36, %v3479_v58  ;;  %v11924_v18 = vld [vmem:[#allocation407_spill] sm:$0xff]  ;;  %v11925_v63 = vld [vmem:[#allocation408_spill] sm:$0xff] }
 0x65e   :  { %v3449_v39 = vsel %vm11907_vm5, %v11906_v10, %v8943_v23  ;;  %vm11908_vm6 = vmmov %vm11902_vm3  ;;  %v3519_v61 = vsel %vm11909_vm7, %v9205_v42, %v9203_v33  ;;  %v3465_v17 = vadd.f32 %v3463_v52, %v3444_v56  ;;  %v11914_v33 = vld [vmem:[#allocation391_spill] sm:$0xff]  ;;  %v11915_v42 = vld [vmem:[#allocation392_spill] sm:$0xff]  ;;  %vm11923_vm5 = vcmask 605184  }
 0x65f   :  { %v3484_v47 = vsel %vm11908_vm6, %v9075_v29, %v9073_v44  ;;  %vm11910_vm8 = vmmov %vm11897_vm0  ;;  %v3451_v44 = vadd.f32 %v3449_v39, %v3430_v19  ;;  %v3521_v43 = vadd.f32 %v3519_v61, %v3500_v26  ;;  %v3567_v13 = vpop.permute.xlu1 %3566  ;;  %v11929_v30 = vld [vmem:[#allocation380_spill] sm:$0xff]  ;;  %v11931_v14 = vld [vmem:[#allocation399_spill] sm:$0xff] }
 0x660   :  { %v3470_v3 = vsel %vm11910_vm8, %v9023_v41, %v9021_v50  ;;  %vm11911_vm9 = vmmov %vm11909_vm7  ;;  %v3486_v29 = vadd.f32 %v3484_v47, %v3465_v17  ;;  %v3526_v50 = vsel %vm11917_vm1, %v9231_v62, %v9229_v32  ;;  %v3565_v9 = vpop.permute.xlu0 %3564  ;;  %v11932_v16 = vld [vmem:[#allocation400_spill] sm:$0xff]  ;;  %vm11933_vm8 = vcmask 596992   ;;  %v11938_v10 = vld [vmem:[#allocation367_spill] sm:$0xff] }
 0x661   :  { %v3505_v23 = vsel %vm11911_vm9, %v9153_v28, %v9151_v55  ;;  %vm11912_vm10 = vmmov %vm11903_vm4  ;;  %3755 = vrot.lane.b32.xlu1 %v11914_v33, %s11913_s12  ;;  %3753 = vrot.lane.b32.xlu0 %v11915_v42, %s11913_s12  ;;  %v3472_v41 = vadd.f32 %v3470_v3, %v3451_v44  ;;  %v3542_v28 = vadd.f32 %v3540_v25, %v3521_v43  ;;  %v11935_v4 = vld [vmem:[#allocation396_spill] sm:$0xff]  ;;  %v11941_v26 = vld [vmem:[#allocation387_spill] sm:$0xff] }
 0x662   :  { %v3554_v48 = vsel %vm11912_vm10, %v3551_v51, %v3553_v34  ;;  %vm11916_vm0 = vmmov %vm11902_vm3  ;;  %v3507_v55 = vadd.f32 %v3505_v23, %v3486_v29  ;;  %v11939_v39 = vld [vmem:[#allocation368_spill] sm:$0xff]  ;;  %v11944_v44 = vld [vmem:[#allocation383_spill] sm:$0xff] }
 0x663   :  { %v3491_v1 = vsel %vm11916_vm0, %v9101_v60, %v9099_v45  ;;  %vm11918_vm2 = vmmov %vm11909_vm7  ;;  %v11920_v45 = vld [vmem:[#allocation411_spill] sm:$0xff]  ;;  %v11921_v60 = vld [vmem:[#allocation412_spill] sm:$0xff]  ;;  %v3574_v6 = vpop.permute.xlu1 %3573  ;;  %vm11943_vm0 = vcmask 588800  }
 0x664   :  { %v3512_v12 = vsel %vm11918_vm2, %v9179_v7, %v9177_v37  ;;  %vm11919_vm3 = vmmov %vm11903_vm4  ;;  %v3493_v20 = vadd.f32 %v3491_v1, %v3472_v41  ;;  %v3528_v2 = vadd.f32 %v3526_v50, %v3507_v55  ;;  %v3568_v37 = vsel %vm11923_vm5, %v3565_v9, %v3567_v13  ;;  %v3572_v57 = vpop.permute.xlu0 %3571  ;;  %v11942_v34 = vld [vmem:[#allocation388_spill] sm:$0xff]  ;;  %v11948_v50 = vld [vmem:[#allocation7_spill] sm:$0xff] }
 0x665   :  { %v3561_v27 = vsel %vm11919_vm3, %v3558_v38, %v3560_v40  ;;  %3762 = vrot.lane.b32.xlu1 %v11920_v45, %s11913_s12  ;;  %3760 = vrot.lane.b32.xlu0 %v11921_v60, %s11913_s12  ;;  %vm11922_vm4 = vmmov %vm11917_vm1  ;;  %v11945_v29 = vld [vmem:[#allocation384_spill] sm:$0xff]  ;;  %v11949_v41 = vld [vmem:[#allocation5_spill] sm:$0xff]  ;;  %vm11953_vm3 = vcmask 580608  }
 0x666   :  { %v3563_v24 = vadd.f32 %v3561_v27, %v3542_v28  ;;  %v3533_v32 = vsel %vm11922_vm4, %v9257_v15, %v9255_v8  ;;  %v3514_v62 = vadd.f32 %v3512_v12, %v3493_v20  ;;  %v3549_v25 = vadd.f32 %v3547_v22, %v3528_v2  ;;  %vm11926_vm6 = vmmov %vm11923_vm5  ;;  %v11928_v15 = vld [vmem:[#allocation379_spill] sm:$0xff]  ;;  %v11952_v27 = vld [vmem:[#allocation376_spill] sm:$0xff] }
 0x667   :  { %v3575_v53 = vsel %vm11926_vm6, %v3572_v57, %v3574_v6  ;;  %v3581_v46 = vpop.permute.xlu1 %3580  ;;  %vm11930_vm7 = vmmov %vm11923_vm5  ;;  %v11934_v22 = vld [vmem:[#allocation395_spill] sm:$0xff]  ;;  %vm11961_vm6 = vcmask 572416  }
 0x668   :  { %v3535_v7 = vadd.f32 %v3533_v32, %v3514_v62  ;;  %v3570_v5 = vadd.f32 %v3568_v37, %v3549_v25  ;;  %v3579_v35 = vpop.permute.xlu0 %3578  ;;  %vm11936_vm9 = vmmov %vm11933_vm8  ;;  %v11951_v12 = vld [vmem:[#allocation375_spill] sm:$0xff]  ;;  %v11955_v32 = vld [vmem:[#allocation372_spill] sm:$0xff] }
 0x669   :  { %3769 = vrot.lane.b32.xlu1 %v11924_v18, %s11913_s12  ;;  %3767 = vrot.lane.b32.xlu0 %v11925_v63, %s11913_s12  ;;  %v3582_v59 = vsel %vm11930_vm7, %v3579_v35, %v3581_v46  ;;  %vm11940_vm10 = vmmov %vm11933_vm8  ;;  %v11954_v60 = vld [vmem:[#allocation371_spill] sm:$0xff]  ;;  %v3990_v62 = vld [vmem:[%s9475_s1 + $0x18] sm:$0xff] }
 0x66a   :  { %v3556_v0 = vadd.f32 %v3554_v48, %v3535_v7  ;;  %v3584_v11 = vadd.f32 %v3582_v59, %v3563_v24  ;;  %vm11946_vm1 = vmmov %vm11943_vm0  ;;  %v3837_v25 = vmul.f32 -9.91476e-08, %v3990_v62  ;;  %v11959_v57 = vld [vmem:[#allocation363_spill] sm:$0xff]  ;;  %v11963_v59 = vld [vmem:[#allocation360_spill] sm:$0xff] }
 0x66b   :  { %v3588_v21 = vpop.permute.xlu1 %3587  ;;  %vm11950_vm2 = vmmov %vm11943_vm0  ;;  %v11962_v35 = vld [vmem:[#allocation359_spill] sm:$0xff] }
 0x66c   :  { %v3577_v8 = vadd.f32 %v3575_v53, %v3556_v0  ;;  %v3586_v49 = vpop.permute.xlu0 %3585  ;;  %vm11956_vm4 = vmmov %vm11953_vm3  ;;  %v11960_v53 = vld [vmem:[#allocation364_spill] sm:$0xff] }
 0x66d   :  { %3776 = vrot.lane.b32.xlu1 %v11928_v15, %s11927_s8  ;;  %3774 = vrot.lane.b32.xlu0 %v11929_v30, %s11927_s8  ;;  %v3589_v52 = vsel %vm11933_vm8, %v3586_v49, %v3588_v21  ;;  %vm11958_vm5 = vmmov %vm11953_vm3 }
 0x66e   :  { %v3591_v36 = vadd.f32 %v3589_v52, %v3570_v5  ;;  %v11957_v5 = vld [vmem:[#allocation177_spill] sm:$0xff]  ;;  %vm11964_vm7 = vmmov %vm11961_vm6 }
 0x66f   :  { %v3595_v56 = vpop.permute.xlu1 %3594  ;;  %vm11965_vm8 = vmmov %vm11961_vm6 }
 0x670   :  { %v3593_v58 = vpop.permute.xlu0 %3592 }
 0x671   :  { %3783 = vrot.lane.b32.xlu1 %v11931_v14, %s11927_s8  ;;  %3781 = vrot.lane.b32.xlu0 %v11932_v16, %s11927_s8  ;;  %v3596_v31 = vsel %vm11936_vm9, %v3593_v58, %v3595_v56  ;;  %v3991_v14 = vld [vmem:[%s9474_s0 + $0x10] sm:$0xff]  ;;  %vm11967_vm9 = vcmask 564224  }
 0x672   :  { %v3598_v54 = vadd.f32 %v3596_v31, %v3577_v8  ;;  %v3861_v16 = vmul.f32 -0.0, %v3991_v14 }
 0x673   :  { %v3602_v47 = vpop.permute.xlu1 %3601 }
 0x674   :  { %v3600_v61 = vpop.permute.xlu0 %3599 }
 0x675   :  { %3790 = vrot.lane.b32.xlu1 %v11934_v22, %s11927_s8  ;;  %3788 = vrot.lane.b32.xlu0 %v11935_v4, %s11927_s8  ;;  %v3603_v19 = vsel %vm11940_vm10, %v3600_v61, %v3602_v47  ;;  %v3872_v22 = vmul.f32 0.0, %v3990_v62  ;;  %vm11969_vm10 = vmmov %vm11967_vm9 }
 0x676   :  { %v3605_v17 = vadd.f32 %v3603_v19, %v3584_v11  ;;  %v3862_v11 = vmul.f32 -0.0, %v3990_v62 }
 0x677   :  { %v3609_v51 = vpop.permute.xlu1 %3608 }
 0x678   :  { %v3607_v3 = vpop.permute.xlu0 %3606 }
 0x679   :  { %3797 = vrot.lane.b32.xlu1 %v11938_v10, %s11937_s9  ;;  %3795 = vrot.lane.b32.xlu0 %v11939_v39, %s11937_s9  ;;  %v3610_v23 = vsel %vm11943_vm0, %v3607_v3, %v3609_v51  ;;  %v3882_v10 = vmul.f32 4.3495472e-08, %v3990_v62  ;;  %vm11970_vm0 = vmmov %vm11967_vm9 }
 0x67a   :  { %v3612_v48 = vadd.f32 %v3610_v23, %v3591_v36 }
 0x67b   :  { %v3616_v43 = vpop.permute.xlu1 %3615 }
 0x67c   :  { %v3614_v33 = vpop.permute.xlu0 %3613 }
 0x67d   :  { %3804 = vrot.lane.b32.xlu1 %v11941_v26, %s11937_s9  ;;  %3802 = vrot.lane.b32.xlu0 %v11942_v34, %s11937_s9  ;;  %v3617_v42 = vsel %vm11946_vm1, %v3614_v33, %v3616_v43  ;;  %vm11971_vm1 = vcmask 556032  }
 0x67e   :  { %v3619_v1 = vadd.f32 %v3617_v42, %v3598_v54  ;;  %v11966_v54 = vld [vmem:[#allocation206_spill] sm:$0xff] }
 0x67f   :  { %v3623_v55 = vpop.permute.xlu1 %3622 }
 0x680   :  { %v3621_v28 = vpop.permute.xlu0 %3620 }
 0x681   :  { %3811 = vrot.lane.b32.xlu1 %v11944_v44, %s11937_s9  ;;  %3809 = vrot.lane.b32.xlu0 %v11945_v29, %s11937_s9  ;;  %v3624_v40 = vsel %vm11950_vm2, %v3621_v28, %v3623_v55  ;;  %vm11972_vm2 = vmmov %vm11971_vm1 }
 0x682   :  { %v3626_v38 = vadd.f32 %v3624_v40, %v3605_v17  ;;  %v11968_v17 = vld [vmem:[#allocation198_spill] sm:$0xff] }
 0x683   :  { %v3630_v20 = vpop.permute.xlu1 %3629 }
 0x684   :  { %v3628_v2 = vpop.permute.xlu0 %3627 }
 0x685   :  { %3818 = vrot.lane.b32.xlu1 %v11948_v50, %s11947_s10  ;;  %3816 = vrot.lane.b32.xlu0 %v11949_v41, %s11947_s10  ;;  %v3631_v24 = vsel %vm11953_vm3, %v3628_v2, %v3630_v20  ;;  %vm11973_vm3 = vmmov %vm11971_vm1 }
 0x686   :  { %v3633_v45 = vadd.f32 %v3631_v24, %v3612_v48 }
 0x687   :  { %v3637_v13 = vpop.permute.xlu1 %3636 }
 0x688   :  { %v3635_v9 = vpop.permute.xlu0 %3634 }
 0x689   :  { %3825 = vrot.lane.b32.xlu1 %v11951_v12, %s11947_s10  ;;  %3823 = vrot.lane.b32.xlu0 %v11952_v27, %s11947_s10  ;;  %v3638_v37 = vsel %vm11956_vm4, %v3635_v9, %v3637_v13  ;;  %vm11974_vm4 = vcmask 547840  }
 0x68a   :  { %v3640_v7 = vadd.f32 %v3638_v37, %v3619_v1 }
 0x68b   :  { %v3644_v18 = vpop.permute.xlu1 %3643 }
 0x68c   :  { %v3642_v63 = vpop.permute.xlu0 %3641 }
 0x68d   :  { %3832 = vrot.lane.b32.xlu1 %v11954_v60, %s11947_s10  ;;  %3830 = vrot.lane.b32.xlu0 %v11955_v32, %s11947_s10  ;;  %v3645_v0 = vsel %vm11958_vm5, %v3642_v63, %v3644_v18  ;;  %vm11975_vm5 = vmmov %vm11974_vm4 }
 0x68e   :  { %v3647_v6 = vadd.f32 %v3645_v0, %v3626_v38 }
 0x68f   :  { %v3651_v8 = vpop.permute.xlu1 %3650 }
 0x690   :  { %v3649_v15 = vpop.permute.xlu0 %3648 }
 0x691   :  { %3842 = vrot.lane.b32.xlu1 %v3837_v25, %s4058_s11  ;;  %3840 = vrot.lane.b32.xlu0 %v11957_v5, %s4058_s11  ;;  %v3652_v30 = vsel %vm11961_vm6, %v3649_v15, %v3651_v8  ;;  %vm11976_vm6 = vmmov %vm11974_vm4 }
 0x692   :  { %v3654_v46 = vadd.f32 %v3652_v30, %v3633_v45 }
 0x693   :  { %v3658_v21 = vpop.permute.xlu1 %3657 }
 0x694   :  { %v3656_v49 = vpop.permute.xlu0 %3655 }
 0x695   :  { %3849 = vrot.lane.b32.xlu1 %v11959_v57, %s4058_s11  ;;  %3847 = vrot.lane.b32.xlu0 %v11960_v53, %s4058_s11  ;;  %v3659_v52 = vsel %vm11964_vm7, %v3656_v49, %v3658_v21  ;;  %vm11977_vm7 = vcmask 539648  }
 0x696   :  { %v3661_v36 = vadd.f32 %v3659_v52, %v3640_v7 }
 0x697   :  { %v3665_v4 = vpop.permute.xlu1 %3664 }
 0x698   :  { %v3663_v56 = vpop.permute.xlu0 %3662 }
 0x699   :  { %3856 = vrot.lane.b32.xlu1 %v11962_v35, %s4058_s11  ;;  %3854 = vrot.lane.b32.xlu0 %v11963_v59, %s4058_s11  ;;  %v3666_v58 = vsel %vm11965_vm8, %v3663_v56, %v3665_v4  ;;  %vm11978_vm8 = vcmask 531456  }
 0x69a   :  { %v3668_v31 = vadd.f32 %v3666_v58, %v3647_v6 }
 0x69b   :  { %v3672_v39 = vpop.permute.xlu1 %3671 }
 0x69c   :  { %v3670_v47 = vpop.permute.xlu0 %3669 }
 0x69d   :  { %3867 = vrot.lane.b32.xlu1 %v3862_v11, %s4059_s7  ;;  %3865 = vrot.lane.b32.xlu0 %v3861_v16, %s4059_s7  ;;  %v3673_v61 = vsel %vm11967_vm9, %v3670_v47, %v3672_v39  ;;  %vm11979_vm9 = vmmov %vm11977_vm7 }
 0x69e   :  { %v3675_v19 = vadd.f32 %v3673_v61, %v3654_v46 }
 0x69f   :  { %v3679_v26 = vpop.permute.xlu1 %3678 }
 0x6a0   :  { %v3677_v34 = vpop.permute.xlu0 %3676 }
 0x6a1   :  { %3877 = vrot.lane.b32.xlu1 %v3872_v22, %s4059_s7  ;;  %3875 = vrot.lane.b32.xlu0 %v11966_v54, %s4059_s7  ;;  %v3680_v51 = vsel %vm11969_vm10, %v3677_v34, %v3679_v26  ;;  %vm11980_vm10 = vmmov %vm11978_vm8 }
 0x6a2   :  { %v3682_v3 = vadd.f32 %v3680_v51, %v3661_v36 }
 0x6a3   :  { %v3686_v23 = vpop.permute.xlu1 %3685 }
 0x6a4   :  { %v3684_v48 = vpop.permute.xlu0 %3683 }
 0x6a5   :  { %3887 = vrot.lane.b32.xlu1 %v3882_v10, %s4059_s7  ;;  %3885 = vrot.lane.b32.xlu0 %v11968_v17, %s4059_s7  ;;  %v3687_v44 = vsel %vm11970_vm0, %v3684_v48, %v3686_v23  ;;  %vm11981_vm0 = vmmov %vm11977_vm7 }
 0x6a6   :  { %v3689_v29 = vadd.f32 %v3687_v44, %v3668_v31 }
 0x6a7   :  { %v3693_v43 = vpop.permute.xlu1 %3692 }
 0x6a8   :  { %v3691_v33 = vpop.permute.xlu0 %3690 }
 0x6a9   :  { %v3694_v42 = vsel %vm11971_vm1, %v3691_v33, %v3693_v43  ;;  %vm11982_vm1 = vmmov %vm11978_vm8 }
 0x6aa   :  { %v3696_v1 = vadd.f32 %v3694_v42, %v3675_v19 }
 0x6ab   :  { %v3700_v50 = vpop.permute.xlu1 %3699 }
 0x6ac   :  { %v3698_v41 = vpop.permute.xlu0 %3697 }
 0x6ad   :  { %v3701_v55 = vsel %vm11972_vm2, %v3698_v41, %v3700_v50 }
 0x6ae   :  { %v3703_v28 = vadd.f32 %v3701_v55, %v3682_v3 }
 0x6af   :  { %v3707_v40 = vpop.permute.xlu1 %3706 }
 0x6b0   :  { %v3705_v38 = vpop.permute.xlu0 %3704 }
 0x6b1   :  { %v3708_v12 = vsel %vm11973_vm3, %v3705_v38, %v3707_v40 }
 0x6b2   :  { %v3710_v27 = vadd.f32 %v3708_v12, %v3689_v29 }
 0x6b3   :  { %v3714_v20 = vpop.permute.xlu1 %3713 }
 0x6b4   :  { %v3712_v2 = vpop.permute.xlu0 %3711 }
 0x6b5   :  { %v3715_v24 = vsel %vm11974_vm4, %v3712_v2, %v3714_v20 }
 0x6b6   :  { %v3717_v45 = vadd.f32 %v3715_v24, %v3696_v1 }
 0x6b9   :  { %v3721_v60 = vpop.permute.xlu1 %3720 }
 0x6ba   :  { %v3719_v32 = vpop.permute.xlu0 %3718 }
 0x6bb   :  { %v3722_v62 = vsel %vm11975_vm5, %v3719_v32, %v3721_v60 }
 0x6bc   :  { %v3724_v25 = vadd.f32 %v3722_v62, %v3703_v28 }
 0x6bf   :  { %v3728_v13 = vpop.permute.xlu1 %3727 }
 0x6c0   :  { %v3726_v9 = vpop.permute.xlu0 %3725 }
 0x6c1   :  { %v3729_v37 = vsel %vm11976_vm6, %v3726_v9, %v3728_v13 }
 0x6c2   :  { %v3731_v7 = vadd.f32 %v3729_v37, %v3710_v27 }
 0x6c6   :  { %v3735_v5 = vpop.permute.xlu1 %3734  ;;  %v3733_v18 = vpop.permute.xlu0 %3732 }
 0x6c7   :  { %v3736_v19 = vsel %vm11977_vm7, %v3733_v18, %v3735_v5 }
 0x6c8   :  { %v3738_v51 = vadd.f32 %v3736_v19, %v3717_v45 }
 0x6cb   :  { %v3742_v63 = vpop.permute.xlu1 %3741  ;;  %v3740_v0 = vpop.permute.xlu0 %3739 }
 0x6cc   :  { %v3743_v3 = vsel %vm11979_vm9, %v3740_v0, %v3742_v63 }
 0x6cd   :  { %v3745_v42 = vadd.f32 %v3743_v3, %v3724_v25 }
 0x6cf   :  { %v3749_v6 = vpop.permute.xlu1 %3748  ;;  %v3747_v57 = vpop.permute.xlu0 %3746 }
 0x6d0   :  { %v3750_v50 = vsel %vm11981_vm0, %v3747_v57, %v3749_v6 }
 0x6d1   :  { %v3752_v24 = vadd.f32 %v3750_v50, %v3731_v7 }
 0x6d3   :  { %v3756_v53 = vpop.permute.xlu1 %3755  ;;  %v3754_v8 = vpop.permute.xlu0 %3753 }
 0x6d4   :  { %v3757_v34 = vsel %vm11978_vm8, %v3754_v8, %v3756_v53 }
 0x6d5   :  { %v3759_v48 = vadd.f32 %v3757_v34, %v3738_v51 }
 0x6d7   :  { %v3763_v15 = vpop.permute.xlu1 %3762  ;;  %v3761_v30 = vpop.permute.xlu0 %3760 }
 0x6d8   :  { %v3764_v43 = vsel %vm11980_vm10, %v3761_v30, %v3763_v15 }
 0x6d9   :  { %v3766_v28 = vadd.f32 %v3764_v43, %v3745_v42 }
 0x6db   :  { %v3770_v46 = vpop.permute.xlu1 %3769  ;;  %v3768_v35 = vpop.permute.xlu0 %3767 }
 0x6dc   :  { %v3771_v27 = vsel %vm11982_vm1, %v3768_v35, %v3770_v46 }
 0x6dd   :  { %v3773_v25 = vadd.f32 %v3771_v27, %v3752_v24 }
 0x6df   :  { %v3777_v59 = vpop.permute.xlu1 %3776  ;;  %v3775_v11 = vpop.permute.xlu0 %3774 }
 0x6e0   :  { %v3778_v23 = vsel %vm1921_vm13, %v3775_v11, %v3777_v59 }
 0x6e1   :  { %v3780_v1 = vadd.f32 %v3778_v23, %v3759_v48 }
 0x6e3   :  { %v3784_v14 = vpop.permute.xlu1 %3783  ;;  %v3782_v16 = vpop.permute.xlu0 %3781 }
 0x6e4   :  { %v3785_v41 = vsel %vm1921_vm13, %v3782_v16, %v3784_v14 }
 0x6e5   :  { %v3787_v45 = vadd.f32 %v3785_v41, %v3766_v28 }
 0x6e7   :  { %v3791_v21 = vpop.permute.xlu1 %3790  ;;  %v3789_v49 = vpop.permute.xlu0 %3788 }
 0x6e8   :  { %v3792_v32 = vsel %vm1921_vm13, %v3789_v49, %v3791_v21 }
 0x6e9   :  { %v3794_v6 = vadd.f32 %v3792_v32, %v3773_v25 }
 0x6eb   :  { %v3798_v52 = vpop.permute.xlu1 %3797  ;;  %v3796_v36 = vpop.permute.xlu0 %3795 }
 0x6ec   :  { %v3799_v33 = vsel %vm1943_vm14, %v3796_v36, %v3798_v52 }
 0x6ed   :  { %v3801_v40 = vadd.f32 %v3799_v33, %v3780_v1 }
 0x6ef   :  { %v3805_v22 = vpop.permute.xlu1 %3804  ;;  %v3803_v4 = vpop.permute.xlu0 %3802 }
 0x6f0   :  { %v3806_v20 = vsel %vm1943_vm14, %v3803_v4, %v3805_v22 }
 0x6f1   :  { %v3808_v13 = vadd.f32 %v3806_v20, %v3787_v45 }
 0x6f3   :  { %v3812_v56 = vpop.permute.xlu1 %3811  ;;  %v3810_v58 = vpop.permute.xlu0 %3809 }
 0x6f4   :  { %v3813_v18 = vsel %vm1943_vm14, %v3810_v58, %v3812_v56 }
 0x6f5   :  { %v3815_v8 = vadd.f32 %v3813_v18, %v3794_v6 }
 0x6f7   :  { %v3819_v31 = vpop.permute.xlu1 %3818  ;;  %v3817_v54 = vpop.permute.xlu0 %3816 }
 0x6f8   :  { %v3820_v55 = vsel %vm1965_vm15, %v3817_v54, %v3819_v31 }
 0x6f9   :  { %v3822_v60 = vadd.f32 %v3820_v55, %v3801_v40 }
 0x6fb   :  { %v3826_v10 = vpop.permute.xlu1 %3825  ;;  %v3824_v39 = vpop.permute.xlu0 %3823 }
 0x6fc   :  { %v3827_v62 = vsel %vm1965_vm15, %v3824_v39, %v3826_v10 }
 0x6fd   :  { %v3829_v57 = vadd.f32 %v3827_v62, %v3808_v13 }
 0x6ff   :  { %v3833_v47 = vpop.permute.xlu1 %3832  ;;  %v3831_v61 = vpop.permute.xlu0 %3830 }
 0x700   :  { %v3834_v53 = vsel %vm1965_vm15, %v3831_v61, %v3833_v47 }
 0x701   :  { %v3836_v11 = vadd.f32 %v3834_v53, %v3815_v8 }
 0x703   :  { %v3843_v17 = vpop.permute.xlu1 %3842  ;;  %v3841_v26 = vpop.permute.xlu0 %3840 }
 0x704   :  { %v3844_v2 = vsel %vm1987_vm11, %v3841_v26, %v3843_v17 }
 0x705   :  { %v3846_v9 = vadd.f32 %v3844_v2, %v3822_v60 }
 0x707   :  { %v3850_v44 = vpop.permute.xlu1 %3849  ;;  %v3848_v29 = vpop.permute.xlu0 %3847 }
 0x708   :  { %v3851_v63 = vsel %vm1987_vm11, %v3848_v29, %v3850_v44 }
 0x709   :  { %v3853_v15 = vadd.f32 %v3851_v63, %v3829_v57 }
 0x70b   :  { %v3857_v38 = vpop.permute.xlu1 %3856  ;;  %v3855_v12 = vpop.permute.xlu0 %3854 }
 0x70c   :  { %v3858_v35 = vsel %vm1987_vm11, %v3855_v12, %v3857_v38 }
 0x70d   :  { %v3860_v16 = vadd.f32 %v3858_v35, %v3836_v11 }
 0x70f   :  { %v3868_v37 = vpop.permute.xlu1 %3867  ;;  %v3866_v5 = vpop.permute.xlu0 %3865 }
 0x710   :  { %v3869_v0 = vsel %vm2012_vm12, %v3866_v5, %v3868_v37 }
 0x711   :  { %v3871_v7 = vadd.f32 %v3869_v0, %v3846_v9 }
 0x713   :  { %3892 = vst [vmem:[%s9476_s2] sm:$0xff] %v3871_v7  ;;  %v3878_v30 = vpop.permute.xlu1 %3877  ;;  %v3876_v46 = vpop.permute.xlu0 %3875 }
 0x714   :  { %v3879_v59 = vsel %vm2012_vm12, %v3876_v46, %v3878_v30 }
 0x715   :  { %v3881_v14 = vadd.f32 %v3879_v59, %v3853_v15 }
 0x717   :  { %3912 = vst [vmem:[%s9476_s2 + $0x8] sm:$0xff] %v3881_v14  ;;  %v3888_v21 = vpop.permute.xlu1 %3887  ;;  %v3886_v49 = vpop.permute.xlu0 %3885 }
 0x718   :  { %v3889_v52 = vsel %vm2012_vm12, %v3886_v49, %v3888_v21 }
 0x719   :  { %v3891_v36 = vadd.f32 %v3889_v52, %v3860_v16 }
 0x71b   :  { %3913 = vst [vmem:[%s9476_s2 + $0x10] sm:$0xff] %v3891_v36 }

</bundles_post_ra>
